<compile_context>
chip_gen: v5e
topology: v5e:2x2
jax: 0.10.0
libtpu: 0.0.40
codegen_flags: <defaults>
</compile_context>

<pallas_src>
import functools

import jax
import jax.numpy as jnp
from jax.experimental import pallas as pl
from jax.experimental.pallas import tpu as pltpu

LATENT = 32      # latent_dim (small for this synthetic test; PyTorch default is 256)
KSIZE = 4
BN_EPS = 1e-5


def _round_up(x, m):
    return (x + m - 1) // m * m


# ----------------------------------------------------------------------------
# Pallas kernel: whole-K GEMM (+ optional phase batch) + BN(train) + activation
#   lhs block: (P, tm, K) bf16, rhs block: (P, K, tn) bf16 -> out (P, tm, tn)
#   P = 1 for normal convs, P = 4 for the parity phases of a transposed conv.
# ----------------------------------------------------------------------------
def _gemm_bn_act_kernel(*refs, use_bn, activation, m_valid, n_seg):
    if use_bn:
        x_ref, w_ref, g_ref, be_ref, o_ref = refs
    else:
        x_ref, w_ref, b_ref, o_ref = refs

    P, tm, _ = x_ref.shape
    tn = o_ref.shape[2]

    # One MXU GEMM per conv phase (static unrolled; P is 1 or 4), whole K.
    acc = jnp.stack(
        [jnp.dot(x_ref[p], w_ref[p], preferred_element_type=jnp.float32)
         for p in range(P)], axis=0)                      # (P, tm, tn) f32

    if use_bn:
        # Train-mode BatchNorm over all (phase, valid-row) elements of this
        # column tile, single fused pass: var = E[x^2] - mu^2.  Conv bias is
        # skipped under BN (cancels under mean subtraction), which also keeps
        # zero-padded rows exactly zero, so full-tile sums stay exact.
        cnt = jnp.float32(P * m_valid)
        gamma = g_ref[...]                                # (1, 1, tn)
        beta = be_ref[...]
        if n_seg == 1:
            s = jnp.sum(acc, axis=(0, 1), keepdims=True)
            ss = jnp.sum(acc * acc, axis=(0, 1), keepdims=True)
            mu = s / cnt
            var = ss / cnt - mu * mu
            scale = gamma * jax.lax.rsqrt(var + BN_EPS)
            shift = beta - mu * scale
            acc = acc * scale + shift
        else:
            # Segmented stats (batched start/end encoder passes): one mean/var
            # per contiguous block of m_valid rows, matching two separate
            # PyTorch train-mode BN evaluations.
            pieces = []
            for seg in range(n_seg):
                a = acc[:, seg * m_valid:(seg + 1) * m_valid, :]
                s = jnp.sum(a, axis=(0, 1), keepdims=True)
                ss = jnp.sum(a * a, axis=(0, 1), keepdims=True)
                mu = s / cnt
                var = ss / cnt - mu * mu
                scale = gamma * jax.lax.rsqrt(var + BN_EPS)
                shift = beta - mu * scale
                pieces.append(a * scale + shift)
            pad_rows = tm - n_seg * m_valid
            if pad_rows > 0:
                pieces.append(jnp.zeros((P, pad_rows, tn), jnp.float32))
            acc = (jnp.concatenate(pieces, axis=1)
                   if len(pieces) > 1 else pieces[0])
    else:
        acc = acc + b_ref[...]                            # (1, 1, tn) bias

    if activation == "relu":
        acc = jnp.maximum(acc, 0.0)
    elif activation == "sigmoid":
        acc = jax.nn.sigmoid(acc)
    o_ref[...] = acc.astype(o_ref.dtype)


def fused_gemm(lhs, rhs, bias, gamma, beta, *, use_bn, activation, n_seg=1,
               out_dtype=jnp.bfloat16):
    """y = act(BN(lhs @ rhs [+ bias])).  lhs:(P,M,K) rhs:(P,K,N) -> (P,M,N)."""
    P, M, K = lhs.shape
    N = rhs.shape[2]
    assert M % n_seg == 0

    Mp = _round_up(M, 16)            # bf16 packs 16 rows per sublane pair
    Kp = _round_up(K, 128)           # whole K per tile: no K grid axis
    Np = _round_up(N, 128)
    tn = 256 if Np % 256 == 0 else 128
    if use_bn:
        # BN stats need every row of a column tile in one grid step.
        tm = Mp
    else:
        tm = 128 if Mp % 128 == 0 else Mp

    # bf16 operands for the MXU; accumulation stays f32 inside the kernel.
    lhs_p = jnp.pad(lhs, ((0, 0), (0, Mp - M), (0, Kp - K))).astype(jnp.bfloat16)
    rhs_p = jnp.pad(rhs, ((0, 0), (0, Kp - K), (0, Np - N))).astype(jnp.bfloat16)

    vec_spec = pl.BlockSpec((1, 1, tn), lambda m, n: (0, 0, n))
    in_specs = [pl.BlockSpec((P, tm, Kp), lambda m, n: (0, m, 0)),
                pl.BlockSpec((P, Kp, tn), lambda m, n: (0, 0, n))]
    args = [lhs_p, rhs_p]
    if use_bn:
        g_p = jnp.pad(gamma.reshape(1, 1, N).astype(jnp.float32),
                      ((0, 0), (0, 0), (0, Np - N)), constant_values=1.0)
        be_p = jnp.pad(beta.reshape(1, 1, N).astype(jnp.float32),
                       ((0, 0), (0, 0), (0, Np - N)))
        in_specs += [vec_spec, vec_spec]
        args += [g_p, be_p]
    else:
        b_p = jnp.pad(bias.reshape(1, 1, N).astype(jnp.float32),
                      ((0, 0), (0, 0), (0, Np - N)))
        in_specs += [vec_spec]
        args += [b_p]

    kern = functools.partial(_gemm_bn_act_kernel, use_bn=use_bn,
                             activation=activation, m_valid=M // n_seg,
                             n_seg=n_seg)
    out = pl.pallas_call(
        kern,
        out_shape=jax.ShapeDtypeStruct((P, Mp, Np), out_dtype),
        grid=(Mp // tm, Np // tn),
        in_specs=in_specs,
        out_specs=pl.BlockSpec((P, tm, tn), lambda m, n: (0, m, n)),
        compiler_params=pltpu.CompilerParams(
            dimension_semantics=("parallel", "parallel"),
            vmem_limit_bytes=32 * 1024 * 1024),
    )(*args)
    # TODO(synk): dec3 has N=1 -> 127+/128 padded MXU columns; a VPU reduction
    # epilogue (or fusing it into dec2) would remove the padding entirely.
    return out[:, :M, :N]


# ----------------------------------------------------------------------------
# Plain-JAX glue: im2col (encoder), transposed-conv phase operands (decoder)
# ----------------------------------------------------------------------------
def im2col(x_nhwc, k, stride, pad):
    """x: (B,H,W,C) -> patches (B*Ho*Wo, k*k*C) in (kh, kw, cin) column order."""
    B, H, W, C = x_nhwc.shape
    xp = jnp.pad(x_nhwc, ((0, 0), (pad, pad), (pad, pad), (0, 0)))
    Ho = (H + 2 * pad - k) // stride + 1
    Wo = (W + 2 * pad - k) // stride + 1
    cols = []
    for di in range(k):
        for dj in range(k):
            cols.append(xp[:, di:di + (Ho - 1) * stride + 1:stride,
                           dj:dj + (Wo - 1) * stride + 1:stride, :])
    patches = jnp.stack(cols, axis=3)              # (B,Ho,Wo,k*k,C)
    return patches.reshape(B * Ho * Wo, k * k * C), B, Ho, Wo


def tconv_phase_operands(x, w):
    """Decompose ConvTranspose2d(k=4, s=2, p=1) into 4 output-parity 2x2 convs.

    x: (B,H,W,Cin), w: (Cin,Cout,4,4)  (PyTorch ConvTranspose2d layout).
    Returns lhs (4, B*H*W, 4*Cin), rhs (4, 4*Cin, Cout); phase order is
    (py, px) in {0,1}^2 with output[2*iy+py, 2*ix+px] = phase output[iy, ix].
    """
    B, H, W, Cin = x.shape
    Cout = w.shape[1]
    xp = jnp.pad(x, ((0, 0), (1, 1), (1, 1), (0, 0)))
    lhs, rhs = [], []
    for py in range(2):
        for px in range(2):
            taps = [xp[:, py + a:py + a + H, px + b:px + b + W, :]
                    for a in range(2) for b in range(2)]
            lhs.append(jnp.stack(taps, axis=3).reshape(B * H * W, 4 * Cin))
            wk = [w[:, :, 3 - py - 2 * a, 3 - px - 2 * b]    # (Cin, Cout)
                  for a in range(2) for b in range(2)]
            rhs.append(jnp.stack(wk, axis=0).reshape(4 * Cin, Cout))
    return jnp.stack(lhs, 0), jnp.stack(rhs, 0), B, H, W


# ----------------------------------------------------------------------------
# Parameters and layer orchestration
# ----------------------------------------------------------------------------
def init_params(key):
    params = {}
    enc_ch = [(1, 64), (64, 128), (128, 256), (256, LATENT)]
    dec_ch = [(LATENT, 256), (256, 128), (128, 64), (64, 1)]
    keys = jax.random.split(key, 16)
    ki = 0
    for i, (cin, cout) in enumerate(enc_ch):
        fan_in = cin * KSIZE * KSIZE
        params[f"enc{i}_w"] = jax.random.normal(
            keys[ki], (cout, cin, KSIZE, KSIZE), jnp.float32) / jnp.sqrt(fan_in)
        params[f"enc{i}_b"] = 0.01 * jax.random.normal(
            keys[ki + 1], (cout,), jnp.float32)
        ki += 2
    for i, (cin, cout) in enumerate(dec_ch):
        fan_in = cin * KSIZE * KSIZE
        # nn.ConvTranspose2d weight layout: (Cin, Cout, kH, kW)
        params[f"dec{i}_w"] = jax.random.normal(
            keys[ki], (cin, cout, KSIZE, KSIZE), jnp.float32) / jnp.sqrt(fan_in)
        params[f"dec{i}_b"] = 0.01 * jax.random.normal(
            keys[ki + 1], (cout,), jnp.float32)
        ki += 2
    # BatchNorm affine params (default init: gamma=1, beta=0)
    for name, c in [("enc1", 128), ("enc2", 256),
                    ("dec0", 256), ("dec1", 128), ("dec2", 64)]:
        params[f"{name}_gamma"] = jnp.ones((c,), jnp.float32)
        params[f"{name}_beta"] = jnp.zeros((c,), jnp.float32)
    return params


def encoder_forward(params, x_nhwc, *, n_seg):
    """x: (n_seg*B, H, W, 1) NHWC; BN stats are taken per row-segment."""
    x = x_nhwc
    cfg = [("enc0", False, "relu"), ("enc1", True, "relu"),
           ("enc2", True, "relu"), ("enc3", False, "none")]
    for li, (name, use_bn, act) in enumerate(cfg):
        w = params[f"{name}_w"]                     # (Cout, Cin, K, K)
        cout = w.shape[0]
        patches, B, Ho, Wo = im2col(x, KSIZE, stride=2, pad=1)
        wmat = jnp.transpose(w, (2, 3, 1, 0)).reshape(-1, cout)  # (K*K*Cin, Cout)
        last = li == len(cfg) - 1
        y = fused_gemm(patches[None], wmat[None], params[f"{name}_b"],
                       params.get(f"{name}_gamma"), params.get(f"{name}_beta"),
                       use_bn=use_bn, activation=act, n_seg=n_seg,
                       out_dtype=jnp.float32 if last else jnp.bfloat16)
        x = y[0].reshape(B, Ho, Wo, cout)
    return x                                        # (n_seg*B, H/16, W/16, LATENT)


def decoder_forward(params, z_nhwc):
    x = z_nhwc
    cfg = [("dec0", True, "relu"), ("dec1", True, "relu"),
           ("dec2", True, "relu"), ("dec3", False, "sigmoid")]
    for li, (name, use_bn, act) in enumerate(cfg):
        w = params[f"{name}_w"]                     # (Cin, Cout, K, K)
        cout = w.shape[1]
        lhs4, rhs4, B, H, W = tconv_phase_operands(x, w)
        last = li == len(cfg) - 1
        y4 = fused_gemm(lhs4, rhs4, params[f"{name}_b"],
                        params.get(f"{name}_gamma"), params.get(f"{name}_beta"),
                        use_bn=use_bn, activation=act,
                        out_dtype=jnp.float32 if last else jnp.bfloat16)
        y = y4.reshape(2, 2, B, H, W, cout)              # (py, px, b, iy, ix, c)
        x = jnp.transpose(y, (2, 3, 0, 4, 1, 5)).reshape(B, 2 * H, 2 * W, cout)
    return x                                        # (B, H, W, 1)


def diffmorpher_forward(params, start, end, t, noise_key):
    """start/end: [B,1,H,W] NCHW, t: [B,1,1,1]. Returns [B,1,H,W]."""
    # Batch the start/end encoder passes into one launch set (concatenate along
    # the batch dim); BN statistics stay segmented (first half = start rows,
    # second half = end rows), matching two separate train-mode PyTorch calls.
    B = start.shape[0]
    x = jnp.concatenate([start, end], axis=0)                   # (2B, 1, H, W)
    x = jnp.transpose(x, (0, 2, 3, 1)).astype(jnp.bfloat16)     # NHWC, bf16
    z = encoder_forward(params, x, n_seg=2)                     # (2B, h, w, LATENT)
    z_start, z_end = z[:B], z[B:]
    t_b = t.astype(jnp.float32)                                 # (B,1,1,1) broadcast
    # Latent lerp + noise: ~64 elements total -> plain XLA (a Pallas launch
    # would cost more than the compute).
    # TODO(synk): torch.randn_like's RNG stream is not reproducible in JAX;
    # noise is generated deterministically with jax.random instead.
    noise = 0.1 * jax.random.normal(noise_key, z_start.shape, jnp.float32)
    z_t = z_start + (z_end - z_start) * t_b + noise
    out_nhwc = decoder_forward(params, z_t)
    return jnp.transpose(out_nhwc, (0, 3, 1, 2))                # back to NCHW


if __name__ == "__main__":
    key = jax.random.PRNGKey(0)
    k_par, k_s, k_e, k_t, k_n = jax.random.split(key, 5)

    B, H, W = 2, 16, 16
    params = init_params(k_par)
    start = jax.random.uniform(k_s, (B, 1, H, W), jnp.float32)
    end = jax.random.uniform(k_e, (B, 1, H, W), jnp.float32)
    t = jax.random.uniform(k_t, (B, 1, 1, 1), jnp.float32)

    fwd = jax.jit(diffmorpher_forward)
    out = fwd(params, start, end, t, k_n)
    out = jax.block_until_ready(out)
    assert out.shape == (B, 1, H, W), out.shape
    assert bool(jnp.all(jnp.isfinite(out)))
    print("KERNEL_OK")
</pallas_src>

<mosaic_0001>
module attributes {stable_mosaic.version = 11 : i64} {
  func.func @_gemm_bn_act_kernel(%arg0: i32, %arg1: i32, %arg2: memref<1x128x128xbf16, #tpu.memory_space<vmem>>, %arg3: memref<1x128x128xbf16, #tpu.memory_space<vmem>>, %arg4: memref<1x1x128xf32, #tpu.memory_space<vmem>>, %arg5: memref<1x128x128xbf16, #tpu.memory_space<vmem>>) attributes {dimension_semantics = [#tpu.dimension_semantics<parallel>, #tpu.dimension_semantics<parallel>], iteration_bounds = array<i64: 2, 1>, scalar_prefetch = 0 : i64, scratch_operands = 0 : i64, tpu.core_type = #tpu.core_type<tc>, window_params = [{transform_indices = @transform_0, window_bounds = array<i64: 1, 128, 128>}, {transform_indices = @transform_1, window_bounds = array<i64: 1, 128, 128>}, {transform_indices = @transform_2, window_bounds = array<i64: 1, 1, 128>}, {transform_indices = @transform_3, window_bounds = array<i64: 1, 128, 128>}]} {
    %c0 = arith.constant 0 : index
    %c0_0 = arith.constant 0 : index
    %c0_1 = arith.constant 0 : index
    %0 = vector.load %arg2[%c0, %c0_0, %c0_1] : memref<1x128x128xbf16, #tpu.memory_space<vmem>>, vector<1x128x128xbf16>
    %1 = vector.shape_cast %0 : vector<1x128x128xbf16> to vector<128x128xbf16>
    %c0_2 = arith.constant 0 : index
    %c0_3 = arith.constant 0 : index
    %c0_4 = arith.constant 0 : index
    %2 = vector.load %arg3[%c0_2, %c0_3, %c0_4] : memref<1x128x128xbf16, #tpu.memory_space<vmem>>, vector<1x128x128xbf16>
    %3 = vector.shape_cast %2 : vector<1x128x128xbf16> to vector<128x128xbf16>
    %cst = arith.constant dense<0.000000e+00> : vector<128x128xf32>
    %4 = tpu.matmul %1, %3, %cst {dimension_numbers = #tpu.dot_dimension_numbers<[1], [0], [0], [1], [0, 0, 1, 1], [], []>} : vector<128x128xbf16>, vector<128x128xbf16>, vector<128x128xf32> -> vector<128x128xf32>
    %5 = vector.shape_cast %4 : vector<128x128xf32> to vector<1x128x128xf32>
    %c0_5 = arith.constant 0 : index
    %c0_6 = arith.constant 0 : index
    %c0_7 = arith.constant 0 : index
    %6 = vector.load %arg4[%c0_5, %c0_6, %c0_7] : memref<1x1x128xf32, #tpu.memory_space<vmem>>, vector<1x1x128xf32>
    %7 = vector.broadcast %6 : vector<1x1x128xf32> to vector<1x128x128xf32>
    %8 = arith.addf %5, %7 : vector<1x128x128xf32>
    %cst_8 = arith.constant 0.000000e+00 : f32
    %9 = vector.broadcast %cst_8 : f32 to vector<1x128x128xf32>
    %10 = arith.maximumf %8, %9 : vector<1x128x128xf32>
    %11 = arith.truncf %10 : vector<1x128x128xf32> to vector<1x128x128xbf16>
    %c0_9 = arith.constant 0 : index
    %c0_10 = arith.constant 0 : index
    %c0_11 = arith.constant 0 : index
    %12 = vector.load %arg5[%c0_9, %c0_10, %c0_11] : memref<1x128x128xbf16, #tpu.memory_space<vmem>>, vector<1x128x128xbf16>
    tpu.vector_store %arg5[%c0_9, %c0_10, %c0_11], %11 {strides = array<i32>} : memref<1x128x128xbf16, #tpu.memory_space<vmem>>, vector<1x128x128xbf16>,
    return
  }
  func.func @transform_0(%arg0: i32, %arg1: i32) -> (i32, i32, i32) {
    %c0_i32 = arith.constant 0 : i32
    %c0_i32_0 = arith.constant 0 : i32
    %c0_i32_1 = arith.constant 0 : i32
    return %c0_i32, %arg0, %c0_i32_0 : i32, i32, i32
  }
  func.func @transform_1(%arg0: i32, %arg1: i32) -> (i32, i32, i32) {
    %c0_i32 = arith.constant 0 : i32
    %c0_i32_0 = arith.constant 0 : i32
    %c0_i32_1 = arith.constant 0 : i32
    return %c0_i32, %c0_i32_0, %arg1 : i32, i32, i32
  }
  func.func @transform_2(%arg0: i32, %arg1: i32) -> (i32, i32, i32) {
    %c0_i32 = arith.constant 0 : i32
    %c0_i32_0 = arith.constant 0 : i32
    %c0_i32_1 = arith.constant 0 : i32
    return %c0_i32, %c0_i32_0, %arg1 : i32, i32, i32
  }
  func.func @transform_3(%arg0: i32, %arg1: i32) -> (i32, i32, i32) {
    %c0_i32 = arith.constant 0 : i32
    %c0_i32_0 = arith.constant 0 : i32
    return %c0_i32, %arg0, %arg1 : i32, i32, i32
  }
}

module attributes {stable_mosaic.version = 11 : i64} {
  func.func @_gemm_bn_act_kernel(%arg0: i32, %arg1: i32, %arg2: memref<1x64x1024xbf16, #tpu.memory_space<vmem>>, %arg3: memref<1x1024x128xbf16, #tpu.memory_space<vmem>>, %arg4: memref<1x1x128xf32, #tpu.memory_space<vmem>>, %arg5: memref<1x1x128xf32, #tpu.memory_space<vmem>>, %arg6: memref<1x64x128xbf16, #tpu.memory_space<vmem>>) attributes {dimension_semantics = [#tpu.dimension_semantics<parallel>, #tpu.dimension_semantics<parallel>], iteration_bounds = array<i64: 1, 1>, scalar_prefetch = 0 : i64, scratch_operands = 0 : i64, tpu.core_type = #tpu.core_type<tc>, window_params = [{transform_indices = @transform_0, window_bounds = array<i64: 1, 64, 1024>}, {transform_indices = @transform_1, window_bounds = array<i64: 1, 1024, 128>}, {transform_indices = @transform_2, window_bounds = array<i64: 1, 1, 128>}, {transform_indices = @transform_3, window_bounds = array<i64: 1, 1, 128>}, {transform_indices = @transform_4, window_bounds = array<i64: 1, 64, 128>}]} {
    %c0 = arith.constant 0 : index
    %c0_0 = arith.constant 0 : index
    %c0_1 = arith.constant 0 : index
    %0 = vector.load %arg2[%c0, %c0_0, %c0_1] : memref<1x64x1024xbf16, #tpu.memory_space<vmem>>, vector<1x64x1024xbf16>
    %1 = vector.shape_cast %0 : vector<1x64x1024xbf16> to vector<64x1024xbf16>
    %c0_2 = arith.constant 0 : index
    %c0_3 = arith.constant 0 : index
    %c0_4 = arith.constant 0 : index
    %2 = vector.load %arg3[%c0_2, %c0_3, %c0_4] : memref<1x1024x128xbf16, #tpu.memory_space<vmem>>, vector<1x1024x128xbf16>
    %3 = vector.shape_cast %2 : vector<1x1024x128xbf16> to vector<1024x128xbf16>
    %cst = arith.constant dense<0.000000e+00> : vector<64x128xf32>
    %4 = tpu.matmul %1, %3, %cst {dimension_numbers = #tpu.dot_dimension_numbers<[1], [0], [0], [1], [0, 0, 1, 1], [], []>} : vector<64x1024xbf16>, vector<1024x128xbf16>, vector<64x128xf32> -> vector<64x128xf32>
    %5 = vector.shape_cast %4 : vector<64x128xf32> to vector<1x64x128xf32>
    %c0_5 = arith.constant 0 : index
    %c0_6 = arith.constant 0 : index
    %c0_7 = arith.constant 0 : index
    %6 = vector.load %arg4[%c0_5, %c0_6, %c0_7] : memref<1x1x128xf32, #tpu.memory_space<vmem>>, vector<1x1x128xf32>
    %c0_8 = arith.constant 0 : index
    %c0_9 = arith.constant 0 : index
    %c0_10 = arith.constant 0 : index
    %7 = vector.load %arg5[%c0_8, %c0_9, %c0_10] : memref<1x1x128xf32, #tpu.memory_space<vmem>>, vector<1x1x128xf32>
    %8 = vector.extract_strided_slice %5 {offsets = [0, 0, 0], sizes = [1, 32, 128], strides = [1, 1, 1]} : vector<1x64x128xf32> to vector<1x32x128xf32>
    %cst_11 = arith.constant dense<0.000000e+00> : vector<128xf32>
    %9 = vector.multi_reduction <add>, %8, %cst_11 [0, 1] : vector<1x32x128xf32> to vector<128xf32>
    %10 = vector.shape_cast %9 : vector<128xf32> to vector<1x1x128xf32>
    %11 = arith.mulf %8, %8 : vector<1x32x128xf32>
    %cst_12 = arith.constant dense<0.000000e+00> : vector<128xf32>
    %12 = vector.multi_reduction <add>, %11, %cst_12 [0, 1] : vector<1x32x128xf32> to vector<128xf32>
    %13 = vector.shape_cast %12 : vector<128xf32> to vector<1x1x128xf32>
    %cst_13 = arith.constant 3.200000e+01 : f32
    %14 = vector.broadcast %cst_13 : f32 to vector<1x1x128xf32>
    %15 = arith.divf %10, %14 : vector<1x1x128xf32>
    %cst_14 = arith.constant 3.200000e+01 : f32
    %16 = vector.broadcast %cst_14 : f32 to vector<1x1x128xf32>
    %17 = arith.divf %13, %16 : vector<1x1x128xf32>
    %18 = arith.mulf %15, %15 : vector<1x1x128xf32>
    %19 = arith.subf %17, %18 : vector<1x1x128xf32>
    %cst_15 = arith.constant 9.99999974E-6 : f32
    %20 = vector.broadcast %cst_15 : f32 to vector<1x1x128xf32>
    %21 = arith.addf %19, %20 : vector<1x1x128xf32>
    %22 = math.rsqrt %21 : vector<1x1x128xf32>
    %23 = arith.mulf %6, %22 : vector<1x1x128xf32>
    %24 = arith.mulf %15, %23 : vector<1x1x128xf32>
    %25 = arith.subf %7, %24 : vector<1x1x128xf32>
    %26 = vector.broadcast %23 : vector<1x1x128xf32> to vector<1x32x128xf32>
    %27 = arith.mulf %8, %26 : vector<1x32x128xf32>
    %28 = vector.broadcast %25 : vector<1x1x128xf32> to vector<1x32x128xf32>
    %29 = arith.addf %27, %28 : vector<1x32x128xf32>
    %30 = vector.extract_strided_slice %5 {offsets = [0, 32, 0], sizes = [1, 32, 128], strides = [1, 1, 1]} : vector<1x64x128xf32> to vector<1x32x128xf32>
    %cst_16 = arith.constant dense<0.000000e+00> : vector<128xf32>
    %31 = vector.multi_reduction <add>, %30, %cst_16 [0, 1] : vector<1x32x128xf32> to vector<128xf32>
    %32 = vector.shape_cast %31 : vector<128xf32> to vector<1x1x128xf32>
    %33 = arith.mulf %30, %30 : vector<1x32x128xf32>
    %cst_17 = arith.constant dense<0.000000e+00> : vector<128xf32>
    %34 = vector.multi_reduction <add>, %33, %cst_17 [0, 1] : vector<1x32x128xf32> to vector<128xf32>
    %35 = vector.shape_cast %34 : vector<128xf32> to vector<1x1x128xf32>
    %cst_18 = arith.constant 3.200000e+01 : f32
    %36 = vector.broadcast %cst_18 : f32 to vector<1x1x128xf32>
    %37 = arith.divf %32, %36 : vector<1x1x128xf32>
    %cst_19 = arith.constant 3.200000e+01 : f32
    %38 = vector.broadcast %cst_19 : f32 to vector<1x1x128xf32>
    %39 = arith.divf %35, %38 : vector<1x1x128xf32>
    %40 = arith.mulf %37, %37 : vector<1x1x128xf32>
    %41 = arith.subf %39, %40 : vector<1x1x128xf32>
    %cst_20 = arith.constant 9.99999974E-6 : f32
    %42 = vector.broadcast %cst_20 : f32 to vector<1x1x128xf32>
    %43 = arith.addf %41, %42 : vector<1x1x128xf32>
    %44 = math.rsqrt %43 : vector<1x1x128xf32>
    %45 = arith.mulf %6, %44 : vector<1x1x128xf32>
    %46 = arith.mulf %37, %45 : vector<1x1x128xf32>
    %47 = arith.subf %7, %46 : vector<1x1x128xf32>
    %48 = vector.broadcast %45 : vector<1x1x128xf32> to vector<1x32x128xf32>
    %49 = arith.mulf %30, %48 : vector<1x32x128xf32>
    %50 = vector.broadcast %47 : vector<1x1x128xf32> to vector<1x32x128xf32>
    %51 = arith.addf %49, %50 : vector<1x32x128xf32>
    %52 = tpu.concatenate %29, %51 in 1 : vector<1x32x128xf32>, vector<1x32x128xf32> -> vector<1x64x128xf32>
    %cst_21 = arith.constant 0.000000e+00 : f32
    %53 = vector.broadcast %cst_21 : f32 to vector<1x64x128xf32>
    %54 = arith.maximumf %52, %53 : vector<1x64x128xf32>
    %55 = arith.truncf %54 : vector<1x64x128xf32> to vector<1x64x128xbf16>
    %c0_22 = arith.constant 0 : index
    %c0_23 = arith.constant 0 : index
    %c0_24 = arith.constant 0 : index
    %56 = vector.load %arg6[%c0_22, %c0_23, %c0_24] : memref<1x64x128xbf16, #tpu.memory_space<vmem>>, vector<1x64x128xbf16>
    tpu.vector_store %arg6[%c0_22, %c0_23, %c0_24], %55 {strides = array<i32>} : memref<1x64x128xbf16, #tpu.memory_space<vmem>>, vector<1x64x128xbf16>,
    return
  }
  func.func @transform_0(%arg0: i32, %arg1: i32) -> (i32, i32, i32) {
    %c0_i32 = arith.constant 0 : i32
    %c0_i32_0 = arith.constant 0 : i32
    %c0_i32_1 = arith.constant 0 : i32
    return %c0_i32, %arg0, %c0_i32_0 : i32, i32, i32
  }
  func.func @transform_1(%arg0: i32, %arg1: i32) -> (i32, i32, i32) {
    %c0_i32 = arith.constant 0 : i32
    %c0_i32_0 = arith.constant 0 : i32
    %c0_i32_1 = arith.constant 0 : i32
    return %c0_i32, %c0_i32_0, %arg1 : i32, i32, i32
  }
  func.func @transform_2(%arg0: i32, %arg1: i32) -> (i32, i32, i32) {
    %c0_i32 = arith.constant 0 : i32
    %c0_i32_0 = arith.constant 0 : i32
    %c0_i32_1 = arith.constant 0 : i32
    return %c0_i32, %c0_i32_0, %arg1 : i32, i32, i32
  }
  func.func @transform_3(%arg0: i32, %arg1: i32) -> (i32, i32, i32) {
    %c0_i32 = arith.constant 0 : i32
    %c0_i32_0 = arith.constant 0 : i32
    %c0_i32_1 = arith.constant 0 : i32
    return %c0_i32, %c0_i32_0, %arg1 : i32, i32, i32
  }
  func.func @transform_4(%arg0: i32, %arg1: i32) -> (i32, i32, i32) {
    %c0_i32 = arith.constant 0 : i32
    %c0_i32_0 = arith.constant 0 : i32
    return %c0_i32, %arg0, %arg1 : i32, i32, i32
  }
}

module attributes {stable_mosaic.version = 11 : i64} {
  func.func @_gemm_bn_act_kernel(%arg0: i32, %arg1: i32, %arg2: memref<1x16x2048xbf16, #tpu.memory_space<vmem>>, %arg3: memref<1x2048x256xbf16, #tpu.memory_space<vmem>>, %arg4: memref<1x1x256xf32, #tpu.memory_space<vmem>>, %arg5: memref<1x1x256xf32, #tpu.memory_space<vmem>>, %arg6: memref<1x16x256xbf16, #tpu.memory_space<vmem>>) attributes {dimension_semantics = [#tpu.dimension_semantics<parallel>, #tpu.dimension_semantics<parallel>], iteration_bounds = array<i64: 1, 1>, scalar_prefetch = 0 : i64, scratch_operands = 0 : i64, tpu.core_type = #tpu.core_type<tc>, window_params = [{transform_indices = @transform_0, window_bounds = array<i64: 1, 16, 2048>}, {transform_indices = @transform_1, window_bounds = array<i64: 1, 2048, 256>}, {transform_indices = @transform_2, window_bounds = array<i64: 1, 1, 256>}, {transform_indices = @transform_3, window_bounds = array<i64: 1, 1, 256>}, {transform_indices = @transform_4, window_bounds = array<i64: 1, 16, 256>}]} {
    %c0 = arith.constant 0 : index
    %c0_0 = arith.constant 0 : index
    %c0_1 = arith.constant 0 : index
    %0 = vector.load %arg2[%c0, %c0_0, %c0_1] : memref<1x16x2048xbf16, #tpu.memory_space<vmem>>, vector<1x16x2048xbf16>
    %1 = vector.shape_cast %0 : vector<1x16x2048xbf16> to vector<16x2048xbf16>
    %c0_2 = arith.constant 0 : index
    %c0_3 = arith.constant 0 : index
    %c0_4 = arith.constant 0 : index
    %2 = vector.load %arg3[%c0_2, %c0_3, %c0_4] : memref<1x2048x256xbf16, #tpu.memory_space<vmem>>, vector<1x2048x256xbf16>
    %3 = vector.shape_cast %2 : vector<1x2048x256xbf16> to vector<2048x256xbf16>
    %cst = arith.constant dense<0.000000e+00> : vector<16x256xf32>
    %4 = tpu.matmul %1, %3, %cst {dimension_numbers = #tpu.dot_dimension_numbers<[1], [0], [0], [1], [0, 0, 1, 1], [], []>} : vector<16x2048xbf16>, vector<2048x256xbf16>, vector<16x256xf32> -> vector<16x256xf32>
    %5 = vector.shape_cast %4 : vector<16x256xf32> to vector<1x16x256xf32>
    %c0_5 = arith.constant 0 : index
    %c0_6 = arith.constant 0 : index
    %c0_7 = arith.constant 0 : index
    %6 = vector.load %arg4[%c0_5, %c0_6, %c0_7] : memref<1x1x256xf32, #tpu.memory_space<vmem>>, vector<1x1x256xf32>
    %c0_8 = arith.constant 0 : index
    %c0_9 = arith.constant 0 : index
    %c0_10 = arith.constant 0 : index
    %7 = vector.load %arg5[%c0_8, %c0_9, %c0_10] : memref<1x1x256xf32, #tpu.memory_space<vmem>>, vector<1x1x256xf32>
    %8 = vector.extract_strided_slice %5 {offsets = [0, 0, 0], sizes = [1, 8, 256], strides = [1, 1, 1]} : vector<1x16x256xf32> to vector<1x8x256xf32>
    %cst_11 = arith.constant dense<0.000000e+00> : vector<256xf32>
    %9 = vector.multi_reduction <add>, %8, %cst_11 [0, 1] : vector<1x8x256xf32> to vector<256xf32>
    %10 = vector.shape_cast %9 : vector<256xf32> to vector<1x1x256xf32>
    %11 = arith.mulf %8, %8 : vector<1x8x256xf32>
    %cst_12 = arith.constant dense<0.000000e+00> : vector<256xf32>
    %12 = vector.multi_reduction <add>, %11, %cst_12 [0, 1] : vector<1x8x256xf32> to vector<256xf32>
    %13 = vector.shape_cast %12 : vector<256xf32> to vector<1x1x256xf32>
    %cst_13 = arith.constant 8.000000e+00 : f32
    %14 = vector.broadcast %cst_13 : f32 to vector<1x1x256xf32>
    %15 = arith.divf %10, %14 : vector<1x1x256xf32>
    %cst_14 = arith.constant 8.000000e+00 : f32
    %16 = vector.broadcast %cst_14 : f32 to vector<1x1x256xf32>
    %17 = arith.divf %13, %16 : vector<1x1x256xf32>
    %18 = arith.mulf %15, %15 : vector<1x1x256xf32>
    %19 = arith.subf %17, %18 : vector<1x1x256xf32>
    %cst_15 = arith.constant 9.99999974E-6 : f32
    %20 = vector.broadcast %cst_15 : f32 to vector<1x1x256xf32>
    %21 = arith.addf %19, %20 : vector<1x1x256xf32>
    %22 = math.rsqrt %21 : vector<1x1x256xf32>
    %23 = arith.mulf %6, %22 : vector<1x1x256xf32>
    %24 = arith.mulf %15, %23 : vector<1x1x256xf32>
    %25 = arith.subf %7, %24 : vector<1x1x256xf32>
    %26 = vector.broadcast %23 : vector<1x1x256xf32> to vector<1x8x256xf32>
    %27 = arith.mulf %8, %26 : vector<1x8x256xf32>
    %28 = vector.broadcast %25 : vector<1x1x256xf32> to vector<1x8x256xf32>
    %29 = arith.addf %27, %28 : vector<1x8x256xf32>
    %30 = vector.extract_strided_slice %5 {offsets = [0, 8, 0], sizes = [1, 8, 256], strides = [1, 1, 1]} : vector<1x16x256xf32> to vector<1x8x256xf32>
    %cst_16 = arith.constant dense<0.000000e+00> : vector<256xf32>
    %31 = vector.multi_reduction <add>, %30, %cst_16 [0, 1] : vector<1x8x256xf32> to vector<256xf32>
    %32 = vector.shape_cast %31 : vector<256xf32> to vector<1x1x256xf32>
    %33 = arith.mulf %30, %30 : vector<1x8x256xf32>
    %cst_17 = arith.constant dense<0.000000e+00> : vector<256xf32>
    %34 = vector.multi_reduction <add>, %33, %cst_17 [0, 1] : vector<1x8x256xf32> to vector<256xf32>
    %35 = vector.shape_cast %34 : vector<256xf32> to vector<1x1x256xf32>
    %cst_18 = arith.constant 8.000000e+00 : f32
    %36 = vector.broadcast %cst_18 : f32 to vector<1x1x256xf32>
    %37 = arith.divf %32, %36 : vector<1x1x256xf32>
    %cst_19 = arith.constant 8.000000e+00 : f32
    %38 = vector.broadcast %cst_19 : f32 to vector<1x1x256xf32>
    %39 = arith.divf %35, %38 : vector<1x1x256xf32>
    %40 = arith.mulf %37, %37 : vector<1x1x256xf32>
    %41 = arith.subf %39, %40 : vector<1x1x256xf32>
    %cst_20 = arith.constant 9.99999974E-6 : f32
    %42 = vector.broadcast %cst_20 : f32 to vector<1x1x256xf32>
    %43 = arith.addf %41, %42 : vector<1x1x256xf32>
    %44 = math.rsqrt %43 : vector<1x1x256xf32>
    %45 = arith.mulf %6, %44 : vector<1x1x256xf32>
    %46 = arith.mulf %37, %45 : vector<1x1x256xf32>
    %47 = arith.subf %7, %46 : vector<1x1x256xf32>
    %48 = vector.broadcast %45 : vector<1x1x256xf32> to vector<1x8x256xf32>
    %49 = arith.mulf %30, %48 : vector<1x8x256xf32>
    %50 = vector.broadcast %47 : vector<1x1x256xf32> to vector<1x8x256xf32>
    %51 = arith.addf %49, %50 : vector<1x8x256xf32>
    %52 = tpu.concatenate %29, %51 in 1 : vector<1x8x256xf32>, vector<1x8x256xf32> -> vector<1x16x256xf32>
    %cst_21 = arith.constant 0.000000e+00 : f32
    %53 = vector.broadcast %cst_21 : f32 to vector<1x16x256xf32>
    %54 = arith.maximumf %52, %53 : vector<1x16x256xf32>
    %55 = arith.truncf %54 : vector<1x16x256xf32> to vector<1x16x256xbf16>
    %c0_22 = arith.constant 0 : index
    %c0_23 = arith.constant 0 : index
    %c0_24 = arith.constant 0 : index
    %56 = vector.load %arg6[%c0_22, %c0_23, %c0_24] : memref<1x16x256xbf16, #tpu.memory_space<vmem>>, vector<1x16x256xbf16>
    tpu.vector_store %arg6[%c0_22, %c0_23, %c0_24], %55 {strides = array<i32>} : memref<1x16x256xbf16, #tpu.memory_space<vmem>>, vector<1x16x256xbf16>,
    return
  }
  func.func @transform_0(%arg0: i32, %arg1: i32) -> (i32, i32, i32) {
    %c0_i32 = arith.constant 0 : i32
    %c0_i32_0 = arith.constant 0 : i32
    %c0_i32_1 = arith.constant 0 : i32
    return %c0_i32, %arg0, %c0_i32_0 : i32, i32, i32
  }
  func.func @transform_1(%arg0: i32, %arg1: i32) -> (i32, i32, i32) {
    %c0_i32 = arith.constant 0 : i32
    %c0_i32_0 = arith.constant 0 : i32
    %c0_i32_1 = arith.constant 0 : i32
    return %c0_i32, %c0_i32_0, %arg1 : i32, i32, i32
  }
  func.func @transform_2(%arg0: i32, %arg1: i32) -> (i32, i32, i32) {
    %c0_i32 = arith.constant 0 : i32
    %c0_i32_0 = arith.constant 0 : i32
    %c0_i32_1 = arith.constant 0 : i32
    return %c0_i32, %c0_i32_0, %arg1 : i32, i32, i32
  }
  func.func @transform_3(%arg0: i32, %arg1: i32) -> (i32, i32, i32) {
    %c0_i32 = arith.constant 0 : i32
    %c0_i32_0 = arith.constant 0 : i32
    %c0_i32_1 = arith.constant 0 : i32
    return %c0_i32, %c0_i32_0, %arg1 : i32, i32, i32
  }
  func.func @transform_4(%arg0: i32, %arg1: i32) -> (i32, i32, i32) {
    %c0_i32 = arith.constant 0 : i32
    %c0_i32_0 = arith.constant 0 : i32
    return %c0_i32, %arg0, %arg1 : i32, i32, i32
  }
}

module attributes {stable_mosaic.version = 11 : i64} {
  func.func @_gemm_bn_act_kernel(%arg0: i32, %arg1: i32, %arg2: memref<1x16x4096xbf16, #tpu.memory_space<vmem>>, %arg3: memref<1x4096x128xbf16, #tpu.memory_space<vmem>>, %arg4: memref<1x1x128xf32, #tpu.memory_space<vmem>>, %arg5: memref<1x16x128xf32, #tpu.memory_space<vmem>>) attributes {dimension_semantics = [#tpu.dimension_semantics<parallel>, #tpu.dimension_semantics<parallel>], iteration_bounds = array<i64: 1, 1>, scalar_prefetch = 0 : i64, scratch_operands = 0 : i64, tpu.core_type = #tpu.core_type<tc>, window_params = [{transform_indices = @transform_0, window_bounds = array<i64: 1, 16, 4096>}, {transform_indices = @transform_1, window_bounds = array<i64: 1, 4096, 128>}, {transform_indices = @transform_2, window_bounds = array<i64: 1, 1, 128>}, {transform_indices = @transform_3, window_bounds = array<i64: 1, 16, 128>}]} {
    %c0 = arith.constant 0 : index
    %c0_0 = arith.constant 0 : index
    %c0_1 = arith.constant 0 : index
    %0 = vector.load %arg2[%c0, %c0_0, %c0_1] : memref<1x16x4096xbf16, #tpu.memory_space<vmem>>, vector<1x16x4096xbf16>
    %1 = vector.shape_cast %0 : vector<1x16x4096xbf16> to vector<16x4096xbf16>
    %c0_2 = arith.constant 0 : index
    %c0_3 = arith.constant 0 : index
    %c0_4 = arith.constant 0 : index
    %2 = vector.load %arg3[%c0_2, %c0_3, %c0_4] : memref<1x4096x128xbf16, #tpu.memory_space<vmem>>, vector<1x4096x128xbf16>
    %3 = vector.shape_cast %2 : vector<1x4096x128xbf16> to vector<4096x128xbf16>
    %cst = arith.constant dense<0.000000e+00> : vector<16x128xf32>
    %4 = tpu.matmul %1, %3, %cst {dimension_numbers = #tpu.dot_dimension_numbers<[1], [0], [0], [1], [0, 0, 1, 1], [], []>} : vector<16x4096xbf16>, vector<4096x128xbf16>, vector<16x128xf32> -> vector<16x128xf32>
    %5 = vector.shape_cast %4 : vector<16x128xf32> to vector<1x16x128xf32>
    %c0_5 = arith.constant 0 : index
    %c0_6 = arith.constant 0 : index
    %c0_7 = arith.constant 0 : index
    %6 = vector.load %arg4[%c0_5, %c0_6, %c0_7] : memref<1x1x128xf32, #tpu.memory_space<vmem>>, vector<1x1x128xf32>
    %7 = vector.broadcast %6 : vector<1x1x128xf32> to vector<1x16x128xf32>
    %8 = arith.addf %5, %7 : vector<1x16x128xf32>
    %c0_8 = arith.constant 0 : index
    %c0_9 = arith.constant 0 : index
    %c0_10 = arith.constant 0 : index
    %9 = vector.load %arg5[%c0_8, %c0_9, %c0_10] : memref<1x16x128xf32, #tpu.memory_space<vmem>>, vector<1x16x128xf32>
    tpu.vector_store %arg5[%c0_8, %c0_9, %c0_10], %8 {strides = array<i32>} : memref<1x16x128xf32, #tpu.memory_space<vmem>>, vector<1x16x128xf32>,
    return
  }
  func.func @transform_0(%arg0: i32, %arg1: i32) -> (i32, i32, i32) {
    %c0_i32 = arith.constant 0 : i32
    %c0_i32_0 = arith.constant 0 : i32
    %c0_i32_1 = arith.constant 0 : i32
    return %c0_i32, %arg0, %c0_i32_0 : i32, i32, i32
  }
  func.func @transform_1(%arg0: i32, %arg1: i32) -> (i32, i32, i32) {
    %c0_i32 = arith.constant 0 : i32
    %c0_i32_0 = arith.constant 0 : i32
    %c0_i32_1 = arith.constant 0 : i32
    return %c0_i32, %c0_i32_0, %arg1 : i32, i32, i32
  }
  func.func @transform_2(%arg0: i32, %arg1: i32) -> (i32, i32, i32) {
    %c0_i32 = arith.constant 0 : i32
    %c0_i32_0 = arith.constant 0 : i32
    %c0_i32_1 = arith.constant 0 : i32
    return %c0_i32, %c0_i32_0, %arg1 : i32, i32, i32
  }
  func.func @transform_3(%arg0: i32, %arg1: i32) -> (i32, i32, i32) {
    %c0_i32 = arith.constant 0 : i32
    %c0_i32_0 = arith.constant 0 : i32
    return %c0_i32, %arg0, %arg1 : i32, i32, i32
  }
}

module attributes {stable_mosaic.version = 11 : i64} {
  func.func @_gemm_bn_act_kernel(%arg0: i32, %arg1: i32, %arg2: memref<4x16x128xbf16, #tpu.memory_space<vmem>>, %arg3: memref<4x128x256xbf16, #tpu.memory_space<vmem>>, %arg4: memref<1x1x256xf32, #tpu.memory_space<vmem>>, %arg5: memref<1x1x256xf32, #tpu.memory_space<vmem>>, %arg6: memref<4x16x256xbf16, #tpu.memory_space<vmem>>) attributes {dimension_semantics = [#tpu.dimension_semantics<parallel>, #tpu.dimension_semantics<parallel>], iteration_bounds = array<i64: 1, 1>, scalar_prefetch = 0 : i64, scratch_operands = 0 : i64, tpu.core_type = #tpu.core_type<tc>, window_params = [{transform_indices = @transform_0, window_bounds = array<i64: 4, 16, 128>}, {transform_indices = @transform_1, window_bounds = array<i64: 4, 128, 256>}, {transform_indices = @transform_2, window_bounds = array<i64: 1, 1, 256>}, {transform_indices = @transform_3, window_bounds = array<i64: 1, 1, 256>}, {transform_indices = @transform_4, window_bounds = array<i64: 4, 16, 256>}]} {
    %c0 = arith.constant 0 : index
    %c0_0 = arith.constant 0 : index
    %c0_1 = arith.constant 0 : index
    %0 = vector.load %arg2[%c0, %c0_0, %c0_1] : memref<4x16x128xbf16, #tpu.memory_space<vmem>>, vector<1x16x128xbf16>
    %1 = vector.shape_cast %0 : vector<1x16x128xbf16> to vector<16x128xbf16>
    %c0_2 = arith.constant 0 : index
    %c0_3 = arith.constant 0 : index
    %c0_4 = arith.constant 0 : index
    %2 = vector.load %arg3[%c0_2, %c0_3, %c0_4] : memref<4x128x256xbf16, #tpu.memory_space<vmem>>, vector<1x128x256xbf16>
    %3 = vector.shape_cast %2 : vector<1x128x256xbf16> to vector<128x256xbf16>
    %cst = arith.constant dense<0.000000e+00> : vector<16x256xf32>
    %4 = tpu.matmul %1, %3, %cst {dimension_numbers = #tpu.dot_dimension_numbers<[1], [0], [0], [1], [0, 0, 1, 1], [], []>} : vector<16x128xbf16>, vector<128x256xbf16>, vector<16x256xf32> -> vector<16x256xf32>
    %c1 = arith.constant 1 : index
    %c0_5 = arith.constant 0 : index
    %c0_6 = arith.constant 0 : index
    %5 = vector.load %arg2[%c1, %c0_5, %c0_6] : memref<4x16x128xbf16, #tpu.memory_space<vmem>>, vector<1x16x128xbf16>
    %6 = vector.shape_cast %5 : vector<1x16x128xbf16> to vector<16x128xbf16>
    %c1_7 = arith.constant 1 : index
    %c0_8 = arith.constant 0 : index
    %c0_9 = arith.constant 0 : index
    %7 = vector.load %arg3[%c1_7, %c0_8, %c0_9] : memref<4x128x256xbf16, #tpu.memory_space<vmem>>, vector<1x128x256xbf16>
    %8 = vector.shape_cast %7 : vector<1x128x256xbf16> to vector<128x256xbf16>
    %cst_10 = arith.constant dense<0.000000e+00> : vector<16x256xf32>
    %9 = tpu.matmul %6, %8, %cst_10 {dimension_numbers = #tpu.dot_dimension_numbers<[1], [0], [0], [1], [0, 0, 1, 1], [], []>} : vector<16x128xbf16>, vector<128x256xbf16>, vector<16x256xf32> -> vector<16x256xf32>
    %c2 = arith.constant 2 : index
    %c0_11 = arith.constant 0 : index
    %c0_12 = arith.constant 0 : index
    %10 = vector.load %arg2[%c2, %c0_11, %c0_12] : memref<4x16x128xbf16, #tpu.memory_space<vmem>>, vector<1x16x128xbf16>
    %11 = vector.shape_cast %10 : vector<1x16x128xbf16> to vector<16x128xbf16>
    %c2_13 = arith.constant 2 : index
    %c0_14 = arith.constant 0 : index
    %c0_15 = arith.constant 0 : index
    %12 = vector.load %arg3[%c2_13, %c0_14, %c0_15] : memref<4x128x256xbf16, #tpu.memory_space<vmem>>, vector<1x128x256xbf16>
    %13 = vector.shape_cast %12 : vector<1x128x256xbf16> to vector<128x256xbf16>
    %cst_16 = arith.constant dense<0.000000e+00> : vector<16x256xf32>
    %14 = tpu.matmul %11, %13, %cst_16 {dimension_numbers = #tpu.dot_dimension_numbers<[1], [0], [0], [1], [0, 0, 1, 1], [], []>} : vector<16x128xbf16>, vector<128x256xbf16>, vector<16x256xf32> -> vector<16x256xf32>
    %c3 = arith.constant 3 : index
    %c0_17 = arith.constant 0 : index
    %c0_18 = arith.constant 0 : index
    %15 = vector.load %arg2[%c3, %c0_17, %c0_18] : memref<4x16x128xbf16, #tpu.memory_space<vmem>>, vector<1x16x128xbf16>
    %16 = vector.shape_cast %15 : vector<1x16x128xbf16> to vector<16x128xbf16>
    %c3_19 = arith.constant 3 : index
    %c0_20 = arith.constant 0 : index
    %c0_21 = arith.constant 0 : index
    %17 = vector.load %arg3[%c3_19, %c0_20, %c0_21] : memref<4x128x256xbf16, #tpu.memory_space<vmem>>, vector<1x128x256xbf16>
    %18 = vector.shape_cast %17 : vector<1x128x256xbf16> to vector<128x256xbf16>
    %cst_22 = arith.constant dense<0.000000e+00> : vector<16x256xf32>
    %19 = tpu.matmul %16, %18, %cst_22 {dimension_numbers = #tpu.dot_dimension_numbers<[1], [0], [0], [1], [0, 0, 1, 1], [], []>} : vector<16x128xbf16>, vector<128x256xbf16>, vector<16x256xf32> -> vector<16x256xf32>
    %20 = vector.shape_cast %4 : vector<16x256xf32> to vector<1x16x256xf32>
    %21 = vector.shape_cast %9 : vector<16x256xf32> to vector<1x16x256xf32>
    %22 = vector.shape_cast %14 : vector<16x256xf32> to vector<1x16x256xf32>
    %23 = vector.shape_cast %19 : vector<16x256xf32> to vector<1x16x256xf32>
    %24 = tpu.concatenate %20, %21, %22, %23 in 0 : vector<1x16x256xf32>, vector<1x16x256xf32>, vector<1x16x256xf32>, vector<1x16x256xf32> -> vector<4x16x256xf32>
    %c0_23 = arith.constant 0 : index
    %c0_24 = arith.constant 0 : index
    %c0_25 = arith.constant 0 : index
    %25 = vector.load %arg4[%c0_23, %c0_24, %c0_25] : memref<1x1x256xf32, #tpu.memory_space<vmem>>, vector<1x1x256xf32>
    %c0_26 = arith.constant 0 : index
    %c0_27 = arith.constant 0 : index
    %c0_28 = arith.constant 0 : index
    %26 = vector.load %arg5[%c0_26, %c0_27, %c0_28] : memref<1x1x256xf32, #tpu.memory_space<vmem>>, vector<1x1x256xf32>
    %cst_29 = arith.constant dense<0.000000e+00> : vector<256xf32>
    %27 = vector.multi_reduction <add>, %24, %cst_29 [0, 1] : vector<4x16x256xf32> to vector<256xf32>
    %28 = vector.shape_cast %27 : vector<256xf32> to vector<1x1x256xf32>
    %29 = arith.mulf %24, %24 : vector<4x16x256xf32>
    %cst_30 = arith.constant dense<0.000000e+00> : vector<256xf32>
    %30 = vector.multi_reduction <add>, %29, %cst_30 [0, 1] : vector<4x16x256xf32> to vector<256xf32>
    %31 = vector.shape_cast %30 : vector<256xf32> to vector<1x1x256xf32>
    %cst_31 = arith.constant 8.000000e+00 : f32
    %32 = vector.broadcast %cst_31 : f32 to vector<1x1x256xf32>
    %33 = arith.divf %28, %32 : vector<1x1x256xf32>
    %cst_32 = arith.constant 8.000000e+00 : f32
    %34 = vector.broadcast %cst_32 : f32 to vector<1x1x256xf32>
    %35 = arith.divf %31, %34 : vector<1x1x256xf32>
    %36 = arith.mulf %33, %33 : vector<1x1x256xf32>
    %37 = arith.subf %35, %36 : vector<1x1x256xf32>
    %cst_33 = arith.constant 9.99999974E-6 : f32
    %38 = vector.broadcast %cst_33 : f32 to vector<1x1x256xf32>
    %39 = arith.addf %37, %38 : vector<1x1x256xf32>
    %40 = math.rsqrt %39 : vector<1x1x256xf32>
    %41 = arith.mulf %25, %40 : vector<1x1x256xf32>
    %42 = arith.mulf %33, %41 : vector<1x1x256xf32>
    %43 = arith.subf %26, %42 : vector<1x1x256xf32>
    %44 = vector.broadcast %41 : vector<1x1x256xf32> to vector<4x16x256xf32>
    %45 = arith.mulf %24, %44 : vector<4x16x256xf32>
    %46 = vector.broadcast %43 : vector<1x1x256xf32> to vector<4x16x256xf32>
    %47 = arith.addf %45, %46 : vector<4x16x256xf32>
    %cst_34 = arith.constant 0.000000e+00 : f32
    %48 = vector.broadcast %cst_34 : f32 to vector<4x16x256xf32>
    %49 = arith.maximumf %47, %48 : vector<4x16x256xf32>
    %50 = arith.truncf %49 : vector<4x16x256xf32> to vector<4x16x256xbf16>
    %c0_35 = arith.constant 0 : index
    %c0_36 = arith.constant 0 : index
    %c0_37 = arith.constant 0 : index
    %51 = vector.load %arg6[%c0_35, %c0_36, %c0_37] : memref<4x16x256xbf16, #tpu.memory_space<vmem>>, vector<4x16x256xbf16>
    tpu.vector_store %arg6[%c0_35, %c0_36, %c0_37], %50 {strides = array<i32>} : memref<4x16x256xbf16, #tpu.memory_space<vmem>>, vector<4x16x256xbf16>,
    return
  }
  func.func @transform_0(%arg0: i32, %arg1: i32) -> (i32, i32, i32) {
    %c0_i32 = arith.constant 0 : i32
    %c0_i32_0 = arith.constant 0 : i32
    %c0_i32_1 = arith.constant 0 : i32
    return %c0_i32, %arg0, %c0_i32_0 : i32, i32, i32
  }
  func.func @transform_1(%arg0: i32, %arg1: i32) -> (i32, i32, i32) {
    %c0_i32 = arith.constant 0 : i32
    %c0_i32_0 = arith.constant 0 : i32
    %c0_i32_1 = arith.constant 0 : i32
    return %c0_i32, %c0_i32_0, %arg1 : i32, i32, i32
  }
  func.func @transform_2(%arg0: i32, %arg1: i32) -> (i32, i32, i32) {
    %c0_i32 = arith.constant 0 : i32
    %c0_i32_0 = arith.constant 0 : i32
    %c0_i32_1 = arith.constant 0 : i32
    return %c0_i32, %c0_i32_0, %arg1 : i32, i32, i32
  }
  func.func @transform_3(%arg0: i32, %arg1: i32) -> (i32, i32, i32) {
    %c0_i32 = arith.constant 0 : i32
    %c0_i32_0 = arith.constant 0 : i32
    %c0_i32_1 = arith.constant 0 : i32
    return %c0_i32, %c0_i32_0, %arg1 : i32, i32, i32
  }
  func.func @transform_4(%arg0: i32, %arg1: i32) -> (i32, i32, i32) {
    %c0_i32 = arith.constant 0 : i32
    %c0_i32_0 = arith.constant 0 : i32
    return %c0_i32, %arg0, %arg1 : i32, i32, i32
  }
}

module attributes {stable_mosaic.version = 11 : i64} {
  func.func @_gemm_bn_act_kernel(%arg0: i32, %arg1: i32, %arg2: memref<4x16x1024xbf16, #tpu.memory_space<vmem>>, %arg3: memref<4x1024x128xbf16, #tpu.memory_space<vmem>>, %arg4: memref<1x1x128xf32, #tpu.memory_space<vmem>>, %arg5: memref<1x1x128xf32, #tpu.memory_space<vmem>>, %arg6: memref<4x16x128xbf16, #tpu.memory_space<vmem>>) attributes {dimension_semantics = [#tpu.dimension_semantics<parallel>, #tpu.dimension_semantics<parallel>], iteration_bounds = array<i64: 1, 1>, scalar_prefetch = 0 : i64, scratch_operands = 0 : i64, tpu.core_type = #tpu.core_type<tc>, window_params = [{transform_indices = @transform_0, window_bounds = array<i64: 4, 16, 1024>}, {transform_indices = @transform_1, window_bounds = array<i64: 4, 1024, 128>}, {transform_indices = @transform_2, window_bounds = array<i64: 1, 1, 128>}, {transform_indices = @transform_3, window_bounds = array<i64: 1, 1, 128>}, {transform_indices = @transform_4, window_bounds = array<i64: 4, 16, 128>}]} {
    %c0 = arith.constant 0 : index
    %c0_0 = arith.constant 0 : index
    %c0_1 = arith.constant 0 : index
    %0 = vector.load %arg2[%c0, %c0_0, %c0_1] : memref<4x16x1024xbf16, #tpu.memory_space<vmem>>, vector<1x16x1024xbf16>
    %1 = vector.shape_cast %0 : vector<1x16x1024xbf16> to vector<16x1024xbf16>
    %c0_2 = arith.constant 0 : index
    %c0_3 = arith.constant 0 : index
    %c0_4 = arith.constant 0 : index
    %2 = vector.load %arg3[%c0_2, %c0_3, %c0_4] : memref<4x1024x128xbf16, #tpu.memory_space<vmem>>, vector<1x1024x128xbf16>
    %3 = vector.shape_cast %2 : vector<1x1024x128xbf16> to vector<1024x128xbf16>
    %cst = arith.constant dense<0.000000e+00> : vector<16x128xf32>
    %4 = tpu.matmul %1, %3, %cst {dimension_numbers = #tpu.dot_dimension_numbers<[1], [0], [0], [1], [0, 0, 1, 1], [], []>} : vector<16x1024xbf16>, vector<1024x128xbf16>, vector<16x128xf32> -> vector<16x128xf32>
    %c1 = arith.constant 1 : index
    %c0_5 = arith.constant 0 : index
    %c0_6 = arith.constant 0 : index
    %5 = vector.load %arg2[%c1, %c0_5, %c0_6] : memref<4x16x1024xbf16, #tpu.memory_space<vmem>>, vector<1x16x1024xbf16>
    %6 = vector.shape_cast %5 : vector<1x16x1024xbf16> to vector<16x1024xbf16>
    %c1_7 = arith.constant 1 : index
    %c0_8 = arith.constant 0 : index
    %c0_9 = arith.constant 0 : index
    %7 = vector.load %arg3[%c1_7, %c0_8, %c0_9] : memref<4x1024x128xbf16, #tpu.memory_space<vmem>>, vector<1x1024x128xbf16>
    %8 = vector.shape_cast %7 : vector<1x1024x128xbf16> to vector<1024x128xbf16>
    %cst_10 = arith.constant dense<0.000000e+00> : vector<16x128xf32>
    %9 = tpu.matmul %6, %8, %cst_10 {dimension_numbers = #tpu.dot_dimension_numbers<[1], [0], [0], [1], [0, 0, 1, 1], [], []>} : vector<16x1024xbf16>, vector<1024x128xbf16>, vector<16x128xf32> -> vector<16x128xf32>
    %c2 = arith.constant 2 : index
    %c0_11 = arith.constant 0 : index
    %c0_12 = arith.constant 0 : index
    %10 = vector.load %arg2[%c2, %c0_11, %c0_12] : memref<4x16x1024xbf16, #tpu.memory_space<vmem>>, vector<1x16x1024xbf16>
    %11 = vector.shape_cast %10 : vector<1x16x1024xbf16> to vector<16x1024xbf16>
    %c2_13 = arith.constant 2 : index
    %c0_14 = arith.constant 0 : index
    %c0_15 = arith.constant 0 : index
    %12 = vector.load %arg3[%c2_13, %c0_14, %c0_15] : memref<4x1024x128xbf16, #tpu.memory_space<vmem>>, vector<1x1024x128xbf16>
    %13 = vector.shape_cast %12 : vector<1x1024x128xbf16> to vector<1024x128xbf16>
    %cst_16 = arith.constant dense<0.000000e+00> : vector<16x128xf32>
    %14 = tpu.matmul %11, %13, %cst_16 {dimension_numbers = #tpu.dot_dimension_numbers<[1], [0], [0], [1], [0, 0, 1, 1], [], []>} : vector<16x1024xbf16>, vector<1024x128xbf16>, vector<16x128xf32> -> vector<16x128xf32>
    %c3 = arith.constant 3 : index
    %c0_17 = arith.constant 0 : index
    %c0_18 = arith.constant 0 : index
    %15 = vector.load %arg2[%c3, %c0_17, %c0_18] : memref<4x16x1024xbf16, #tpu.memory_space<vmem>>, vector<1x16x1024xbf16>
    %16 = vector.shape_cast %15 : vector<1x16x1024xbf16> to vector<16x1024xbf16>
    %c3_19 = arith.constant 3 : index
    %c0_20 = arith.constant 0 : index
    %c0_21 = arith.constant 0 : index
    %17 = vector.load %arg3[%c3_19, %c0_20, %c0_21] : memref<4x1024x128xbf16, #tpu.memory_space<vmem>>, vector<1x1024x128xbf16>
    %18 = vector.shape_cast %17 : vector<1x1024x128xbf16> to vector<1024x128xbf16>
    %cst_22 = arith.constant dense<0.000000e+00> : vector<16x128xf32>
    %19 = tpu.matmul %16, %18, %cst_22 {dimension_numbers = #tpu.dot_dimension_numbers<[1], [0], [0], [1], [0, 0, 1, 1], [], []>} : vector<16x1024xbf16>, vector<1024x128xbf16>, vector<16x128xf32> -> vector<16x128xf32>
    %20 = vector.shape_cast %4 : vector<16x128xf32> to vector<1x16x128xf32>
    %21 = vector.shape_cast %9 : vector<16x128xf32> to vector<1x16x128xf32>
    %22 = vector.shape_cast %14 : vector<16x128xf32> to vector<1x16x128xf32>
    %23 = vector.shape_cast %19 : vector<16x128xf32> to vector<1x16x128xf32>
    %24 = tpu.concatenate %20, %21, %22, %23 in 0 : vector<1x16x128xf32>, vector<1x16x128xf32>, vector<1x16x128xf32>, vector<1x16x128xf32> -> vector<4x16x128xf32>
    %c0_23 = arith.constant 0 : index
    %c0_24 = arith.constant 0 : index
    %c0_25 = arith.constant 0 : index
    %25 = vector.load %arg4[%c0_23, %c0_24, %c0_25] : memref<1x1x128xf32, #tpu.memory_space<vmem>>, vector<1x1x128xf32>
    %c0_26 = arith.constant 0 : index
    %c0_27 = arith.constant 0 : index
    %c0_28 = arith.constant 0 : index
    %26 = vector.load %arg5[%c0_26, %c0_27, %c0_28] : memref<1x1x128xf32, #tpu.memory_space<vmem>>, vector<1x1x128xf32>
    %cst_29 = arith.constant dense<0.000000e+00> : vector<128xf32>
    %27 = vector.multi_reduction <add>, %24, %cst_29 [0, 1] : vector<4x16x128xf32> to vector<128xf32>
    %28 = vector.shape_cast %27 : vector<128xf32> to vector<1x1x128xf32>
    %29 = arith.mulf %24, %24 : vector<4x16x128xf32>
    %cst_30 = arith.constant dense<0.000000e+00> : vector<128xf32>
    %30 = vector.multi_reduction <add>, %29, %cst_30 [0, 1] : vector<4x16x128xf32> to vector<128xf32>
    %31 = vector.shape_cast %30 : vector<128xf32> to vector<1x1x128xf32>
    %cst_31 = arith.constant 3.200000e+01 : f32
    %32 = vector.broadcast %cst_31 : f32 to vector<1x1x128xf32>
    %33 = arith.divf %28, %32 : vector<1x1x128xf32>
    %cst_32 = arith.constant 3.200000e+01 : f32
    %34 = vector.broadcast %cst_32 : f32 to vector<1x1x128xf32>
    %35 = arith.divf %31, %34 : vector<1x1x128xf32>
    %36 = arith.mulf %33, %33 : vector<1x1x128xf32>
    %37 = arith.subf %35, %36 : vector<1x1x128xf32>
    %cst_33 = arith.constant 9.99999974E-6 : f32
    %38 = vector.broadcast %cst_33 : f32 to vector<1x1x128xf32>
    %39 = arith.addf %37, %38 : vector<1x1x128xf32>
    %40 = math.rsqrt %39 : vector<1x1x128xf32>
    %41 = arith.mulf %25, %40 : vector<1x1x128xf32>
    %42 = arith.mulf %33, %41 : vector<1x1x128xf32>
    %43 = arith.subf %26, %42 : vector<1x1x128xf32>
    %44 = vector.broadcast %41 : vector<1x1x128xf32> to vector<4x16x128xf32>
    %45 = arith.mulf %24, %44 : vector<4x16x128xf32>
    %46 = vector.broadcast %43 : vector<1x1x128xf32> to vector<4x16x128xf32>
    %47 = arith.addf %45, %46 : vector<4x16x128xf32>
    %cst_34 = arith.constant 0.000000e+00 : f32
    %48 = vector.broadcast %cst_34 : f32 to vector<4x16x128xf32>
    %49 = arith.maximumf %47, %48 : vector<4x16x128xf32>
    %50 = arith.truncf %49 : vector<4x16x128xf32> to vector<4x16x128xbf16>
    %c0_35 = arith.constant 0 : index
    %c0_36 = arith.constant 0 : index
    %c0_37 = arith.constant 0 : index
    %51 = vector.load %arg6[%c0_35, %c0_36, %c0_37] : memref<4x16x128xbf16, #tpu.memory_space<vmem>>, vector<4x16x128xbf16>
    tpu.vector_store %arg6[%c0_35, %c0_36, %c0_37], %50 {strides = array<i32>} : memref<4x16x128xbf16, #tpu.memory_space<vmem>>, vector<4x16x128xbf16>,
    return
  }
  func.func @transform_0(%arg0: i32, %arg1: i32) -> (i32, i32, i32) {
    %c0_i32 = arith.constant 0 : i32
    %c0_i32_0 = arith.constant 0 : i32
    %c0_i32_1 = arith.constant 0 : i32
    return %c0_i32, %arg0, %c0_i32_0 : i32, i32, i32
  }
  func.func @transform_1(%arg0: i32, %arg1: i32) -> (i32, i32, i32) {
    %c0_i32 = arith.constant 0 : i32
    %c0_i32_0 = arith.constant 0 : i32
    %c0_i32_1 = arith.constant 0 : i32
    return %c0_i32, %c0_i32_0, %arg1 : i32, i32, i32
  }
  func.func @transform_2(%arg0: i32, %arg1: i32) -> (i32, i32, i32) {
    %c0_i32 = arith.constant 0 : i32
    %c0_i32_0 = arith.constant 0 : i32
    %c0_i32_1 = arith.constant 0 : i32
    return %c0_i32, %c0_i32_0, %arg1 : i32, i32, i32
  }
  func.func @transform_3(%arg0: i32, %arg1: i32) -> (i32, i32, i32) {
    %c0_i32 = arith.constant 0 : i32
    %c0_i32_0 = arith.constant 0 : i32
    %c0_i32_1 = arith.constant 0 : i32
    return %c0_i32, %c0_i32_0, %arg1 : i32, i32, i32
  }
  func.func @transform_4(%arg0: i32, %arg1: i32) -> (i32, i32, i32) {
    %c0_i32 = arith.constant 0 : i32
    %c0_i32_0 = arith.constant 0 : i32
    return %c0_i32, %arg0, %arg1 : i32, i32, i32
  }
}

module attributes {stable_mosaic.version = 11 : i64} {
  func.func @_gemm_bn_act_kernel(%arg0: i32, %arg1: i32, %arg2: memref<4x32x512xbf16, #tpu.memory_space<vmem>>, %arg3: memref<4x512x128xbf16, #tpu.memory_space<vmem>>, %arg4: memref<1x1x128xf32, #tpu.memory_space<vmem>>, %arg5: memref<1x1x128xf32, #tpu.memory_space<vmem>>, %arg6: memref<4x32x128xbf16, #tpu.memory_space<vmem>>) attributes {dimension_semantics = [#tpu.dimension_semantics<parallel>, #tpu.dimension_semantics<parallel>], iteration_bounds = array<i64: 1, 1>, scalar_prefetch = 0 : i64, scratch_operands = 0 : i64, tpu.core_type = #tpu.core_type<tc>, window_params = [{transform_indices = @transform_0, window_bounds = array<i64: 4, 32, 512>}, {transform_indices = @transform_1, window_bounds = array<i64: 4, 512, 128>}, {transform_indices = @transform_2, window_bounds = array<i64: 1, 1, 128>}, {transform_indices = @transform_3, window_bounds = array<i64: 1, 1, 128>}, {transform_indices = @transform_4, window_bounds = array<i64: 4, 32, 128>}]} {
    %c0 = arith.constant 0 : index
    %c0_0 = arith.constant 0 : index
    %c0_1 = arith.constant 0 : index
    %0 = vector.load %arg2[%c0, %c0_0, %c0_1] : memref<4x32x512xbf16, #tpu.memory_space<vmem>>, vector<1x32x512xbf16>
    %1 = vector.shape_cast %0 : vector<1x32x512xbf16> to vector<32x512xbf16>
    %c0_2 = arith.constant 0 : index
    %c0_3 = arith.constant 0 : index
    %c0_4 = arith.constant 0 : index
    %2 = vector.load %arg3[%c0_2, %c0_3, %c0_4] : memref<4x512x128xbf16, #tpu.memory_space<vmem>>, vector<1x512x128xbf16>
    %3 = vector.shape_cast %2 : vector<1x512x128xbf16> to vector<512x128xbf16>
    %cst = arith.constant dense<0.000000e+00> : vector<32x128xf32>
    %4 = tpu.matmul %1, %3, %cst {dimension_numbers = #tpu.dot_dimension_numbers<[1], [0], [0], [1], [0, 0, 1, 1], [], []>} : vector<32x512xbf16>, vector<512x128xbf16>, vector<32x128xf32> -> vector<32x128xf32>
    %c1 = arith.constant 1 : index
    %c0_5 = arith.constant 0 : index
    %c0_6 = arith.constant 0 : index
    %5 = vector.load %arg2[%c1, %c0_5, %c0_6] : memref<4x32x512xbf16, #tpu.memory_space<vmem>>, vector<1x32x512xbf16>
    %6 = vector.shape_cast %5 : vector<1x32x512xbf16> to vector<32x512xbf16>
    %c1_7 = arith.constant 1 : index
    %c0_8 = arith.constant 0 : index
    %c0_9 = arith.constant 0 : index
    %7 = vector.load %arg3[%c1_7, %c0_8, %c0_9] : memref<4x512x128xbf16, #tpu.memory_space<vmem>>, vector<1x512x128xbf16>
    %8 = vector.shape_cast %7 : vector<1x512x128xbf16> to vector<512x128xbf16>
    %cst_10 = arith.constant dense<0.000000e+00> : vector<32x128xf32>
    %9 = tpu.matmul %6, %8, %cst_10 {dimension_numbers = #tpu.dot_dimension_numbers<[1], [0], [0], [1], [0, 0, 1, 1], [], []>} : vector<32x512xbf16>, vector<512x128xbf16>, vector<32x128xf32> -> vector<32x128xf32>
    %c2 = arith.constant 2 : index
    %c0_11 = arith.constant 0 : index
    %c0_12 = arith.constant 0 : index
    %10 = vector.load %arg2[%c2, %c0_11, %c0_12] : memref<4x32x512xbf16, #tpu.memory_space<vmem>>, vector<1x32x512xbf16>
    %11 = vector.shape_cast %10 : vector<1x32x512xbf16> to vector<32x512xbf16>
    %c2_13 = arith.constant 2 : index
    %c0_14 = arith.constant 0 : index
    %c0_15 = arith.constant 0 : index
    %12 = vector.load %arg3[%c2_13, %c0_14, %c0_15] : memref<4x512x128xbf16, #tpu.memory_space<vmem>>, vector<1x512x128xbf16>
    %13 = vector.shape_cast %12 : vector<1x512x128xbf16> to vector<512x128xbf16>
    %cst_16 = arith.constant dense<0.000000e+00> : vector<32x128xf32>
    %14 = tpu.matmul %11, %13, %cst_16 {dimension_numbers = #tpu.dot_dimension_numbers<[1], [0], [0], [1], [0, 0, 1, 1], [], []>} : vector<32x512xbf16>, vector<512x128xbf16>, vector<32x128xf32> -> vector<32x128xf32>
    %c3 = arith.constant 3 : index
    %c0_17 = arith.constant 0 : index
    %c0_18 = arith.constant 0 : index
    %15 = vector.load %arg2[%c3, %c0_17, %c0_18] : memref<4x32x512xbf16, #tpu.memory_space<vmem>>, vector<1x32x512xbf16>
    %16 = vector.shape_cast %15 : vector<1x32x512xbf16> to vector<32x512xbf16>
    %c3_19 = arith.constant 3 : index
    %c0_20 = arith.constant 0 : index
    %c0_21 = arith.constant 0 : index
    %17 = vector.load %arg3[%c3_19, %c0_20, %c0_21] : memref<4x512x128xbf16, #tpu.memory_space<vmem>>, vector<1x512x128xbf16>
    %18 = vector.shape_cast %17 : vector<1x512x128xbf16> to vector<512x128xbf16>
    %cst_22 = arith.constant dense<0.000000e+00> : vector<32x128xf32>
    %19 = tpu.matmul %16, %18, %cst_22 {dimension_numbers = #tpu.dot_dimension_numbers<[1], [0], [0], [1], [0, 0, 1, 1], [], []>} : vector<32x512xbf16>, vector<512x128xbf16>, vector<32x128xf32> -> vector<32x128xf32>
    %20 = vector.shape_cast %4 : vector<32x128xf32> to vector<1x32x128xf32>
    %21 = vector.shape_cast %9 : vector<32x128xf32> to vector<1x32x128xf32>
    %22 = vector.shape_cast %14 : vector<32x128xf32> to vector<1x32x128xf32>
    %23 = vector.shape_cast %19 : vector<32x128xf32> to vector<1x32x128xf32>
    %24 = tpu.concatenate %20, %21, %22, %23 in 0 : vector<1x32x128xf32>, vector<1x32x128xf32>, vector<1x32x128xf32>, vector<1x32x128xf32> -> vector<4x32x128xf32>
    %c0_23 = arith.constant 0 : index
    %c0_24 = arith.constant 0 : index
    %c0_25 = arith.constant 0 : index
    %25 = vector.load %arg4[%c0_23, %c0_24, %c0_25] : memref<1x1x128xf32, #tpu.memory_space<vmem>>, vector<1x1x128xf32>
    %c0_26 = arith.constant 0 : index
    %c0_27 = arith.constant 0 : index
    %c0_28 = arith.constant 0 : index
    %26 = vector.load %arg5[%c0_26, %c0_27, %c0_28] : memref<1x1x128xf32, #tpu.memory_space<vmem>>, vector<1x1x128xf32>
    %cst_29 = arith.constant dense<0.000000e+00> : vector<128xf32>
    %27 = vector.multi_reduction <add>, %24, %cst_29 [0, 1] : vector<4x32x128xf32> to vector<128xf32>
    %28 = vector.shape_cast %27 : vector<128xf32> to vector<1x1x128xf32>
    %29 = arith.mulf %24, %24 : vector<4x32x128xf32>
    %cst_30 = arith.constant dense<0.000000e+00> : vector<128xf32>
    %30 = vector.multi_reduction <add>, %29, %cst_30 [0, 1] : vector<4x32x128xf32> to vector<128xf32>
    %31 = vector.shape_cast %30 : vector<128xf32> to vector<1x1x128xf32>
    %cst_31 = arith.constant 1.280000e+02 : f32
    %32 = vector.broadcast %cst_31 : f32 to vector<1x1x128xf32>
    %33 = arith.divf %28, %32 : vector<1x1x128xf32>
    %cst_32 = arith.constant 1.280000e+02 : f32
    %34 = vector.broadcast %cst_32 : f32 to vector<1x1x128xf32>
    %35 = arith.divf %31, %34 : vector<1x1x128xf32>
    %36 = arith.mulf %33, %33 : vector<1x1x128xf32>
    %37 = arith.subf %35, %36 : vector<1x1x128xf32>
    %cst_33 = arith.constant 9.99999974E-6 : f32
    %38 = vector.broadcast %cst_33 : f32 to vector<1x1x128xf32>
    %39 = arith.addf %37, %38 : vector<1x1x128xf32>
    %40 = math.rsqrt %39 : vector<1x1x128xf32>
    %41 = arith.mulf %25, %40 : vector<1x1x128xf32>
    %42 = arith.mulf %33, %41 : vector<1x1x128xf32>
    %43 = arith.subf %26, %42 : vector<1x1x128xf32>
    %44 = vector.broadcast %41 : vector<1x1x128xf32> to vector<4x32x128xf32>
    %45 = arith.mulf %24, %44 : vector<4x32x128xf32>
    %46 = vector.broadcast %43 : vector<1x1x128xf32> to vector<4x32x128xf32>
    %47 = arith.addf %45, %46 : vector<4x32x128xf32>
    %cst_34 = arith.constant 0.000000e+00 : f32
    %48 = vector.broadcast %cst_34 : f32 to vector<4x32x128xf32>
    %49 = arith.maximumf %47, %48 : vector<4x32x128xf32>
    %50 = arith.truncf %49 : vector<4x32x128xf32> to vector<4x32x128xbf16>
    %c0_35 = arith.constant 0 : index
    %c0_36 = arith.constant 0 : index
    %c0_37 = arith.constant 0 : index
    %51 = vector.load %arg6[%c0_35, %c0_36, %c0_37] : memref<4x32x128xbf16, #tpu.memory_space<vmem>>, vector<4x32x128xbf16>
    tpu.vector_store %arg6[%c0_35, %c0_36, %c0_37], %50 {strides = array<i32>} : memref<4x32x128xbf16, #tpu.memory_space<vmem>>, vector<4x32x128xbf16>,
    return
  }
  func.func @transform_0(%arg0: i32, %arg1: i32) -> (i32, i32, i32) {
    %c0_i32 = arith.constant 0 : i32
    %c0_i32_0 = arith.constant 0 : i32
    %c0_i32_1 = arith.constant 0 : i32
    return %c0_i32, %arg0, %c0_i32_0 : i32, i32, i32
  }
  func.func @transform_1(%arg0: i32, %arg1: i32) -> (i32, i32, i32) {
    %c0_i32 = arith.constant 0 : i32
    %c0_i32_0 = arith.constant 0 : i32
    %c0_i32_1 = arith.constant 0 : i32
    return %c0_i32, %c0_i32_0, %arg1 : i32, i32, i32
  }
  func.func @transform_2(%arg0: i32, %arg1: i32) -> (i32, i32, i32) {
    %c0_i32 = arith.constant 0 : i32
    %c0_i32_0 = arith.constant 0 : i32
    %c0_i32_1 = arith.constant 0 : i32
    return %c0_i32, %c0_i32_0, %arg1 : i32, i32, i32
  }
  func.func @transform_3(%arg0: i32, %arg1: i32) -> (i32, i32, i32) {
    %c0_i32 = arith.constant 0 : i32
    %c0_i32_0 = arith.constant 0 : i32
    %c0_i32_1 = arith.constant 0 : i32
    return %c0_i32, %c0_i32_0, %arg1 : i32, i32, i32
  }
  func.func @transform_4(%arg0: i32, %arg1: i32) -> (i32, i32, i32) {
    %c0_i32 = arith.constant 0 : i32
    %c0_i32_0 = arith.constant 0 : i32
    return %c0_i32, %arg0, %arg1 : i32, i32, i32
  }
}

module attributes {stable_mosaic.version = 11 : i64} {
  func.func @_gemm_bn_act_kernel(%arg0: i32, %arg1: i32, %arg2: memref<4x128x256xbf16, #tpu.memory_space<vmem>>, %arg3: memref<4x256x128xbf16, #tpu.memory_space<vmem>>, %arg4: memref<1x1x128xf32, #tpu.memory_space<vmem>>, %arg5: memref<4x128x128xf32, #tpu.memory_space<vmem>>) attributes {dimension_semantics = [#tpu.dimension_semantics<parallel>, #tpu.dimension_semantics<parallel>], iteration_bounds = array<i64: 1, 1>, scalar_prefetch = 0 : i64, scratch_operands = 0 : i64, tpu.core_type = #tpu.core_type<tc>, window_params = [{transform_indices = @transform_0, window_bounds = array<i64: 4, 128, 256>}, {transform_indices = @transform_1, window_bounds = array<i64: 4, 256, 128>}, {transform_indices = @transform_2, window_bounds = array<i64: 1, 1, 128>}, {transform_indices = @transform_3, window_bounds = array<i64: 4, 128, 128>}]} {
    %c0 = arith.constant 0 : index
    %c0_0 = arith.constant 0 : index
    %c0_1 = arith.constant 0 : index
    %0 = vector.load %arg2[%c0, %c0_0, %c0_1] : memref<4x128x256xbf16, #tpu.memory_space<vmem>>, vector<1x128x256xbf16>
    %1 = vector.shape_cast %0 : vector<1x128x256xbf16> to vector<128x256xbf16>
    %c0_2 = arith.constant 0 : index
    %c0_3 = arith.constant 0 : index
    %c0_4 = arith.constant 0 : index
    %2 = vector.load %arg3[%c0_2, %c0_3, %c0_4] : memref<4x256x128xbf16, #tpu.memory_space<vmem>>, vector<1x256x128xbf16>
    %3 = vector.shape_cast %2 : vector<1x256x128xbf16> to vector<256x128xbf16>
    %cst = arith.constant dense<0.000000e+00> : vector<128x128xf32>
    %4 = tpu.matmul %1, %3, %cst {dimension_numbers = #tpu.dot_dimension_numbers<[1], [0], [0], [1], [0, 0, 1, 1], [], []>} : vector<128x256xbf16>, vector<256x128xbf16>, vector<128x128xf32> -> vector<128x128xf32>
    %c1 = arith.constant 1 : index
    %c0_5 = arith.constant 0 : index
    %c0_6 = arith.constant 0 : index
    %5 = vector.load %arg2[%c1, %c0_5, %c0_6] : memref<4x128x256xbf16, #tpu.memory_space<vmem>>, vector<1x128x256xbf16>
    %6 = vector.shape_cast %5 : vector<1x128x256xbf16> to vector<128x256xbf16>
    %c1_7 = arith.constant 1 : index
    %c0_8 = arith.constant 0 : index
    %c0_9 = arith.constant 0 : index
    %7 = vector.load %arg3[%c1_7, %c0_8, %c0_9] : memref<4x256x128xbf16, #tpu.memory_space<vmem>>, vector<1x256x128xbf16>
    %8 = vector.shape_cast %7 : vector<1x256x128xbf16> to vector<256x128xbf16>
    %cst_10 = arith.constant dense<0.000000e+00> : vector<128x128xf32>
    %9 = tpu.matmul %6, %8, %cst_10 {dimension_numbers = #tpu.dot_dimension_numbers<[1], [0], [0], [1], [0, 0, 1, 1], [], []>} : vector<128x256xbf16>, vector<256x128xbf16>, vector<128x128xf32> -> vector<128x128xf32>
    %c2 = arith.constant 2 : index
    %c0_11 = arith.constant 0 : index
    %c0_12 = arith.constant 0 : index
    %10 = vector.load %arg2[%c2, %c0_11, %c0_12] : memref<4x128x256xbf16, #tpu.memory_space<vmem>>, vector<1x128x256xbf16>
    %11 = vector.shape_cast %10 : vector<1x128x256xbf16> to vector<128x256xbf16>
    %c2_13 = arith.constant 2 : index
    %c0_14 = arith.constant 0 : index
    %c0_15 = arith.constant 0 : index
    %12 = vector.load %arg3[%c2_13, %c0_14, %c0_15] : memref<4x256x128xbf16, #tpu.memory_space<vmem>>, vector<1x256x128xbf16>
    %13 = vector.shape_cast %12 : vector<1x256x128xbf16> to vector<256x128xbf16>
    %cst_16 = arith.constant dense<0.000000e+00> : vector<128x128xf32>
    %14 = tpu.matmul %11, %13, %cst_16 {dimension_numbers = #tpu.dot_dimension_numbers<[1], [0], [0], [1], [0, 0, 1, 1], [], []>} : vector<128x256xbf16>, vector<256x128xbf16>, vector<128x128xf32> -> vector<128x128xf32>
    %c3 = arith.constant 3 : index
    %c0_17 = arith.constant 0 : index
    %c0_18 = arith.constant 0 : index
    %15 = vector.load %arg2[%c3, %c0_17, %c0_18] : memref<4x128x256xbf16, #tpu.memory_space<vmem>>, vector<1x128x256xbf16>
    %16 = vector.shape_cast %15 : vector<1x128x256xbf16> to vector<128x256xbf16>
    %c3_19 = arith.constant 3 : index
    %c0_20 = arith.constant 0 : index
    %c0_21 = arith.constant 0 : index
    %17 = vector.load %arg3[%c3_19, %c0_20, %c0_21] : memref<4x256x128xbf16, #tpu.memory_space<vmem>>, vector<1x256x128xbf16>
    %18 = vector.shape_cast %17 : vector<1x256x128xbf16> to vector<256x128xbf16>
    %cst_22 = arith.constant dense<0.000000e+00> : vector<128x128xf32>
    %19 = tpu.matmul %16, %18, %cst_22 {dimension_numbers = #tpu.dot_dimension_numbers<[1], [0], [0], [1], [0, 0, 1, 1], [], []>} : vector<128x256xbf16>, vector<256x128xbf16>, vector<128x128xf32> -> vector<128x128xf32>
    %20 = vector.shape_cast %4 : vector<128x128xf32> to vector<1x128x128xf32>
    %21 = vector.shape_cast %9 : vector<128x128xf32> to vector<1x128x128xf32>
    %22 = vector.shape_cast %14 : vector<128x128xf32> to vector<1x128x128xf32>
    %23 = vector.shape_cast %19 : vector<128x128xf32> to vector<1x128x128xf32>
    %24 = tpu.concatenate %20, %21, %22, %23 in 0 : vector<1x128x128xf32>, vector<1x128x128xf32>, vector<1x128x128xf32>, vector<1x128x128xf32> -> vector<4x128x128xf32>
    %c0_23 = arith.constant 0 : index
    %c0_24 = arith.constant 0 : index
    %c0_25 = arith.constant 0 : index
    %25 = vector.load %arg4[%c0_23, %c0_24, %c0_25] : memref<1x1x128xf32, #tpu.memory_space<vmem>>, vector<1x1x128xf32>
    %26 = vector.broadcast %25 : vector<1x1x128xf32> to vector<4x128x128xf32>
    %27 = arith.addf %24, %26 : vector<4x128x128xf32>
    %28 = arith.negf %27 : vector<4x128x128xf32>
    %29 = math.exp %28 : vector<4x128x128xf32>
    %cst_26 = arith.constant 1.000000e+00 : f32
    %30 = vector.broadcast %cst_26 : f32 to vector<4x128x128xf32>
    %31 = arith.addf %30, %29 : vector<4x128x128xf32>
    %32 = arith.divf %30, %31 : vector<4x128x128xf32>
    %c0_27 = arith.constant 0 : index
    %c0_28 = arith.constant 0 : index
    %c0_29 = arith.constant 0 : index
    %33 = vector.load %arg5[%c0_27, %c0_28, %c0_29] : memref<4x128x128xf32, #tpu.memory_space<vmem>>, vector<4x128x128xf32>
    tpu.vector_store %arg5[%c0_27, %c0_28, %c0_29], %32 {strides = array<i32>} : memref<4x128x128xf32, #tpu.memory_space<vmem>>, vector<4x128x128xf32>,
    return
  }
  func.func @transform_0(%arg0: i32, %arg1: i32) -> (i32, i32, i32) {
    %c0_i32 = arith.constant 0 : i32
    %c0_i32_0 = arith.constant 0 : i32
    %c0_i32_1 = arith.constant 0 : i32
    return %c0_i32, %arg0, %c0_i32_0 : i32, i32, i32
  }
  func.func @transform_1(%arg0: i32, %arg1: i32) -> (i32, i32, i32) {
    %c0_i32 = arith.constant 0 : i32
    %c0_i32_0 = arith.constant 0 : i32
    %c0_i32_1 = arith.constant 0 : i32
    return %c0_i32, %c0_i32_0, %arg1 : i32, i32, i32
  }
  func.func @transform_2(%arg0: i32, %arg1: i32) -> (i32, i32, i32) {
    %c0_i32 = arith.constant 0 : i32
    %c0_i32_0 = arith.constant 0 : i32
    %c0_i32_1 = arith.constant 0 : i32
    return %c0_i32, %c0_i32_0, %arg1 : i32, i32, i32
  }
  func.func @transform_3(%arg0: i32, %arg1: i32) -> (i32, i32, i32) {
    %c0_i32 = arith.constant 0 : i32
    %c0_i32_0 = arith.constant 0 : i32
    return %c0_i32, %arg0, %arg1 : i32, i32, i32
  }
}

</mosaic_0001>

<bundles_post_ra>
// kernel: diffmorpher_forward.8
= control target key start
LH: loop header
LB: loop body
LE: loop exit
PB: predicated region body
PF: predicated region fallthrough
CT: control target
= control target key end

     0   :  { %s805_s12 = smov 0   ;;  %s807_s13 = smov 0   ;;  %s885_s0 = inlined_call_operand.vmem [shape: bf16[1,256,128], index: 0, kind: input, shape index: {}]   ;;  %s886_s1 = inlined_call_operand.vmem [shape: bf16[1,128,128], index: 1, kind: input, shape index: {}]   ;;  %s887_s2 = inlined_call_operand.vmem [shape: f32[1,1,128], index: 2, kind: input, shape index: {}]   ;;  %s888_s3 = inlined_call_operand.vmem [shape: bf16[1,256,128], index: 3, kind: output, shape index: {}]  }
   0x1   :  { %s809_s14 = smov 0  }
   0x2 LB: > { %s25_s15 = sadd.s32 1, %s779_s13  ;;  %p578_p0 = scmp.ge.s32.totalorder %s783_s14, 1  ;;  %s783_s14 = sphi %s809_s14, %s13_s14   ;;  %s779_s13 = sphi %s807_s13, %s890_s13   ;;  %s775_s12 = sphi %s805_s12, %s889_s12  }
   0x3   : > { %p27_p1 = scmp.ge.s32.totalorder %s25_s15, 2  ;;  %p169_p2 = scmp.lt.s32.totalorder %s783_s14, 3 }
   0x5   : > { %s892_s15 = smov (%p27_p1, %s25_s15), 0  ;;  %p170_p3 = pnand %p578_p0, %p169_p2 }
   0x6   : > { %s579_s24 = sshll.u32 (!%p170_p3), %s775_s12, 4 }
   0x7   : > { %173 = sbr.rel (%p170_p3) target bundleno = 209 (0xd1), region = 32  ;;  %p204_p4 = scmp.lt.s32.totalorder (!%p170_p3), %s579_s24, 31 }
   0xc   : > { %v664_v0 = vld [vmem:[%s886_s1 + $0x38] sm:$0xff]  ;;  %v663_v1 = vld [vmem:[%s886_s1 + $0x30] sm:$0xff]  ;;  %v662_v2 = vld [vmem:[%s886_s1 + $0x28] sm:$0xff]  ;;  %s894_s24 = smov (!%p204_p4, %s579_s24), 31 }
   0xd   : > { %353 = vmatpush.bf16.msra.mxu0 %v664_v0  ;;  %712 = vmatpush.bf16.msra.mxu1 %v664_v0  ;;  %v661_v3 = vld [vmem:[%s886_s1 + $0x20] sm:$0xff]  ;;  %v660_v4 = vld [vmem:[%s886_s1 + $0x18] sm:$0xff]  ;;  %v659_v5 = vld [vmem:[%s886_s1 + $0x10] sm:$0xff]  ;;  %s580_s4 = sshll.u32 %s894_s24, 2 }
   0xe   : > { %713 = vmatpush.bf16.msra.mxu2 %v664_v0  ;;  %714 = vmatpush.bf16.msra.mxu3 %v664_v0  ;;  %v658_v6 = vld [vmem:[%s886_s1 + $0x8] sm:$0xff]  ;;  %v657_v7 = vld [vmem:[%s886_s1] sm:$0xff]  ;;  %s207_s9 = scalar_lea.vmem %s885_s0, %s580_s4  ;;  %s866_s17 = scalar_lea.vmem %s888_s3, %s580_s4 }
   0xf   : > { %v649_v8 = vld [vmem:[%s207_s9] sm:$0xff]  ;;  %v651_v9 = vld [vmem:[%s207_s9 + $0x10] sm:$0xff]  ;;  %v650_v12 = vld [vmem:[%s207_s9 + $0x8] sm:$0xff] }
  0x10   : > { %v653_v10 = vld [vmem:[%s207_s9 + $0x20] sm:$0xff]  ;;  %v655_v11 = vld [vmem:[%s207_s9 + $0x30] sm:$0xff]  ;;  %v652_v13 = vld [vmem:[%s207_s9 + $0x18] sm:$0xff] }
  0x11   : > { %354 = vmatpush.bf16.msra.mxu0 %v663_v1  ;;  %715 = vmatpush.bf16.msra.mxu1 %v663_v1  ;;  %v654_v14 = vld [vmem:[%s207_s9 + $0x28] sm:$0xff]  ;;  %v656_v15 = vld [vmem:[%s207_s9 + $0x38] sm:$0xff]  ;;  %v760_v18 = vld [vmem:[%s887_s2] ss:$0 sm:$0xff] }
  0x12   : > { %716 = vmatpush.bf16.msra.mxu2 %v663_v1  ;;  %717 = vmatpush.bf16.msra.mxu3 %v663_v1 }
  0x15   : > { %355 = vmatpush.bf16.msra.mxu0 %v662_v2  ;;  %718 = vmatpush.bf16.msra.mxu1 %v662_v2 }
  0x16   : > { %719 = vmatpush.bf16.msra.mxu2 %v662_v2  ;;  %720 = vmatpush.bf16.msra.mxu3 %v662_v2 }
  0x19   : > { %356 = vmatpush.bf16.msra.mxu0 %v661_v3  ;;  %721 = vmatpush.bf16.msra.mxu1 %v661_v3 }
  0x1a   : > { %722 = vmatpush.bf16.msra.mxu2 %v661_v3  ;;  %723 = vmatpush.bf16.msra.mxu3 %v661_v3 }
  0x1d   : > { %357 = vmatpush.bf16.msra.mxu0 %v660_v4  ;;  %724 = vmatpush.bf16.msra.mxu1 %v660_v4 }
  0x1e   : > { %725 = vmatpush.bf16.msra.mxu2 %v660_v4  ;;  %726 = vmatpush.bf16.msra.mxu3 %v660_v4 }
  0x21   : > { %358 = vmatpush.bf16.msra.mxu0 %v659_v5  ;;  %727 = vmatpush.bf16.msra.mxu1 %v659_v5 }
  0x22   : > { %728 = vmatpush.bf16.msra.mxu2 %v659_v5  ;;  %729 = vmatpush.bf16.msra.mxu3 %v659_v5 }
  0x25   : > { %359 = vmatpush.bf16.msra.mxu0 %v658_v6  ;;  %730 = vmatpush.bf16.msra.mxu1 %v658_v6 }
  0x26   : > { %731 = vmatpush.bf16.msra.mxu2 %v658_v6  ;;  %732 = vmatpush.bf16.msra.mxu3 %v658_v6 }
  0x29   : > { %360 = vmatpush.bf16.msra.mxu0 %v657_v7  ;;  %733 = vmatpush.bf16.msra.mxu1 %v657_v7 }
  0x2a   : > { %734 = vmatpush.bf16.msra.mxu2 %v657_v7  ;;  %735 = vmatpush.bf16.msra.mxu3 %v657_v7 }
  0x2c   : > { %361 = vmatmul.bf16.vlgmr.msra.gmra.mxu0 %v649_v8  ;;  %371 = vmatmul.bf16.vlgmr.msra.gmra.mxu1 %v651_v9 }
  0x2d   : > { %381 = vmatmul.bf16.vlgmr.msra.gmra.mxu2 %v653_v10  ;;  %391 = vmatmul.bf16.vlgmr.msra.gmra.mxu3 %v655_v11 }
  0x3c   : > { %366 = vmatmul.bf16.gmra.mxu0 %v650_v12  ;;  %376 = vmatmul.bf16.gmra.mxu1 %v652_v13 }
  0x3d   : > { %386 = vmatmul.bf16.gmra.mxu2 %v654_v14  ;;  %396 = vmatmul.bf16.gmra.mxu3 %v656_v15 }
  0xa9   : > { %v362_v16 = vpop.f32.mrf.mxu0  ;;  %v372_v17 = vpop.f32.mrf.mxu1 }
  0xaa   : > { %v406_v19 = vadd.f32 %v760_v18, %v362_v16  ;;  %v410_v20 = vadd.f32 %v760_v18, %v372_v17 }
  0xac   : > { %v422_v27 = vmax.f32 %v406_v19, 0.0  ;;  %v426_v28 = vmax.f32 %v410_v20, 0.0 }
  0xb0   : > { %v382_v21 = vpop.f32.mrf.mxu2  ;;  %v392_v22 = vpop.f32.mrf.mxu3 }
  0xb1   : > { %v364_v23 = vpop.f32.mrf.mxu0  ;;  %v374_v24 = vpop.f32.mrf.mxu1  ;;  %v414_v33 = vadd.f32 %v760_v18, %v382_v21  ;;  %v418_v34 = vadd.f32 %v760_v18, %v392_v22 }
  0xb2   : > { %v407_v25 = vadd.f32 %v760_v18, %v364_v23  ;;  %v411_v26 = vadd.f32 %v760_v18, %v374_v24 }
  0xb3   : > { %v430_v41 = vmax.f32 %v414_v33, 0.0  ;;  %v434_v42 = vmax.f32 %v418_v34, 0.0 }
  0xb4   : > { %v423_v29 = vmax.f32 %v407_v25, 0.0  ;;  %v427_v30 = vmax.f32 %v411_v26, 0.0 }
  0xb6   : > { %v668_v31 = vpack.c.bf16 %v423_v29, %v422_v27  ;;  %v678_v32 = vpack.c.bf16 %v427_v30, %v426_v28 }
  0xb8   : > { %669 = vst [vmem:[%s866_s17] sm:$0xff] %v668_v31   ;;  %v384_v35 = vpop.f32.mrf.mxu2  ;;  %v394_v36 = vpop.f32.mrf.mxu3 }
  0xb9   : > { %706 = vst [vmem:[%s866_s17 + $0x10] sm:$0xff] %v678_v32   ;;  %v415_v37 = vadd.f32 %v760_v18, %v384_v35  ;;  %v419_v38 = vadd.f32 %v760_v18, %v394_v36  ;;  %v367_v39 = vpop.f32.mrf.mxu0  ;;  %v377_v40 = vpop.f32.mrf.mxu1 }
  0xba   : > { %v408_v47 = vadd.f32 %v760_v18, %v367_v39  ;;  %v412_v48 = vadd.f32 %v760_v18, %v377_v40 }
  0xbb   : > { %v431_v43 = vmax.f32 %v415_v37, 0.0  ;;  %v435_v44 = vmax.f32 %v419_v38, 0.0 }
  0xbc   : > { %v424_v55 = vmax.f32 %v408_v47, 0.0  ;;  %v428_v56 = vmax.f32 %v412_v48, 0.0 }
  0xbd   : > { %v688_v45 = vpack.c.bf16 %v431_v43, %v430_v41  ;;  %v698_v46 = vpack.c.bf16 %v435_v44, %v434_v42 }
  0xbf   : > { %708 = vst [vmem:[%s866_s17 + $0x20] sm:$0xff] %v688_v45  }
  0xc0   : > { %710 = vst [vmem:[%s866_s17 + $0x30] sm:$0xff] %v698_v46   ;;  %v387_v49 = vpop.f32.mrf.mxu2  ;;  %v397_v50 = vpop.f32.mrf.mxu3 }
  0xc1   : > { %v369_v51 = vpop.f32.mrf.mxu0  ;;  %v379_v52 = vpop.f32.mrf.mxu1  ;;  %v416_v61 = vadd.f32 %v760_v18, %v387_v49  ;;  %v420_v62 = vadd.f32 %v760_v18, %v397_v50 }
  0xc2   : > { %v409_v53 = vadd.f32 %v760_v18, %v369_v51  ;;  %v413_v54 = vadd.f32 %v760_v18, %v379_v52 }
  0xc3   : > { %v432_v3 = vmax.f32 %v416_v61, 0.0  ;;  %v436_v4 = vmax.f32 %v420_v62, 0.0 }
  0xc4   : > { %v425_v57 = vmax.f32 %v409_v53, 0.0  ;;  %v429_v58 = vmax.f32 %v413_v54, 0.0 }
  0xc6   : > { %v673_v59 = vpack.c.bf16 %v425_v57, %v424_v55  ;;  %v683_v60 = vpack.c.bf16 %v429_v58, %v428_v56 }
  0xc8   : > { %705 = vst [vmem:[%s866_s17 + $0x8] sm:$0xff] %v673_v59   ;;  %v389_v63 = vpop.f32.mrf.mxu2  ;;  %v399_v0 = vpop.f32.mrf.mxu3 }
  0xc9   : > { %707 = vst [vmem:[%s866_s17 + $0x18] sm:$0xff] %v683_v60   ;;  %v417_v1 = vadd.f32 %v760_v18, %v389_v63  ;;  %v421_v2 = vadd.f32 %v760_v18, %v399_v0 }
  0xcb   : > { %v433_v5 = vmax.f32 %v417_v1, 0.0  ;;  %v437_v6 = vmax.f32 %v421_v2, 0.0 }
  0xcd   : > { %v693_v7 = vpack.c.bf16 %v433_v5, %v432_v3  ;;  %v703_v8 = vpack.c.bf16 %v437_v6, %v436_v4 }
  0xcf   : > { %709 = vst [vmem:[%s866_s17 + $0x28] sm:$0xff] %v693_v7  }
  0xd0   : > { %711 = vst [vmem:[%s866_s17 + $0x38] sm:$0xff] %v703_v8  }
  0xd1 PF: > { %s13_s14 = sadd.s32 1, %s783_s14   ;;  %s889_s12 = smov %s779_s13 }
  0xd2   : > { %p10_p5 = scmp.ge.s32.totalorder %s13_s14, 4   ;;  %s890_s13 = smov %s892_s15 }
  0xd4   :  { %12 = sbr.rel (!%p10_p5) target bundleno = 2 (0x2), region = 68 }

// kernel: diffmorpher_forward.9
= control target key start
LH: loop header
LB: loop body
LE: loop exit
PB: predicated region body
PF: predicated region fallthrough
CT: control target
= control target key end

     0   :  { %s2120_s1 = inlined_call_operand.vmem [shape: bf16[1,1024,128], index: 1, kind: input, shape index: {}]   ;;  %s2121_s0 = inlined_call_operand.vmem [shape: bf16[1,64,1024], index: 0, kind: input, shape index: {}]   ;;  %s2122_s2 = inlined_call_operand.vmem [shape: f32[1,1,128], index: 2, kind: input, shape index: {}]   ;;  %s2123_s3 = inlined_call_operand.vmem [shape: f32[1,1,128], index: 3, kind: input, shape index: {}]   ;;  %s2124_s4 = inlined_call_operand.vmem [shape: bf16[1,64,128], index: 4, kind: output, shape index: {}]  }
   0x1   :  { %v1521_v0 = vld [vmem:[%s2120_s1 + $0x38] sm:$0xff]  ;;  %v1520_v4 = vld [vmem:[%s2120_s1 + $0x30] sm:$0xff]  ;;  %v1519_v8 = vld [vmem:[%s2120_s1 + $0x28] sm:$0xff] }
   0x2   :  { %v1529_v1 = vld [vmem:[%s2120_s1 + $0x78] sm:$0xff]  ;;  %721 = vmatpush.bf16.msra.mxu0 %v1521_v0  ;;  %v1528_v5 = vld [vmem:[%s2120_s1 + $0x70] sm:$0xff]  ;;  %v1527_v9 = vld [vmem:[%s2120_s1 + $0x68] sm:$0xff] }
   0x3   :  { %v1537_v2 = vld [vmem:[%s2120_s1 + $0xb8] sm:$0xff]  ;;  %750 = vmatpush.bf16.msra.mxu1 %v1529_v1  ;;  %v1536_v6 = vld [vmem:[%s2120_s1 + $0xb0] sm:$0xff]  ;;  %v1535_v10 = vld [vmem:[%s2120_s1 + $0xa8] sm:$0xff] }
   0x4   :  { %v1545_v3 = vld [vmem:[%s2120_s1 + $0xf8] sm:$0xff]  ;;  %779 = vmatpush.bf16.msra.mxu2 %v1537_v2  ;;  %v1544_v7 = vld [vmem:[%s2120_s1 + $0xf0] sm:$0xff]  ;;  %v1543_v11 = vld [vmem:[%s2120_s1 + $0xe8] sm:$0xff] }
   0x5   :  { %808 = vmatpush.bf16.msra.mxu3 %v1545_v3  ;;  %v1518_v12 = vld [vmem:[%s2120_s1 + $0x20] sm:$0xff]  ;;  %v1517_v16 = vld [vmem:[%s2120_s1 + $0x18] sm:$0xff]  ;;  %v1516_v20 = vld [vmem:[%s2120_s1 + $0x10] sm:$0xff] }
   0x6   :  { %722 = vmatpush.bf16.msra.mxu0 %v1520_v4  ;;  %v1526_v13 = vld [vmem:[%s2120_s1 + $0x60] sm:$0xff]  ;;  %v1525_v17 = vld [vmem:[%s2120_s1 + $0x58] sm:$0xff]  ;;  %v1524_v21 = vld [vmem:[%s2120_s1 + $0x50] sm:$0xff] }
   0x7   :  { %751 = vmatpush.bf16.msra.mxu1 %v1528_v5  ;;  %v1534_v14 = vld [vmem:[%s2120_s1 + $0xa0] sm:$0xff]  ;;  %v1533_v18 = vld [vmem:[%s2120_s1 + $0x98] sm:$0xff]  ;;  %v1532_v22 = vld [vmem:[%s2120_s1 + $0x90] sm:$0xff] }
   0x8   :  { %780 = vmatpush.bf16.msra.mxu2 %v1536_v6  ;;  %v1542_v15 = vld [vmem:[%s2120_s1 + $0xe0] sm:$0xff]  ;;  %v1541_v19 = vld [vmem:[%s2120_s1 + $0xd8] sm:$0xff]  ;;  %v1540_v23 = vld [vmem:[%s2120_s1 + $0xd0] sm:$0xff] }
   0x9   :  { %809 = vmatpush.bf16.msra.mxu3 %v1544_v7  ;;  %v1515_v24 = vld [vmem:[%s2120_s1 + $0x8] sm:$0xff]  ;;  %v1514_v28 = vld [vmem:[%s2120_s1] sm:$0xff]  ;;  %v1569_v40 = vld [vmem:[%s2120_s1 + $0x1b8] sm:$0xff] }
   0xa   :  { %723 = vmatpush.bf16.msra.mxu0 %v1519_v8  ;;  %v1523_v25 = vld [vmem:[%s2120_s1 + $0x48] sm:$0xff]  ;;  %v1522_v29 = vld [vmem:[%s2120_s1 + $0x40] sm:$0xff]  ;;  %v1553_v41 = vld [vmem:[%s2120_s1 + $0x138] sm:$0xff] }
   0xb   :  { %752 = vmatpush.bf16.msra.mxu1 %v1527_v9  ;;  %v1531_v26 = vld [vmem:[%s2120_s1 + $0x88] sm:$0xff]  ;;  %v1530_v30 = vld [vmem:[%s2120_s1 + $0x80] sm:$0xff]  ;;  %v1577_v46 = vld [vmem:[%s2120_s1 + $0x1f8] sm:$0xff] }
   0xc   :  { %781 = vmatpush.bf16.msra.mxu2 %v1535_v10  ;;  %v1539_v27 = vld [vmem:[%s2120_s1 + $0xc8] sm:$0xff]  ;;  %v1538_v31 = vld [vmem:[%s2120_s1 + $0xc0] sm:$0xff]  ;;  %v1561_v47 = vld [vmem:[%s2120_s1 + $0x178] sm:$0xff] }
   0xd   :  { %810 = vmatpush.bf16.msra.mxu3 %v1543_v11  ;;  %v1100_v32 = vld [vmem:[%s2121_s0] sm:$0xf]  ;;  %v1482_v34 = vld [vmem:[%s2121_s0 + $0x4] sm:$0xf]  ;;  %v1108_v36 = vld [vmem:[%s2121_s0 + $0x8] sm:$0xf] }
   0xe   :  { %724 = vmatpush.bf16.msra.mxu0 %v1518_v12  ;;  %v1486_v33 = vld [vmem:[%s2121_s0 + $0x1c] sm:$0xf0]  ;;  %v1102_v35 = vld [vmem:[%s2121_s0 + $0x20] sm:$0xf0]  ;;  %v1487_v37 = vld [vmem:[%s2121_s0 + $0x24] sm:$0xf0] }
   0xf   :  { %753 = vmatpush.bf16.msra.mxu1 %v1526_v13  ;;  %v1483_v38 = vld [vmem:[%s2121_s0 + $0xc] sm:$0xf]  ;;  %v1101_v42 = vor.u32 %v1486_v33, %v1100_v32  ;;  %v1105_v43 = vor.u32 %v1482_v34, %v1102_v35  ;;  %v1109_v44 = vor.u32 %v1487_v37, %v1108_v36  ;;  %v1568_v48 = vld [vmem:[%s2120_s1 + $0x1b0] sm:$0xff]  ;;  %v1132_v56 = vld [vmem:[%s2121_s0 + $0x40] sm:$0xf] }
  0x10   :  { %782 = vmatpush.bf16.msra.mxu2 %v1534_v14  ;;  %v1110_v39 = vld [vmem:[%s2121_s0 + $0x28] sm:$0xf0]  ;;  %v1552_v49 = vld [vmem:[%s2120_s1 + $0x130] sm:$0xff]  ;;  %v1566_v57 = vld [vmem:[%s2120_s1 + $0x1a0] sm:$0xff] }
  0x11   :  { %811 = vmatpush.bf16.msra.mxu3 %v1542_v15  ;;  %v1113_v45 = vor.u32 %v1483_v38, %v1110_v39  ;;  %v1576_v50 = vld [vmem:[%s2120_s1 + $0x1f0] sm:$0xff]  ;;  %v1567_v52 = vld [vmem:[%s2120_s1 + $0x1a8] sm:$0xff]  ;;  %v1550_v58 = vld [vmem:[%s2120_s1 + $0x120] sm:$0xff] }
  0x12   :  { %725 = vmatpush.bf16.msra.mxu0 %v1517_v16  ;;  %v1560_v51 = vld [vmem:[%s2120_s1 + $0x170] sm:$0xff]  ;;  %v1551_v53 = vld [vmem:[%s2120_s1 + $0x128] sm:$0xff]  ;;  %v1494_v59 = vld [vmem:[%s2121_s0 + $0x5c] sm:$0xf0] }
  0x13   :  { %754 = vmatpush.bf16.msra.mxu1 %v1525_v17  ;;  %v1575_v54 = vld [vmem:[%s2120_s1 + $0x1e8] sm:$0xff]  ;;  %v1490_v60 = vld [vmem:[%s2121_s0 + $0x44] sm:$0xf]  ;;  %v1565_v4 = vld [vmem:[%s2120_s1 + $0x198] sm:$0xff]  ;;  %v1133_v6 = vor.u32 %v1494_v59, %v1132_v56 }
  0x14   :  { %783 = vmatpush.bf16.msra.mxu2 %v1533_v18  ;;  %v1559_v55 = vld [vmem:[%s2120_s1 + $0x168] sm:$0xff]  ;;  %v1134_v61 = vld [vmem:[%s2121_s0 + $0x60] sm:$0xf0]  ;;  %v1549_v5 = vld [vmem:[%s2120_s1 + $0x118] sm:$0xff] }
  0x15   :  { %812 = vmatpush.bf16.msra.mxu3 %v1541_v19  ;;  %v1140_v62 = vld [vmem:[%s2121_s0 + $0x48] sm:$0xf]  ;;  %v1491_v0 = vld [vmem:[%s2121_s0 + $0x4c] sm:$0xf]  ;;  %v1574_v2 = vld [vmem:[%s2120_s1 + $0x1e0] sm:$0xff]  ;;  %v1137_v7 = vor.u32 %v1490_v60, %v1134_v61 }
  0x16   :  { %726 = vmatpush.bf16.msra.mxu0 %v1516_v20  ;;  %v1495_v63 = vld [vmem:[%s2121_s0 + $0x64] sm:$0xf0]  ;;  %v1142_v1 = vld [vmem:[%s2121_s0 + $0x68] sm:$0xf0]  ;;  %v1558_v3 = vld [vmem:[%s2120_s1 + $0x160] sm:$0xff] }
  0x17   :  { %755 = vmatpush.bf16.msra.mxu1 %v1524_v21  ;;  %v1141_v8 = vor.u32 %v1495_v63, %v1140_v62  ;;  %v1145_v9 = vor.u32 %v1491_v0, %v1142_v1  ;;  %v1573_v10 = vld [vmem:[%s2120_s1 + $0x1d8] sm:$0xff]  ;;  %v1564_v12 = vld [vmem:[%s2120_s1 + $0x190] sm:$0xff]  ;;  %v1563_v16 = vld [vmem:[%s2120_s1 + $0x188] sm:$0xff] }
  0x18   :  { %784 = vmatpush.bf16.msra.mxu2 %v1532_v22  ;;  %v1557_v11 = vld [vmem:[%s2120_s1 + $0x158] sm:$0xff]  ;;  %v1548_v13 = vld [vmem:[%s2120_s1 + $0x110] sm:$0xff]  ;;  %v1547_v17 = vld [vmem:[%s2120_s1 + $0x108] sm:$0xff] }
  0x19   :  { %813 = vmatpush.bf16.msra.mxu3 %v1540_v23  ;;  %v1572_v14 = vld [vmem:[%s2120_s1 + $0x1d0] sm:$0xff]  ;;  %v1571_v18 = vld [vmem:[%s2120_s1 + $0x1c8] sm:$0xff]  ;;  %v1164_v20 = vld [vmem:[%s2121_s0 + $0x80] sm:$0xf] }
  0x1a   :  { %727 = vmatpush.bf16.msra.mxu0 %v1515_v24  ;;  %v1556_v15 = vld [vmem:[%s2120_s1 + $0x150] sm:$0xff]  ;;  %v1555_v19 = vld [vmem:[%s2120_s1 + $0x148] sm:$0xff]  ;;  %v1562_v21 = vld [vmem:[%s2120_s1 + $0x180] sm:$0xff] }
  0x1b   :  { %756 = vmatpush.bf16.msra.mxu1 %v1523_v25  ;;  %v1546_v22 = vld [vmem:[%s2120_s1 + $0x100] sm:$0xff]  ;;  %v1148_v60 = vld [vmem:[%s2121_s0 + $0x50] sm:$0xf]  ;;  %v1492_v62 = vld [vmem:[%s2121_s0 + $0x54] sm:$0xf] }
  0x1c   :  { %785 = vmatpush.bf16.msra.mxu2 %v1531_v26  ;;  %v1502_v23 = vld [vmem:[%s2121_s0 + $0x9c] sm:$0xf0]  ;;  %v1498_v24 = vld [vmem:[%s2121_s0 + $0x84] sm:$0xf]  ;;  %v1172_v26 = vld [vmem:[%s2121_s0 + $0x88] sm:$0xf] }
  0x1d   :  { %814 = vmatpush.bf16.msra.mxu3 %v1539_v27  ;;  %v1166_v25 = vld [vmem:[%s2121_s0 + $0xa0] sm:$0xf0]  ;;  %v1503_v27 = vld [vmem:[%s2121_s0 + $0xa4] sm:$0xf0]  ;;  %v1165_v32 = vor.u32 %v1502_v23, %v1164_v20  ;;  %v1196_v36 = vld [vmem:[%s2121_s0 + $0xc0] sm:$0xf] }
  0x1e   :  { %728 = vmatpush.bf16.msra.mxu0 %v1514_v28  ;;  %v1499_v28 = vld [vmem:[%s2121_s0 + $0x8c] sm:$0xf]  ;;  %v1169_v33 = vor.u32 %v1498_v24, %v1166_v25  ;;  %v1173_v34 = vor.u32 %v1503_v27, %v1172_v26  ;;  %v1510_v37 = vld [vmem:[%s2121_s0 + $0xdc] sm:$0xf0]  ;;  %v1506_v38 = vld [vmem:[%s2121_s0 + $0xc4] sm:$0xf] }
  0x1f   :  { %757 = vmatpush.bf16.msra.mxu1 %v1522_v29  ;;  %v1174_v29 = vld [vmem:[%s2121_s0 + $0xa8] sm:$0xf0]  ;;  %v1198_v39 = vld [vmem:[%s2121_s0 + $0xe0] sm:$0xf0]  ;;  %v1496_v61 = vld [vmem:[%s2121_s0 + $0x6c] sm:$0xf0] }
  0x20   :  { %786 = vmatpush.bf16.msra.mxu2 %v1530_v30  ;;  %v1570_v30 = vld [vmem:[%s2120_s1 + $0x1c0] sm:$0xff]  ;;  %v1177_v35 = vor.u32 %v1499_v28, %v1174_v29  ;;  %v1150_v63 = vld [vmem:[%s2121_s0 + $0x70] sm:$0xf0]  ;;  %v1156_v0 = vld [vmem:[%s2121_s0 + $0x58] sm:$0xf] }
  0x21   :  { %815 = vmatpush.bf16.msra.mxu3 %v1538_v31  ;;  %729 = vmatmul.bf16.vlgmr.msra.gmra.mxu0 %v1101_v42  ;;  %v1554_v31 = vld [vmem:[%s2120_s1 + $0x140] sm:$0xff]  ;;  %v1507_v42 = vld [vmem:[%s2121_s0 + $0xcc] sm:$0xf]  ;;  %v1497_v1 = vld [vmem:[%s2121_s0 + $0x74] sm:$0xf0] }
  0x22   :  { %837 = vmatpush.bf16.msrb.mxu0 %v1553_v41  ;;  %758 = vmatmul.bf16.vlgmr.msra.gmra.mxu1 %v1105_v43  ;;  %v1511_v41 = vld [vmem:[%s2121_s0 + $0xe4] sm:$0xf0]  ;;  %v1206_v43 = vld [vmem:[%s2121_s0 + $0xe8] sm:$0xf0]  ;;  %v1212_v20 = vld [vmem:[%s2121_s0 + $0xd0] sm:$0xf] }
  0x23   :  { %787 = vmatmul.bf16.vlgmr.msra.gmra.mxu2 %v1109_v44  ;;  %866 = vmatpush.bf16.msrb.mxu1 %v1561_v47  ;;  %v1197_v44 = vor.u32 %v1510_v37, %v1196_v36  ;;  %v1209_v47 = vor.u32 %v1507_v42, %v1206_v43  ;;  %v1214_v23 = vld [vmem:[%s2121_s0 + $0xf0] sm:$0xf0]  ;;  %v1220_v24 = vld [vmem:[%s2121_s0 + $0xd8] sm:$0xf]  ;;  %v1509_v26 = vld [vmem:[%s2121_s0 + $0xdc] sm:$0xf] }
  0x24   :  { %895 = vmatpush.bf16.msrb.mxu2 %v1569_v40  ;;  %816 = vmatmul.bf16.vlgmr.msra.gmra.mxu3 %v1113_v45  ;;  %v1204_v40 = vld [vmem:[%s2121_s0 + $0xc8] sm:$0xf]  ;;  %v1201_v45 = vor.u32 %v1506_v38, %v1198_v39  ;;  %v1513_v25 = vld [vmem:[%s2121_s0 + $0xf4] sm:$0xf0]  ;;  %v1222_v27 = vld [vmem:[%s2121_s0 + $0xf8] sm:$0xf0] }
  0x25   :  { %924 = vmatpush.bf16.msrb.mxu3 %v1577_v46  ;;  %v1205_v46 = vor.u32 %v1511_v41, %v1204_v40 }
  0x26   :  { %838 = vmatpush.bf16.msrb.mxu0 %v1552_v49  ;;  %v1488_v49 = vld [vmem:[%s2121_s0 + $0x2c] sm:$0xf0] }
  0x27   :  { %867 = vmatpush.bf16.msrb.mxu1 %v1560_v51  ;;  %v1118_v51 = vld [vmem:[%s2121_s0 + $0x30] sm:$0xf0] }
  0x28   :  { %896 = vmatpush.bf16.msrb.mxu2 %v1568_v48  ;;  %v1116_v48 = vld [vmem:[%s2121_s0 + $0x10] sm:$0xf] }
  0x29   :  { %925 = vmatpush.bf16.msrb.mxu3 %v1576_v50  ;;  %v1484_v50 = vld [vmem:[%s2121_s0 + $0x14] sm:$0xf]  ;;  %v1117_v56 = vor.u32 %v1488_v49, %v1116_v48 }
  0x2a   :  { %839 = vmatpush.bf16.msrb.mxu0 %v1551_v53  ;;  %v1489_v53 = vld [vmem:[%s2121_s0 + $0x34] sm:$0xf0] }
  0x2b   :  { %868 = vmatpush.bf16.msrb.mxu1 %v1559_v55  ;;  %v1126_v55 = vld [vmem:[%s2121_s0 + $0x38] sm:$0xf0] }
  0x2c   :  { %897 = vmatpush.bf16.msrb.mxu2 %v1567_v52  ;;  %v1124_v52 = vld [vmem:[%s2121_s0 + $0x18] sm:$0xf] }
  0x2d   :  { %926 = vmatpush.bf16.msrb.mxu3 %v1575_v54  ;;  %v1485_v54 = vld [vmem:[%s2121_s0 + $0x1c] sm:$0xf] }
  0x2e   :  { %840 = vmatpush.bf16.msrb.mxu0 %v1550_v58  ;;  %v1125_v58 = vor.u32 %v1489_v53, %v1124_v52  ;;  %v1129_v59 = vor.u32 %v1485_v54, %v1126_v55 }
  0x2f   :  { %869 = vmatpush.bf16.msrb.mxu1 %v1558_v3  ;;  %v1158_v3 = vld [vmem:[%s2121_s0 + $0x78] sm:$0xf0] }
  0x30   :  { %898 = vmatpush.bf16.msrb.mxu2 %v1566_v57  ;;  %v1121_v57 = vor.u32 %v1484_v50, %v1118_v51 }
  0x31   :  { %927 = vmatpush.bf16.msrb.mxu3 %v1574_v2  ;;  %734 = vmatmul.bf16.gmra.mxu0 %v1133_v6  ;;  %v1493_v2 = vld [vmem:[%s2121_s0 + $0x5c] sm:$0xf]  ;;  %v1157_v6 = vor.u32 %v1497_v1, %v1156_v0 }
  0x32   :  { %841 = vmatpush.bf16.msrb.mxu0 %v1549_v5  ;;  %763 = vmatmul.bf16.gmra.mxu1 %v1137_v7  ;;  %v1153_v5 = vor.u32 %v1492_v62, %v1150_v63  ;;  %v1161_v7 = vor.u32 %v1493_v2, %v1158_v3 }
  0x33   :  { %792 = vmatmul.bf16.gmra.mxu2 %v1141_v8  ;;  %870 = vmatpush.bf16.msrb.mxu1 %v1557_v11  ;;  %v1180_v8 = vld [vmem:[%s2121_s0 + $0x90] sm:$0xf]  ;;  %v1182_v11 = vld [vmem:[%s2121_s0 + $0xb0] sm:$0xf0] }
  0x34   :  { %899 = vmatpush.bf16.msrb.mxu2 %v1565_v4  ;;  %821 = vmatmul.bf16.gmra.mxu3 %v1145_v9  ;;  %v1149_v4 = vor.u32 %v1496_v61, %v1148_v60  ;;  %v1504_v9 = vld [vmem:[%s2121_s0 + $0xac] sm:$0xf0] }
  0x35   :  { %928 = vmatpush.bf16.msrb.mxu3 %v1573_v10  ;;  %v1500_v10 = vld [vmem:[%s2121_s0 + $0x94] sm:$0xf] }
  0x36   :  { %842 = vmatpush.bf16.msrb.mxu0 %v1548_v13  ;;  %v1505_v13 = vld [vmem:[%s2121_s0 + $0xb4] sm:$0xf0] }
  0x37   :  { %871 = vmatpush.bf16.msrb.mxu1 %v1556_v15  ;;  %v1190_v15 = vld [vmem:[%s2121_s0 + $0xb8] sm:$0xf0] }
  0x38   :  { %900 = vmatpush.bf16.msrb.mxu2 %v1564_v12  ;;  %v1188_v12 = vld [vmem:[%s2121_s0 + $0x98] sm:$0xf] }
  0x39   :  { %929 = vmatpush.bf16.msrb.mxu3 %v1572_v14  ;;  %v1501_v14 = vld [vmem:[%s2121_s0 + $0x9c] sm:$0xf] }
  0x3a   :  { %843 = vmatpush.bf16.msrb.mxu0 %v1547_v17  ;;  %v1185_v17 = vor.u32 %v1500_v10, %v1182_v11 }
  0x3b   :  { %872 = vmatpush.bf16.msrb.mxu1 %v1555_v19  ;;  %v1193_v19 = vor.u32 %v1501_v14, %v1190_v15 }
  0x3c   :  { %901 = vmatpush.bf16.msrb.mxu2 %v1563_v16  ;;  %v1181_v16 = vor.u32 %v1504_v9, %v1180_v8 }
  0x3d   :  { %930 = vmatpush.bf16.msrb.mxu3 %v1571_v18  ;;  %v1189_v18 = vor.u32 %v1505_v13, %v1188_v12 }
  0x3e   :  { %844 = vmatpush.bf16.msrb.mxu0 %v1546_v22  ;;  %v1508_v22 = vld [vmem:[%s2121_s0 + $0xd4] sm:$0xf] }
  0x3f   :  { %873 = vmatpush.bf16.msrb.mxu1 %v1554_v31  ;;  %v1217_v29 = vor.u32 %v1508_v22, %v1214_v23  ;;  %v1225_v31 = vor.u32 %v1509_v26, %v1222_v27 }
  0x40   :  { %902 = vmatpush.bf16.msrb.mxu2 %v1562_v21  ;;  %v1512_v21 = vld [vmem:[%s2121_s0 + $0xec] sm:$0xf0] }
  0x41   :  { %931 = vmatpush.bf16.msrb.mxu3 %v1570_v30  ;;  %739 = vmatmul.bf16.gmra.mxu0 %v1165_v32  ;;  %v1213_v28 = vor.u32 %v1512_v21, %v1212_v20  ;;  %v1221_v30 = vor.u32 %v1513_v25, %v1220_v24 }
  0x42   :  { %768 = vmatmul.bf16.gmra.mxu1 %v1169_v33 }
  0x43   :  { %797 = vmatmul.bf16.gmra.mxu2 %v1173_v34 }
  0x44   :  { %826 = vmatmul.bf16.gmra.mxu3 %v1177_v35 }
  0x51   :  { %744 = vmatmul.bf16.gmra.mxu0 %v1197_v44 }
  0x52   :  { %773 = vmatmul.bf16.gmra.mxu1 %v1201_v45 }
  0x53   :  { %802 = vmatmul.bf16.gmra.mxu2 %v1205_v46 }
  0x54   :  { %831 = vmatmul.bf16.gmra.mxu3 %v1209_v47 }
  0x61   :  { %845 = vmatmul.bf16.vlgmr.msrb.gmra.mxu0 %v1117_v56 }
  0x62   :  { %874 = vmatmul.bf16.vlgmr.msrb.gmra.mxu1 %v1121_v57 }
  0x63   :  { %903 = vmatmul.bf16.vlgmr.msrb.gmra.mxu2 %v1125_v58 }
  0x64   :  { %932 = vmatmul.bf16.vlgmr.msrb.gmra.mxu3 %v1129_v59 }
  0x71   :  { %850 = vmatmul.bf16.gmra.mxu0 %v1149_v4 }
  0x72   :  { %879 = vmatmul.bf16.gmra.mxu1 %v1153_v5 }
  0x73   :  { %908 = vmatmul.bf16.gmra.mxu2 %v1157_v6 }
  0x74   :  { %937 = vmatmul.bf16.gmra.mxu3 %v1161_v7 }
  0x81   :  { %855 = vmatmul.bf16.gmra.mxu0 %v1181_v16 }
  0x82   :  { %884 = vmatmul.bf16.gmra.mxu1 %v1185_v17 }
  0x83   :  { %913 = vmatmul.bf16.gmra.mxu2 %v1189_v18 }
  0x84   :  { %942 = vmatmul.bf16.gmra.mxu3 %v1193_v19 }
  0x91   :  { %860 = vmatmul.bf16.gmra.mxu0 %v1213_v28 }
  0x92   :  { %889 = vmatmul.bf16.gmra.mxu1 %v1217_v29 }
  0x93   :  { %918 = vmatmul.bf16.gmra.mxu2 %v1221_v30 }
  0x94   :  { %947 = vmatmul.bf16.gmra.mxu3 %v1225_v31 }
  0x9e   :  { %v730_v32 = vpop.f32.mrf.mxu0 }
  0x9f   :  { %v759_v33 = vpop.f32.mrf.mxu1 }
  0xa0   :  { %v760_v34 = vadd.f32 %v759_v33, %v730_v32 }
  0xa6   :  { %v788_v35 = vpop.f32.mrf.mxu2  ;;  %v732_v38 = vpop.f32.mrf.mxu0 }
  0xa7   :  { %v817_v36 = vpop.f32.mrf.mxu3  ;;  %v789_v37 = vadd.f32 %v788_v35, %v760_v34  ;;  %v761_v39 = vpop.f32.mrf.mxu1 }
  0xa8   :  { %v762_v40 = vadd.f32 %v761_v39, %v732_v38 }
  0xa9   :  { %v818_v41 = vadd.f32 %v817_v36, %v789_v37 }
  0xae   :  { %v790_v42 = vpop.f32.mrf.mxu2  ;;  %v735_v45 = vpop.f32.mrf.mxu0 }
  0xaf   :  { %v819_v43 = vpop.f32.mrf.mxu3  ;;  %v791_v44 = vadd.f32 %v790_v42, %v762_v40  ;;  %v764_v46 = vpop.f32.mrf.mxu1 }
  0xb0   :  { %v765_v19 = vadd.f32 %v764_v46, %v735_v45 }
  0xb1   :  { %v820_v47 = vadd.f32 %v819_v43, %v791_v44 }
  0xb6   :  { %v793_v48 = vpop.f32.mrf.mxu2  ;;  %v737_v50 = vpop.f32.mrf.mxu0 }
  0xb7   :  { %v822_v49 = vpop.f32.mrf.mxu3  ;;  %v766_v51 = vpop.f32.mrf.mxu1  ;;  %v794_v22 = vadd.f32 %v793_v48, %v765_v19 }
  0xb8   :  { %v767_v32 = vadd.f32 %v766_v51, %v737_v50 }
  0xb9   :  { %v823_v27 = vadd.f32 %v822_v49, %v794_v22 }
  0xbe   :  { %v795_v52 = vpop.f32.mrf.mxu2  ;;  %v740_v54 = vpop.f32.mrf.mxu0 }
  0xbf   :  { %v824_v53 = vpop.f32.mrf.mxu3  ;;  %v769_v55 = vpop.f32.mrf.mxu1  ;;  %v796_v35 = vadd.f32 %v795_v52, %v767_v32 }
  0xc0   :  { %v770_v56 = vadd.f32 %v769_v55, %v740_v54 }
  0xc1   :  { %v825_v44 = vadd.f32 %v824_v53, %v796_v35 }
  0xc6   :  { %v798_v57 = vpop.f32.mrf.mxu2  ;;  %v742_v60 = vpop.f32.mrf.mxu0 }
  0xc7   :  { %v827_v58 = vpop.f32.mrf.mxu3  ;;  %v799_v59 = vadd.f32 %v798_v57, %v770_v56  ;;  %v771_v61 = vpop.f32.mrf.mxu1 }
  0xc8   :  { %v772_v62 = vadd.f32 %v771_v61, %v742_v60 }
  0xc9   :  { %v2018_v63 = vadd.f32 %v827_v58, %v799_v59 }
  0xce   :  { %v800_v0 = vpop.f32.mrf.mxu2  ;;  %v2020_v3 = vpop.f32.mrf.mxu0 }
  0xcf   :  { %v829_v1 = vpop.f32.mrf.mxu3  ;;  %v801_v2 = vadd.f32 %v800_v0, %v772_v62  ;;  %v2022_v4 = vpop.f32.mrf.mxu1 }
  0xd0   :  { %v775_v22 = vadd.f32 %v2022_v4, %v2020_v3 }
  0xd1   :  { %v2024_v5 = vadd.f32 %v829_v1, %v801_v2 }
  0xd6   :  { %v2026_v6 = vpop.f32.mrf.mxu2  ;;  %v2030_v8 = vpop.f32.mrf.mxu0 }
  0xd7   :  { %v2028_v7 = vpop.f32.mrf.mxu3  ;;  %v2032_v9 = vpop.f32.mrf.mxu1 }
  0xde   :  { %v2034_v10 = vpop.f32.mrf.mxu2  ;;  %v846_v12 = vpop.f32.mrf.mxu0 }
  0xdf   :  { %v2036_v11 = vpop.f32.mrf.mxu3  ;;  %v875_v13 = vpop.f32.mrf.mxu1  ;;  %v847_v14 = vadd.f32 %v846_v12, %v818_v41  ;;  %v1608_v41 = vmov 32.0  }
  0xe0   :  { %1602 = vrcp.f32 %v1608_v41 }
  0xe1   :  { %v876_v20 = vadd.f32 %v875_v13, %v847_v14 }
  0xe6   :  { %v904_v15 = vpop.f32.mrf.mxu2  ;;  %v848_v17 = vpop.f32.mrf.mxu0 }
  0xe7   :  { %v933_v16 = vpop.f32.mrf.mxu3  ;;  %v877_v18 = vpop.f32.mrf.mxu1  ;;  %v849_v21 = vadd.f32 %v848_v17, %v820_v47  ;;  %v905_v23 = vadd.f32 %v904_v15, %v876_v20 }
  0xe8   :  { %v1603_v50 = vpop.eup %1602 }
  0xe9   :  { %v878_v24 = vadd.f32 %v877_v18, %v849_v21  ;;  %v2038_v28 = vadd.f32 %v933_v16, %v905_v23  ;;  %v978_v58 = vmul.f32 32.0, %v1603_v50  ;;  %vm982_vm0 = vweird.f32 %v1603_v50 }
  0xeb   :  { %v964_v36 = vmul.f32 %v2038_v28, %v2038_v28  ;;  %v979_v62 = vsub.f32 1.0, %v978_v58 }
  0xed   :  { %v980_v14 = vmul.f32 %v1603_v50, %v979_v62 }
  0xee   :  { %v906_v25 = vpop.f32.mrf.mxu2  ;;  %v851_v30 = vpop.f32.mrf.mxu0 }
  0xef   :  { %v935_v26 = vpop.f32.mrf.mxu3  ;;  %v907_v29 = vadd.f32 %v906_v25, %v878_v24  ;;  %v880_v31 = vpop.f32.mrf.mxu1  ;;  %v852_v34 = vadd.f32 %v851_v30, %v823_v27 }
  0xf1   :  { %v2040_v33 = vadd.f32 %v935_v26, %v907_v29  ;;  %v881_v40 = vadd.f32 %v880_v31, %v852_v34  ;;  %v981_v26 = vadd.f32 %v1603_v50, %v980_v14 }
  0xf3   :  { %v955_v37 = vadd.f32 %v2040_v33, %v2038_v28  ;;  %v965_v38 = vmul.f32 %v2040_v33, %v2040_v33  ;;  %v2063_v35 = vsel %vm982_vm0, %v1603_v50, %v981_v26  ;;  %v953_v26 = vld [vmem:[%s2122_s2] sm:$0x1] }
  0xf5   :  { %v968_v39 = vadd.f32 %v965_v38, %v964_v36 }
  0xf6   :  { %v909_v42 = vpop.f32.mrf.mxu2  ;;  %v853_v46 = vpop.f32.mrf.mxu0 }
  0xf7   :  { %v938_v43 = vpop.f32.mrf.mxu3  ;;  %v910_v45 = vadd.f32 %v909_v42, %v881_v40  ;;  %v882_v47 = vpop.f32.mrf.mxu1  ;;  %v854_v49 = vadd.f32 %v853_v46, %v825_v44 }
  0xf9   :  { %v2048_v48 = vadd.f32 %v938_v43, %v910_v45  ;;  %v883_v55 = vadd.f32 %v882_v47, %v854_v49 }
  0xfb   :  { %v956_v51 = vadd.f32 %v955_v37, %v2048_v48  ;;  %v966_v52 = vmul.f32 %v2048_v48, %v2048_v48 }
  0xfd   :  { %v969_v54 = vadd.f32 %v968_v39, %v966_v52 }
  0xfe   :  { %v911_v56 = vpop.f32.mrf.mxu2  ;;  %v856_v60 = vpop.f32.mrf.mxu0 }
  0xff   :  { %v940_v57 = vpop.f32.mrf.mxu3  ;;  %v912_v59 = vadd.f32 %v911_v56, %v883_v55  ;;  %v885_v53 = vpop.f32.mrf.mxu1  ;;  %v857_v2 = vadd.f32 %v856_v60, %v2018_v63  ;;  %v804_v63 = vadd.f32 %v2026_v6, %v775_v22  ;;  %v777_v6 = vadd.f32 %v2032_v9, %v2030_v8 }
 0x101   :  { %v2053_v61 = vadd.f32 %v940_v57, %v912_v59  ;;  %v886_v20 = vadd.f32 %v885_v53, %v857_v2  ;;  %v833_v4 = vadd.f32 %v2028_v7, %v804_v63  ;;  %v806_v45 = vadd.f32 %v2034_v10, %v777_v6 }
 0x103   :  { %v957_v0 = vadd.f32 %v956_v51, %v2053_v61  ;;  %v967_v1 = vmul.f32 %v2053_v61, %v2053_v61  ;;  %v835_v10 = vadd.f32 %v2036_v11, %v806_v45 }
 0x105   :  { %v958_v12 = vrot.slane %v957_v0, 4  ;;  %v970_v13 = vadd.f32 %v969_v54, %v967_v1 }
 0x106   :  { %v914_v15 = vpop.f32.mrf.mxu2  ;;  %v858_v19 = vpop.f32.mrf.mxu0 }
 0x107   :  { %v943_v16 = vpop.f32.mrf.mxu3  ;;  %v959_v17 = vadd.f32 %v958_v12, %v957_v0  ;;  %v971_v18 = vrot.slane %v970_v13, 4  ;;  %v887_v21 = vpop.f32.mrf.mxu1  ;;  %v859_v25 = vadd.f32 %v858_v19, %v2024_v5  ;;  %v915_v27 = vadd.f32 %v914_v15, %v886_v20 }
 0x109   :  { %v960_v23 = vrot.slane %v959_v17, 2  ;;  %v972_v24 = vadd.f32 %v971_v18, %v970_v13  ;;  %v888_v34 = vadd.f32 %v887_v21, %v859_v25  ;;  %v2065_v36 = vadd.f32 %v943_v16, %v915_v27 }
 0x10b   :  { %v961_v29 = vadd.f32 %v960_v23, %v959_v17  ;;  %v973_v30 = vrot.slane %v972_v24, 2  ;;  %v1025_v46 = vmul.f32 %v2065_v36, %v2065_v36 }
 0x10d   :  { %v962_v31 = vrot.slane %v961_v29, 1  ;;  %v974_v32 = vadd.f32 %v973_v30, %v972_v24 }
 0x10e   :  { %v916_v37 = vpop.f32.mrf.mxu2  ;;  %v861_v40 = vpop.f32.mrf.mxu0 }
 0x10f   :  { %v945_v3 = vpop.f32.mrf.mxu3  ;;  %v963_v38 = vadd.f32 %v962_v31, %v961_v29  ;;  %v975_v5 = vrot.slane %v974_v32, 1  ;;  %v917_v39 = vadd.f32 %v916_v37, %v888_v34  ;;  %v862_v44 = vadd.f32 %v861_v40, %v833_v4  ;;  %v890_v47 = vpop.f32.mrf.mxu1  ;;  %v954_v37 = vld [vmem:[%s2123_s3] sm:$0x1] }
 0x111   :  { %v976_v41 = vadd.f32 %v975_v5, %v974_v32  ;;  %v984_v42 = vmul.f32 %v2063_v35, %v963_v38  ;;  %v2071_v43 = vadd.f32 %v945_v3, %v917_v39  ;;  %v891_v52 = vadd.f32 %v890_v47, %v862_v44 }
 0x113   :  { %v985_v7 = vmul.f32 %v2063_v35, %v976_v41  ;;  %v986_v49 = vmul.f32 %v984_v42, %v984_v42  ;;  %v1016_v50 = vadd.f32 %v2071_v43, %v2065_v36  ;;  %v1026_v8 = vmul.f32 %v2071_v43, %v2071_v43 }
 0x115   :  { %v987_v9 = vsub.f32 %v985_v7, %v986_v49  ;;  %v1029_v51 = vadd.f32 %v1026_v8, %v1025_v46 }
 0x116   :  { %v919_v54 = vpop.f32.mrf.mxu2  ;;  %v863_v58 = vpop.f32.mrf.mxu0 }
 0x117   :  { %v948_v55 = vpop.f32.mrf.mxu3  ;;  %v988_v56 = vadd.f32 1e-05, %v987_v9  ;;  %v920_v57 = vadd.f32 %v919_v54, %v891_v52  ;;  %v864_v60 = vadd.f32 %v863_v58, %v835_v10  ;;  %v892_v0 = vpop.f32.mrf.mxu1 }
 0x119   :  { %1604 = vrsqrt.f32 %v988_v56  ;;  %v2082_v59 = vadd.f32 %v948_v55, %v920_v57  ;;  %v893_v2 = vadd.f32 %v892_v0, %v864_v60  ;;  %vm995_vm2 = vweird.f32 %v988_v56 }
 0x11b   :  { %v1017_v53 = vadd.f32 %v1016_v50, %v2082_v59  ;;  %v1027_v62 = vmul.f32 %v2082_v59, %v2082_v59 }
 0x11d   :  { %v1030_v1 = vadd.f32 %v1029_v51, %v1027_v62 }
 0x11e   :  { %v921_v12 = vpop.f32.mrf.mxu2 }
 0x11f   :  { %v1605_v13 = vpop.eup %1604  ;;  %v922_v14 = vadd.f32 %v921_v12, %v893_v2  ;;  %v950_v11 = vpop.f32.mrf.mxu3 }
 0x120   :  { %v990_v15 = vmul.f32 %v1605_v13, %v988_v56  ;;  %vm996_vm1 = vweird.f32 %v1605_v13 }
 0x121   :  { %v2087_v16 = vadd.f32 %v950_v11, %v922_v14  ;;  %vm997_vm3 = vmor %vm995_vm2, %vm996_vm1 }
 0x122   :  { %v991_v17 = vmul.f32 %v1605_v13, %v990_v15 }
 0x123   :  { %v1018_v18 = vadd.f32 %v1017_v53, %v2087_v16  ;;  %v1028_v19 = vmul.f32 %v2087_v16, %v2087_v16 }
 0x124   :  { %v992_v20 = vmul.f32 0.5, %v991_v17 }
 0x125   :  { %v1019_v21 = vrot.slane %v1018_v18, 4  ;;  %v1031_v22 = vadd.f32 %v1030_v1, %v1028_v19 }
 0x126   :  { %v993_v23 = vsub.f32 1.5, %v992_v20 }
 0x127   :  { %v1020_v24 = vadd.f32 %v1019_v21, %v1018_v18  ;;  %v1032_v25 = vrot.slane %v1031_v22, 4 }
 0x128   :  { %v994_v27 = vmul.f32 %v1605_v13, %v993_v23 }
 0x129   :  { %v1021_v63 = vrot.slane %v1020_v24, 2  ;;  %v1033_v29 = vadd.f32 %v1032_v25, %v1031_v22 }
 0x12a   :  { %v998_v30 = vsel %vm997_vm3, %v1605_v13, %v994_v27 }
 0x12b   :  { %v999_v31 = vmul.f32 %v998_v30, %v953_v26  ;;  %v1022_v32 = vadd.f32 %v1021_v63, %v1020_v24  ;;  %v1034_v34 = vrot.slane %v1033_v29, 2 }
 0x12d   :  { %v1000_v3 = vmul.f32 %v999_v31, %v984_v42  ;;  %v1003_v4 = vperm.slane %v999_v31, 0  ;;  %v1023_v38 = vrot.slane %v1022_v32, 1  ;;  %v1035_v5 = vadd.f32 %v1034_v34, %v1033_v29 }
 0x12f   :  { %v1001_v39 = vsub.f32 %v954_v37, %v1000_v3  ;;  %v1005_v40 = vmul.f32 %v1003_v4, %v2038_v28  ;;  %v1006_v6 = vmul.f32 %v1003_v4, %v2040_v33  ;;  %v1007_v41 = vmul.f32 %v1003_v4, %v2048_v48 }
 0x130   :  { %v1024_v44 = vadd.f32 %v1023_v38, %v1022_v32  ;;  %v1036_v45 = vrot.slane %v1035_v5, 1  ;;  %v1008_v46 = vmul.f32 %v1003_v4, %v2053_v61 }
 0x131   :  { %v1010_v47 = vperm.slane %v1001_v39, 0 }
 0x132   :  { %v1037_v7 = vadd.f32 %v1036_v45, %v1035_v5  ;;  %v1038_v49 = vmul.f32 %v1024_v44, %v2063_v35 }
 0x133   :  { %v1012_v50 = vadd.f32 %v1010_v47, %v1005_v40  ;;  %v1013_v42 = vadd.f32 %v1010_v47, %v1006_v6  ;;  %v1014_v8 = vadd.f32 %v1010_v47, %v1007_v41  ;;  %v1015_v9 = vadd.f32 %v1010_v47, %v1008_v46 }
 0x134   :  { %v1039_v51 = vmul.f32 %v1037_v7, %v2063_v35  ;;  %v1040_v52 = vmul.f32 %v1038_v49, %v1038_v49 }
 0x135   :  { %v1070_v28 = vmax.f32 %v1012_v50, 0.0  ;;  %v1071_v54 = vmax.f32 %v1013_v42, 0.0  ;;  %v1072_v33 = vmax.f32 %v1014_v8, 0.0  ;;  %v1073_v55 = vmax.f32 %v1015_v9, 0.0 }
 0x136   :  { %v1041_v48 = vsub.f32 %v1039_v51, %v1040_v52 }
 0x137   :  { %v1581_v10 = vpack.c.bf16 %v1071_v54, %v1070_v28  ;;  %v1586_v56 = vpack.c.bf16 %v1073_v55, %v1072_v33 }
 0x138   :  { %v1042_v57 = vadd.f32 1e-05, %v1041_v48 }
 0x139   :  { %1582 = vst [vmem:[%s2124_s4] sm:$0xff] %v1581_v10  }
 0x13a   :  { %1598 = vst [vmem:[%s2124_s4 + $0x8] sm:$0xff] %v1586_v56   ;;  %1606 = vrsqrt.f32 %v1042_v57  ;;  %vm1049_vm5 = vweird.f32 %v1042_v57 }
 0x140   :  { %v1607_v61 = vpop.eup %1606 }
 0x141   :  { %v1044_v35 = vmul.f32 %v1607_v61, %v1042_v57  ;;  %vm1050_vm4 = vweird.f32 %v1607_v61 }
 0x142   :  { %vm1051_vm6 = vmor %vm1049_vm5, %vm1050_vm4 }
 0x143   :  { %v1045_v58 = vmul.f32 %v1607_v61, %v1044_v35 }
 0x145   :  { %v1046_v60 = vmul.f32 0.5, %v1045_v58 }
 0x147   :  { %v1047_v53 = vsub.f32 1.5, %v1046_v60 }
 0x149   :  { %v1048_v62 = vmul.f32 %v1607_v61, %v1047_v53 }
 0x14b   :  { %v1052_v0 = vsel %vm1051_vm6, %v1607_v61, %v1048_v62 }
 0x14c   :  { %v1053_v1 = vmul.f32 %v1052_v0, %v953_v26 }
 0x14e   :  { %v1054_v2 = vmul.f32 %v1053_v1, %v1038_v49  ;;  %v1057_v12 = vperm.slane %v1053_v1, 0 }
 0x150   :  { %v1055_v13 = vsub.f32 %v954_v37, %v1054_v2  ;;  %v1059_v14 = vmul.f32 %v1057_v12, %v2065_v36  ;;  %v1060_v15 = vmul.f32 %v1057_v12, %v2071_v43  ;;  %v1061_v11 = vmul.f32 %v1057_v12, %v2082_v59 }
 0x151   :  { %v1062_v17 = vmul.f32 %v1057_v12, %v2087_v16 }
 0x152   :  { %v1064_v18 = vperm.slane %v1055_v13, 0 }
 0x154   :  { %v1066_v19 = vadd.f32 %v1064_v18, %v1059_v14  ;;  %v1067_v20 = vadd.f32 %v1064_v18, %v1060_v15  ;;  %v1068_v21 = vadd.f32 %v1064_v18, %v1061_v11  ;;  %v1069_v22 = vadd.f32 %v1064_v18, %v1062_v17 }
 0x156   :  { %v1074_v23 = vmax.f32 %v1066_v19, 0.0  ;;  %v1075_v24 = vmax.f32 %v1067_v20, 0.0  ;;  %v1076_v25 = vmax.f32 %v1068_v21, 0.0  ;;  %v1077_v26 = vmax.f32 %v1069_v22, 0.0 }
 0x158   :  { %v1591_v27 = vpack.c.bf16 %v1075_v24, %v1074_v23  ;;  %v1596_v63 = vpack.c.bf16 %v1077_v26, %v1076_v25 }
 0x15a   :  { %1599 = vst [vmem:[%s2124_s4 + $0x10] sm:$0xff] %v1591_v27  }
 0x15b   :  { %1600 = vst [vmem:[%s2124_s4 + $0x18] sm:$0xff] %v1596_v63  }

// kernel: squeeze.74
= control target key start
LH: loop header
LB: loop body
LE: loop exit
PB: predicated region body
PF: predicated region fallthrough
CT: control target
= control target key end

     0   :  { %s303_s0 = inlined_call_operand.vmem [shape: bf16[1,16,256], index: 0, kind: input, shape index: {}]   ;;  %s304_s1 = inlined_call_operand.vmem [shape: bf16[4,2,2,256], index: 1, kind: output, shape index: {}]  }
   0x1   :  { %v235_v0 = vld [vmem:[%s303_s0] sm:$0xff]   ;;  %v238_v3 = vld [vmem:[%s303_s0 + $0x8] sm:$0xff]  }
   0x2   :  { %v236_v1 = vunpack.c.l.bf16 %v235_v0  ;;  %v237_v2 = vunpack.c.h.bf16 %v235_v0  ;;  %v232_v4 = vunpack.c.l.bf16 %v238_v3  ;;  %v233_v5 = vunpack.c.h.bf16 %v238_v3 }
   0x4   :  { %63 = vst [vmem:[#allocation0] sm:$0x3] %v236_v1  }
   0x5   :  { %65 = vst [vmem:[#allocation0 + $0xe] sm:$0xc] %v236_v1  }
   0x6   :  { %67 = vst [vmem:[#allocation0 + $0x1c] sm:$0x30] %v236_v1  }
   0x7   :  { %69 = vst [vmem:[#allocation0 + $0x2a] sm:$0xc0] %v236_v1  }
   0x8   :  { %73 = vst [vmem:[#allocation0 + $0x8] sm:$0x3] %v237_v2  }
   0x9   :  { %75 = vst [vmem:[#allocation0 + $0x16] sm:$0xc] %v237_v2  }
   0xa   :  { %77 = vst [vmem:[#allocation0 + $0x24] sm:$0x30] %v237_v2  }
   0xb   :  { %79 = vst [vmem:[#allocation0 + $0x32] sm:$0xc0] %v237_v2   ;;  %v102_v6 = vld [vmem:[#allocation0] sm:$0x3] }
   0xc   :  { %83 = vst [vmem:[#allocation0 + $0x40] sm:$0x3] %v232_v4   ;;  %v115_v7 = vld [vmem:[#allocation0 + $0x10] sm:$0x3]  ;;  %v103_v9 = vpack.c.bf16 0.0, %v102_v6 }
   0xd   :  { %85 = vst [vmem:[#allocation0 + $0x4e] sm:$0xc] %v232_v4   ;;  %v116_v12 = vpack.c.bf16 0.0, %v115_v7  ;;  %v129_v13 = vld [vmem:[#allocation0 + $0x20] sm:$0x3] }
   0xe   :  { %87 = vst [vmem:[#allocation0 + $0x5c] sm:$0x30] %v232_v4   ;;  %v143_v15 = vld [vmem:[#allocation0 + $0x30] sm:$0x3]  ;;  %v130_v18 = vpack.c.bf16 0.0, %v129_v13 }
   0xf   :  { %89 = vst [vmem:[#allocation0 + $0x6a] sm:$0xc0] %v232_v4   ;;  %v108_v8 = vld [vmem:[#allocation0 + $0x8] sm:$0x3]  ;;  %v144_v21 = vpack.c.bf16 0.0, %v143_v15 }
  0x10   :  { %93 = vst [vmem:[#allocation0 + $0x48] sm:$0x3] %v233_v5   ;;  %v122_v10 = vld [vmem:[#allocation0 + $0x18] sm:$0x3]  ;;  %v109_v11 = vpack.c.bf16 0.0, %v108_v8 }
  0x11   :  { %95 = vst [vmem:[#allocation0 + $0x56] sm:$0xc] %v233_v5   ;;  %v136_v14 = vld [vmem:[#allocation0 + $0x28] sm:$0x3]  ;;  %v123_v16 = vpack.c.bf16 0.0, %v122_v10 }
  0x12   :  { %97 = vst [vmem:[#allocation0 + $0x64] sm:$0x30] %v233_v5   ;;  %v150_v17 = vld [vmem:[#allocation0 + $0x38] sm:$0x3]  ;;  %v137_v19 = vpack.c.bf16 0.0, %v136_v14 }
  0x13   :  { %99 = vst [vmem:[#allocation0 + $0x72] sm:$0xc0] %v233_v5   ;;  %v157_v20 = vld [vmem:[#allocation0 + $0x40] sm:$0x3]  ;;  %v151_v22 = vpack.c.bf16 0.0, %v150_v17 }
  0x14   :  { %106 = vst [vmem:[%s304_s1] sm:$0x1] %v103_v9  ;;  %v171_v24 = vld [vmem:[#allocation0 + $0x50] sm:$0x3]  ;;  %v158_v25 = vpack.c.bf16 0.0, %v157_v20 }
  0x15   :  { %215 = vst [vmem:[%s304_s1 + $0x1] sm:$0x1] %v109_v11  ;;  %v185_v28 = vld [vmem:[#allocation0 + $0x60] sm:$0x3]  ;;  %v172_v29 = vpack.c.bf16 0.0, %v171_v24 }
  0x16   :  { %216 = vst [vmem:[%s304_s1 + $0x2] sm:$0x1] %v116_v12  ;;  %v199_v32 = vld [vmem:[#allocation0 + $0x70] sm:$0x3]  ;;  %v186_v33 = vpack.c.bf16 0.0, %v185_v28 }
  0x17   :  { %217 = vst [vmem:[%s304_s1 + $0x3] sm:$0x1] %v123_v16  ;;  %v164_v23 = vld [vmem:[#allocation0 + $0x48] sm:$0x3]  ;;  %v200_v36 = vpack.c.bf16 0.0, %v199_v32 }
  0x18   :  { %218 = vst [vmem:[%s304_s1 + $0x4] sm:$0x1] %v130_v18  ;;  %v178_v26 = vld [vmem:[#allocation0 + $0x58] sm:$0x3]  ;;  %v165_v27 = vpack.c.bf16 0.0, %v164_v23 }
  0x19   :  { %219 = vst [vmem:[%s304_s1 + $0x5] sm:$0x1] %v137_v19  ;;  %v192_v30 = vld [vmem:[#allocation0 + $0x68] sm:$0x3]  ;;  %v179_v31 = vpack.c.bf16 0.0, %v178_v26 }
  0x1a   :  { %220 = vst [vmem:[%s304_s1 + $0x6] sm:$0x1] %v144_v21  ;;  %v206_v34 = vld [vmem:[#allocation0 + $0x78] sm:$0x3]  ;;  %v193_v35 = vpack.c.bf16 0.0, %v192_v30 }
  0x1b   :  { %221 = vst [vmem:[%s304_s1 + $0x7] sm:$0x1] %v151_v22  ;;  %v207_v37 = vpack.c.bf16 0.0, %v206_v34 }
  0x1c   :  { %222 = vst [vmem:[%s304_s1 + $0x8] sm:$0x1] %v158_v25 }
  0x1d   :  { %223 = vst [vmem:[%s304_s1 + $0x9] sm:$0x1] %v165_v27 }
  0x1e   :  { %224 = vst [vmem:[%s304_s1 + $0xa] sm:$0x1] %v172_v29 }
  0x1f   :  { %225 = vst [vmem:[%s304_s1 + $0xb] sm:$0x1] %v179_v31 }
  0x20   :  { %226 = vst [vmem:[%s304_s1 + $0xc] sm:$0x1] %v186_v33 }
  0x21   :  { %227 = vst [vmem:[%s304_s1 + $0xd] sm:$0x1] %v193_v35 }
  0x22   :  { %228 = vst [vmem:[%s304_s1 + $0xe] sm:$0x1] %v200_v36 }
  0x23   :  { %229 = vst [vmem:[%s304_s1 + $0xf] sm:$0x1] %v207_v37 }

// kernel: diffmorpher_forward.10
= control target key start
LH: loop header
LB: loop body
LE: loop exit
PB: predicated region body
PF: predicated region fallthrough
CT: control target
= control target key end

     0   :  { %vm2165_vm6 = vcmask 1040384   ;;  %s5476_s1 = inlined_call_operand.vmem [shape: bf16[1,2048,256], index: 1, kind: input, shape index: {}]   ;;  %s5477_s0 = inlined_call_operand.vmem [shape: bf16[1,16,2048], index: 0, kind: input, shape index: {}]   ;;  %s5478_s2 = inlined_call_operand.vmem [shape: f32[1,1,256], index: 2, kind: input, shape index: {}]   ;;  %s5479_s3 = inlined_call_operand.vmem [shape: f32[1,1,256], index: 3, kind: input, shape index: {}]   ;;  %s5480_s4 = inlined_call_operand.vmem [shape: bf16[1,16,256], index: 4, kind: output, shape index: {}]  }
   0x1   :  { %v2409_v0 = vld [vmem:[%s5476_s1 + $0x70] sm:$0xf]  ;;  %v3406_v1 = vld [vmem:[%s5476_s1 + $0x74] sm:$0xf0]  ;;  %v2401_v11 = vld [vmem:[%s5476_s1 + $0x60] sm:$0xf] }
   0x2   :  { %v2473_v2 = vld [vmem:[%s5476_s1 + $0xf0] sm:$0xf]  ;;  %v2410_v3 = vor.u32 %v3406_v1, %v2409_v0  ;;  %v3422_v4 = vld [vmem:[%s5476_s1 + $0xf4] sm:$0xf0]  ;;  %v3404_v13 = vld [vmem:[%s5476_s1 + $0x64] sm:$0xf0] }
   0x3   :  { %v2537_v5 = vld [vmem:[%s5476_s1 + $0x170] sm:$0xf]  ;;  %v3438_v6 = vld [vmem:[%s5476_s1 + $0x174] sm:$0xf0]  ;;  %v2474_v7 = vor.u32 %v3422_v4, %v2473_v2  ;;  %v2465_v14 = vld [vmem:[%s5476_s1 + $0xe0] sm:$0xf]  ;;  %v2402_v16 = vor.u32 %v3404_v13, %v2401_v11 }
   0x4   :  { %v2538_v8 = vor.u32 %v3438_v6, %v2537_v5  ;;  %v2601_v9 = vld [vmem:[%s5476_s1 + $0x1f0] sm:$0xf]  ;;  %v3454_v10 = vld [vmem:[%s5476_s1 + $0x1f4] sm:$0xf0]  ;;  %1649 = vmatpush.bf16.msra.mxu0 %v2410_v3  ;;  %v3420_v15 = vld [vmem:[%s5476_s1 + $0xe4] sm:$0xf0] }
   0x5   :  { %v2602_v12 = vor.u32 %v3454_v10, %v2601_v9  ;;  %1663 = vmatpush.bf16.msra.mxu1 %v2474_v7  ;;  %v2466_v17 = vor.u32 %v3420_v15, %v2465_v14  ;;  %v2529_v18 = vld [vmem:[%s5476_s1 + $0x160] sm:$0xf]  ;;  %v3436_v19 = vld [vmem:[%s5476_s1 + $0x164] sm:$0xf0]  ;;  %v2393_v23 = vld [vmem:[%s5476_s1 + $0x50] sm:$0xf] }
   0x6   :  { %1677 = vmatpush.bf16.msra.mxu2 %v2538_v8  ;;  %v2593_v20 = vld [vmem:[%s5476_s1 + $0x1e0] sm:$0xf]  ;;  %v2530_v21 = vor.u32 %v3436_v19, %v2529_v18  ;;  %v3452_v22 = vld [vmem:[%s5476_s1 + $0x1e4] sm:$0xf0]  ;;  %v3402_v24 = vld [vmem:[%s5476_s1 + $0x54] sm:$0xf0] }
   0x7   :  { %1691 = vmatpush.bf16.msra.mxu3 %v2602_v12  ;;  %v2594_v25 = vor.u32 %v3452_v22, %v2593_v20  ;;  %v2457_v26 = vld [vmem:[%s5476_s1 + $0xd0] sm:$0xf]  ;;  %v3418_v27 = vld [vmem:[%s5476_s1 + $0xd4] sm:$0xf0]  ;;  %v2394_v29 = vor.u32 %v3402_v24, %v2393_v23  ;;  %v2385_v35 = vld [vmem:[%s5476_s1 + $0x40] sm:$0xf] }
   0x8   :  { %v2521_v28 = vld [vmem:[%s5476_s1 + $0x150] sm:$0xf]  ;;  %1650 = vmatpush.bf16.msra.mxu0 %v2402_v16  ;;  %v3434_v30 = vld [vmem:[%s5476_s1 + $0x154] sm:$0xf0]  ;;  %v2458_v33 = vor.u32 %v3418_v27, %v2457_v26  ;;  %v3400_v36 = vld [vmem:[%s5476_s1 + $0x44] sm:$0xf0] }
   0x9   :  { %v2585_v31 = vld [vmem:[%s5476_s1 + $0x1d0] sm:$0xf]  ;;  %v3450_v32 = vld [vmem:[%s5476_s1 + $0x1d4] sm:$0xf0]  ;;  %1664 = vmatpush.bf16.msra.mxu1 %v2466_v17  ;;  %v2522_v34 = vor.u32 %v3434_v30, %v2521_v28  ;;  %v2449_v37 = vld [vmem:[%s5476_s1 + $0xc0] sm:$0xf]  ;;  %v2386_v44 = vor.u32 %v3400_v36, %v2385_v35 }
   0xa   :  { %1678 = vmatpush.bf16.msra.mxu2 %v2530_v21  ;;  %v2586_v38 = vor.u32 %v3450_v32, %v2585_v31  ;;  %v3416_v39 = vld [vmem:[%s5476_s1 + $0xc4] sm:$0xf0]  ;;  %v2513_v40 = vld [vmem:[%s5476_s1 + $0x140] sm:$0xf]  ;;  %v2377_v47 = vld [vmem:[%s5476_s1 + $0x30] sm:$0xf] }
   0xb   :  { %1692 = vmatpush.bf16.msra.mxu3 %v2594_v25  ;;  %v3432_v41 = vld [vmem:[%s5476_s1 + $0x144] sm:$0xf0]  ;;  %v2577_v42 = vld [vmem:[%s5476_s1 + $0x1c0] sm:$0xf]  ;;  %v2450_v45 = vor.u32 %v3416_v39, %v2449_v37  ;;  %v3398_v48 = vld [vmem:[%s5476_s1 + $0x34] sm:$0xf0] }
   0xc   :  { %v3448_v43 = vld [vmem:[%s5476_s1 + $0x1c4] sm:$0xf0]  ;;  %1651 = vmatpush.bf16.msra.mxu0 %v2394_v29  ;;  %v2514_v46 = vor.u32 %v3432_v41, %v2513_v40  ;;  %v2441_v49 = vld [vmem:[%s5476_s1 + $0xb0] sm:$0xf]  ;;  %v3414_v51 = vld [vmem:[%s5476_s1 + $0xb4] sm:$0xf0]  ;;  %v2378_v56 = vor.u32 %v3398_v48, %v2377_v47 }
   0xd   :  { %1665 = vmatpush.bf16.msra.mxu1 %v2458_v33  ;;  %v2578_v50 = vor.u32 %v3448_v43, %v2577_v42  ;;  %v2505_v52 = vld [vmem:[%s5476_s1 + $0x130] sm:$0xf]  ;;  %v3430_v53 = vld [vmem:[%s5476_s1 + $0x134] sm:$0xf0]  ;;  %v2442_v57 = vor.u32 %v3414_v51, %v2441_v49  ;;  %v2369_v59 = vld [vmem:[%s5476_s1 + $0x20] sm:$0xf] }
   0xe   :  { %1679 = vmatpush.bf16.msra.mxu2 %v2522_v34  ;;  %v2569_v54 = vld [vmem:[%s5476_s1 + $0x1b0] sm:$0xf]  ;;  %v3446_v55 = vld [vmem:[%s5476_s1 + $0x1b4] sm:$0xf0]  ;;  %v2506_v58 = vor.u32 %v3430_v53, %v2505_v52  ;;  %v3396_v60 = vld [vmem:[%s5476_s1 + $0x24] sm:$0xf0] }
   0xf   :  { %1693 = vmatpush.bf16.msra.mxu3 %v2586_v38  ;;  %v2433_v61 = vld [vmem:[%s5476_s1 + $0xa0] sm:$0xf]  ;;  %v2570_v62 = vor.u32 %v3446_v55, %v2569_v54  ;;  %v3412_v63 = vld [vmem:[%s5476_s1 + $0xa4] sm:$0xf0]  ;;  %v2370_v4 = vor.u32 %v3396_v60, %v2369_v59  ;;  %v2361_v7 = vld [vmem:[%s5476_s1 + $0x10] sm:$0xf] }
  0x10   :  { %1652 = vmatpush.bf16.msra.mxu0 %v2386_v44  ;;  %v2497_v0 = vld [vmem:[%s5476_s1 + $0x120] sm:$0xf]  ;;  %v3428_v1 = vld [vmem:[%s5476_s1 + $0x124] sm:$0xf0]  ;;  %v2434_v5 = vor.u32 %v3412_v63, %v2433_v61  ;;  %v3394_v8 = vld [vmem:[%s5476_s1 + $0x14] sm:$0xf0] }
  0x11   :  { %1666 = vmatpush.bf16.msra.mxu1 %v2450_v45  ;;  %v2561_v2 = vld [vmem:[%s5476_s1 + $0x1a0] sm:$0xf]  ;;  %v3444_v3 = vld [vmem:[%s5476_s1 + $0x1a4] sm:$0xf0]  ;;  %v2498_v6 = vor.u32 %v3428_v1, %v2497_v0  ;;  %v2425_v9 = vld [vmem:[%s5476_s1 + $0x90] sm:$0xf]  ;;  %v2362_v16 = vor.u32 %v3394_v8, %v2361_v7 }
  0x12   :  { %1680 = vmatpush.bf16.msra.mxu2 %v2514_v46  ;;  %v2562_v10 = vor.u32 %v3444_v3, %v2561_v2  ;;  %v3410_v11 = vld [vmem:[%s5476_s1 + $0x94] sm:$0xf0]  ;;  %v2489_v12 = vld [vmem:[%s5476_s1 + $0x110] sm:$0xf]  ;;  %v2353_v17 = vld [vmem:[%s5476_s1] sm:$0xf] }
  0x13   :  { %1694 = vmatpush.bf16.msra.mxu3 %v2578_v50  ;;  %v3426_v13 = vld [vmem:[%s5476_s1 + $0x114] sm:$0xf0]  ;;  %v2553_v14 = vld [vmem:[%s5476_s1 + $0x190] sm:$0xf]  ;;  %v3392_v18 = vld [vmem:[%s5476_s1 + $0x4] sm:$0xf0]  ;;  %v2426_v19 = vor.u32 %v3410_v11, %v2425_v9 }
  0x14   :  { %1653 = vmatpush.bf16.msra.mxu0 %v2378_v56  ;;  %v3442_v15 = vld [vmem:[%s5476_s1 + $0x194] sm:$0xf0]  ;;  %v2490_v20 = vor.u32 %v3426_v13, %v2489_v12  ;;  %v2417_v21 = vld [vmem:[%s5476_s1 + $0x80] sm:$0xf]  ;;  %v3408_v22 = vld [vmem:[%s5476_s1 + $0x84] sm:$0xf0]  ;;  %v2354_v31 = vor.u32 %v3392_v18, %v2353_v17 }
  0x15   :  { %1667 = vmatpush.bf16.msra.mxu1 %v2442_v57  ;;  %v2481_v23 = vld [vmem:[%s5476_s1 + $0x100] sm:$0xf]  ;;  %v2554_v24 = vor.u32 %v3442_v15, %v2553_v14  ;;  %v3424_v25 = vld [vmem:[%s5476_s1 + $0x104] sm:$0xf0]  ;;  %v2665_v28 = vld [vmem:[%s5476_s1 + $0x270] sm:$0xf]  ;;  %v2418_v35 = vor.u32 %v3408_v22, %v2417_v21 }
  0x16   :  { %1681 = vmatpush.bf16.msra.mxu2 %v2506_v58  ;;  %v2545_v26 = vld [vmem:[%s5476_s1 + $0x180] sm:$0xf]  ;;  %v3440_v27 = vld [vmem:[%s5476_s1 + $0x184] sm:$0xf0]  ;;  %v3470_v29 = vld [vmem:[%s5476_s1 + $0x274] sm:$0xf0]  ;;  %v2482_v36 = vor.u32 %v3424_v25, %v2481_v23 }
  0x17   :  { %1695 = vmatpush.bf16.msra.mxu3 %v2570_v62  ;;  %v2729_v30 = vld [vmem:[%s5476_s1 + $0x2f0] sm:$0xf]  ;;  %v3486_v32 = vld [vmem:[%s5476_s1 + $0x2f4] sm:$0xf0]  ;;  %v2546_v39 = vor.u32 %v3440_v27, %v2545_v26  ;;  %v2666_v40 = vor.u32 %v3470_v29, %v2665_v28  ;;  %v2657_v41 = vld [vmem:[%s5476_s1 + $0x260] sm:$0xf] }
  0x18   :  { %1654 = vmatpush.bf16.msra.mxu0 %v2370_v4  ;;  %v2793_v33 = vld [vmem:[%s5476_s1 + $0x370] sm:$0xf]  ;;  %v3502_v34 = vld [vmem:[%s5476_s1 + $0x374] sm:$0xf0]  ;;  %v3468_v42 = vld [vmem:[%s5476_s1 + $0x264] sm:$0xf0]  ;;  %v2730_v43 = vor.u32 %v3486_v32, %v2729_v30 }
  0x19   :  { %1668 = vmatpush.bf16.msra.mxu1 %v2434_v5  ;;  %v2857_v37 = vld [vmem:[%s5476_s1 + $0x3f0] sm:$0xf]  ;;  %v3518_v38 = vld [vmem:[%s5476_s1 + $0x3f4] sm:$0xf0]  ;;  %v2794_v44 = vor.u32 %v3502_v34, %v2793_v33  ;;  %v2721_v45 = vld [vmem:[%s5476_s1 + $0x2e0] sm:$0xf]  ;;  %v2658_v55 = vor.u32 %v3468_v42, %v2657_v41 }
  0x1a   :  { %1682 = vmatpush.bf16.msra.mxu2 %v2498_v6  ;;  %v3484_v46 = vld [vmem:[%s5476_s1 + $0x2e4] sm:$0xf0]  ;;  %v2785_v47 = vld [vmem:[%s5476_s1 + $0x360] sm:$0xf]  ;;  %v2858_v48 = vor.u32 %v3518_v38, %v2857_v37  ;;  %v2649_v56 = vld [vmem:[%s5476_s1 + $0x250] sm:$0xf] }
  0x1b   :  { %1696 = vmatpush.bf16.msra.mxu3 %v2562_v10  ;;  %v3500_v49 = vld [vmem:[%s5476_s1 + $0x364] sm:$0xf0]  ;;  %v2849_v50 = vld [vmem:[%s5476_s1 + $0x3e0] sm:$0xf]  ;;  %v3466_v57 = vld [vmem:[%s5476_s1 + $0x254] sm:$0xf0]  ;;  %v2722_v60 = vor.u32 %v3484_v46, %v2721_v45 }
  0x1c   :  { %1655 = vmatpush.bf16.msra.mxu0 %v2362_v16  ;;  %v3516_v51 = vld [vmem:[%s5476_s1 + $0x3e4] sm:$0xf0]  ;;  %v2289_v52 = vld [vmem:[%s5477_s0] sm:$0xf]  ;;  %v2786_v61 = vor.u32 %v3500_v49, %v2785_v47  ;;  %v2713_v62 = vld [vmem:[%s5476_s1 + $0x2d0] sm:$0xf]  ;;  %v2650_v9 = vor.u32 %v3466_v57, %v2649_v56 }
  0x1d   :  { %1669 = vmatpush.bf16.msra.mxu1 %v2426_v19  ;;  %v3383_v53 = vld [vmem:[%s5477_s0 + $0x3c] sm:$0xf0]  ;;  %v2297_v54 = vld [vmem:[%s5477_s0 + $0x8] sm:$0xf]  ;;  %v3482_v63 = vld [vmem:[%s5476_s1 + $0x2d4] sm:$0xf0]  ;;  %v2850_v2 = vor.u32 %v3516_v51, %v2849_v50 }
  0x1e   :  { %1683 = vmatpush.bf16.msra.mxu2 %v2490_v20  ;;  %v3939_v58 = vor.u32 %v3383_v53, %v2289_v52  ;;  %v3384_v59 = vld [vmem:[%s5477_s0 + $0x44] sm:$0xf0]  ;;  %v2777_v0 = vld [vmem:[%s5476_s1 + $0x350] sm:$0xf]  ;;  %v3498_v3 = vld [vmem:[%s5476_s1 + $0x354] sm:$0xf0]  ;;  %v2714_v12 = vor.u32 %v3482_v63, %v2713_v62 }
  0x1f   :  { %1697 = vmatpush.bf16.msra.mxu3 %v2554_v24  ;;  %v3953_v1 = vor.u32 %v3384_v59, %v2297_v54  ;;  %v2841_v4 = vld [vmem:[%s5476_s1 + $0x3d0] sm:$0xf]  ;;  %v3514_v5 = vld [vmem:[%s5476_s1 + $0x3d4] sm:$0xf0]  ;;  %v3375_v6 = vld [vmem:[%s5477_s0 + $0x4] sm:$0xf]  ;;  %v2778_v13 = vor.u32 %v3498_v3, %v2777_v0 }
  0x20   :  { %1656 = vmatpush.bf16.msra.mxu0 %v2354_v31  ;;  %v2291_v7 = vld [vmem:[%s5477_s0 + $0x40] sm:$0xf0]  ;;  %v3376_v8 = vld [vmem:[%s5477_s0 + $0xc] sm:$0xf]  ;;  %v2641_v14 = vld [vmem:[%s5476_s1 + $0x240] sm:$0xf]  ;;  %v2842_v18 = vor.u32 %v3514_v5, %v2841_v4 }
  0x21   :  { %1670 = vmatpush.bf16.msra.mxu1 %v2418_v35  ;;  %v3975_v10 = vor.u32 %v3375_v6, %v2291_v7  ;;  %v2299_v11 = vld [vmem:[%s5477_s0 + $0x48] sm:$0xf0]  ;;  %v3464_v15 = vld [vmem:[%s5476_s1 + $0x244] sm:$0xf0]  ;;  %v2705_v16 = vld [vmem:[%s5476_s1 + $0x2c0] sm:$0xf] }
  0x22   :  { %1684 = vmatpush.bf16.msra.mxu2 %v2482_v36  ;;  %v3989_v17 = vor.u32 %v3376_v8, %v2299_v11  ;;  %v3480_v19 = vld [vmem:[%s5476_s1 + $0x2c4] sm:$0xf0]  ;;  %v2769_v20 = vld [vmem:[%s5476_s1 + $0x340] sm:$0xf]  ;;  %v2642_v24 = vor.u32 %v3464_v15, %v2641_v14  ;;  %v2633_v27 = vld [vmem:[%s5476_s1 + $0x230] sm:$0xf] }
  0x23   :  { %1698 = vmatpush.bf16.msra.mxu3 %v2546_v39  ;;  %1657 = vmatmul.bf16.vlgmr.msra.gmra.mxu0 %v3939_v58  ;;  %v3496_v21 = vld [vmem:[%s5476_s1 + $0x344] sm:$0xf0]  ;;  %v2833_v22 = vld [vmem:[%s5476_s1 + $0x3c0] sm:$0xf]  ;;  %v2706_v25 = vor.u32 %v3480_v19, %v2705_v16  ;;  %v3462_v28 = vld [vmem:[%s5476_s1 + $0x234] sm:$0xf0] }
  0x24   :  { %1705 = vmatpush.bf16.msrb.mxu0 %v2666_v40  ;;  %1671 = vmatmul.bf16.vlgmr.msra.gmra.mxu1 %v3975_v10  ;;  %v3512_v23 = vld [vmem:[%s5476_s1 + $0x3c4] sm:$0xf0]  ;;  %v2770_v26 = vor.u32 %v3496_v21, %v2769_v20  ;;  %v2697_v29 = vld [vmem:[%s5476_s1 + $0x2b0] sm:$0xf]  ;;  %v3478_v31 = vld [vmem:[%s5476_s1 + $0x2b4] sm:$0xf0]  ;;  %v2634_v36 = vor.u32 %v3462_v28, %v2633_v27 }
  0x25   :  { %1719 = vmatpush.bf16.msrb.mxu1 %v2730_v43  ;;  %1685 = vmatmul.bf16.vlgmr.msra.gmra.mxu2 %v3953_v1  ;;  %v2834_v30 = vor.u32 %v3512_v23, %v2833_v22  ;;  %v2761_v32 = vld [vmem:[%s5476_s1 + $0x330] sm:$0xf]  ;;  %v3494_v33 = vld [vmem:[%s5476_s1 + $0x334] sm:$0xf0]  ;;  %v2698_v37 = vor.u32 %v3478_v31, %v2697_v29  ;;  %v2625_v39 = vld [vmem:[%s5476_s1 + $0x220] sm:$0xf] }
  0x26   :  { %1733 = vmatpush.bf16.msrb.mxu2 %v2794_v44  ;;  %1699 = vmatmul.bf16.vlgmr.msra.gmra.mxu3 %v3989_v17  ;;  %v2825_v34 = vld [vmem:[%s5476_s1 + $0x3b0] sm:$0xf]  ;;  %v3510_v35 = vld [vmem:[%s5476_s1 + $0x3b4] sm:$0xf0]  ;;  %v2762_v38 = vor.u32 %v3494_v33, %v2761_v32  ;;  %v3460_v40 = vld [vmem:[%s5476_s1 + $0x224] sm:$0xf0] }
  0x27   :  { %1747 = vmatpush.bf16.msrb.mxu3 %v2858_v48  ;;  %v2689_v41 = vld [vmem:[%s5476_s1 + $0x2a0] sm:$0xf]  ;;  %v2826_v42 = vor.u32 %v3510_v35, %v2825_v34  ;;  %v3476_v43 = vld [vmem:[%s5476_s1 + $0x2a4] sm:$0xf0]  ;;  %v2626_v48 = vor.u32 %v3460_v40, %v2625_v39  ;;  %v2617_v49 = vld [vmem:[%s5476_s1 + $0x210] sm:$0xf] }
  0x28   :  { %1706 = vmatpush.bf16.msrb.mxu0 %v2658_v55  ;;  %v2753_v44 = vld [vmem:[%s5476_s1 + $0x320] sm:$0xf]  ;;  %v3492_v45 = vld [vmem:[%s5476_s1 + $0x324] sm:$0xf0]  ;;  %v2690_v50 = vor.u32 %v3476_v43, %v2689_v41  ;;  %v3458_v52 = vld [vmem:[%s5476_s1 + $0x214] sm:$0xf0] }
  0x29   :  { %1720 = vmatpush.bf16.msrb.mxu1 %v2722_v60  ;;  %v2817_v46 = vld [vmem:[%s5476_s1 + $0x3a0] sm:$0xf]  ;;  %v3508_v47 = vld [vmem:[%s5476_s1 + $0x3a4] sm:$0xf0]  ;;  %v2754_v51 = vor.u32 %v3492_v45, %v2753_v44  ;;  %v2681_v53 = vld [vmem:[%s5476_s1 + $0x290] sm:$0xf]  ;;  %v2618_v63 = vor.u32 %v3458_v52, %v2617_v49 }
  0x2a   :  { %1734 = vmatpush.bf16.msrb.mxu2 %v2786_v61  ;;  %v3474_v54 = vld [vmem:[%s5476_s1 + $0x294] sm:$0xf0]  ;;  %v2818_v55 = vor.u32 %v3508_v47, %v2817_v46  ;;  %v2745_v56 = vld [vmem:[%s5476_s1 + $0x310] sm:$0xf]  ;;  %v2609_v61 = vld [vmem:[%s5476_s1 + $0x200] sm:$0xf] }
  0x2b   :  { %1748 = vmatpush.bf16.msrb.mxu3 %v2850_v2  ;;  %v3490_v57 = vld [vmem:[%s5476_s1 + $0x314] sm:$0xf0]  ;;  %v2809_v59 = vld [vmem:[%s5476_s1 + $0x390] sm:$0xf]  ;;  %v3456_v62 = vld [vmem:[%s5476_s1 + $0x204] sm:$0xf0]  ;;  %v2682_v5 = vor.u32 %v3474_v54, %v2681_v53 }
  0x2c   :  { %1707 = vmatpush.bf16.msrb.mxu0 %v2650_v9  ;;  %v3506_v60 = vld [vmem:[%s5476_s1 + $0x394] sm:$0xf0]  ;;  %v2673_v0 = vld [vmem:[%s5476_s1 + $0x280] sm:$0xf]  ;;  %v3472_v2 = vld [vmem:[%s5476_s1 + $0x284] sm:$0xf0]  ;;  %v2746_v6 = vor.u32 %v3490_v57, %v2745_v56  ;;  %v2610_v19 = vor.u32 %v3456_v62, %v2609_v61 }
  0x2d   :  { %1721 = vmatpush.bf16.msrb.mxu1 %v2714_v12  ;;  %v2737_v3 = vld [vmem:[%s5476_s1 + $0x300] sm:$0xf]  ;;  %v3488_v4 = vld [vmem:[%s5476_s1 + $0x304] sm:$0xf0]  ;;  %v2921_v9 = vld [vmem:[%s5476_s1 + $0x470] sm:$0xf]  ;;  %v2810_v11 = vor.u32 %v3506_v60, %v2809_v59  ;;  %v2674_v23 = vor.u32 %v3472_v2, %v2673_v0 }
  0x2e   :  { %1735 = vmatpush.bf16.msrb.mxu2 %v2778_v13  ;;  %v2801_v7 = vld [vmem:[%s5476_s1 + $0x380] sm:$0xf]  ;;  %v3504_v8 = vld [vmem:[%s5476_s1 + $0x384] sm:$0xf0]  ;;  %v3534_v12 = vld [vmem:[%s5476_s1 + $0x474] sm:$0xf0] }
  0x2f   :  { %1749 = vmatpush.bf16.msrb.mxu3 %v2842_v18  ;;  %v2985_v13 = vld [vmem:[%s5476_s1 + $0x4f0] sm:$0xf]  ;;  %v3550_v14 = vld [vmem:[%s5476_s1 + $0x4f4] sm:$0xf0]  ;;  %v3377_v27 = vld [vmem:[%s5477_s0 + $0x14] sm:$0xf]  ;;  %v2802_v28 = vor.u32 %v3504_v8, %v2801_v7  ;;  %v2922_v29 = vor.u32 %v3534_v12, %v2921_v9 }
  0x30   :  { %1708 = vmatpush.bf16.msrb.mxu0 %v2642_v24  ;;  %v3049_v15 = vld [vmem:[%s5476_s1 + $0x570] sm:$0xf]  ;;  %v3566_v16 = vld [vmem:[%s5476_s1 + $0x574] sm:$0xf0]  ;;  %v2738_v24 = vor.u32 %v3488_v4, %v2737_v3  ;;  %v3378_v31 = vld [vmem:[%s5477_s0 + $0x1c] sm:$0xf]  ;;  %v2986_v33 = vor.u32 %v3550_v14, %v2985_v13 }
  0x31   :  { %1722 = vmatpush.bf16.msrb.mxu1 %v2706_v25  ;;  %v3113_v18 = vld [vmem:[%s5476_s1 + $0x5f0] sm:$0xf]  ;;  %v3582_v20 = vld [vmem:[%s5476_s1 + $0x5f4] sm:$0xf0]  ;;  %v2315_v32 = vld [vmem:[%s5477_s0 + $0x58] sm:$0xf0]  ;;  %v3050_v34 = vor.u32 %v3566_v16, %v3049_v15 }
  0x32   :  { %1736 = vmatpush.bf16.msrb.mxu2 %v2770_v26  ;;  %v2305_v21 = vld [vmem:[%s5477_s0 + $0x10] sm:$0xf]  ;;  %v2313_v25 = vld [vmem:[%s5477_s0 + $0x18] sm:$0xf]  ;;  %v2913_v35 = vld [vmem:[%s5476_s1 + $0x460] sm:$0xf]  ;;  %v4182_v47 = vor.u32 %v3378_v31, %v2315_v32 }
  0x33   :  { %1750 = vmatpush.bf16.msrb.mxu3 %v2834_v30  ;;  %v3385_v22 = vld [vmem:[%s5477_s0 + $0x4c] sm:$0xf0]  ;;  %v3386_v26 = vld [vmem:[%s5477_s0 + $0x54] sm:$0xf0]  ;;  %v2307_v30 = vld [vmem:[%s5477_s0 + $0x50] sm:$0xf0] }
  0x34   :  { %1709 = vmatpush.bf16.msrb.mxu0 %v2634_v36  ;;  %v3532_v36 = vld [vmem:[%s5476_s1 + $0x464] sm:$0xf0]  ;;  %v4161_v39 = vor.u32 %v3385_v22, %v2305_v21  ;;  %v3041_v41 = vld [vmem:[%s5476_s1 + $0x560] sm:$0xf]  ;;  %v4172_v43 = vor.u32 %v3386_v26, %v2313_v25  ;;  %v4174_v44 = vor.u32 %v3377_v27, %v2307_v30  ;;  %v3530_v52 = vld [vmem:[%s5476_s1 + $0x454] sm:$0xf0] }
  0x35   :  { %1723 = vmatpush.bf16.msrb.mxu1 %v2698_v37  ;;  %v2977_v37 = vld [vmem:[%s5476_s1 + $0x4e0] sm:$0xf]  ;;  %v3548_v40 = vld [vmem:[%s5476_s1 + $0x4e4] sm:$0xf0]  ;;  %v2969_v53 = vld [vmem:[%s5476_s1 + $0x4d0] sm:$0xf] }
  0x36   :  { %1737 = vmatpush.bf16.msrb.mxu2 %v2762_v38  ;;  %v3114_v38 = vor.u32 %v3582_v20, %v3113_v18  ;;  %v3105_v45 = vld [vmem:[%s5476_s1 + $0x5e0] sm:$0xf]  ;;  %v3580_v46 = vld [vmem:[%s5476_s1 + $0x5e4] sm:$0xf0]  ;;  %v2978_v49 = vor.u32 %v3548_v40, %v2977_v37  ;;  %v3033_v56 = vld [vmem:[%s5476_s1 + $0x550] sm:$0xf] }
  0x37   :  { %1751 = vmatpush.bf16.msrb.mxu3 %v2826_v42  ;;  %v3564_v42 = vld [vmem:[%s5476_s1 + $0x564] sm:$0xf0]  ;;  %v3106_v54 = vor.u32 %v3580_v46, %v3105_v45  ;;  %v3562_v57 = vld [vmem:[%s5476_s1 + $0x554] sm:$0xf0]  ;;  %v3097_v59 = vld [vmem:[%s5476_s1 + $0x5d0] sm:$0xf] }
  0x38   :  { %1710 = vmatpush.bf16.msrb.mxu0 %v2626_v48  ;;  %v2914_v48 = vor.u32 %v3532_v36, %v2913_v35  ;;  %v3578_v60 = vld [vmem:[%s5476_s1 + $0x5d4] sm:$0xf0]  ;;  %v2897_v0 = vld [vmem:[%s5476_s1 + $0x440] sm:$0xf]  ;;  %v3528_v2 = vld [vmem:[%s5476_s1 + $0x444] sm:$0xf0] }
  0x39   :  { %1724 = vmatpush.bf16.msrb.mxu1 %v2690_v50  ;;  %v3042_v50 = vor.u32 %v3564_v42, %v3041_v41  ;;  %v2961_v3 = vld [vmem:[%s5476_s1 + $0x4c0] sm:$0xf]  ;;  %v3098_v4 = vor.u32 %v3578_v60, %v3097_v59  ;;  %v3560_v7 = vld [vmem:[%s5476_s1 + $0x544] sm:$0xf0]  ;;  %v2889_v14 = vld [vmem:[%s5476_s1 + $0x430] sm:$0xf] }
  0x3a   :  { %1738 = vmatpush.bf16.msrb.mxu2 %v2754_v51  ;;  %v2905_v51 = vld [vmem:[%s5476_s1 + $0x450] sm:$0xf]  ;;  %v3089_v8 = vld [vmem:[%s5476_s1 + $0x5c0] sm:$0xf]  ;;  %v3576_v9 = vld [vmem:[%s5476_s1 + $0x5c4] sm:$0xf0] }
  0x3b   :  { %1752 = vmatpush.bf16.msrb.mxu3 %v2818_v55  ;;  %v3546_v55 = vld [vmem:[%s5476_s1 + $0x4d4] sm:$0xf0]  ;;  %v2906_v61 = vor.u32 %v3530_v52, %v2905_v51  ;;  %v2953_v16 = vld [vmem:[%s5476_s1 + $0x4b0] sm:$0xf]  ;;  %v3090_v18 = vor.u32 %v3576_v9, %v3089_v8  ;;  %v2881_v27 = vld [vmem:[%s5476_s1 + $0x420] sm:$0xf] }
  0x3c   :  { %1711 = vmatpush.bf16.msrb.mxu0 %v2618_v63  ;;  %v2970_v62 = vor.u32 %v3546_v55, %v2969_v53  ;;  %v3034_v63 = vor.u32 %v3562_v57, %v3033_v56  ;;  %v3526_v15 = vld [vmem:[%s5476_s1 + $0x434] sm:$0xf0]  ;;  %v3017_v20 = vld [vmem:[%s5476_s1 + $0x530] sm:$0xf]  ;;  %v3540_v31 = vld [vmem:[%s5476_s1 + $0x4a4] sm:$0xf0] }
  0x3d   :  { %1725 = vmatpush.bf16.msrb.mxu1 %v2682_v5  ;;  %v3544_v5 = vld [vmem:[%s5476_s1 + $0x4c4] sm:$0xf0]  ;;  %v3558_v21 = vld [vmem:[%s5476_s1 + $0x534] sm:$0xf0]  ;;  %v3081_v22 = vld [vmem:[%s5476_s1 + $0x5b0] sm:$0xf] }
  0x3e   :  { %1739 = vmatpush.bf16.msrb.mxu2 %v2746_v6  ;;  %v3025_v6 = vld [vmem:[%s5476_s1 + $0x540] sm:$0xf]  ;;  %v2962_v12 = vor.u32 %v3544_v5, %v2961_v3  ;;  %v3018_v26 = vor.u32 %v3558_v21, %v3017_v20  ;;  %v3572_v35 = vld [vmem:[%s5476_s1 + $0x5a4] sm:$0xf0]  ;;  %v2873_v37 = vld [vmem:[%s5476_s1 + $0x410] sm:$0xf] }
  0x3f   :  { %1753 = vmatpush.bf16.msrb.mxu3 %v2810_v11  ;;  %v2898_v11 = vor.u32 %v3528_v2, %v2897_v0  ;;  %v3026_v13 = vor.u32 %v3560_v7, %v3025_v6  ;;  %v3009_v32 = vld [vmem:[%s5476_s1 + $0x520] sm:$0xf]  ;;  %v3522_v41 = vld [vmem:[%s5476_s1 + $0x414] sm:$0xf0]  ;;  %v2937_v42 = vld [vmem:[%s5476_s1 + $0x490] sm:$0xf] }
  0x40   :  { %1712 = vmatpush.bf16.msrb.mxu0 %v2610_v19  ;;  %v3542_v19 = vld [vmem:[%s5476_s1 + $0x4b4] sm:$0xf0]  ;;  %v2865_v52 = vld [vmem:[%s5476_s1 + $0x400] sm:$0xf]  ;;  %v3520_v53 = vld [vmem:[%s5476_s1 + $0x404] sm:$0xf0] }
  0x41   :  { %1726 = vmatpush.bf16.msrb.mxu1 %v2674_v23  ;;  %v3574_v23 = vld [vmem:[%s5476_s1 + $0x5b4] sm:$0xf0]  ;;  %v2954_v25 = vor.u32 %v3542_v19, %v2953_v16  ;;  %v2929_v55 = vld [vmem:[%s5476_s1 + $0x480] sm:$0xf]  ;;  %v3536_v56 = vld [vmem:[%s5476_s1 + $0x484] sm:$0xf0]  ;;  %v2866_v9 = vor.u32 %v3520_v53, %v2865_v52 }
  0x42   :  { %1740 = vmatpush.bf16.msrb.mxu2 %v2738_v24  ;;  %v2890_v24 = vor.u32 %v3526_v15, %v2889_v14  ;;  %v3082_v30 = vor.u32 %v3574_v23, %v3081_v22  ;;  %v3538_v45 = vld [vmem:[%s5476_s1 + $0x494] sm:$0xf0]  ;;  %v2993_v57 = vld [vmem:[%s5476_s1 + $0x500] sm:$0xf]  ;;  %v3552_v59 = vld [vmem:[%s5476_s1 + $0x504] sm:$0xf0]  ;;  %v2930_v14 = vor.u32 %v3536_v56, %v2929_v55 }
  0x43   :  { %1754 = vmatpush.bf16.msrb.mxu3 %v2802_v28  ;;  %1713 = vmatmul.bf16.vlgmr.msrb.gmra.mxu0 %v4161_v39  ;;  %v3524_v28 = vld [vmem:[%s5476_s1 + $0x424] sm:$0xf0]  ;;  %v3570_v51 = vld [vmem:[%s5476_s1 + $0x594] sm:$0xf0]  ;;  %v2938_v60 = vor.u32 %v3538_v45, %v2937_v42  ;;  %v3177_v0 = vld [vmem:[%s5476_s1 + $0x670] sm:$0xf]  ;;  %v2994_v15 = vor.u32 %v3552_v59, %v2993_v57 }
  0x44   :  { %1761 = vmatpush.bf16.msra.mxu0 %v2922_v29  ;;  %1727 = vmatmul.bf16.vlgmr.msrb.gmra.mxu1 %v4174_v44  ;;  %v2945_v29 = vld [vmem:[%s5476_s1 + $0x4a0] sm:$0xf]  ;;  %v2882_v36 = vor.u32 %v3524_v28, %v2881_v27  ;;  %v3598_v3 = vld [vmem:[%s5476_s1 + $0x674] sm:$0xf0]  ;;  %v3305_v6 = vld [vmem:[%s5476_s1 + $0x770] sm:$0xf] }
  0x45   :  { %1775 = vmatpush.bf16.msra.mxu1 %v2986_v33  ;;  %1741 = vmatmul.bf16.vlgmr.msrb.gmra.mxu2 %v4172_v43  ;;  %v3556_v33 = vld [vmem:[%s5476_s1 + $0x524] sm:$0xf0]  ;;  %v3614_v5 = vld [vmem:[%s5476_s1 + $0x6f4] sm:$0xf0]  ;;  %v3369_v8 = vld [vmem:[%s5476_s1 + $0x7f0] sm:$0xf]  ;;  %v3178_v21 = vor.u32 %v3598_v3, %v3177_v0 }
  0x46   :  { %1789 = vmatpush.bf16.msra.mxu2 %v3050_v34  ;;  %1755 = vmatmul.bf16.vlgmr.msrb.gmra.mxu3 %v4182_v47  ;;  %v3073_v34 = vld [vmem:[%s5476_s1 + $0x5a0] sm:$0xf]  ;;  %v3010_v40 = vor.u32 %v3556_v33, %v3009_v32  ;;  %v3630_v7 = vld [vmem:[%s5476_s1 + $0x774] sm:$0xf0]  ;;  %v2329_v16 = vld [vmem:[%s5477_s0 + $0x28] sm:$0xf] }
  0x47   :  { %1803 = vmatpush.bf16.msra.mxu3 %v3114_v38  ;;  %v2946_v38 = vor.u32 %v3540_v31, %v2945_v29  ;;  %v3074_v46 = vor.u32 %v3572_v35, %v3073_v34  ;;  %v3379_v19 = vld [vmem:[%s5477_s0 + $0x24] sm:$0xf]  ;;  %v3380_v23 = vld [vmem:[%s5477_s0 + $0x2c] sm:$0xf]  ;;  %v3169_v27 = vld [vmem:[%s5476_s1 + $0x660] sm:$0xf] }
  0x48   :  { %1762 = vmatpush.bf16.msra.mxu0 %v2914_v48  ;;  %v3001_v48 = vld [vmem:[%s5476_s1 + $0x510] sm:$0xf]  ;;  %v2323_v22 = vld [vmem:[%s5477_s0 + $0x60] sm:$0xf0]  ;;  %v3596_v28 = vld [vmem:[%s5476_s1 + $0x664] sm:$0xf0] }
  0x49   :  { %1776 = vmatpush.bf16.msra.mxu1 %v2978_v49  ;;  %v3554_v49 = vld [vmem:[%s5476_s1 + $0x514] sm:$0xf0]  ;;  %v3233_v29 = vld [vmem:[%s5476_s1 + $0x6e0] sm:$0xf]  ;;  %v3612_v32 = vld [vmem:[%s5476_s1 + $0x6e4] sm:$0xf0] }
  0x4a   :  { %1790 = vmatpush.bf16.msra.mxu2 %v3042_v50  ;;  %v3065_v50 = vld [vmem:[%s5476_s1 + $0x590] sm:$0xf]  ;;  %v3297_v33 = vld [vmem:[%s5476_s1 + $0x760] sm:$0xf]  ;;  %v3628_v34 = vld [vmem:[%s5476_s1 + $0x764] sm:$0xf0]  ;;  %v3234_v42 = vor.u32 %v3612_v32, %v3233_v29 }
  0x4b   :  { %1804 = vmatpush.bf16.msra.mxu3 %v3106_v54  ;;  %v2874_v54 = vor.u32 %v3522_v41, %v2873_v37  ;;  %v3066_v2 = vor.u32 %v3570_v51, %v3065_v50  ;;  %v3361_v37 = vld [vmem:[%s5476_s1 + $0x7e0] sm:$0xf]  ;;  %v3170_v41 = vor.u32 %v3596_v28, %v3169_v27  ;;  %v3298_v45 = vor.u32 %v3628_v34, %v3297_v33  ;;  %v3610_v51 = vld [vmem:[%s5476_s1 + $0x6d4] sm:$0xf0]  ;;  %v3289_v52 = vld [vmem:[%s5476_s1 + $0x750] sm:$0xf] }
  0x4c   :  { %1763 = vmatpush.bf16.msra.mxu0 %v2906_v61  ;;  %v3002_v61 = vor.u32 %v3554_v49, %v3001_v48  ;;  %v3594_v48 = vld [vmem:[%s5476_s1 + $0x654] sm:$0xf0]  ;;  %v3225_v49 = vld [vmem:[%s5476_s1 + $0x6d0] sm:$0xf]  ;;  %v3608_v0 = vld [vmem:[%s5476_s1 + $0x6c4] sm:$0xf0] }
  0x4d   :  { %1777 = vmatpush.bf16.msra.mxu1 %v2970_v62  ;;  %v3057_v62 = vld [vmem:[%s5476_s1 + $0x580] sm:$0xf]  ;;  %v3626_v53 = vld [vmem:[%s5476_s1 + $0x754] sm:$0xf0]  ;;  %v3226_v57 = vor.u32 %v3610_v51, %v3225_v49  ;;  %v3624_v3 = vld [vmem:[%s5476_s1 + $0x744] sm:$0xf0] }
  0x4e   :  { %1791 = vmatpush.bf16.msra.mxu2 %v3034_v63  ;;  %v3568_v63 = vld [vmem:[%s5476_s1 + $0x584] sm:$0xf0]  ;;  %v3642_v55 = vld [vmem:[%s5476_s1 + $0x7d4] sm:$0xf0]  ;;  %v3290_v59 = vor.u32 %v3626_v53, %v3289_v52  ;;  %v3265_v28 = vld [vmem:[%s5476_s1 + $0x720] sm:$0xf] }
  0x4f   :  { %1805 = vmatpush.bf16.msra.mxu3 %v3098_v4  ;;  %v3241_v4 = vld [vmem:[%s5476_s1 + $0x6f0] sm:$0xf]  ;;  %v3058_v20 = vor.u32 %v3568_v63, %v3057_v62  ;;  %v3217_v62 = vld [vmem:[%s5476_s1 + $0x6c0] sm:$0xf]  ;;  %v3604_v27 = vld [vmem:[%s5476_s1 + $0x6a4] sm:$0xf0] }
  0x50   :  { %1764 = vmatpush.bf16.msra.mxu0 %v2898_v11  ;;  %v3646_v11 = vld [vmem:[%s5476_s1 + $0x7f4] sm:$0xf0]  ;;  %v3620_v29 = vld [vmem:[%s5476_s1 + $0x724] sm:$0xf0]  ;;  %v3129_v34 = vld [vmem:[%s5476_s1 + $0x610] sm:$0xf] }
  0x51   :  { %1778 = vmatpush.bf16.msra.mxu1 %v2962_v12  ;;  %v2321_v12 = vld [vmem:[%s5477_s0 + $0x20] sm:$0xf]  ;;  %v3636_v32 = vld [vmem:[%s5476_s1 + $0x7a4] sm:$0xf0]  ;;  %v3618_v49 = vld [vmem:[%s5476_s1 + $0x714] sm:$0xf0] }
  0x52   :  { %1792 = vmatpush.bf16.msra.mxu2 %v3026_v13  ;;  %v3387_v13 = vld [vmem:[%s5477_s0 + $0x5c] sm:$0xf0]  ;;  %v3634_v51 = vld [vmem:[%s5476_s1 + $0x794] sm:$0xf0]  ;;  %v3584_v53 = vld [vmem:[%s5476_s1 + $0x604] sm:$0xf0] }
  0x53   :  { %1806 = vmatpush.bf16.msra.mxu3 %v3090_v18  ;;  %v3388_v18 = vld [vmem:[%s5477_s0 + $0x64] sm:$0xf0]  ;;  %v4389_v31 = vor.u32 %v3387_v13, %v2321_v12  ;;  %v3209_v12 = vld [vmem:[%s5476_s1 + $0x6b0] sm:$0xf]  ;;  %v3121_v52 = vld [vmem:[%s5476_s1 + $0x600] sm:$0xf] }
  0x54   :  { %1765 = vmatpush.bf16.msra.mxu0 %v2890_v24  ;;  %v2331_v24 = vld [vmem:[%s5477_s0 + $0x68] sm:$0xf0]  ;;  %v4400_v35 = vor.u32 %v3388_v18, %v2329_v16  ;;  %v3622_v16 = vld [vmem:[%s5476_s1 + $0x734] sm:$0xf0]  ;;  %v3337_v18 = vld [vmem:[%s5476_s1 + $0x7b0] sm:$0xf] }
  0x55   :  { %1779 = vmatpush.bf16.msra.mxu1 %v2954_v25  ;;  %v3242_v25 = vor.u32 %v3614_v5, %v3241_v4  ;;  %v3345_v4 = vld [vmem:[%s5476_s1 + $0x7c0] sm:$0xf]  ;;  %v3640_v5 = vld [vmem:[%s5476_s1 + $0x7c4] sm:$0xf0] }
  0x56   :  { %1793 = vmatpush.bf16.msra.mxu2 %v3018_v26  ;;  %v3306_v26 = vor.u32 %v3630_v7, %v3305_v6  ;;  %v3218_v7 = vor.u32 %v3608_v0, %v3217_v62  ;;  %v3346_v13 = vor.u32 %v3640_v5, %v3345_v4  ;;  %v3313_v62 = vld [vmem:[%s5476_s1 + $0x780] sm:$0xf]  ;;  %v3405_v0 = vld [vmem:[%s5476_s1 + $0x74] sm:$0xf]  ;;  %v2475_v5 = vld [vmem:[%s5476_s1 + $0xf8] sm:$0xf0] }
  0x57   :  { %1807 = vmatpush.bf16.msra.mxu3 %v3082_v30  ;;  %v3370_v30 = vor.u32 %v3646_v11, %v3369_v8  ;;  %v3590_v11 = vld [vmem:[%s5476_s1 + $0x634] sm:$0xf0]  ;;  %v3421_v4 = vld [vmem:[%s5476_s1 + $0xf4] sm:$0xf] }
  0x58   :  { %1766 = vmatpush.bf16.msra.mxu0 %v2882_v36  ;;  %v4402_v36 = vor.u32 %v3379_v19, %v2323_v22  ;;  %v3638_v19 = vld [vmem:[%s5476_s1 + $0x7b4] sm:$0xf0] }
  0x59   :  { %1780 = vmatpush.bf16.msra.mxu1 %v2946_v38  ;;  %v3644_v38 = vld [vmem:[%s5476_s1 + $0x7e4] sm:$0xf0] }
  0x5a   :  { %1794 = vmatpush.bf16.msra.mxu2 %v3010_v40  ;;  %v4410_v40 = vor.u32 %v3380_v23, %v2331_v24  ;;  %v3362_v50 = vor.u32 %v3644_v38, %v3361_v37  ;;  %v3137_v23 = vld [vmem:[%s5476_s1 + $0x620] sm:$0xf]  ;;  %v3588_v24 = vld [vmem:[%s5476_s1 + $0x624] sm:$0xf0]  ;;  %v3266_v38 = vor.u32 %v3620_v29, %v3265_v28  ;;  %v2403_v28 = vld [vmem:[%s5476_s1 + $0x68] sm:$0xf0] }
  0x5b   :  { %1808 = vmatpush.bf16.msra.mxu3 %v3074_v46  ;;  %v3161_v46 = vld [vmem:[%s5476_s1 + $0x650] sm:$0xf]  ;;  %v3138_v33 = vor.u32 %v3588_v24, %v3137_v23  ;;  %v3382_v23 = vld [vmem:[%s5477_s0 + $0x3c] sm:$0xf]  ;;  %v3419_v29 = vld [vmem:[%s5476_s1 + $0xe4] sm:$0xf] }
  0x5c   :  { %1767 = vmatpush.bf16.msra.mxu0 %v2874_v54  ;;  %v3353_v54 = vld [vmem:[%s5476_s1 + $0x7d0] sm:$0xf]  ;;  %v3162_v56 = vor.u32 %v3594_v48, %v3161_v46  ;;  %v2347_v24 = vld [vmem:[%s5477_s0 + $0x78] sm:$0xf0] }
  0x5d   :  { %1781 = vmatpush.bf16.msra.mxu1 %v2938_v60  ;;  %v3153_v60 = vld [vmem:[%s5476_s1 + $0x640] sm:$0xf]  ;;  %v3354_v63 = vor.u32 %v3642_v55, %v3353_v54  ;;  %v3257_v48 = vld [vmem:[%s5476_s1 + $0x710] sm:$0xf] }
  0x5e   :  { %1795 = vmatpush.bf16.msra.mxu2 %v3002_v61  ;;  %v3592_v61 = vld [vmem:[%s5476_s1 + $0x644] sm:$0xf0]  ;;  %v3185_v55 = vld [vmem:[%s5476_s1 + $0x680] sm:$0xf] }
  0x5f   :  { %1809 = vmatpush.bf16.msra.mxu3 %v3066_v2  ;;  %v3281_v2 = vld [vmem:[%s5476_s1 + $0x740] sm:$0xf]  ;;  %v3154_v6 = vor.u32 %v3592_v61, %v3153_v60  ;;  %v3258_v61 = vor.u32 %v3618_v49, %v3257_v48 }
  0x60   :  { %1768 = vmatpush.bf16.msra.mxu0 %v2866_v9  ;;  %v3282_v8 = vor.u32 %v3624_v3, %v3281_v2  ;;  %v3145_v9 = vld [vmem:[%s5476_s1 + $0x630] sm:$0xf]  ;;  %v2411_v3 = vld [vmem:[%s5476_s1 + $0x78] sm:$0xf0] }
  0x61   :  { %1782 = vmatpush.bf16.msra.mxu1 %v2930_v14  ;;  %v3606_v14 = vld [vmem:[%s5476_s1 + $0x6b4] sm:$0xf0] }
  0x62   :  { %1796 = vmatpush.bf16.msra.mxu2 %v2994_v15  ;;  %v3273_v15 = vld [vmem:[%s5476_s1 + $0x730] sm:$0xf] }
  0x63   :  { %1810 = vmatpush.bf16.msra.mxu3 %v3058_v20  ;;  %1769 = vmatmul.bf16.vlgmr.msra.gmra.mxu0 %v4389_v31  ;;  %v3146_v20 = vor.u32 %v3590_v11, %v3145_v9  ;;  %v3274_v22 = vor.u32 %v3622_v16, %v3273_v15  ;;  %v3122_v9 = vor.u32 %v3584_v53, %v3121_v52  ;;  %v2603_v11 = vld [vmem:[%s5476_s1 + $0x1f8] sm:$0xf0]  ;;  %v2345_v16 = vld [vmem:[%s5477_s0 + $0x38] sm:$0xf]  ;;  %v3417_v53 = vld [vmem:[%s5476_s1 + $0xd4] sm:$0xf] }
  0x64   :  { %1817 = vmatpush.bf16.msrb.mxu0 %v3178_v21  ;;  %1783 = vmatmul.bf16.vlgmr.msra.gmra.mxu1 %v4402_v36  ;;  %v3210_v21 = vor.u32 %v3606_v14, %v3209_v12  ;;  %v2337_v12 = vld [vmem:[%s5477_s0 + $0x30] sm:$0xf]  ;;  %v2395_v52 = vld [vmem:[%s5476_s1 + $0x58] sm:$0xf0] }
  0x65   :  { %1831 = vmatpush.bf16.msrb.mxu1 %v3242_v25  ;;  %1797 = vmatmul.bf16.vlgmr.msra.gmra.mxu2 %v4400_v35  ;;  %v3201_v25 = vld [vmem:[%s5476_s1 + $0x6a0] sm:$0xf] }
  0x66   :  { %1845 = vmatpush.bf16.msrb.mxu2 %v3306_v26  ;;  %1811 = vmatmul.bf16.vlgmr.msra.gmra.mxu3 %v4410_v40  ;;  %v3338_v26 = vor.u32 %v3638_v19, %v3337_v18  ;;  %v3202_v37 = vor.u32 %v3604_v27, %v3201_v25  ;;  %v3390_v18 = vld [vmem:[%s5477_s0 + $0x74] sm:$0xf0]  ;;  %v3381_v19 = vld [vmem:[%s5477_s0 + $0x34] sm:$0xf]  ;;  %v2478_v25 = vor.u32 %v3421_v4, %v2475_v5  ;;  %v3403_v27 = vld [vmem:[%s5476_s1 + $0x64] sm:$0xf] }
  0x67   :  { %1859 = vmatpush.bf16.msrb.mxu3 %v3370_v30  ;;  %v3329_v30 = vld [vmem:[%s5476_s1 + $0x7a0] sm:$0xf]  ;;  %v2406_v48 = vor.u32 %v3403_v27, %v2403_v28  ;;  %v2451_v5 = vld [vmem:[%s5476_s1 + $0xc8] sm:$0xf0]  ;;  %v3395_v27 = vld [vmem:[%s5476_s1 + $0x24] sm:$0xf] }
  0x68   :  { %1818 = vmatpush.bf16.msrb.mxu0 %v3170_v41  ;;  %v3586_v41 = vld [vmem:[%s5476_s1 + $0x614] sm:$0xf0]  ;;  %v3330_v46 = vor.u32 %v3636_v32, %v3329_v30  ;;  %v2371_v28 = vld [vmem:[%s5476_s1 + $0x28] sm:$0xf0] }
  0x69   :  { %1832 = vmatpush.bf16.msrb.mxu1 %v3234_v42  ;;  %v3193_v42 = vld [vmem:[%s5476_s1 + $0x690] sm:$0xf]  ;;  %v3130_v54 = vor.u32 %v3586_v41, %v3129_v34  ;;  %v3435_v34 = vld [vmem:[%s5476_s1 + $0x164] sm:$0xf] }
  0x6a   :  { %1846 = vmatpush.bf16.msrb.mxu2 %v3298_v45  ;;  %v3602_v45 = vld [vmem:[%s5476_s1 + $0x694] sm:$0xf0] }
  0x6b   :  { %1860 = vmatpush.bf16.msrb.mxu3 %v3362_v50  ;;  %v3321_v50 = vld [vmem:[%s5476_s1 + $0x790] sm:$0xf]  ;;  %v3194_v60 = vor.u32 %v3602_v45, %v3193_v42  ;;  %v3451_v42 = vld [vmem:[%s5476_s1 + $0x1e4] sm:$0xf]  ;;  %v2595_v45 = vld [vmem:[%s5476_s1 + $0x1e8] sm:$0xf0] }
  0x6c   :  { %1819 = vmatpush.bf16.msrb.mxu0 %v3162_v56  ;;  %v3600_v56 = vld [vmem:[%s5476_s1 + $0x684] sm:$0xf0]  ;;  %v3322_v2 = vor.u32 %v3634_v51, %v3321_v50  ;;  %v3401_v51 = vld [vmem:[%s5476_s1 + $0x54] sm:$0xf] }
  0x6d   :  { %1833 = vmatpush.bf16.msrb.mxu1 %v3226_v57  ;;  %v3249_v57 = vld [vmem:[%s5476_s1 + $0x700] sm:$0xf]  ;;  %v3186_v14 = vor.u32 %v3600_v56, %v3185_v55  ;;  %v2459_v55 = vld [vmem:[%s5476_s1 + $0xd8] sm:$0xf0]  ;;  %v3433_v56 = vld [vmem:[%s5476_s1 + $0x154] sm:$0xf] }
  0x6e   :  { %1847 = vmatpush.bf16.msrb.mxu2 %v3290_v59  ;;  %v3616_v59 = vld [vmem:[%s5476_s1 + $0x704] sm:$0xf0] }
  0x6f   :  { %1861 = vmatpush.bf16.msrb.mxu3 %v3354_v63  ;;  %v3632_v63 = vld [vmem:[%s5476_s1 + $0x784] sm:$0xf0]  ;;  %v3250_v15 = vor.u32 %v3616_v59, %v3249_v57  ;;  %v2523_v57 = vld [vmem:[%s5476_s1 + $0x158] sm:$0xf0]  ;;  %v3449_v59 = vld [vmem:[%s5476_s1 + $0x1d4] sm:$0xf] }
  0x70   :  { %1820 = vmatpush.bf16.msrb.mxu0 %v3154_v6  ;;  %v3437_v6 = vld [vmem:[%s5476_s1 + $0x174] sm:$0xf] }
  0x71   :  { %1834 = vmatpush.bf16.msrb.mxu1 %v3218_v7  ;;  %v2539_v7 = vld [vmem:[%s5476_s1 + $0x178] sm:$0xf0] }
  0x72   :  { %1848 = vmatpush.bf16.msrb.mxu2 %v3282_v8  ;;  %v3453_v8 = vld [vmem:[%s5476_s1 + $0x1f4] sm:$0xf] }
  0x73   :  { %1862 = vmatpush.bf16.msrb.mxu3 %v3346_v13  ;;  %v3389_v13 = vld [vmem:[%s5477_s0 + $0x6c] sm:$0xf0]  ;;  %v2606_v30 = vor.u32 %v3453_v8, %v2603_v11  ;;  %v3447_v8 = vld [vmem:[%s5476_s1 + $0x1c4] sm:$0xf] }
  0x74   :  { %1821 = vmatpush.bf16.msrb.mxu0 %v3146_v20  ;;  %v3314_v20 = vor.u32 %v3632_v63, %v3313_v62  ;;  %v4617_v32 = vor.u32 %v3389_v13, %v2337_v12  ;;  %v2462_v62 = vor.u32 %v3417_v53, %v2459_v55  ;;  %v2526_v63 = vor.u32 %v3433_v56, %v2523_v57  ;;  %v3409_v53 = vld [vmem:[%s5476_s1 + $0x94] sm:$0xf]  ;;  %v2427_v55 = vld [vmem:[%s5476_s1 + $0x98] sm:$0xf0] }
  0x75   :  { %1835 = vmatpush.bf16.msrb.mxu1 %v3210_v21  ;;  %v2414_v21 = vor.u32 %v3405_v0, %v2411_v3  ;;  %v3399_v0 = vld [vmem:[%s5476_s1 + $0x44] sm:$0xf]  ;;  %v3425_v56 = vld [vmem:[%s5476_s1 + $0x114] sm:$0xf]  ;;  %v2491_v57 = vld [vmem:[%s5476_s1 + $0x118] sm:$0xf0] }
  0x76   :  { %1849 = vmatpush.bf16.msrb.mxu2 %v3274_v22  ;;  %v2339_v22 = vld [vmem:[%s5477_s0 + $0x70] sm:$0xf0]  ;;  %v3415_v3 = vld [vmem:[%s5476_s1 + $0xc4] sm:$0xf] }
  0x77   :  { %1863 = vmatpush.bf16.msrb.mxu3 %v3338_v26  ;;  %v2542_v26 = vor.u32 %v3437_v6, %v2539_v7  ;;  %v4630_v41 = vor.u32 %v3381_v19, %v2339_v22  ;;  %v3431_v6 = vld [vmem:[%s5476_s1 + $0x144] sm:$0xf]  ;;  %v2515_v7 = vld [vmem:[%s5476_s1 + $0x148] sm:$0xf0]  ;;  %v2454_v12 = vor.u32 %v3415_v3, %v2451_v5  ;;  %v2443_v19 = vld [vmem:[%s5476_s1 + $0xb8] sm:$0xf0] }
  0x78   :  { %1822 = vmatpush.bf16.msrb.mxu0 %v3138_v33  ;;  %v2467_v33 = vld [vmem:[%s5476_s1 + $0xe8] sm:$0xf0]  ;;  %v2518_v13 = vor.u32 %v3431_v6, %v2515_v7  ;;  %v3445_v22 = vld [vmem:[%s5476_s1 + $0x1b4] sm:$0xf]  ;;  %v3407_v3 = vld [vmem:[%s5476_s1 + $0x84] sm:$0xf] }
  0x79   :  { %1836 = vmatpush.bf16.msrb.mxu1 %v3202_v37  ;;  %v2531_v37 = vld [vmem:[%s5476_s1 + $0x168] sm:$0xf0]  ;;  %v2470_v49 = vor.u32 %v3419_v29, %v2467_v33  ;;  %v3411_v29 = vld [vmem:[%s5476_s1 + $0xa4] sm:$0xf] }
  0x7a   :  { %1850 = vmatpush.bf16.msrb.mxu2 %v3266_v38  ;;  %v4628_v38 = vor.u32 %v3390_v18, %v2345_v16  ;;  %v2534_v50 = vor.u32 %v3435_v34, %v2531_v37  ;;  %v3413_v16 = vld [vmem:[%s5476_s1 + $0xb4] sm:$0xf]  ;;  %v2435_v33 = vld [vmem:[%s5476_s1 + $0xa8] sm:$0xf0]  ;;  %v3427_v34 = vld [vmem:[%s5476_s1 + $0x124] sm:$0xf] }
  0x7b   :  { %1864 = vmatpush.bf16.msrb.mxu3 %v3330_v46  ;;  %v4638_v46 = vor.u32 %v3382_v23, %v2347_v24  ;;  %v2571_v23 = vld [vmem:[%s5476_s1 + $0x1b8] sm:$0xf0]  ;;  %v2499_v37 = vld [vmem:[%s5476_s1 + $0x128] sm:$0xf0]  ;;  %v3423_v5 = vld [vmem:[%s5476_s1 + $0x104] sm:$0xf] }
  0x7c   :  { %1823 = vmatpush.bf16.msrb.mxu0 %v3130_v54  ;;  %v2598_v54 = vor.u32 %v3451_v42, %v2595_v45  ;;  %v3443_v42 = vld [vmem:[%s5476_s1 + $0x1a4] sm:$0xf]  ;;  %v2563_v45 = vld [vmem:[%s5476_s1 + $0x1a8] sm:$0xf0] }
  0x7d   :  { %1837 = vmatpush.bf16.msrb.mxu1 %v3194_v60  ;;  %v2587_v60 = vld [vmem:[%s5476_s1 + $0x1d8] sm:$0xf0]  ;;  %v2483_v7 = vld [vmem:[%s5476_s1 + $0x108] sm:$0xf0] }
  0x7e   :  { %1851 = vmatpush.bf16.msrb.mxu2 %v3258_v61  ;;  %v2398_v61 = vor.u32 %v3401_v51, %v2395_v52  ;;  %v2590_v4 = vor.u32 %v3449_v59, %v2587_v60  ;;  %v3393_v51 = vld [vmem:[%s5476_s1 + $0x14] sm:$0xf]  ;;  %v2363_v52 = vld [vmem:[%s5476_s1 + $0x18] sm:$0xf0] }
  0x7f   :  { %1865 = vmatpush.bf16.msrb.mxu3 %v3322_v2  ;;  %v2387_v2 = vld [vmem:[%s5476_s1 + $0x48] sm:$0xf0]  ;;  %v3441_v59 = vld [vmem:[%s5476_s1 + $0x194] sm:$0xf]  ;;  %v2555_v60 = vld [vmem:[%s5476_s1 + $0x198] sm:$0xf0] }
  0x80   :  { %1824 = vmatpush.bf16.msrb.mxu0 %v3122_v9  ;;  %v2579_v9 = vld [vmem:[%s5476_s1 + $0x1c8] sm:$0xf0]  ;;  %v2390_v11 = vor.u32 %v3399_v0, %v2387_v2  ;;  %v2430_v0 = vor.u32 %v3409_v53, %v2427_v55  ;;  %v2494_v2 = vor.u32 %v3425_v56, %v2491_v57  ;;  %v2558_v6 = vor.u32 %v3441_v59, %v2555_v60  ;;  %v3481_v53 = vld [vmem:[%s5476_s1 + $0x2d4] sm:$0xf]  ;;  %v2715_v55 = vld [vmem:[%s5476_s1 + $0x2d8] sm:$0xf0] }
  0x81   :  { %1838 = vmatpush.bf16.msrb.mxu1 %v3186_v14  ;;  %v3397_v14 = vld [vmem:[%s5476_s1 + $0x34] sm:$0xf]  ;;  %v2582_v18 = vor.u32 %v3447_v8, %v2579_v9  ;;  %v3439_v8 = vld [vmem:[%s5476_s1 + $0x184] sm:$0xf]  ;;  %v2547_v9 = vld [vmem:[%s5476_s1 + $0x188] sm:$0xf0] }
  0x82   :  { %1852 = vmatpush.bf16.msrb.mxu2 %v3250_v15  ;;  %v2379_v15 = vld [vmem:[%s5476_s1 + $0x38] sm:$0xf0]  ;;  %v3497_v56 = vld [vmem:[%s5476_s1 + $0x354] sm:$0xf] }
  0x83   :  { %1866 = vmatpush.bf16.msrb.mxu3 %v3314_v20  ;;  %1825 = vmatmul.bf16.vlgmr.msrb.gmra.mxu0 %v4617_v32  ;;  %v3429_v20 = vld [vmem:[%s5476_s1 + $0x134] sm:$0xf]  ;;  %v2382_v24 = vor.u32 %v3397_v14, %v2379_v15  ;;  %v2731_v15 = vld [vmem:[%s5476_s1 + $0x2f8] sm:$0xf0] }
  0x84   :  { %1873 = vmatpush.bf16.msra.mxu0 %v2414_v21  ;;  %1839 = vmatmul.bf16.vlgmr.msrb.gmra.mxu1 %v4630_v41  ;;  %v2507_v21 = vld [vmem:[%s5476_s1 + $0x138] sm:$0xf0]  ;;  %v3513_v59 = vld [vmem:[%s5476_s1 + $0x3d4] sm:$0xf] }
  0x85   :  { %1887 = vmatpush.bf16.msra.mxu1 %v2478_v25  ;;  %1853 = vmatmul.bf16.vlgmr.msrb.gmra.mxu2 %v4628_v38  ;;  %v2446_v25 = vor.u32 %v3413_v16, %v2443_v19  ;;  %v3501_v16 = vld [vmem:[%s5476_s1 + $0x374] sm:$0xf]  ;;  %v2779_v57 = vld [vmem:[%s5476_s1 + $0x358] sm:$0xf0] }
  0x86   :  { %1901 = vmatpush.bf16.msra.mxu2 %v2542_v26  ;;  %1867 = vmatmul.bf16.vlgmr.msrb.gmra.mxu3 %v4638_v46  ;;  %v2510_v26 = vor.u32 %v3429_v20, %v2507_v21  ;;  %v2486_v20 = vor.u32 %v3423_v5, %v2483_v7  ;;  %v3517_v21 = vld [vmem:[%s5476_s1 + $0x3f4] sm:$0xf]  ;;  %v2843_v60 = vld [vmem:[%s5476_s1 + $0x3d8] sm:$0xf0]  ;;  %v2835_v5 = vld [vmem:[%s5476_s1 + $0x3c8] sm:$0xf0] }
  0x87   :  { %1915 = vmatpush.bf16.msra.mxu3 %v2606_v30  ;;  %v2574_v30 = vor.u32 %v3445_v22, %v2571_v23  ;;  %v2859_v22 = vld [vmem:[%s5476_s1 + $0x3f8] sm:$0xf0]  ;;  %v2550_v23 = vor.u32 %v3439_v8, %v2547_v9  ;;  %v3461_v9 = vld [vmem:[%s5476_s1 + $0x234] sm:$0xf] }
  0x88   :  { %1874 = vmatpush.bf16.msra.mxu0 %v2406_v48  ;;  %v2374_v48 = vor.u32 %v3395_v27, %v2371_v28  ;;  %v3467_v27 = vld [vmem:[%s5476_s1 + $0x264] sm:$0xf]  ;;  %v2659_v28 = vld [vmem:[%s5476_s1 + $0x268] sm:$0xf0] }
  0x89   :  { %1888 = vmatpush.bf16.msra.mxu1 %v2470_v49  ;;  %v2438_v49 = vor.u32 %v3411_v29, %v2435_v33  ;;  %v3483_v29 = vld [vmem:[%s5476_s1 + $0x2e4] sm:$0xf]  ;;  %v2723_v33 = vld [vmem:[%s5476_s1 + $0x2e8] sm:$0xf0] }
  0x8a   :  { %1902 = vmatpush.bf16.msra.mxu2 %v2534_v50  ;;  %v2502_v50 = vor.u32 %v3427_v34, %v2499_v37  ;;  %v3499_v34 = vld [vmem:[%s5476_s1 + $0x364] sm:$0xf]  ;;  %v2787_v37 = vld [vmem:[%s5476_s1 + $0x368] sm:$0xf0] }
  0x8b   :  { %1916 = vmatpush.bf16.msra.mxu3 %v2598_v54  ;;  %v2566_v54 = vor.u32 %v3443_v42, %v2563_v45  ;;  %v3515_v42 = vld [vmem:[%s5476_s1 + $0x3e4] sm:$0xf]  ;;  %v2851_v45 = vld [vmem:[%s5476_s1 + $0x3e8] sm:$0xf0] }
  0x8c   :  { %1875 = vmatpush.bf16.msra.mxu0 %v2398_v61  ;;  %v2366_v61 = vor.u32 %v3393_v51, %v2363_v52  ;;  %v3465_v51 = vld [vmem:[%s5476_s1 + $0x254] sm:$0xf]  ;;  %v2651_v52 = vld [vmem:[%s5476_s1 + $0x258] sm:$0xf0] }
  0x8d   :  { %1889 = vmatpush.bf16.msra.mxu1 %v2462_v62  ;;  %v3391_v62 = vld [vmem:[%s5476_s1 + $0x4] sm:$0xf] }
  0x8e   :  { %1903 = vmatpush.bf16.msra.mxu2 %v2526_v63  ;;  %v2355_v63 = vld [vmem:[%s5476_s1 + $0x8] sm:$0xf0] }
  0x8f   :  { %1917 = vmatpush.bf16.msra.mxu3 %v2590_v4  ;;  %v2419_v4 = vld [vmem:[%s5476_s1 + $0x88] sm:$0xf0]  ;;  %v2358_v14 = vor.u32 %v3391_v62, %v2355_v63  ;;  %v2718_v62 = vor.u32 %v3481_v53, %v2715_v55  ;;  %v3463_v63 = vld [vmem:[%s5476_s1 + $0x244] sm:$0xf]  ;;  %v2619_v53 = vld [vmem:[%s5476_s1 + $0x218] sm:$0xf0] }
  0x90   :  { %1876 = vmatpush.bf16.msra.mxu0 %v2390_v11  ;;  %v3469_v11 = vld [vmem:[%s5476_s1 + $0x274] sm:$0xf]  ;;  %v2422_v19 = vor.u32 %v3407_v3, %v2419_v4  ;;  %v2771_v3 = vld [vmem:[%s5476_s1 + $0x348] sm:$0xf0]  ;;  %v3511_v4 = vld [vmem:[%s5476_s1 + $0x3c4] sm:$0xf] }
  0x91   :  { %1890 = vmatpush.bf16.msra.mxu1 %v2454_v12  ;;  %v2667_v12 = vld [vmem:[%s5476_s1 + $0x278] sm:$0xf0] }
  0x92   :  { %1904 = vmatpush.bf16.msra.mxu2 %v2518_v13  ;;  %v3485_v13 = vld [vmem:[%s5476_s1 + $0x2f4] sm:$0xf] }
  0x93   :  { %1918 = vmatpush.bf16.msra.mxu3 %v2582_v18  ;;  %v2795_v18 = vld [vmem:[%s5476_s1 + $0x378] sm:$0xf0] }
  0x94   :  { %1877 = vmatpush.bf16.msra.mxu0 %v2382_v24  ;;  %v2670_v24 = vor.u32 %v3469_v11, %v2667_v12  ;;  %v2635_v11 = vld [vmem:[%s5476_s1 + $0x238] sm:$0xf0]  ;;  %v3477_v12 = vld [vmem:[%s5476_s1 + $0x2b4] sm:$0xf] }
  0x95   :  { %1891 = vmatpush.bf16.msra.mxu1 %v2446_v25  ;;  %v2734_v25 = vor.u32 %v3485_v13, %v2731_v15  ;;  %v2699_v15 = vld [vmem:[%s5476_s1 + $0x2b8] sm:$0xf0] }
  0x96   :  { %1905 = vmatpush.bf16.msra.mxu2 %v2510_v26  ;;  %v2798_v26 = vor.u32 %v3501_v16, %v2795_v18  ;;  %v3493_v16 = vld [vmem:[%s5476_s1 + $0x334] sm:$0xf]  ;;  %v2763_v18 = vld [vmem:[%s5476_s1 + $0x338] sm:$0xf0] }
  0x97   :  { %1919 = vmatpush.bf16.msra.mxu3 %v2574_v30  ;;  %v2862_v30 = vor.u32 %v3517_v21, %v2859_v22  ;;  %v2638_v22 = vor.u32 %v3461_v9, %v2635_v11  ;;  %v2739_v9 = vld [vmem:[%s5476_s1 + $0x308] sm:$0xf0]  ;;  %v3503_v11 = vld [vmem:[%s5476_s1 + $0x384] sm:$0xf] }
  0x98   :  { %1878 = vmatpush.bf16.msra.mxu0 %v2374_v48  ;;  %v2662_v48 = vor.u32 %v3467_v27, %v2659_v28  ;;  %v2627_v27 = vld [vmem:[%s5476_s1 + $0x228] sm:$0xf0]  ;;  %v3475_v28 = vld [vmem:[%s5476_s1 + $0x2a4] sm:$0xf] }
  0x99   :  { %1892 = vmatpush.bf16.msra.mxu1 %v2438_v49  ;;  %v2726_v49 = vor.u32 %v3483_v29, %v2723_v33  ;;  %v3491_v33 = vld [vmem:[%s5476_s1 + $0x324] sm:$0xf] }
  0x9a   :  { %1906 = vmatpush.bf16.msra.mxu2 %v2502_v50  ;;  %v2790_v50 = vor.u32 %v3499_v34, %v2787_v37  ;;  %v2755_v34 = vld [vmem:[%s5476_s1 + $0x328] sm:$0xf0] }
  0x9b   :  { %1920 = vmatpush.bf16.msra.mxu3 %v2566_v54  ;;  %v2854_v54 = vor.u32 %v3515_v42, %v2851_v45  ;;  %v3507_v42 = vld [vmem:[%s5476_s1 + $0x3a4] sm:$0xf]  ;;  %v2819_v45 = vld [vmem:[%s5476_s1 + $0x3a8] sm:$0xf0] }
  0x9c   :  { %1879 = vmatpush.bf16.msra.mxu0 %v2366_v61  ;;  %v2654_v61 = vor.u32 %v3465_v51, %v2651_v52  ;;  %v2758_v51 = vor.u32 %v3491_v33, %v2755_v34  ;;  %v3457_v52 = vld [vmem:[%s5476_s1 + $0x214] sm:$0xf]  ;;  %v2822_v55 = vor.u32 %v3507_v42, %v2819_v45  ;;  %v3531_v34 = vld [vmem:[%s5476_s1 + $0x464] sm:$0xf] }
  0x9d   :  { %1893 = vmatpush.bf16.msra.mxu1 %v2430_v0  ;;  %v2643_v0 = vld [vmem:[%s5476_s1 + $0x248] sm:$0xf0]  ;;  %v3547_v42 = vld [vmem:[%s5476_s1 + $0x4e4] sm:$0xf] }
  0x9e   :  { %1907 = vmatpush.bf16.msra.mxu2 %v2494_v2  ;;  %v3495_v2 = vld [vmem:[%s5476_s1 + $0x344] sm:$0xf] }
  0x9f   :  { %1921 = vmatpush.bf16.msra.mxu3 %v2558_v6  ;;  %v2646_v6 = vor.u32 %v3463_v63, %v2643_v0  ;;  %v2774_v8 = vor.u32 %v3495_v2, %v2771_v3 }
  0xa0   :  { %1880 = vmatpush.bf16.msra.mxu0 %v2358_v14  ;;  %v1658_v13 = vpop.f32.mrf.mxu0  ;;  %v2838_v14 = vor.u32 %v3511_v4, %v2835_v5  ;;  %v3471_v5 = vld [vmem:[%s5476_s1 + $0x284] sm:$0xf] }
  0xa1   :  { %1894 = vmatpush.bf16.msra.mxu1 %v2422_v19  ;;  %v3509_v19 = vld [vmem:[%s5476_s1 + $0x3b4] sm:$0xf]  ;;  %v1672_v21 = vpop.f32.mrf.mxu1 }
  0xa2   :  { %1908 = vmatpush.bf16.msra.mxu2 %v2486_v20  ;;  %v2827_v20 = vld [vmem:[%s5476_s1 + $0x3b8] sm:$0xf0] }
  0xa3   :  { %1922 = vmatpush.bf16.msra.mxu3 %v2550_v23  ;;  %1881 = vmatmul.bf16.vlgmr.msra.gmra.mxu0 %v3939_v58  ;;  %v2782_v58 = vor.u32 %v3497_v56, %v2779_v57  ;;  %v1673_v23 = vadd.f32 %v1672_v21, %v1658_v13  ;;  %v2830_v29 = vor.u32 %v3509_v19, %v2827_v20  ;;  %v2683_v56 = vld [vmem:[%s5476_s1 + $0x298] sm:$0xf0]  ;;  %v3489_v57 = vld [vmem:[%s5476_s1 + $0x314] sm:$0xf] }
  0xa4   :  { %1929 = vmatpush.bf16.msrb.mxu0 %v2670_v24  ;;  %1895 = vmatmul.bf16.vlgmr.msra.gmra.mxu1 %v3975_v10  ;;  %v2846_v10 = vor.u32 %v3513_v59, %v2843_v60  ;;  %v2702_v24 = vor.u32 %v3477_v12, %v2699_v15  ;;  %v2747_v59 = vld [vmem:[%s5476_s1 + $0x318] sm:$0xf0]  ;;  %v2803_v12 = vld [vmem:[%s5476_s1 + $0x388] sm:$0xf0]  ;;  %v3565_v21 = vld [vmem:[%s5476_s1 + $0x574] sm:$0xf] }
  0xa5   :  { %1943 = vmatpush.bf16.msrb.mxu1 %v2734_v25  ;;  %1909 = vmatmul.bf16.vlgmr.msra.gmra.mxu2 %v3953_v1  ;;  %v3479_v1 = vld [vmem:[%s5476_s1 + $0x2c4] sm:$0xf]  ;;  %v2766_v25 = vor.u32 %v3493_v16, %v2763_v18  ;;  %v2750_v4 = vor.u32 %v3489_v57, %v2747_v59  ;;  %v2923_v15 = vld [vmem:[%s5476_s1 + $0x478] sm:$0xf0]  ;;  %v3549_v16 = vld [vmem:[%s5476_s1 + $0x4f4] sm:$0xf] }
  0xa6   :  { %1957 = vmatpush.bf16.msrb.mxu2 %v2798_v26  ;;  %1923 = vmatmul.bf16.vlgmr.msra.gmra.mxu3 %v3989_v17  ;;  %v2707_v17 = vld [vmem:[%s5476_s1 + $0x2c8] sm:$0xf0]  ;;  %v3459_v26 = vld [vmem:[%s5476_s1 + $0x224] sm:$0xf]  ;;  %v2987_v20 = vld [vmem:[%s5476_s1 + $0x4f8] sm:$0xf0] }
  0xa7   :  { %1971 = vmatpush.bf16.msrb.mxu3 %v2862_v30  ;;  %v2710_v7 = vor.u32 %v3479_v1, %v2707_v17  ;;  %v2691_v30 = vld [vmem:[%s5476_s1 + $0x2a8] sm:$0xf0]  ;;  %v2622_v1 = vor.u32 %v3457_v52, %v2619_v53  ;;  %v3579_v52 = vld [vmem:[%s5476_s1 + $0x5e4] sm:$0xf]  ;;  %v3529_v57 = vld [vmem:[%s5476_s1 + $0x454] sm:$0xf] }
  0xa8   :  { %1930 = vmatpush.bf16.msrb.mxu0 %v2662_v48  ;;  %v1686_v37 = vpop.f32.mrf.mxu2  ;;  %v2611_v17 = vld [vmem:[%s5476_s1 + $0x208] sm:$0xf0]  ;;  %v2907_v59 = vld [vmem:[%s5476_s1 + $0x458] sm:$0xf0] }
  0xa9   :  { %1944 = vmatpush.bf16.msrb.mxu1 %v2726_v49  ;;  %v1687_v48 = vadd.f32 %v1686_v37, %v1673_v23  ;;  %v2630_v49 = vor.u32 %v3459_v26, %v2627_v27  ;;  %v1700_v60 = vpop.f32.mrf.mxu3  ;;  %v1674_v0 = vpop.f32.mrf.mxu1  ;;  %v3115_v26 = vld [vmem:[%s5476_s1 + $0x5f8] sm:$0xf0]  ;;  %v2806_v27 = vor.u32 %v3503_v11, %v2803_v12  ;;  %v2915_v37 = vld [vmem:[%s5476_s1 + $0x468] sm:$0xf0] }
  0xaa   :  { %1958 = vmatpush.bf16.msrb.mxu2 %v2790_v50  ;;  %v2694_v50 = vor.u32 %v3475_v28, %v2691_v30  ;;  %v2990_v30 = vor.u32 %v3549_v16, %v2987_v20  ;;  %v3107_v53 = vld [vmem:[%s5476_s1 + $0x5e8] sm:$0xf0]  ;;  %v3525_v16 = vld [vmem:[%s5476_s1 + $0x434] sm:$0xf] }
  0xab   :  { %1972 = vmatpush.bf16.msrb.mxu3 %v2854_v54  ;;  %v3473_v54 = vld [vmem:[%s5476_s1 + $0x294] sm:$0xf]  ;;  %v4960_v63 = vadd.f32 %v1700_v60, %v1687_v48 }
  0xac   :  { %1931 = vmatpush.bf16.msrb.mxu0 %v2654_v61  ;;  %v3505_v61 = vld [vmem:[%s5476_s1 + $0x394] sm:$0xf]  ;;  %v2686_v3 = vor.u32 %v3473_v54, %v2683_v56  ;;  %v2918_v54 = vor.u32 %v3531_v34, %v2915_v37 }
  0xad   :  { %1945 = vmatpush.bf16.msrb.mxu1 %v2718_v62  ;;  %v2811_v62 = vld [vmem:[%s5476_s1 + $0x398] sm:$0xf0]  ;;  %v3545_v60 = vld [vmem:[%s5476_s1 + $0x4d4] sm:$0xf] }
  0xae   :  { %1959 = vmatpush.bf16.msrb.mxu2 %v2782_v58  ;;  %v1660_v58 = vpop.f32.mrf.mxu0 }
  0xaf   :  { %1973 = vmatpush.bf16.msrb.mxu3 %v2846_v10  ;;  %v3455_v10 = vld [vmem:[%s5476_s1 + $0x204] sm:$0xf]  ;;  %v1675_v2 = vadd.f32 %v1674_v0, %v1660_v58  ;;  %v3561_v58 = vld [vmem:[%s5476_s1 + $0x554] sm:$0xf]  ;;  %v3035_v0 = vld [vmem:[%s5476_s1 + $0x558] sm:$0xf0] }
  0xb0   :  { %1932 = vmatpush.bf16.msrb.mxu0 %v2646_v6  ;;  %v2675_v6 = vld [vmem:[%s5476_s1 + $0x288] sm:$0xf0]  ;;  %v1688_v13 = vpop.f32.mrf.mxu2  ;;  %v2614_v19 = vor.u32 %v3455_v10, %v2611_v17  ;;  %v2910_v10 = vor.u32 %v3529_v57, %v2907_v59 }
  0xb1   :  { %1946 = vmatpush.bf16.msrb.mxu1 %v2710_v7  ;;  %v3487_v7 = vld [vmem:[%s5476_s1 + $0x304] sm:$0xf]  ;;  %v1689_v18 = vadd.f32 %v1688_v13, %v1675_v2  ;;  %v2678_v23 = vor.u32 %v3471_v5, %v2675_v6  ;;  %v3038_v2 = vor.u32 %v3561_v58, %v3035_v0  ;;  %v3027_v6 = vld [vmem:[%s5476_s1 + $0x548] sm:$0xf0]  ;;  %v2875_v58 = vld [vmem:[%s5476_s1 + $0x418] sm:$0xf0] }
  0xb2   :  { %1960 = vmatpush.bf16.msrb.mxu2 %v2774_v8  ;;  %v2814_v8 = vor.u32 %v3505_v61, %v2811_v62  ;;  %v3110_v61 = vor.u32 %v3579_v52, %v3107_v53  ;;  %v2971_v62 = vld [vmem:[%s5476_s1 + $0x4d8] sm:$0xf0]  ;;  %v3559_v5 = vld [vmem:[%s5476_s1 + $0x544] sm:$0xf] }
  0xb3   :  { %1974 = vmatpush.bf16.msrb.mxu3 %v2838_v14  ;;  %v3533_v14 = vld [vmem:[%s5476_s1 + $0x474] sm:$0xf]  ;;  %v2974_v17 = vor.u32 %v3545_v60, %v2971_v62  ;;  %v3571_v53 = vld [vmem:[%s5476_s1 + $0x5a4] sm:$0xf] }
  0xb4   :  { %1933 = vmatpush.bf16.msrb.mxu0 %v2638_v22  ;;  %v3051_v22 = vld [vmem:[%s5476_s1 + $0x578] sm:$0xf0]  ;;  %v2926_v28 = vor.u32 %v3533_v14, %v2923_v15  ;;  %v3030_v15 = vor.u32 %v3559_v5, %v3027_v6  ;;  %v3521_v62 = vld [vmem:[%s5476_s1 + $0x414] sm:$0xf]  ;;  %v3535_v6 = vld [vmem:[%s5476_s1 + $0x484] sm:$0xf] }
  0xb5   :  { %1947 = vmatpush.bf16.msrb.mxu1 %v2702_v24  ;;  %v2742_v24 = vor.u32 %v3487_v7, %v2739_v9  ;;  %v3054_v33 = vor.u32 %v3565_v21, %v3051_v22  ;;  %v3091_v9 = vld [vmem:[%s5476_s1 + $0x5c8] sm:$0xf0]  ;;  %v2955_v21 = vld [vmem:[%s5476_s1 + $0x4b8] sm:$0xf0]  ;;  %v3557_v22 = vld [vmem:[%s5476_s1 + $0x534] sm:$0xf] }
  0xb6   :  { %1961 = vmatpush.bf16.msrb.mxu2 %v2766_v25  ;;  %v3581_v25 = vld [vmem:[%s5476_s1 + $0x5f4] sm:$0xf] }
  0xb7   :  { %1975 = vmatpush.bf16.msrb.mxu3 %v2830_v29  ;;  %v1702_v29 = vpop.f32.mrf.mxu3  ;;  %v3118_v48 = vor.u32 %v3581_v25, %v3115_v26  ;;  %v3083_v25 = vld [vmem:[%s5476_s1 + $0x5b8] sm:$0xf0] }
  0xb8   :  { %1934 = vmatpush.bf16.msrb.mxu0 %v2630_v49  ;;  %v5019_v45 = vadd.f32 %v1702_v29, %v1689_v18  ;;  %v2979_v49 = vld [vmem:[%s5476_s1 + $0x4e8] sm:$0xf0]  ;;  %v2891_v18 = vld [vmem:[%s5476_s1 + $0x438] sm:$0xf0]  ;;  %v3523_v29 = vld [vmem:[%s5476_s1 + $0x424] sm:$0xf] }
  0xb9   :  { %1948 = vmatpush.bf16.msrb.mxu1 %v2694_v50  ;;  %v3563_v50 = vld [vmem:[%s5476_s1 + $0x564] sm:$0xf]  ;;  %v2894_v26 = vor.u32 %v3525_v16, %v2891_v18  ;;  %v3597_v18 = vld [vmem:[%s5476_s1 + $0x674] sm:$0xf] }
  0xba   :  { %1962 = vmatpush.bf16.msrb.mxu2 %v2758_v51  ;;  %v3043_v51 = vld [vmem:[%s5476_s1 + $0x568] sm:$0xf0] }
  0xbb   :  { %1976 = vmatpush.bf16.msrb.mxu3 %v2822_v55  ;;  %v2982_v55 = vor.u32 %v3547_v42, %v2979_v49  ;;  %v3046_v56 = vor.u32 %v3563_v50, %v3043_v51  ;;  %v2947_v42 = vld [vmem:[%s5476_s1 + $0x4a8] sm:$0xf0] }
  0xbc   :  { %1935 = vmatpush.bf16.msrb.mxu0 %v2622_v1  ;;  %v3099_v1 = vld [vmem:[%s5476_s1 + $0x5d8] sm:$0xf0]  ;;  %v3011_v49 = vld [vmem:[%s5476_s1 + $0x528] sm:$0xf0] }
  0xbd   :  { %1949 = vmatpush.bf16.msrb.mxu1 %v2686_v3  ;;  %v3543_v3 = vld [vmem:[%s5476_s1 + $0x4c4] sm:$0xf] }
  0xbe   :  { %1963 = vmatpush.bf16.msrb.mxu2 %v2750_v4  ;;  %v2963_v4 = vld [vmem:[%s5476_s1 + $0x4c8] sm:$0xf0] }
  0xbf   :  { %1977 = vmatpush.bf16.msrb.mxu3 %v2814_v8  ;;  %v3575_v8 = vld [vmem:[%s5476_s1 + $0x5c4] sm:$0xf]  ;;  %v2966_v14 = vor.u32 %v3543_v3, %v2963_v4 }
  0xc0   :  { %1936 = vmatpush.bf16.msrb.mxu0 %v2614_v19  ;;  %v1714_v7 = vpop.f32.mrf.mxu0  ;;  %v3541_v19 = vld [vmem:[%s5476_s1 + $0x4b4] sm:$0xf]  ;;  %v3519_v3 = vld [vmem:[%s5476_s1 + $0x404] sm:$0xf] }
  0xc1   :  { %1950 = vmatpush.bf16.msrb.mxu1 %v2678_v23  ;;  %v1715_v11 = vadd.f32 %v1714_v7, %v4960_v63  ;;  %v1728_v13 = vpop.f32.mrf.mxu1  ;;  %v3094_v63 = vor.u32 %v3575_v8, %v3091_v9  ;;  %v3019_v23 = vld [vmem:[%s5476_s1 + $0x538] sm:$0xf0]  ;;  %v2931_v7 = vld [vmem:[%s5476_s1 + $0x488] sm:$0xf0]  ;;  %v3551_v8 = vld [vmem:[%s5476_s1 + $0x504] sm:$0xf] }
  0xc2   :  { %1964 = vmatpush.bf16.msrb.mxu2 %v2742_v24  ;;  %v3573_v24 = vld [vmem:[%s5476_s1 + $0x5b4] sm:$0xf] }
  0xc3   :  { %1978 = vmatpush.bf16.msrb.mxu3 %v2806_v27  ;;  %1937 = vmatmul.bf16.vlgmr.msrb.gmra.mxu0 %v4161_v39  ;;  %v3577_v39 = vld [vmem:[%s5476_s1 + $0x5d4] sm:$0xf]  ;;  %v1729_v20 = vadd.f32 %v1728_v13, %v1715_v11  ;;  %v2958_v27 = vor.u32 %v3541_v19, %v2955_v21  ;;  %v3086_v34 = vor.u32 %v3573_v24, %v3083_v25  ;;  %v3567_v13 = vld [vmem:[%s5476_s1 + $0x584] sm:$0xf]  ;;  %v3179_v19 = vld [vmem:[%s5476_s1 + $0x678] sm:$0xf0] }
  0xc4   :  { %1985 = vmatpush.bf16.msra.mxu0 %v2926_v28  ;;  %1951 = vmatmul.bf16.vlgmr.msrb.gmra.mxu1 %v4174_v44  ;;  %v2899_v44 = vld [vmem:[%s5476_s1 + $0x448] sm:$0xf0]  ;;  %v3022_v28 = vor.u32 %v3557_v22, %v3019_v23  ;;  %v3243_v21 = vld [vmem:[%s5476_s1 + $0x6f8] sm:$0xf0]  ;;  %v3629_v22 = vld [vmem:[%s5476_s1 + $0x774] sm:$0xf]  ;;  %v2934_v25 = vor.u32 %v3535_v6, %v2931_v7 }
  0xc5   :  { %1999 = vmatpush.bf16.msra.mxu1 %v2990_v30  ;;  %1965 = vmatmul.bf16.vlgmr.msrb.gmra.mxu2 %v4172_v43  ;;  %v3527_v43 = vld [vmem:[%s5476_s1 + $0x444] sm:$0xf]  ;;  %v2883_v30 = vld [vmem:[%s5476_s1 + $0x428] sm:$0xf0]  ;;  %v3307_v23 = vld [vmem:[%s5476_s1 + $0x778] sm:$0xf0] }
  0xc6   :  { %2013 = vmatpush.bf16.msra.mxu2 %v3054_v33  ;;  %1979 = vmatmul.bf16.vlgmr.msrb.gmra.mxu3 %v4182_v47  ;;  %v3102_v47 = vor.u32 %v3577_v39, %v3099_v1  ;;  %v2902_v12 = vor.u32 %v3527_v43, %v2899_v44  ;;  %v3539_v33 = vld [vmem:[%s5476_s1 + $0x4a4] sm:$0xf]  ;;  %v2939_v1 = vld [vmem:[%s5476_s1 + $0x498] sm:$0xf0]  ;;  %v2878_v44 = vor.u32 %v3521_v62, %v2875_v58  ;;  %v3609_v62 = vld [vmem:[%s5476_s1 + $0x6d4] sm:$0xf] }
  0xc7   :  { %2027 = vmatpush.bf16.msra.mxu3 %v3118_v48  ;;  %v3555_v48 = vld [vmem:[%s5476_s1 + $0x524] sm:$0xf]  ;;  %v2950_v60 = vor.u32 %v3539_v33, %v2947_v42  ;;  %v3067_v43 = vld [vmem:[%s5476_s1 + $0x598] sm:$0xf0]  ;;  %v3171_v42 = vld [vmem:[%s5476_s1 + $0x668] sm:$0xf0] }
  0xc8   :  { %1986 = vmatpush.bf16.msra.mxu0 %v2918_v54  ;;  %v1742_v37 = vpop.f32.mrf.mxu2  ;;  %v1716_v51 = vpop.f32.mrf.mxu0  ;;  %v3075_v54 = vld [vmem:[%s5476_s1 + $0x5a8] sm:$0xf0] }
  0xc9   :  { %2000 = vmatpush.bf16.msra.mxu1 %v2982_v55  ;;  %v1743_v50 = vadd.f32 %v1742_v37, %v1729_v20  ;;  %v1756_v52 = vpop.f32.mrf.mxu3  ;;  %v1717_v55 = vadd.f32 %v1716_v51, %v5019_v45  ;;  %v1730_v57 = vpop.f32.mrf.mxu1  ;;  %v3537_v45 = vld [vmem:[%s5476_s1 + $0x494] sm:$0xf]  ;;  %v3078_v0 = vor.u32 %v3571_v53, %v3075_v54  ;;  %v3595_v37 = vld [vmem:[%s5476_s1 + $0x664] sm:$0xf]  ;;  %v3363_v54 = vld [vmem:[%s5476_s1 + $0x7e8] sm:$0xf0] }
  0xca   :  { %2014 = vmatpush.bf16.msra.mxu2 %v3046_v56  ;;  %v2886_v56 = vor.u32 %v3523_v29, %v2883_v30  ;;  %v2942_v4 = vor.u32 %v3537_v45, %v2939_v1  ;;  %v3182_v30 = vor.u32 %v3597_v18, %v3179_v19  ;;  %v3627_v51 = vld [vmem:[%s5476_s1 + $0x764] sm:$0xf]  ;;  %v3227_v45 = vld [vmem:[%s5476_s1 + $0x6d8] sm:$0xf0]  ;;  %v3347_v6 = vld [vmem:[%s5476_s1 + $0x7c8] sm:$0xf0] }
  0xcb   :  { %2028 = vmatpush.bf16.msra.mxu3 %v3110_v61  ;;  %v5138_v59 = vadd.f32 %v1756_v52, %v1743_v50  ;;  %v3014_v61 = vor.u32 %v3555_v48, %v3011_v49  ;;  %v1731_v39 = vadd.f32 %v1730_v57, %v1717_v55  ;;  %v3611_v48 = vld [vmem:[%s5476_s1 + $0x6e4] sm:$0xf]  ;;  %v3235_v50 = vld [vmem:[%s5476_s1 + $0x6e8] sm:$0xf0]  ;;  %v3174_v55 = vor.u32 %v3595_v37, %v3171_v42  ;;  %v3355_v1 = vld [vmem:[%s5476_s1 + $0x7d8] sm:$0xf0] }
  0xcc   :  { %1987 = vmatpush.bf16.msra.mxu0 %v2910_v10  ;;  %v3553_v10 = vld [vmem:[%s5476_s1 + $0x514] sm:$0xf]  ;;  %v3299_v52 = vld [vmem:[%s5476_s1 + $0x768] sm:$0xf0]  ;;  %v3643_v53 = vld [vmem:[%s5476_s1 + $0x7e4] sm:$0xf] }
  0xcd   :  { %2001 = vmatpush.bf16.msra.mxu1 %v2974_v17  ;;  %v3003_v17 = vld [vmem:[%s5476_s1 + $0x518] sm:$0xf0]  ;;  %v3302_v57 = vor.u32 %v3627_v51, %v3299_v52  ;;  %v3366_v58 = vor.u32 %v3643_v53, %v3363_v54  ;;  %v3621_v19 = vld [vmem:[%s5476_s1 + $0x734] sm:$0xf]  ;;  %v3267_v37 = vld [vmem:[%s5476_s1 + $0x728] sm:$0xf0] }
  0xce   :  { %2015 = vmatpush.bf16.msra.mxu2 %v3038_v2  ;;  %v3569_v2 = vld [vmem:[%s5476_s1 + $0x594] sm:$0xf]  ;;  %v3006_v5 = vor.u32 %v3553_v10, %v3003_v17  ;;  %v3230_v17 = vor.u32 %v3609_v62, %v3227_v45  ;;  %v3211_v18 = vld [vmem:[%s5476_s1 + $0x6b8] sm:$0xf0]  ;;  %v3331_v51 = vld [vmem:[%s5476_s1 + $0x7a8] sm:$0xf0] }
  0xcf   :  { %2029 = vmatpush.bf16.msra.mxu3 %v3102_v47  ;;  %v2867_v47 = vld [vmem:[%s5476_s1 + $0x408] sm:$0xf0]  ;;  %v3070_v9 = vor.u32 %v3569_v2, %v3067_v43  ;;  %v3607_v43 = vld [vmem:[%s5476_s1 + $0x6c4] sm:$0xf]  ;;  %v3601_v62 = vld [vmem:[%s5476_s1 + $0x694] sm:$0xf] }
  0xd0   :  { %1988 = vmatpush.bf16.msra.mxu0 %v2902_v12  ;;  %v1744_v11 = vpop.f32.mrf.mxu2  ;;  %v2995_v12 = vld [vmem:[%s5476_s1 + $0x508] sm:$0xf0]  ;;  %v2870_v20 = vor.u32 %v3519_v3, %v2867_v47  ;;  %v3623_v3 = vld [vmem:[%s5476_s1 + $0x744] sm:$0xf]  ;;  %v3195_v45 = vld [vmem:[%s5476_s1 + $0x698] sm:$0xf0] }
  0xd1   :  { %2002 = vmatpush.bf16.msra.mxu1 %v2966_v14  ;;  %v3059_v14 = vld [vmem:[%s5476_s1 + $0x588] sm:$0xf0]  ;;  %v1758_v16 = vpop.f32.mrf.mxu3 }
  0xd2   :  { %2016 = vmatpush.bf16.msra.mxu2 %v3030_v15  ;;  %v1745_v15 = vadd.f32 %v1744_v11, %v1731_v39  ;;  %v3062_v29 = vor.u32 %v3567_v13, %v3059_v14  ;;  %v3291_v39 = vld [vmem:[%s5476_s1 + $0x758] sm:$0xf0]  ;;  %v3283_v47 = vld [vmem:[%s5476_s1 + $0x748] sm:$0xf0]  ;;  %v3589_v13 = vld [vmem:[%s5476_s1 + $0x634] sm:$0xf] }
  0xd3   :  { %2030 = vmatpush.bf16.msra.mxu3 %v3094_v63  ;;  %v3613_v63 = vld [vmem:[%s5476_s1 + $0x6f4] sm:$0xf]  ;;  %v3147_v14 = vld [vmem:[%s5476_s1 + $0x638] sm:$0xf0] }
  0xd4   :  { %1989 = vmatpush.bf16.msra.mxu0 %v2894_v26  ;;  %v5206_v24 = vadd.f32 %v1758_v16, %v1745_v15  ;;  %v2998_v26 = vor.u32 %v3551_v8, %v2995_v12  ;;  %v3246_v33 = vor.u32 %v3613_v63, %v3243_v21  ;;  %v3286_v12 = vor.u32 %v3623_v3, %v3283_v47  ;;  %v3605_v15 = vld [vmem:[%s5476_s1 + $0x6b4] sm:$0xf]  ;;  %v3275_v63 = vld [vmem:[%s5476_s1 + $0x738] sm:$0xf0]  ;;  %v3187_v3 = vld [vmem:[%s5476_s1 + $0x688] sm:$0xf0] }
  0xd5   :  { %2003 = vmatpush.bf16.msra.mxu1 %v2958_v27  ;;  %v3645_v27 = vld [vmem:[%s5476_s1 + $0x7f4] sm:$0xf]  ;;  %v3339_v21 = vld [vmem:[%s5476_s1 + $0x7b8] sm:$0xf0]  ;;  %v3615_v47 = vld [vmem:[%s5476_s1 + $0x704] sm:$0xf] }
  0xd6   :  { %2017 = vmatpush.bf16.msra.mxu2 %v3022_v28  ;;  %v3371_v28 = vld [vmem:[%s5476_s1 + $0x7f8] sm:$0xf0] }
  0xd7   :  { %2031 = vmatpush.bf16.msra.mxu3 %v3086_v34  ;;  %v3310_v34 = vor.u32 %v3629_v22, %v3307_v23  ;;  %v3374_v49 = vor.u32 %v3645_v27, %v3371_v28  ;;  %v3150_v22 = vor.u32 %v3589_v13, %v3147_v14  ;;  %v3214_v23 = vor.u32 %v3605_v15, %v3211_v18  ;;  %v3139_v27 = vld [vmem:[%s5476_s1 + $0x628] sm:$0xf0]  ;;  %v3603_v28 = vld [vmem:[%s5476_s1 + $0x6a4] sm:$0xf] }
  0xd8   :  { %1990 = vmatpush.bf16.msra.mxu0 %v2886_v56  ;;  %v3238_v56 = vor.u32 %v3611_v48, %v3235_v50  ;;  %v3635_v50 = vld [vmem:[%s5476_s1 + $0x7a4] sm:$0xf] }
  0xd9   :  { %2004 = vmatpush.bf16.msra.mxu1 %v2950_v60  ;;  %v3593_v60 = vld [vmem:[%s5476_s1 + $0x654] sm:$0xf] }
  0xda   :  { %2018 = vmatpush.bf16.msra.mxu2 %v3014_v61  ;;  %v3163_v61 = vld [vmem:[%s5476_s1 + $0x658] sm:$0xf0] }
  0xdb   :  { %2032 = vmatpush.bf16.msra.mxu3 %v3078_v0  ;;  %v3625_v0 = vld [vmem:[%s5476_s1 + $0x754] sm:$0xf]  ;;  %v3166_v10 = vor.u32 %v3593_v60, %v3163_v61  ;;  %v3131_v61 = vld [vmem:[%s5476_s1 + $0x618] sm:$0xf0] }
  0xdc   :  { %1991 = vmatpush.bf16.msra.mxu0 %v2878_v44  ;;  %v3294_v2 = vor.u32 %v3625_v0, %v3291_v39  ;;  %v3219_v44 = vld [vmem:[%s5476_s1 + $0x6c8] sm:$0xf0]  ;;  %v3585_v60 = vld [vmem:[%s5476_s1 + $0x614] sm:$0xf]  ;;  %v3259_v39 = vld [vmem:[%s5476_s1 + $0x718] sm:$0xf0] }
  0xdd   :  { %2005 = vmatpush.bf16.msra.mxu1 %v2942_v4  ;;  %v3222_v11 = vor.u32 %v3607_v43, %v3219_v44  ;;  %v3617_v0 = vld [vmem:[%s5476_s1 + $0x714] sm:$0xf]  ;;  %v3599_v43 = vld [vmem:[%s5476_s1 + $0x684] sm:$0xf] }
  0xde   :  { %2019 = vmatpush.bf16.msra.mxu2 %v3006_v5  ;;  %v3639_v5 = vld [vmem:[%s5476_s1 + $0x7c4] sm:$0xf] }
  0xdf   :  { %2033 = vmatpush.bf16.msra.mxu3 %v3070_v9 }
  0xe0   :  { %1992 = vmatpush.bf16.msra.mxu0 %v2870_v20  ;;  %v1770_v4 = vpop.f32.mrf.mxu0  ;;  %v3637_v20 = vld [vmem:[%s5476_s1 + $0x7b4] sm:$0xf] }
  0xe1   :  { %2006 = vmatpush.bf16.msra.mxu1 %v2934_v25  ;;  %v1771_v7 = vadd.f32 %v1770_v4, %v5138_v59  ;;  %v1784_v9 = vpop.f32.mrf.mxu1  ;;  %v3350_v59 = vor.u32 %v3639_v5, %v3347_v6  ;;  %v3278_v25 = vor.u32 %v3621_v19, %v3275_v63  ;;  %v3251_v4 = vld [vmem:[%s5476_s1 + $0x708] sm:$0xf0] }
  0xe2   :  { %2020 = vmatpush.bf16.msra.mxu2 %v2998_v26  ;;  %v3587_v26 = vld [vmem:[%s5476_s1 + $0x624] sm:$0xf]  ;;  %v3254_v13 = vor.u32 %v3615_v47, %v3251_v4 }
  0xe3   :  { %2034 = vmatpush.bf16.msra.mxu3 %v3062_v29  ;;  %1993 = vmatmul.bf16.vlgmr.msra.gmra.mxu0 %v4389_v31  ;;  %v3641_v31 = vld [vmem:[%s5476_s1 + $0x7d4] sm:$0xf]  ;;  %v1785_v16 = vadd.f32 %v1784_v9, %v1771_v7  ;;  %v3342_v29 = vor.u32 %v3637_v20, %v3339_v21  ;;  %v3142_v53 = vor.u32 %v3587_v26, %v3139_v27  ;;  %v3631_v7 = vld [vmem:[%s5476_s1 + $0x784] sm:$0xf] }
  0xe4   :  { %2041 = vmatpush.bf16.msrb.mxu0 %v3182_v30  ;;  %2007 = vmatmul.bf16.vlgmr.msra.gmra.mxu1 %v4402_v36  ;;  %v3155_v36 = vld [vmem:[%s5476_s1 + $0x648] sm:$0xf0] }
  0xe5   :  { %2055 = vmatpush.bf16.msrb.mxu1 %v3246_v33  ;;  %2021 = vmatmul.bf16.vlgmr.msra.gmra.mxu2 %v4400_v35  ;;  %v3591_v35 = vld [vmem:[%s5476_s1 + $0x644] sm:$0xf]  ;;  %v3203_v33 = vld [vmem:[%s5476_s1 + $0x6a8] sm:$0xf0] }
  0xe6   :  { %2069 = vmatpush.bf16.msrb.mxu2 %v3310_v34  ;;  %2035 = vmatmul.bf16.vlgmr.msra.gmra.mxu3 %v4410_v40  ;;  %v3358_v40 = vor.u32 %v3641_v31, %v3355_v1  ;;  %v3158_v8 = vor.u32 %v3591_v35, %v3155_v36  ;;  %v3619_v34 = vld [vmem:[%s5476_s1 + $0x724] sm:$0xf]  ;;  %v3633_v31 = vld [vmem:[%s5476_s1 + $0x794] sm:$0xf]  ;;  %v3323_v1 = vld [vmem:[%s5476_s1 + $0x798] sm:$0xf0] }
  0xe7   :  { %2083 = vmatpush.bf16.msrb.mxu3 %v3374_v49  ;;  %v3583_v35 = vld [vmem:[%s5476_s1 + $0x604] sm:$0xf]  ;;  %v3123_v36 = vld [vmem:[%s5476_s1 + $0x608] sm:$0xf0] }
  0xe8   :  { %2042 = vmatpush.bf16.msrb.mxu0 %v3174_v55  ;;  %v1798_v30 = vpop.f32.mrf.mxu2  ;;  %v1772_v48 = vpop.f32.mrf.mxu0  ;;  %v3126_v9 = vor.u32 %v3583_v35, %v3123_v36 }
  0xe9   :  { %2056 = vmatpush.bf16.msrb.mxu1 %v3238_v56  ;;  %v1799_v42 = vadd.f32 %v1798_v30, %v1785_v16  ;;  %v1812_v49 = vpop.f32.mrf.mxu3  ;;  %v1773_v52 = vadd.f32 %v1772_v48, %v5206_v24  ;;  %v1786_v54 = vpop.f32.mrf.mxu1  ;;  %v3206_v56 = vor.u32 %v3603_v28, %v3203_v33  ;;  %v3334_v24 = vor.u32 %v3635_v50, %v3331_v51 }
  0xea   :  { %2070 = vmatpush.bf16.msrb.mxu2 %v3302_v57  ;;  %v3270_v57 = vor.u32 %v3619_v34, %v3267_v37 }
  0xeb   :  { %2084 = vmatpush.bf16.msrb.mxu3 %v3366_v58  ;;  %v1813_v55 = vadd.f32 %v1812_v49, %v1799_v42  ;;  %v1787_v58 = vadd.f32 %v1786_v54, %v1773_v52 }
  0xec   :  { %2043 = vmatpush.bf16.msrb.mxu0 %v3166_v10  ;;  %v3134_v10 = vor.u32 %v3585_v60, %v3131_v61  ;;  %v3658_v60 = vmov 8.0  }
  0xed   :  { %2057 = vmatpush.bf16.msrb.mxu1 %v3230_v17  ;;  %v3198_v17 = vor.u32 %v3601_v62, %v3195_v45  ;;  %3648 = vrcp.f32 %v3658_v60 }
  0xee   :  { %2071 = vmatpush.bf16.msrb.mxu2 %v3294_v2  ;;  %v3262_v2 = vor.u32 %v3617_v0, %v3259_v39 }
  0xef   :  { %2085 = vmatpush.bf16.msrb.mxu3 %v3358_v40  ;;  %v3326_v40 = vor.u32 %v3633_v31, %v3323_v1 }
  0xf0   :  { %2044 = vmatpush.bf16.msrb.mxu0 %v3158_v8  ;;  %v1800_v44 = vpop.f32.mrf.mxu2  ;;  %v3315_v8 = vld [vmem:[%s5476_s1 + $0x788] sm:$0xf0] }
  0xf1   :  { %2058 = vmatpush.bf16.msrb.mxu1 %v3222_v11  ;;  %v1801_v5 = vadd.f32 %v1800_v44, %v1787_v58  ;;  %v1814_v6 = vpop.f32.mrf.mxu3  ;;  %v3318_v14 = vor.u32 %v3631_v7, %v3315_v8 }
  0xf2   :  { %2072 = vmatpush.bf16.msrb.mxu2 %v3286_v12  ;;  %v3190_v12 = vor.u32 %v3599_v43, %v3187_v3 }
  0xf3   :  { %2086 = vmatpush.bf16.msrb.mxu3 %v3350_v59  ;;  %v1815_v11 = vadd.f32 %v1814_v6, %v1801_v5  ;;  %v3649_v1 = vpop.eup %3648 }
  0xf4   :  { %2045 = vmatpush.bf16.msrb.mxu0 %v3150_v22  ;;  %v2126_v43 = vmul.f32 8.0, %v3649_v1  ;;  %vm2130_vm0 = vweird.f32 %v3649_v1 }
  0xf5   :  { %2059 = vmatpush.bf16.msrb.mxu1 %v3214_v23 }
  0xf6   :  { %2073 = vmatpush.bf16.msrb.mxu2 %v3278_v25  ;;  %v2127_v5 = vsub.f32 1.0, %v2126_v43 }
  0xf7   :  { %2087 = vmatpush.bf16.msrb.mxu3 %v3342_v29 }
  0xf8   :  { %2046 = vmatpush.bf16.msrb.mxu0 %v3142_v53 }
  0xf9   :  { %2060 = vmatpush.bf16.msrb.mxu1 %v3206_v56 }
  0xfa   :  { %2074 = vmatpush.bf16.msrb.mxu2 %v3270_v57 }
  0xfb   :  { %2088 = vmatpush.bf16.msrb.mxu3 %v3334_v24 }
  0xfc   :  { %2047 = vmatpush.bf16.msrb.mxu0 %v3134_v10 }
  0xfd   :  { %2061 = vmatpush.bf16.msrb.mxu1 %v3198_v17 }
  0xfe   :  { %2075 = vmatpush.bf16.msrb.mxu2 %v3262_v2 }
  0xff   :  { %2089 = vmatpush.bf16.msrb.mxu3 %v3326_v40 }
 0x100   :  { %2048 = vmatpush.bf16.msrb.mxu0 %v3126_v9  ;;  %v1826_v15 = vpop.f32.mrf.mxu0 }
 0x101   :  { %2062 = vmatpush.bf16.msrb.mxu1 %v3190_v12  ;;  %v1827_v59 = vadd.f32 %v1826_v15, %v1813_v55  ;;  %v1840_v16 = vpop.f32.mrf.mxu1 }
 0x102   :  { %2076 = vmatpush.bf16.msrb.mxu2 %v3254_v13 }
 0x103   :  { %2090 = vmatpush.bf16.msrb.mxu3 %v3318_v14  ;;  %2049 = vmatmul.bf16.vlgmr.msrb.gmra.mxu0 %v4617_v32  ;;  %v1841_v18 = vadd.f32 %v1840_v16, %v1827_v59  ;;  %v2128_v59 = vmul.f32 %v3649_v1, %v2127_v5 }
 0x104   :  { %2063 = vmatmul.bf16.vlgmr.msrb.gmra.mxu1 %v4630_v41 }
 0x105   :  { %2077 = vmatmul.bf16.vlgmr.msrb.gmra.mxu2 %v4628_v38 }
 0x106   :  { %2091 = vmatmul.bf16.vlgmr.msrb.gmra.mxu3 %v4638_v46 }
 0x108   :  { %v1854_v19 = vpop.f32.mrf.mxu2  ;;  %v1828_v20 = vpop.f32.mrf.mxu0 }
 0x109   :  { %v1855_v63 = vadd.f32 %v1854_v19, %v1841_v18  ;;  %v1868_v21 = vpop.f32.mrf.mxu3  ;;  %v1829_v22 = vadd.f32 %v1828_v20, %v1815_v11  ;;  %v1842_v23 = vpop.f32.mrf.mxu1 }
 0x10b   :  { %v5392_v25 = vadd.f32 %v1868_v21, %v1855_v63  ;;  %v1843_v26 = vadd.f32 %v1842_v23, %v1829_v22 }
 0x10d   :  { %v2099_v58 = vrot.slane %v5392_v25, 4  ;;  %v2111_v45 = vmul.f32 %v5392_v25, %v5392_v25 }
 0x10f   :  { %v2100_v2 = vadd.f32 %v2099_v58, %v5392_v25  ;;  %v2113_v35 = vrot.slane %v2111_v45, 4 }
 0x110   :  { %v1856_v32 = vpop.f32.mrf.mxu2 }
 0x111   :  { %v1857_v27 = vadd.f32 %v1856_v32, %v1843_v26  ;;  %v1870_v41 = vpop.f32.mrf.mxu3  ;;  %v2101_v3 = vrot.slane %v2100_v2, 2  ;;  %v2114_v47 = vadd.f32 %v2113_v35, %v2111_v45  ;;  %v2129_v26 = vadd.f32 %v3649_v1, %v2128_v59 }
 0x113   :  { %v5394_v28 = vadd.f32 %v1870_v41, %v1857_v27  ;;  %v2102_v14 = vadd.f32 %v2101_v3, %v2100_v2  ;;  %v2115_v15 = vrot.slane %v2114_v47, 2 }
 0x115   :  { %v2191_v9 = vrot.slane %v5394_v28, 4  ;;  %v2203_v11 = vmul.f32 %v5394_v28, %v5394_v28  ;;  %v2103_v22 = vrot.slane %v2102_v14, 1  ;;  %v2116_v23 = vadd.f32 %v2115_v15, %v2114_v47 }
 0x117   :  { %v2192_v18 = vadd.f32 %v2191_v9, %v5394_v28  ;;  %v2205_v19 = vrot.slane %v2203_v11, 4 }
 0x119   :  { %v2193_v27 = vrot.slane %v2192_v18, 2  ;;  %v2206_v41 = vadd.f32 %v2205_v19, %v2203_v11 }
 0x120   :  { %v1882_v38 = vpop.f32.mrf.mxu0 }
 0x121   :  { %v1896_v46 = vpop.f32.mrf.mxu1 }
 0x122   :  { %v1897_v48 = vadd.f32 %v1896_v46, %v1882_v38 }
 0x128   :  { %v1910_v29 = vpop.f32.mrf.mxu2  ;;  %v1884_v33 = vpop.f32.mrf.mxu0 }
 0x129   :  { %v1924_v30 = vpop.f32.mrf.mxu3  ;;  %v1898_v34 = vpop.f32.mrf.mxu1  ;;  %v1911_v51 = vadd.f32 %v1910_v29, %v1897_v48 }
 0x12a   :  { %v1899_v56 = vadd.f32 %v1898_v34, %v1884_v33  ;;  %v2104_v33 = vadd.f32 %v2103_v22, %v2102_v14  ;;  %v2117_v34 = vrot.slane %v2116_v23, 1 }
 0x12b   :  { %v1925_v53 = vadd.f32 %v1924_v30, %v1911_v51 }
 0x130   :  { %v1912_v37 = vpop.f32.mrf.mxu2 }
 0x131   :  { %v1926_v42 = vpop.f32.mrf.mxu3  ;;  %v1913_v62 = vadd.f32 %v1912_v37, %v1899_v56  ;;  %v5404_v37 = vsel %vm2130_vm0, %v3649_v1, %v2129_v26 }
 0x133   :  { %v1927_v10 = vadd.f32 %v1926_v42, %v1913_v62 }
 0x140   :  { %v1938_v49 = vpop.f32.mrf.mxu0 }
 0x141   :  { %v1952_v50 = vpop.f32.mrf.mxu1  ;;  %v1939_v57 = vadd.f32 %v1938_v49, %v1925_v53  ;;  %v2194_v49 = vadd.f32 %v2193_v27, %v2192_v18  ;;  %v2118_v53 = vadd.f32 %v2117_v34, %v2116_v23 }
 0x143   :  { %v1953_v24 = vadd.f32 %v1952_v50, %v1939_v57  ;;  %v2207_v50 = vrot.slane %v2206_v41, 2  ;;  %v2195_v56 = vrot.slane %v2194_v49, 1  ;;  %v2134_v45 = vmul.f32 %v5404_v37, %v2118_v53 }
 0x145   :  { %v2208_v57 = vadd.f32 %v2207_v50, %v2206_v41  ;;  %v2196_v1 = vadd.f32 %v2195_v56, %v2194_v49 }
 0x147   :  { %v5419_v47 = vmul.f32 %v2196_v1, %v5404_v37 }
 0x148   :  { %v1966_v52 = vpop.f32.mrf.mxu2  ;;  %v1940_v55 = vpop.f32.mrf.mxu0 }
 0x149   :  { %v1980_v54 = vpop.f32.mrf.mxu3  ;;  %v1954_v61 = vpop.f32.mrf.mxu1  ;;  %v1967_v17 = vadd.f32 %v1966_v52, %v1953_v24  ;;  %v1941_v40 = vadd.f32 %v1940_v55, %v1927_v10  ;;  %v2209_v10 = vrot.slane %v2208_v57, 1  ;;  %v2221_v15 = vmul.f32 %v5419_v47, %v5419_v47 }
 0x14b   :  { %v1981_v44 = vadd.f32 %v1980_v54, %v1967_v17  ;;  %v1955_v6 = vadd.f32 %v1954_v61, %v1941_v40  ;;  %v5407_v54 = vmul.f32 %v5404_v37, %v2104_v33  ;;  %v2210_v3 = vadd.f32 %v2209_v10, %v2208_v57 }
 0x14d   :  { %v2219_v14 = vmul.f32 %v2210_v3, %v5404_v37 }
 0x14f   :  { %v2223_v23 = vsub.f32 %v2219_v14, %v2221_v15 }
 0x150   :  { %v1968_v0 = vpop.f32.mrf.mxu2 }
 0x151   :  { %v1982_v39 = vpop.f32.mrf.mxu3  ;;  %v1969_v12 = vadd.f32 %v1968_v0, %v1955_v6  ;;  %v2136_v0 = vmul.f32 %v5407_v54, %v5407_v54  ;;  %v5439_v34 = vadd.f32 1e-05, %v2223_v23 }
 0x153   :  { %v1983_v20 = vadd.f32 %v1982_v39, %v1969_v12  ;;  %v2138_v35 = vsub.f32 %v2134_v45, %v2136_v0  ;;  %vm2233_vm12 = vweird.f32 %v5439_v34 }
 0x160   :  { %v1994_v31 = vpop.f32.mrf.mxu0 }
 0x161   :  { %v2008_v36 = vpop.f32.mrf.mxu1  ;;  %v1995_v7 = vadd.f32 %v1994_v31, %v1981_v44 }
 0x163   :  { %v2009_v16 = vadd.f32 %v2008_v36, %v1995_v7 }
 0x168   :  { %v2022_v4 = vpop.f32.mrf.mxu2  ;;  %v1996_v13 = vpop.f32.mrf.mxu0 }
 0x169   :  { %v2036_v8 = vpop.f32.mrf.mxu3  ;;  %v2010_v63 = vpop.f32.mrf.mxu1  ;;  %v2023_v21 = vadd.f32 %v2022_v4, %v2009_v16  ;;  %v1997_v32 = vadd.f32 %v1996_v13, %v1983_v20 }
 0x16b   :  { %v2037_v46 = vadd.f32 %v2036_v8, %v2023_v21  ;;  %v2011_v42 = vadd.f32 %v2010_v63, %v1997_v32  ;;  %v5421_v8 = vadd.f32 1e-05, %v2138_v35 }
 0x16d   :  { %3650 = vrsqrt.f32 %v5421_v8  ;;  %vm2148_vm5 = vweird.f32 %v5421_v8 }
 0x16e   :  { %3652 = vrsqrt.f32 %v5439_v34 }
 0x170   :  { %v2024_v38 = vpop.f32.mrf.mxu2 }
 0x171   :  { %v2038_v29 = vpop.f32.mrf.mxu3  ;;  %v2025_v52 = vadd.f32 %v2024_v38, %v2011_v42 }
 0x173   :  { %v2039_v61 = vadd.f32 %v2038_v29, %v2025_v52  ;;  %v3651_v33 = vpop.eup %3650 }
 0x174   :  { %v2143_v53 = vmul.f32 %v3651_v33, %v5421_v8  ;;  %vm2149_vm2 = vweird.f32 %v3651_v33 }
 0x175   :  { %vm2150_vm7 = vmor %vm2148_vm5, %vm2149_vm2 }
 0x180   :  { %v2050_v30 = vpop.f32.mrf.mxu0 }
 0x181   :  { %v2051_v48 = vadd.f32 %v2050_v30, %v2037_v46  ;;  %v2064_v51 = vpop.f32.mrf.mxu1 }
 0x183   :  { %v2065_v55 = vadd.f32 %v2064_v51, %v2051_v48 }
 0x188   :  { %v2078_v60 = vpop.f32.mrf.mxu2  ;;  %v2052_v58 = vpop.f32.mrf.mxu0 }
 0x189   :  { %v2079_v62 = vadd.f32 %v2078_v60, %v2065_v55  ;;  %v2092_v24 = vpop.f32.mrf.mxu3  ;;  %v2053_v31 = vadd.f32 %v2052_v58, %v2039_v61  ;;  %v2066_v36 = vpop.f32.mrf.mxu1  ;;  %v2144_v61 = vmul.f32 %v3651_v33, %v2143_v53 }
 0x18b   :  { %v5412_v39 = vadd.f32 %v2092_v24, %v2079_v62  ;;  %v2067_v44 = vadd.f32 %v2066_v36, %v2053_v31  ;;  %v3653_v24 = vpop.eup %3652  ;;  %v2145_v0 = vmul.f32 0.5, %v2144_v61 }
 0x18c   :  { %v2228_v1 = vmul.f32 %v3653_v24, %v5439_v34  ;;  %vm2234_vm9 = vweird.f32 %v3653_v24 }
 0x18d   :  { %v2105_v17 = vrot.slane %v5412_v39, 4  ;;  %v2112_v2 = vmul.f32 %v5412_v39, %v5412_v39  ;;  %vm2235_vm13 = vmor %vm2233_vm12, %vm2234_vm9 }
 0x18e   :  { %v2229_v35 = vmul.f32 %v3653_v24, %v2228_v1 }
 0x18f   :  { %v2106_v43 = vadd.f32 %v2105_v17, %v5412_v39  ;;  %v2119_v40 = vrot.slane %v2112_v2, 4  ;;  %v2146_v17 = vsub.f32 1.5, %v2145_v0 }
 0x190   :  { %v2080_v4 = vpop.f32.mrf.mxu2  ;;  %v2230_v3 = vmul.f32 0.5, %v2229_v35 }
 0x191   :  { %v2107_v5 = vrot.slane %v2106_v43, 2  ;;  %v2120_v6 = vadd.f32 %v2119_v40, %v2112_v2  ;;  %v2081_v7 = vadd.f32 %v2080_v4, %v2067_v44  ;;  %v2094_v9 = vpop.f32.mrf.mxu3 }
 0x192   :  { %v2231_v14 = vsub.f32 1.5, %v2230_v3 }
 0x193   :  { %v2108_v11 = vadd.f32 %v2107_v5, %v2106_v43  ;;  %v2121_v12 = vrot.slane %v2120_v6, 2  ;;  %v5423_v13 = vadd.f32 %v2094_v9, %v2081_v7  ;;  %v2147_v43 = vmul.f32 %v3651_v33, %v2146_v17 }
 0x195   :  { %v2109_v59 = vrot.slane %v2108_v11, 1  ;;  %v2122_v16 = vadd.f32 %v2121_v12, %v2120_v6  ;;  %v2197_v18 = vrot.slane %v5423_v13, 4  ;;  %v2204_v19 = vmul.f32 %v5423_v13, %v5423_v13  ;;  %v2097_v6 = vld [vmem:[%s5478_s2] sm:$0x3] }
 0x196   :  { %v2151_v9 = vsel %vm2150_vm7, %v3651_v33, %v2147_v43 }
 0x197   :  { %v2110_v63 = vadd.f32 %v2109_v59, %v2108_v11  ;;  %v2123_v20 = vrot.slane %v2122_v16, 1  ;;  %v2198_v21 = vadd.f32 %v2197_v18, %v5423_v13  ;;  %v2211_v22 = vrot.slane %v2204_v19, 4 }
 0x199   :  { %v2124_v26 = vadd.f32 %v2123_v20, %v2122_v16  ;;  %v5434_v32 = vmul.f32 %v5404_v37, %v2110_v63  ;;  %v2199_v27 = vrot.slane %v2198_v21, 2  ;;  %v2212_v41 = vadd.f32 %v2211_v22, %v2204_v19 }
 0x19a   :  { %v2232_v19 = vmul.f32 %v3653_v24, %v2231_v14 }
 0x19b   :  { %v2135_v38 = vmul.f32 %v5404_v37, %v2124_v26  ;;  %v2137_v46 = vmul.f32 %v5434_v32, %v5434_v32  ;;  %v2200_v29 = vadd.f32 %v2199_v27, %v2198_v21  ;;  %v2213_v30 = vrot.slane %v2212_v41, 2  ;;  %v2098_v21 = vld [vmem:[%s5479_s3] sm:$0x3] }
 0x19c   :  { %v2236_v27 = vsel %vm2235_vm13, %v3653_v24, %v2232_v19 }
 0x19d   :  { %v2139_v42 = vsub.f32 %v2135_v38, %v2137_v46  ;;  %v2201_v48 = vrot.slane %v2200_v29, 1  ;;  %v2214_v49 = vadd.f32 %v2213_v30, %v2212_v41 }
 0x19f   :  { %v2141_v50 = vadd.f32 1e-05, %v2139_v42  ;;  %v2202_v51 = vadd.f32 %v2201_v48, %v2200_v29  ;;  %v2215_v52 = vrot.slane %v2214_v49, 1 }
 0x1a1   :  { %3654 = vrsqrt.f32 %v2141_v50  ;;  %v2216_v55 = vadd.f32 %v2215_v52, %v2214_v49  ;;  %v5444_v56 = vmul.f32 %v2202_v51, %v5404_v37  ;;  %vm2158_vm3 = vweird.f32 %v2141_v50 }
 0x1a3   :  { %v2220_v57 = vmul.f32 %v2216_v55, %v5404_v37  ;;  %v2222_v60 = vmul.f32 %v5444_v56, %v5444_v56 }
 0x1a5   :  { %v2224_v62 = vsub.f32 %v2220_v57, %v2222_v60 }
 0x1a7   :  { %v3655_v58 = vpop.eup %3654  ;;  %v2226_v45 = vadd.f32 1e-05, %v2224_v62 }
 0x1a8   :  { %v2153_v31 = vmul.f32 %v3655_v58, %v2141_v50  ;;  %vm2159_vm1 = vweird.f32 %v3655_v58 }
 0x1a9   :  { %3656 = vrsqrt.f32 %v2226_v45  ;;  %vm2160_vm4 = vmor %vm2158_vm3, %vm2159_vm1  ;;  %vm2243_vm10 = vweird.f32 %v2226_v45 }
 0x1aa   :  { %v2154_v10 = vmul.f32 %v3655_v58, %v2153_v31 }
 0x1ac   :  { %v2155_v2 = vmul.f32 0.5, %v2154_v10 }
 0x1ae   :  { %v2156_v36 = vsub.f32 1.5, %v2155_v2 }
 0x1af   :  { %v3657_v37 = vpop.eup %3656 }
 0x1b0   :  { %v2157_v40 = vmul.f32 %v3655_v58, %v2156_v36  ;;  %v2238_v44 = vmul.f32 %v3657_v37, %v2226_v45  ;;  %vm2244_vm8 = vweird.f32 %v3657_v37 }
 0x1b1   :  { %vm2245_vm11 = vmor %vm2243_vm10, %vm2244_vm8 }
 0x1b2   :  { %v2161_v4 = vsel %vm2160_vm4, %v3655_v58, %v2157_v40  ;;  %v2239_v5 = vmul.f32 %v3657_v37, %v2238_v44 }
 0x1b3   :  { %v2164_v7 = vrot.slane %v2161_v4, 7 }
 0x1b4   :  { %v2240_v11 = vmul.f32 0.5, %v2239_v5 }
 0x1b5   :  { %v2166_v12 = vsel %vm2165_vm6, %v2151_v9, %v2164_v7 }
 0x1b6   :  { %v2168_v15 = vmul.f32 %v2166_v12, %v2097_v6  ;;  %v2241_v59 = vsub.f32 1.5, %v2240_v11 }
 0x1b8   :  { %v2170_v16 = vperm.slane %v2168_v15, 0  ;;  %v2171_v18 = vperm.slane %v2168_v15, 1  ;;  %v2242_v8 = vmul.f32 %v3657_v37, %v2241_v59 }
 0x1ba   :  { %v2175_v63 = vmul.f32 %v2171_v18, %v5434_v32  ;;  %v2246_v20 = vsel %vm2245_vm11, %v3657_v37, %v2242_v8  ;;  %v2174_v22 = vmul.f32 %v2170_v16, %v5407_v54  ;;  %v2182_v29 = vmul.f32 %v2170_v16, %v5392_v25 }
 0x1bb   :  { %v2249_v26 = vrot.slane %v2246_v20, 7  ;;  %v2183_v30 = vmul.f32 %v2171_v18, %v5412_v39 }
 0x1bc   :  { %v2178_v23 = vrot.slane %v2175_v63, 7 }
 0x1bd   :  { %v2250_v38 = vsel %vm2165_vm6, %v2236_v27, %v2249_v26 }
 0x1be   :  { %v2179_v41 = vsel %vm2165_vm6, %v2174_v22, %v2178_v23  ;;  %v2252_v32 = vmul.f32 %v2250_v38, %v2097_v6 }
 0x1bf   :  { %v2181_v46 = vsub.f32 %v2098_v21, %v2179_v41 }
 0x1c0   :  { %v2254_v42 = vperm.slane %v2252_v32, 0  ;;  %v2255_v48 = vperm.slane %v2252_v32, 1 }
 0x1c1   :  { %v2185_v33 = vperm.slane %v2181_v46, 0  ;;  %v2186_v34 = vperm.slane %v2181_v46, 1 }
 0x1c2   :  { %v2259_v50 = vmul.f32 %v2255_v48, %v5444_v56  ;;  %v2258_v53 = vmul.f32 %v2254_v42, %v5419_v47  ;;  %v2266_v25 = vmul.f32 %v2254_v42, %v5394_v28  ;;  %v2267_v39 = vmul.f32 %v2255_v48, %v5423_v13 }
 0x1c3   :  { %v2189_v49 = vadd.f32 %v2185_v33, %v2182_v29  ;;  %v2190_v54 = vadd.f32 %v2186_v34, %v2183_v30 }
 0x1c4   :  { %v2262_v55 = vrot.slane %v2259_v50, 7 }
 0x1c5   :  { %v2275_v51 = vmax.f32 %v2189_v49, 0.0  ;;  %v2276_v52 = vmax.f32 %v2190_v54, 0.0 }
 0x1c6   :  { %v2263_v60 = vsel %vm2165_vm6, %v2258_v53, %v2262_v55 }
 0x1c7   :  { %v2279_v57 = vpack.c.bf16 %v2276_v52, %v2275_v51  ;;  %v2265_v61 = vsub.f32 %v2098_v21, %v2263_v60 }
 0x1c9   :  { %2281 = vst [vmem:[%s5480_s4] sm:$0xff] %v2279_v57  ;;  %v2269_v62 = vperm.slane %v2265_v61, 0  ;;  %v2270_v24 = vperm.slane %v2265_v61, 1 }
 0x1cb   :  { %v2273_v56 = vadd.f32 %v2269_v62, %v2266_v25  ;;  %v2274_v58 = vadd.f32 %v2270_v24, %v2267_v39 }
 0x1cd   :  { %v2277_v45 = vmax.f32 %v2273_v56, 0.0  ;;  %v2278_v0 = vmax.f32 %v2274_v58, 0.0 }
 0x1cf   :  { %v2280_v47 = vpack.c.bf16 %v2278_v0, %v2277_v45 }
 0x1d1   :  { %2282 = vst [vmem:[%s5480_s4 + $0x8] sm:$0xff] %v2280_v47 }

// kernel: diffmorpher_forward.11
= control target key start
LH: loop header
LB: loop body
LE: loop exit
PB: predicated region body
PF: predicated region fallthrough
CT: control target
= control target key end

     0   :  { %s5144_s1 = inlined_call_operand.vmem [shape: bf16[1,4096,128], index: 1, kind: input, shape index: {}]   ;;  %s5145_s0 = inlined_call_operand.vmem [shape: bf16[1,16,4096], index: 0, kind: input, shape index: {}]   ;;  %s5146_s2 = inlined_call_operand.vmem [shape: f32[1,1,128], index: 2, kind: input, shape index: {}]   ;;  %s5147_s3 = inlined_call_operand.vmem [shape: f32[1,16,128], index: 3, kind: output, shape index: {}]  }
   0x1   :  { %v3905_v0 = vld [vmem:[%s5144_s1 + $0x38] sm:$0xff]  ;;  %v3904_v4 = vld [vmem:[%s5144_s1 + $0x30] sm:$0xff]  ;;  %v3903_v8 = vld [vmem:[%s5144_s1 + $0x28] sm:$0xff] }
   0x2   :  { %v3913_v1 = vld [vmem:[%s5144_s1 + $0x78] sm:$0xff]  ;;  %2254 = vmatpush.bf16.msra.mxu0 %v3905_v0  ;;  %v3912_v5 = vld [vmem:[%s5144_s1 + $0x70] sm:$0xff]  ;;  %v3911_v9 = vld [vmem:[%s5144_s1 + $0x68] sm:$0xff] }
   0x3   :  { %v3921_v2 = vld [vmem:[%s5144_s1 + $0xb8] sm:$0xff]  ;;  %2268 = vmatpush.bf16.msra.mxu1 %v3913_v1  ;;  %v3920_v6 = vld [vmem:[%s5144_s1 + $0xb0] sm:$0xff]  ;;  %v3919_v10 = vld [vmem:[%s5144_s1 + $0xa8] sm:$0xff] }
   0x4   :  { %v3929_v3 = vld [vmem:[%s5144_s1 + $0xf8] sm:$0xff]  ;;  %2282 = vmatpush.bf16.msra.mxu2 %v3921_v2  ;;  %v3928_v7 = vld [vmem:[%s5144_s1 + $0xf0] sm:$0xff]  ;;  %v3927_v11 = vld [vmem:[%s5144_s1 + $0xe8] sm:$0xff] }
   0x5   :  { %2296 = vmatpush.bf16.msra.mxu3 %v3929_v3  ;;  %v3902_v12 = vld [vmem:[%s5144_s1 + $0x20] sm:$0xff]  ;;  %v3901_v16 = vld [vmem:[%s5144_s1 + $0x18] sm:$0xff]  ;;  %v3900_v20 = vld [vmem:[%s5144_s1 + $0x10] sm:$0xff] }
   0x6   :  { %2255 = vmatpush.bf16.msra.mxu0 %v3904_v4  ;;  %v3910_v13 = vld [vmem:[%s5144_s1 + $0x60] sm:$0xff]  ;;  %v3909_v17 = vld [vmem:[%s5144_s1 + $0x58] sm:$0xff]  ;;  %v3908_v21 = vld [vmem:[%s5144_s1 + $0x50] sm:$0xff] }
   0x7   :  { %2269 = vmatpush.bf16.msra.mxu1 %v3912_v5  ;;  %v3918_v14 = vld [vmem:[%s5144_s1 + $0xa0] sm:$0xff]  ;;  %v3917_v18 = vld [vmem:[%s5144_s1 + $0x98] sm:$0xff]  ;;  %v3916_v22 = vld [vmem:[%s5144_s1 + $0x90] sm:$0xff] }
   0x8   :  { %2283 = vmatpush.bf16.msra.mxu2 %v3920_v6  ;;  %v3926_v15 = vld [vmem:[%s5144_s1 + $0xe0] sm:$0xff]  ;;  %v3925_v19 = vld [vmem:[%s5144_s1 + $0xd8] sm:$0xff]  ;;  %v3924_v23 = vld [vmem:[%s5144_s1 + $0xd0] sm:$0xff] }
   0x9   :  { %2297 = vmatpush.bf16.msra.mxu3 %v3928_v7  ;;  %v3899_v24 = vld [vmem:[%s5144_s1 + $0x8] sm:$0xff]  ;;  %v3898_v28 = vld [vmem:[%s5144_s1] sm:$0xff]  ;;  %v3937_v32 = vld [vmem:[%s5144_s1 + $0x138] sm:$0xff] }
   0xa   :  { %2256 = vmatpush.bf16.msra.mxu0 %v3903_v8  ;;  %v3907_v25 = vld [vmem:[%s5144_s1 + $0x48] sm:$0xff]  ;;  %v3906_v29 = vld [vmem:[%s5144_s1 + $0x40] sm:$0xff]  ;;  %v3945_v33 = vld [vmem:[%s5144_s1 + $0x178] sm:$0xff] }
   0xb   :  { %2270 = vmatpush.bf16.msra.mxu1 %v3911_v9  ;;  %v3915_v26 = vld [vmem:[%s5144_s1 + $0x88] sm:$0xff]  ;;  %v3914_v30 = vld [vmem:[%s5144_s1 + $0x80] sm:$0xff]  ;;  %v3953_v42 = vld [vmem:[%s5144_s1 + $0x1b8] sm:$0xff] }
   0xc   :  { %2284 = vmatpush.bf16.msra.mxu2 %v3919_v10  ;;  %v3923_v27 = vld [vmem:[%s5144_s1 + $0xc8] sm:$0xff]  ;;  %v3922_v31 = vld [vmem:[%s5144_s1 + $0xc0] sm:$0xff]  ;;  %v3961_v43 = vld [vmem:[%s5144_s1 + $0x1f8] sm:$0xff] }
   0xd   :  { %2298 = vmatpush.bf16.msra.mxu3 %v3927_v11  ;;  %v2716_v34 = vld [vmem:[%s5145_s0] sm:$0xf]  ;;  %v2724_v36 = vld [vmem:[%s5145_s0 + $0x8] sm:$0xf]  ;;  %v3866_v38 = vld [vmem:[%s5145_s0 + $0x4] sm:$0xf] }
   0xe   :  { %2257 = vmatpush.bf16.msra.mxu0 %v3902_v12  ;;  %v3882_v35 = vld [vmem:[%s5145_s0 + $0x7c] sm:$0xf0]  ;;  %v3883_v37 = vld [vmem:[%s5145_s0 + $0x84] sm:$0xf0]  ;;  %v2718_v39 = vld [vmem:[%s5145_s0 + $0x80] sm:$0xf0] }
   0xf   :  { %2271 = vmatpush.bf16.msra.mxu1 %v3910_v13  ;;  %v3867_v40 = vld [vmem:[%s5145_s0 + $0xc] sm:$0xf]  ;;  %v2717_v44 = vor.u32 %v3882_v35, %v2716_v34  ;;  %v2725_v45 = vor.u32 %v3883_v37, %v2724_v36  ;;  %v2721_v46 = vor.u32 %v3866_v38, %v2718_v39  ;;  %v3936_v48 = vld [vmem:[%s5144_s1 + $0x130] sm:$0xff]  ;;  %v3934_v56 = vld [vmem:[%s5144_s1 + $0x120] sm:$0xff] }
  0x10   :  { %2285 = vmatpush.bf16.msra.mxu2 %v3918_v14  ;;  %v2726_v41 = vld [vmem:[%s5145_s0 + $0x88] sm:$0xf0]  ;;  %v3944_v49 = vld [vmem:[%s5144_s1 + $0x170] sm:$0xff]  ;;  %v3942_v57 = vld [vmem:[%s5144_s1 + $0x160] sm:$0xff] }
  0x11   :  { %2299 = vmatpush.bf16.msra.mxu3 %v3926_v15  ;;  %v2729_v47 = vor.u32 %v3867_v40, %v2726_v41  ;;  %v3952_v50 = vld [vmem:[%s5144_s1 + $0x1b0] sm:$0xff]  ;;  %v3935_v52 = vld [vmem:[%s5144_s1 + $0x128] sm:$0xff]  ;;  %v3950_v58 = vld [vmem:[%s5144_s1 + $0x1a0] sm:$0xff] }
  0x12   :  { %2258 = vmatpush.bf16.msra.mxu0 %v3901_v16  ;;  %v3960_v51 = vld [vmem:[%s5144_s1 + $0x1f0] sm:$0xff]  ;;  %v3943_v53 = vld [vmem:[%s5144_s1 + $0x168] sm:$0xff]  ;;  %v3958_v59 = vld [vmem:[%s5144_s1 + $0x1e0] sm:$0xff] }
  0x13   :  { %2272 = vmatpush.bf16.msra.mxu1 %v3909_v17  ;;  %v3951_v54 = vld [vmem:[%s5144_s1 + $0x1a8] sm:$0xff]  ;;  %v3933_v60 = vld [vmem:[%s5144_s1 + $0x118] sm:$0xff]  ;;  %v3932_v0 = vld [vmem:[%s5144_s1 + $0x110] sm:$0xff] }
  0x14   :  { %2286 = vmatpush.bf16.msra.mxu2 %v3917_v18  ;;  %v3959_v55 = vld [vmem:[%s5144_s1 + $0x1e8] sm:$0xff]  ;;  %v3941_v61 = vld [vmem:[%s5144_s1 + $0x158] sm:$0xff]  ;;  %v3940_v1 = vld [vmem:[%s5144_s1 + $0x150] sm:$0xff] }
  0x15   :  { %2300 = vmatpush.bf16.msra.mxu3 %v3925_v19  ;;  %v3949_v62 = vld [vmem:[%s5144_s1 + $0x198] sm:$0xff]  ;;  %v3948_v2 = vld [vmem:[%s5144_s1 + $0x190] sm:$0xff]  ;;  %v3931_v4 = vld [vmem:[%s5144_s1 + $0x108] sm:$0xff] }
  0x16   :  { %2259 = vmatpush.bf16.msra.mxu0 %v3900_v20  ;;  %v3957_v63 = vld [vmem:[%s5144_s1 + $0x1d8] sm:$0xff]  ;;  %v3956_v3 = vld [vmem:[%s5144_s1 + $0x1d0] sm:$0xff]  ;;  %v3939_v5 = vld [vmem:[%s5144_s1 + $0x148] sm:$0xff] }
  0x17   :  { %2273 = vmatpush.bf16.msra.mxu1 %v3908_v21  ;;  %v3947_v6 = vld [vmem:[%s5144_s1 + $0x188] sm:$0xff]  ;;  %v3930_v8 = vld [vmem:[%s5144_s1 + $0x100] sm:$0xff]  ;;  %v3969_v12 = vld [vmem:[%s5144_s1 + $0x238] sm:$0xff] }
  0x18   :  { %2287 = vmatpush.bf16.msra.mxu2 %v3916_v22  ;;  %v3955_v7 = vld [vmem:[%s5144_s1 + $0x1c8] sm:$0xff]  ;;  %v3938_v9 = vld [vmem:[%s5144_s1 + $0x140] sm:$0xff]  ;;  %v3977_v13 = vld [vmem:[%s5144_s1 + $0x278] sm:$0xff] }
  0x19   :  { %2301 = vmatpush.bf16.msra.mxu3 %v3924_v23  ;;  %v3946_v10 = vld [vmem:[%s5144_s1 + $0x180] sm:$0xff]  ;;  %v2732_v14 = vld [vmem:[%s5145_s0 + $0x10] sm:$0xf]  ;;  %v2740_v16 = vld [vmem:[%s5145_s0 + $0x18] sm:$0xf] }
  0x1a   :  { %2260 = vmatpush.bf16.msra.mxu0 %v3899_v24  ;;  %v3954_v11 = vld [vmem:[%s5144_s1 + $0x1c0] sm:$0xff]  ;;  %v3884_v15 = vld [vmem:[%s5145_s0 + $0x8c] sm:$0xf0]  ;;  %v3885_v17 = vld [vmem:[%s5145_s0 + $0x94] sm:$0xf0] }
  0x1b   :  { %2274 = vmatpush.bf16.msra.mxu1 %v3907_v25  ;;  %v3868_v18 = vld [vmem:[%s5145_s0 + $0x14] sm:$0xf]  ;;  %v3869_v20 = vld [vmem:[%s5145_s0 + $0x1c] sm:$0xf]  ;;  %v2733_v24 = vor.u32 %v3884_v15, %v2732_v14  ;;  %v2741_v25 = vor.u32 %v3885_v17, %v2740_v16  ;;  %v3983_v34 = vld [vmem:[%s5144_s1 + $0x2a8] sm:$0xff] }
  0x1c   :  { %2288 = vmatpush.bf16.msra.mxu2 %v3915_v26  ;;  %v2734_v19 = vld [vmem:[%s5145_s0 + $0x90] sm:$0xf0]  ;;  %v2742_v21 = vld [vmem:[%s5145_s0 + $0x98] sm:$0xf0]  ;;  %v3991_v35 = vld [vmem:[%s5144_s1 + $0x2e8] sm:$0xff] }
  0x1d   :  { %2302 = vmatpush.bf16.msra.mxu3 %v3923_v27  ;;  %v3985_v22 = vld [vmem:[%s5144_s1 + $0x2b8] sm:$0xff]  ;;  %v2737_v26 = vor.u32 %v3868_v18, %v2734_v19  ;;  %v2745_v27 = vor.u32 %v3869_v20, %v2742_v21  ;;  %v3966_v36 = vld [vmem:[%s5144_s1 + $0x220] sm:$0xff]  ;;  %v4015_v14 = vld [vmem:[%s5144_s1 + $0x3a8] sm:$0xff] }
  0x1e   :  { %2261 = vmatpush.bf16.msra.mxu0 %v3898_v28  ;;  %v3993_v23 = vld [vmem:[%s5144_s1 + $0x2f8] sm:$0xff]  ;;  %v3968_v28 = vld [vmem:[%s5144_s1 + $0x230] sm:$0xff]  ;;  %v3974_v37 = vld [vmem:[%s5144_s1 + $0x260] sm:$0xff] }
  0x1f   :  { %2275 = vmatpush.bf16.msra.mxu1 %v3906_v29  ;;  %v3976_v29 = vld [vmem:[%s5144_s1 + $0x270] sm:$0xff]  ;;  %v3982_v38 = vld [vmem:[%s5144_s1 + $0x2a0] sm:$0xff]  ;;  %v3965_v40 = vld [vmem:[%s5144_s1 + $0x218] sm:$0xff] }
  0x20   :  { %2289 = vmatpush.bf16.msra.mxu2 %v3914_v30  ;;  %v3984_v30 = vld [vmem:[%s5144_s1 + $0x2b0] sm:$0xff]  ;;  %v3990_v39 = vld [vmem:[%s5144_s1 + $0x2e0] sm:$0xff]  ;;  %v3973_v41 = vld [vmem:[%s5144_s1 + $0x258] sm:$0xff] }
  0x21   :  { %2303 = vmatpush.bf16.msra.mxu3 %v3922_v31  ;;  %2262 = vmatmul.bf16.vlgmr.msra.gmra.mxu0 %v2717_v44  ;;  %v3992_v31 = vld [vmem:[%s5144_s1 + $0x2f0] sm:$0xff]  ;;  %v4023_v15 = vld [vmem:[%s5144_s1 + $0x3e8] sm:$0xff]  ;;  %v3998_v16 = vld [vmem:[%s5144_s1 + $0x320] sm:$0xff] }
  0x22   :  { %2310 = vmatpush.bf16.msrb.mxu0 %v3937_v32  ;;  %2276 = vmatmul.bf16.vlgmr.msra.gmra.mxu1 %v2721_v46  ;;  %v3967_v32 = vld [vmem:[%s5144_s1 + $0x228] sm:$0xff]  ;;  %v3964_v44 = vld [vmem:[%s5144_s1 + $0x210] sm:$0xff]  ;;  %v4006_v17 = vld [vmem:[%s5144_s1 + $0x360] sm:$0xff] }
  0x23   :  { %2324 = vmatpush.bf16.msrb.mxu1 %v3945_v33  ;;  %2290 = vmatmul.bf16.vlgmr.msra.gmra.mxu2 %v2725_v45  ;;  %v3975_v33 = vld [vmem:[%s5144_s1 + $0x268] sm:$0xff]  ;;  %v3972_v45 = vld [vmem:[%s5144_s1 + $0x250] sm:$0xff]  ;;  %v4014_v18 = vld [vmem:[%s5144_s1 + $0x3a0] sm:$0xff] }
  0x24   :  { %2338 = vmatpush.bf16.msrb.mxu2 %v3953_v42  ;;  %2304 = vmatmul.bf16.vlgmr.msra.gmra.mxu3 %v2729_v47  ;;  %v3981_v42 = vld [vmem:[%s5144_s1 + $0x298] sm:$0xff]  ;;  %v3980_v46 = vld [vmem:[%s5144_s1 + $0x290] sm:$0xff]  ;;  %v4022_v19 = vld [vmem:[%s5144_s1 + $0x3e0] sm:$0xff] }
  0x25   :  { %2352 = vmatpush.bf16.msrb.mxu3 %v3961_v43  ;;  %v3989_v43 = vld [vmem:[%s5144_s1 + $0x2d8] sm:$0xff]  ;;  %v3988_v47 = vld [vmem:[%s5144_s1 + $0x2d0] sm:$0xff] }
  0x26   :  { %2311 = vmatpush.bf16.msrb.mxu0 %v3936_v48  ;;  %v3963_v48 = vld [vmem:[%s5144_s1 + $0x208] sm:$0xff]  ;;  %v3997_v20 = vld [vmem:[%s5144_s1 + $0x318] sm:$0xff] }
  0x27   :  { %2325 = vmatpush.bf16.msrb.mxu1 %v3944_v49  ;;  %v3971_v49 = vld [vmem:[%s5144_s1 + $0x248] sm:$0xff]  ;;  %v4005_v21 = vld [vmem:[%s5144_s1 + $0x358] sm:$0xff] }
  0x28   :  { %2339 = vmatpush.bf16.msrb.mxu2 %v3952_v50  ;;  %v3979_v50 = vld [vmem:[%s5144_s1 + $0x288] sm:$0xff] }
  0x29   :  { %2353 = vmatpush.bf16.msrb.mxu3 %v3960_v51  ;;  %v3987_v51 = vld [vmem:[%s5144_s1 + $0x2c8] sm:$0xff] }
  0x2a   :  { %2312 = vmatpush.bf16.msrb.mxu0 %v3935_v52  ;;  %v3962_v52 = vld [vmem:[%s5144_s1 + $0x200] sm:$0xff] }
  0x2b   :  { %2326 = vmatpush.bf16.msrb.mxu1 %v3943_v53  ;;  %v3970_v53 = vld [vmem:[%s5144_s1 + $0x240] sm:$0xff] }
  0x2c   :  { %2340 = vmatpush.bf16.msrb.mxu2 %v3951_v54  ;;  %v3978_v54 = vld [vmem:[%s5144_s1 + $0x280] sm:$0xff] }
  0x2d   :  { %2354 = vmatpush.bf16.msrb.mxu3 %v3959_v55  ;;  %v3986_v55 = vld [vmem:[%s5144_s1 + $0x2c0] sm:$0xff] }
  0x2e   :  { %2313 = vmatpush.bf16.msrb.mxu0 %v3934_v56  ;;  %v4001_v56 = vld [vmem:[%s5144_s1 + $0x338] sm:$0xff] }
  0x2f   :  { %2327 = vmatpush.bf16.msrb.mxu1 %v3942_v57  ;;  %v4009_v57 = vld [vmem:[%s5144_s1 + $0x378] sm:$0xff] }
  0x30   :  { %2341 = vmatpush.bf16.msrb.mxu2 %v3950_v58  ;;  %v2748_v58 = vld [vmem:[%s5145_s0 + $0x20] sm:$0xf] }
  0x31   :  { %2355 = vmatpush.bf16.msrb.mxu3 %v3958_v59  ;;  %v3886_v59 = vld [vmem:[%s5145_s0 + $0x9c] sm:$0xf0] }
  0x32   :  { %2314 = vmatpush.bf16.msrb.mxu0 %v3933_v60  ;;  %v2756_v60 = vld [vmem:[%s5145_s0 + $0x28] sm:$0xf] }
  0x33   :  { %2328 = vmatpush.bf16.msrb.mxu1 %v3941_v61  ;;  %v3887_v61 = vld [vmem:[%s5145_s0 + $0xa4] sm:$0xf0] }
  0x34   :  { %2342 = vmatpush.bf16.msrb.mxu2 %v3949_v62  ;;  %v3870_v62 = vld [vmem:[%s5145_s0 + $0x24] sm:$0xf] }
  0x35   :  { %2356 = vmatpush.bf16.msrb.mxu3 %v3957_v63  ;;  %v2750_v63 = vld [vmem:[%s5145_s0 + $0xa0] sm:$0xf0] }
  0x36   :  { %2315 = vmatpush.bf16.msrb.mxu0 %v3932_v0  ;;  %v3871_v0 = vld [vmem:[%s5145_s0 + $0x2c] sm:$0xf] }
  0x37   :  { %2329 = vmatpush.bf16.msrb.mxu1 %v3940_v1  ;;  %v2758_v1 = vld [vmem:[%s5145_s0 + $0xa8] sm:$0xf0] }
  0x38   :  { %2343 = vmatpush.bf16.msrb.mxu2 %v3948_v2  ;;  %v4017_v2 = vld [vmem:[%s5144_s1 + $0x3b8] sm:$0xff] }
  0x39   :  { %2357 = vmatpush.bf16.msrb.mxu3 %v3956_v3  ;;  %v4025_v3 = vld [vmem:[%s5144_s1 + $0x3f8] sm:$0xff] }
  0x3a   :  { %2316 = vmatpush.bf16.msrb.mxu0 %v3931_v4  ;;  %v2749_v4 = vor.u32 %v3886_v59, %v2748_v58  ;;  %v4047_v58 = vld [vmem:[%s5144_s1 + $0x4a8] sm:$0xff] }
  0x3b   :  { %2330 = vmatpush.bf16.msrb.mxu1 %v3939_v5  ;;  %v2757_v5 = vor.u32 %v3887_v61, %v2756_v60  ;;  %v4055_v59 = vld [vmem:[%s5144_s1 + $0x4e8] sm:$0xff]  ;;  %v4030_v60 = vld [vmem:[%s5144_s1 + $0x420] sm:$0xff] }
  0x3c   :  { %2344 = vmatpush.bf16.msrb.mxu2 %v3947_v6  ;;  %v2753_v6 = vor.u32 %v3870_v62, %v2750_v63  ;;  %v4038_v61 = vld [vmem:[%s5144_s1 + $0x460] sm:$0xff] }
  0x3d   :  { %2358 = vmatpush.bf16.msrb.mxu3 %v3955_v7  ;;  %v2761_v7 = vor.u32 %v3871_v0, %v2758_v1  ;;  %v4046_v62 = vld [vmem:[%s5144_s1 + $0x4a0] sm:$0xff]  ;;  %v4029_v0 = vld [vmem:[%s5144_s1 + $0x418] sm:$0xff] }
  0x3e   :  { %2317 = vmatpush.bf16.msrb.mxu0 %v3930_v8  ;;  %v4000_v8 = vld [vmem:[%s5144_s1 + $0x330] sm:$0xff]  ;;  %v4054_v63 = vld [vmem:[%s5144_s1 + $0x4e0] sm:$0xff]  ;;  %v4037_v1 = vld [vmem:[%s5144_s1 + $0x458] sm:$0xff] }
  0x3f   :  { %2331 = vmatpush.bf16.msrb.mxu1 %v3938_v9  ;;  %v4008_v9 = vld [vmem:[%s5144_s1 + $0x370] sm:$0xff] }
  0x40   :  { %2345 = vmatpush.bf16.msrb.mxu2 %v3946_v10  ;;  %v4016_v10 = vld [vmem:[%s5144_s1 + $0x3b0] sm:$0xff] }
  0x41   :  { %2359 = vmatpush.bf16.msrb.mxu3 %v3954_v11  ;;  %2318 = vmatmul.bf16.vlgmr.msrb.gmra.mxu0 %v2733_v24  ;;  %v4024_v11 = vld [vmem:[%s5144_s1 + $0x3f0] sm:$0xff] }
  0x42   :  { %2366 = vmatpush.bf16.msra.mxu0 %v3969_v12  ;;  %2332 = vmatmul.bf16.vlgmr.msrb.gmra.mxu1 %v2737_v26  ;;  %v3999_v12 = vld [vmem:[%s5144_s1 + $0x328] sm:$0xff]  ;;  %v3996_v24 = vld [vmem:[%s5144_s1 + $0x310] sm:$0xff] }
  0x43   :  { %2380 = vmatpush.bf16.msra.mxu1 %v3977_v13  ;;  %2346 = vmatmul.bf16.vlgmr.msrb.gmra.mxu2 %v2741_v25  ;;  %v4007_v13 = vld [vmem:[%s5144_s1 + $0x368] sm:$0xff]  ;;  %v4004_v25 = vld [vmem:[%s5144_s1 + $0x350] sm:$0xff] }
  0x44   :  { %2394 = vmatpush.bf16.msra.mxu2 %v3985_v22  ;;  %2360 = vmatmul.bf16.vlgmr.msrb.gmra.mxu3 %v2745_v27  ;;  %v4013_v22 = vld [vmem:[%s5144_s1 + $0x398] sm:$0xff]  ;;  %v4012_v26 = vld [vmem:[%s5144_s1 + $0x390] sm:$0xff] }
  0x45   :  { %2408 = vmatpush.bf16.msra.mxu3 %v3993_v23  ;;  %v4021_v23 = vld [vmem:[%s5144_s1 + $0x3d8] sm:$0xff]  ;;  %v4020_v27 = vld [vmem:[%s5144_s1 + $0x3d0] sm:$0xff] }
  0x46   :  { %2367 = vmatpush.bf16.msra.mxu0 %v3968_v28  ;;  %v3995_v28 = vld [vmem:[%s5144_s1 + $0x308] sm:$0xff] }
  0x47   :  { %2381 = vmatpush.bf16.msra.mxu1 %v3976_v29  ;;  %v4003_v29 = vld [vmem:[%s5144_s1 + $0x348] sm:$0xff] }
  0x48   :  { %2395 = vmatpush.bf16.msra.mxu2 %v3984_v30  ;;  %v4011_v30 = vld [vmem:[%s5144_s1 + $0x388] sm:$0xff] }
  0x49   :  { %2409 = vmatpush.bf16.msra.mxu3 %v3992_v31  ;;  %v4019_v31 = vld [vmem:[%s5144_s1 + $0x3c8] sm:$0xff] }
  0x4a   :  { %2368 = vmatpush.bf16.msra.mxu0 %v3967_v32  ;;  %v3994_v32 = vld [vmem:[%s5144_s1 + $0x300] sm:$0xff] }
  0x4b   :  { %2382 = vmatpush.bf16.msra.mxu1 %v3975_v33  ;;  %v4002_v33 = vld [vmem:[%s5144_s1 + $0x340] sm:$0xff] }
  0x4c   :  { %2396 = vmatpush.bf16.msra.mxu2 %v3983_v34  ;;  %v4010_v34 = vld [vmem:[%s5144_s1 + $0x380] sm:$0xff] }
  0x4d   :  { %2410 = vmatpush.bf16.msra.mxu3 %v3991_v35  ;;  %v4018_v35 = vld [vmem:[%s5144_s1 + $0x3c0] sm:$0xff] }
  0x4e   :  { %2369 = vmatpush.bf16.msra.mxu0 %v3966_v36  ;;  %v4033_v36 = vld [vmem:[%s5144_s1 + $0x438] sm:$0xff] }
  0x4f   :  { %2383 = vmatpush.bf16.msra.mxu1 %v3974_v37  ;;  %v4041_v37 = vld [vmem:[%s5144_s1 + $0x478] sm:$0xff] }
  0x50   :  { %2397 = vmatpush.bf16.msra.mxu2 %v3982_v38  ;;  %v2764_v38 = vld [vmem:[%s5145_s0 + $0x30] sm:$0xf] }
  0x51   :  { %2411 = vmatpush.bf16.msra.mxu3 %v3990_v39  ;;  %v3888_v39 = vld [vmem:[%s5145_s0 + $0xac] sm:$0xf0] }
  0x52   :  { %2370 = vmatpush.bf16.msra.mxu0 %v3965_v40  ;;  %v2772_v40 = vld [vmem:[%s5145_s0 + $0x38] sm:$0xf] }
  0x53   :  { %2384 = vmatpush.bf16.msra.mxu1 %v3973_v41  ;;  %v3889_v41 = vld [vmem:[%s5145_s0 + $0xb4] sm:$0xf0] }
  0x54   :  { %2398 = vmatpush.bf16.msra.mxu2 %v3981_v42  ;;  %v3872_v42 = vld [vmem:[%s5145_s0 + $0x34] sm:$0xf] }
  0x55   :  { %2412 = vmatpush.bf16.msra.mxu3 %v3989_v43  ;;  %v2766_v43 = vld [vmem:[%s5145_s0 + $0xb0] sm:$0xf0] }
  0x56   :  { %2371 = vmatpush.bf16.msra.mxu0 %v3964_v44  ;;  %v3873_v44 = vld [vmem:[%s5145_s0 + $0x3c] sm:$0xf] }
  0x57   :  { %2385 = vmatpush.bf16.msra.mxu1 %v3972_v45  ;;  %v2774_v45 = vld [vmem:[%s5145_s0 + $0xb8] sm:$0xf0] }
  0x58   :  { %2399 = vmatpush.bf16.msra.mxu2 %v3980_v46  ;;  %v4049_v46 = vld [vmem:[%s5144_s1 + $0x4b8] sm:$0xff] }
  0x59   :  { %2413 = vmatpush.bf16.msra.mxu3 %v3988_v47  ;;  %v4057_v47 = vld [vmem:[%s5144_s1 + $0x4f8] sm:$0xff] }
  0x5a   :  { %2372 = vmatpush.bf16.msra.mxu0 %v3963_v48  ;;  %v2765_v48 = vor.u32 %v3888_v39, %v2764_v38  ;;  %v4079_v38 = vld [vmem:[%s5144_s1 + $0x5a8] sm:$0xff] }
  0x5b   :  { %2386 = vmatpush.bf16.msra.mxu1 %v3971_v49  ;;  %v2773_v49 = vor.u32 %v3889_v41, %v2772_v40  ;;  %v4087_v39 = vld [vmem:[%s5144_s1 + $0x5e8] sm:$0xff]  ;;  %v4062_v40 = vld [vmem:[%s5144_s1 + $0x520] sm:$0xff] }
  0x5c   :  { %2400 = vmatpush.bf16.msra.mxu2 %v3979_v50  ;;  %v2769_v50 = vor.u32 %v3872_v42, %v2766_v43  ;;  %v4070_v41 = vld [vmem:[%s5144_s1 + $0x560] sm:$0xff] }
  0x5d   :  { %2414 = vmatpush.bf16.msra.mxu3 %v3987_v51  ;;  %v2777_v51 = vor.u32 %v3873_v44, %v2774_v45  ;;  %v4078_v42 = vld [vmem:[%s5144_s1 + $0x5a0] sm:$0xff]  ;;  %v4061_v44 = vld [vmem:[%s5144_s1 + $0x518] sm:$0xff] }
  0x5e   :  { %2373 = vmatpush.bf16.msra.mxu0 %v3962_v52  ;;  %v4032_v52 = vld [vmem:[%s5144_s1 + $0x430] sm:$0xff]  ;;  %v4086_v43 = vld [vmem:[%s5144_s1 + $0x5e0] sm:$0xff]  ;;  %v4069_v45 = vld [vmem:[%s5144_s1 + $0x558] sm:$0xff] }
  0x5f   :  { %2387 = vmatpush.bf16.msra.mxu1 %v3970_v53  ;;  %v4040_v53 = vld [vmem:[%s5144_s1 + $0x470] sm:$0xff] }
  0x60   :  { %2401 = vmatpush.bf16.msra.mxu2 %v3978_v54  ;;  %v4048_v54 = vld [vmem:[%s5144_s1 + $0x4b0] sm:$0xff] }
  0x61   :  { %2415 = vmatpush.bf16.msra.mxu3 %v3986_v55  ;;  %2374 = vmatmul.bf16.vlgmr.msra.gmra.mxu0 %v2749_v4  ;;  %v4056_v55 = vld [vmem:[%s5144_s1 + $0x4f0] sm:$0xff] }
  0x62   :  { %2422 = vmatpush.bf16.msrb.mxu0 %v4001_v56  ;;  %2388 = vmatmul.bf16.vlgmr.msra.gmra.mxu1 %v2753_v6  ;;  %v4031_v56 = vld [vmem:[%s5144_s1 + $0x428] sm:$0xff]  ;;  %v4028_v4 = vld [vmem:[%s5144_s1 + $0x410] sm:$0xff] }
  0x63   :  { %2436 = vmatpush.bf16.msrb.mxu1 %v4009_v57  ;;  %2402 = vmatmul.bf16.vlgmr.msra.gmra.mxu2 %v2757_v5  ;;  %v4039_v57 = vld [vmem:[%s5144_s1 + $0x468] sm:$0xff]  ;;  %v4036_v5 = vld [vmem:[%s5144_s1 + $0x450] sm:$0xff] }
  0x64   :  { %2450 = vmatpush.bf16.msrb.mxu2 %v4017_v2  ;;  %2416 = vmatmul.bf16.vlgmr.msra.gmra.mxu3 %v2761_v7  ;;  %v4045_v2 = vld [vmem:[%s5144_s1 + $0x498] sm:$0xff]  ;;  %v4044_v6 = vld [vmem:[%s5144_s1 + $0x490] sm:$0xff] }
  0x65   :  { %2464 = vmatpush.bf16.msrb.mxu3 %v4025_v3  ;;  %v4053_v3 = vld [vmem:[%s5144_s1 + $0x4d8] sm:$0xff]  ;;  %v4052_v7 = vld [vmem:[%s5144_s1 + $0x4d0] sm:$0xff] }
  0x66   :  { %2423 = vmatpush.bf16.msrb.mxu0 %v4000_v8  ;;  %v4027_v8 = vld [vmem:[%s5144_s1 + $0x408] sm:$0xff] }
  0x67   :  { %2437 = vmatpush.bf16.msrb.mxu1 %v4008_v9  ;;  %v4035_v9 = vld [vmem:[%s5144_s1 + $0x448] sm:$0xff] }
  0x68   :  { %2451 = vmatpush.bf16.msrb.mxu2 %v4016_v10  ;;  %v4043_v10 = vld [vmem:[%s5144_s1 + $0x488] sm:$0xff] }
  0x69   :  { %2465 = vmatpush.bf16.msrb.mxu3 %v4024_v11  ;;  %v4051_v11 = vld [vmem:[%s5144_s1 + $0x4c8] sm:$0xff] }
  0x6a   :  { %2424 = vmatpush.bf16.msrb.mxu0 %v3999_v12  ;;  %v4026_v12 = vld [vmem:[%s5144_s1 + $0x400] sm:$0xff] }
  0x6b   :  { %2438 = vmatpush.bf16.msrb.mxu1 %v4007_v13  ;;  %v4034_v13 = vld [vmem:[%s5144_s1 + $0x440] sm:$0xff] }
  0x6c   :  { %2452 = vmatpush.bf16.msrb.mxu2 %v4015_v14  ;;  %v4042_v14 = vld [vmem:[%s5144_s1 + $0x480] sm:$0xff] }
  0x6d   :  { %2466 = vmatpush.bf16.msrb.mxu3 %v4023_v15  ;;  %v4050_v15 = vld [vmem:[%s5144_s1 + $0x4c0] sm:$0xff] }
  0x6e   :  { %2425 = vmatpush.bf16.msrb.mxu0 %v3998_v16  ;;  %v4065_v16 = vld [vmem:[%s5144_s1 + $0x538] sm:$0xff] }
  0x6f   :  { %2439 = vmatpush.bf16.msrb.mxu1 %v4006_v17  ;;  %v4073_v17 = vld [vmem:[%s5144_s1 + $0x578] sm:$0xff] }
  0x70   :  { %2453 = vmatpush.bf16.msrb.mxu2 %v4014_v18  ;;  %v2780_v18 = vld [vmem:[%s5145_s0 + $0x40] sm:$0xf] }
  0x71   :  { %2467 = vmatpush.bf16.msrb.mxu3 %v4022_v19  ;;  %v3890_v19 = vld [vmem:[%s5145_s0 + $0xbc] sm:$0xf0] }
  0x72   :  { %2426 = vmatpush.bf16.msrb.mxu0 %v3997_v20  ;;  %v2788_v20 = vld [vmem:[%s5145_s0 + $0x48] sm:$0xf] }
  0x73   :  { %2440 = vmatpush.bf16.msrb.mxu1 %v4005_v21  ;;  %v3891_v21 = vld [vmem:[%s5145_s0 + $0xc4] sm:$0xf0] }
  0x74   :  { %2454 = vmatpush.bf16.msrb.mxu2 %v4013_v22  ;;  %v3874_v22 = vld [vmem:[%s5145_s0 + $0x44] sm:$0xf] }
  0x75   :  { %2468 = vmatpush.bf16.msrb.mxu3 %v4021_v23  ;;  %v2782_v23 = vld [vmem:[%s5145_s0 + $0xc0] sm:$0xf0] }
  0x76   :  { %2427 = vmatpush.bf16.msrb.mxu0 %v3996_v24  ;;  %v3875_v24 = vld [vmem:[%s5145_s0 + $0x4c] sm:$0xf] }
  0x77   :  { %2441 = vmatpush.bf16.msrb.mxu1 %v4004_v25  ;;  %v2790_v25 = vld [vmem:[%s5145_s0 + $0xc8] sm:$0xf0] }
  0x78   :  { %2455 = vmatpush.bf16.msrb.mxu2 %v4012_v26  ;;  %v4081_v26 = vld [vmem:[%s5144_s1 + $0x5b8] sm:$0xff] }
  0x79   :  { %2469 = vmatpush.bf16.msrb.mxu3 %v4020_v27  ;;  %v4089_v27 = vld [vmem:[%s5144_s1 + $0x5f8] sm:$0xff] }
  0x7a   :  { %2428 = vmatpush.bf16.msrb.mxu0 %v3995_v28  ;;  %v2781_v28 = vor.u32 %v3890_v19, %v2780_v18  ;;  %v4111_v18 = vld [vmem:[%s5144_s1 + $0x6a8] sm:$0xff] }
  0x7b   :  { %2442 = vmatpush.bf16.msrb.mxu1 %v4003_v29  ;;  %v2789_v29 = vor.u32 %v3891_v21, %v2788_v20  ;;  %v4119_v19 = vld [vmem:[%s5144_s1 + $0x6e8] sm:$0xff]  ;;  %v4094_v20 = vld [vmem:[%s5144_s1 + $0x620] sm:$0xff] }
  0x7c   :  { %2456 = vmatpush.bf16.msrb.mxu2 %v4011_v30  ;;  %v2785_v30 = vor.u32 %v3874_v22, %v2782_v23  ;;  %v4102_v21 = vld [vmem:[%s5144_s1 + $0x660] sm:$0xff] }
  0x7d   :  { %2470 = vmatpush.bf16.msrb.mxu3 %v4019_v31  ;;  %v2793_v31 = vor.u32 %v3875_v24, %v2790_v25  ;;  %v4110_v22 = vld [vmem:[%s5144_s1 + $0x6a0] sm:$0xff]  ;;  %v4093_v24 = vld [vmem:[%s5144_s1 + $0x618] sm:$0xff] }
  0x7e   :  { %2429 = vmatpush.bf16.msrb.mxu0 %v3994_v32  ;;  %v4064_v32 = vld [vmem:[%s5144_s1 + $0x530] sm:$0xff]  ;;  %v4118_v23 = vld [vmem:[%s5144_s1 + $0x6e0] sm:$0xff]  ;;  %v4101_v25 = vld [vmem:[%s5144_s1 + $0x658] sm:$0xff] }
  0x7f   :  { %2443 = vmatpush.bf16.msrb.mxu1 %v4002_v33  ;;  %v4072_v33 = vld [vmem:[%s5144_s1 + $0x570] sm:$0xff] }
  0x80   :  { %2457 = vmatpush.bf16.msrb.mxu2 %v4010_v34  ;;  %v4080_v34 = vld [vmem:[%s5144_s1 + $0x5b0] sm:$0xff] }
  0x81   :  { %2471 = vmatpush.bf16.msrb.mxu3 %v4018_v35  ;;  %2430 = vmatmul.bf16.vlgmr.msrb.gmra.mxu0 %v2765_v48  ;;  %v4088_v35 = vld [vmem:[%s5144_s1 + $0x5f0] sm:$0xff] }
  0x82   :  { %2478 = vmatpush.bf16.msra.mxu0 %v4033_v36  ;;  %2444 = vmatmul.bf16.vlgmr.msrb.gmra.mxu1 %v2769_v50  ;;  %v4063_v36 = vld [vmem:[%s5144_s1 + $0x528] sm:$0xff]  ;;  %v4060_v48 = vld [vmem:[%s5144_s1 + $0x510] sm:$0xff] }
  0x83   :  { %2492 = vmatpush.bf16.msra.mxu1 %v4041_v37  ;;  %2458 = vmatmul.bf16.vlgmr.msrb.gmra.mxu2 %v2773_v49  ;;  %v4071_v37 = vld [vmem:[%s5144_s1 + $0x568] sm:$0xff]  ;;  %v4068_v49 = vld [vmem:[%s5144_s1 + $0x550] sm:$0xff] }
  0x84   :  { %2506 = vmatpush.bf16.msra.mxu2 %v4049_v46  ;;  %2472 = vmatmul.bf16.vlgmr.msrb.gmra.mxu3 %v2777_v51  ;;  %v4077_v46 = vld [vmem:[%s5144_s1 + $0x598] sm:$0xff]  ;;  %v4076_v50 = vld [vmem:[%s5144_s1 + $0x590] sm:$0xff] }
  0x85   :  { %2520 = vmatpush.bf16.msra.mxu3 %v4057_v47  ;;  %v4085_v47 = vld [vmem:[%s5144_s1 + $0x5d8] sm:$0xff]  ;;  %v4084_v51 = vld [vmem:[%s5144_s1 + $0x5d0] sm:$0xff] }
  0x86   :  { %2479 = vmatpush.bf16.msra.mxu0 %v4032_v52  ;;  %v4059_v52 = vld [vmem:[%s5144_s1 + $0x508] sm:$0xff] }
  0x87   :  { %2493 = vmatpush.bf16.msra.mxu1 %v4040_v53  ;;  %v4067_v53 = vld [vmem:[%s5144_s1 + $0x548] sm:$0xff] }
  0x88   :  { %2507 = vmatpush.bf16.msra.mxu2 %v4048_v54  ;;  %v4075_v54 = vld [vmem:[%s5144_s1 + $0x588] sm:$0xff] }
  0x89   :  { %2521 = vmatpush.bf16.msra.mxu3 %v4056_v55  ;;  %v4083_v55 = vld [vmem:[%s5144_s1 + $0x5c8] sm:$0xff] }
  0x8a   :  { %2480 = vmatpush.bf16.msra.mxu0 %v4031_v56  ;;  %v4058_v56 = vld [vmem:[%s5144_s1 + $0x500] sm:$0xff] }
  0x8b   :  { %2494 = vmatpush.bf16.msra.mxu1 %v4039_v57  ;;  %v4066_v57 = vld [vmem:[%s5144_s1 + $0x540] sm:$0xff] }
  0x8c   :  { %2508 = vmatpush.bf16.msra.mxu2 %v4047_v58  ;;  %v4074_v58 = vld [vmem:[%s5144_s1 + $0x580] sm:$0xff] }
  0x8d   :  { %2522 = vmatpush.bf16.msra.mxu3 %v4055_v59  ;;  %v4082_v59 = vld [vmem:[%s5144_s1 + $0x5c0] sm:$0xff] }
  0x8e   :  { %2481 = vmatpush.bf16.msra.mxu0 %v4030_v60  ;;  %v4097_v60 = vld [vmem:[%s5144_s1 + $0x638] sm:$0xff] }
  0x8f   :  { %2495 = vmatpush.bf16.msra.mxu1 %v4038_v61  ;;  %v4105_v61 = vld [vmem:[%s5144_s1 + $0x678] sm:$0xff] }
  0x90   :  { %2509 = vmatpush.bf16.msra.mxu2 %v4046_v62  ;;  %v2796_v62 = vld [vmem:[%s5145_s0 + $0x50] sm:$0xf] }
  0x91   :  { %2523 = vmatpush.bf16.msra.mxu3 %v4054_v63  ;;  %v3892_v63 = vld [vmem:[%s5145_s0 + $0xcc] sm:$0xf0] }
  0x92   :  { %2482 = vmatpush.bf16.msra.mxu0 %v4029_v0  ;;  %v2804_v0 = vld [vmem:[%s5145_s0 + $0x58] sm:$0xf] }
  0x93   :  { %2496 = vmatpush.bf16.msra.mxu1 %v4037_v1  ;;  %v3893_v1 = vld [vmem:[%s5145_s0 + $0xd4] sm:$0xf0] }
  0x94   :  { %2510 = vmatpush.bf16.msra.mxu2 %v4045_v2  ;;  %v3876_v2 = vld [vmem:[%s5145_s0 + $0x54] sm:$0xf] }
  0x95   :  { %2524 = vmatpush.bf16.msra.mxu3 %v4053_v3  ;;  %v2798_v3 = vld [vmem:[%s5145_s0 + $0xd0] sm:$0xf0] }
  0x96   :  { %2483 = vmatpush.bf16.msra.mxu0 %v4028_v4  ;;  %v3877_v4 = vld [vmem:[%s5145_s0 + $0x5c] sm:$0xf] }
  0x97   :  { %2497 = vmatpush.bf16.msra.mxu1 %v4036_v5  ;;  %v2806_v5 = vld [vmem:[%s5145_s0 + $0xd8] sm:$0xf0] }
  0x98   :  { %2511 = vmatpush.bf16.msra.mxu2 %v4044_v6  ;;  %v4113_v6 = vld [vmem:[%s5144_s1 + $0x6b8] sm:$0xff] }
  0x99   :  { %2525 = vmatpush.bf16.msra.mxu3 %v4052_v7  ;;  %v4121_v7 = vld [vmem:[%s5144_s1 + $0x6f8] sm:$0xff] }
  0x9a   :  { %2484 = vmatpush.bf16.msra.mxu0 %v4027_v8  ;;  %v2797_v8 = vor.u32 %v3892_v63, %v2796_v62  ;;  %v4143_v62 = vld [vmem:[%s5144_s1 + $0x7a8] sm:$0xff] }
  0x9b   :  { %2498 = vmatpush.bf16.msra.mxu1 %v4035_v9  ;;  %v2805_v9 = vor.u32 %v3893_v1, %v2804_v0  ;;  %v4151_v63 = vld [vmem:[%s5144_s1 + $0x7e8] sm:$0xff]  ;;  %v4126_v0 = vld [vmem:[%s5144_s1 + $0x720] sm:$0xff] }
  0x9c   :  { %2512 = vmatpush.bf16.msra.mxu2 %v4043_v10  ;;  %v2801_v10 = vor.u32 %v3876_v2, %v2798_v3  ;;  %v4134_v1 = vld [vmem:[%s5144_s1 + $0x760] sm:$0xff] }
  0x9d   :  { %2526 = vmatpush.bf16.msra.mxu3 %v4051_v11  ;;  %v2809_v11 = vor.u32 %v3877_v4, %v2806_v5  ;;  %v4142_v2 = vld [vmem:[%s5144_s1 + $0x7a0] sm:$0xff]  ;;  %v4125_v4 = vld [vmem:[%s5144_s1 + $0x718] sm:$0xff] }
  0x9e   :  { %2485 = vmatpush.bf16.msra.mxu0 %v4026_v12  ;;  %v4096_v12 = vld [vmem:[%s5144_s1 + $0x630] sm:$0xff]  ;;  %v4150_v3 = vld [vmem:[%s5144_s1 + $0x7e0] sm:$0xff]  ;;  %v4133_v5 = vld [vmem:[%s5144_s1 + $0x758] sm:$0xff] }
  0x9f   :  { %2499 = vmatpush.bf16.msra.mxu1 %v4034_v13  ;;  %v4104_v13 = vld [vmem:[%s5144_s1 + $0x670] sm:$0xff] }
  0xa0   :  { %2513 = vmatpush.bf16.msra.mxu2 %v4042_v14  ;;  %v4112_v14 = vld [vmem:[%s5144_s1 + $0x6b0] sm:$0xff] }
  0xa1   :  { %2527 = vmatpush.bf16.msra.mxu3 %v4050_v15  ;;  %2486 = vmatmul.bf16.vlgmr.msra.gmra.mxu0 %v2781_v28  ;;  %v4120_v15 = vld [vmem:[%s5144_s1 + $0x6f0] sm:$0xff] }
  0xa2   :  { %2534 = vmatpush.bf16.msrb.mxu0 %v4065_v16  ;;  %2500 = vmatmul.bf16.vlgmr.msra.gmra.mxu1 %v2785_v30  ;;  %v4095_v16 = vld [vmem:[%s5144_s1 + $0x628] sm:$0xff]  ;;  %v4092_v28 = vld [vmem:[%s5144_s1 + $0x610] sm:$0xff] }
  0xa3   :  { %2548 = vmatpush.bf16.msrb.mxu1 %v4073_v17  ;;  %2514 = vmatmul.bf16.vlgmr.msra.gmra.mxu2 %v2789_v29  ;;  %v4103_v17 = vld [vmem:[%s5144_s1 + $0x668] sm:$0xff]  ;;  %v4100_v29 = vld [vmem:[%s5144_s1 + $0x650] sm:$0xff] }
  0xa4   :  { %2562 = vmatpush.bf16.msrb.mxu2 %v4081_v26  ;;  %2528 = vmatmul.bf16.vlgmr.msra.gmra.mxu3 %v2793_v31  ;;  %v4109_v26 = vld [vmem:[%s5144_s1 + $0x698] sm:$0xff]  ;;  %v4108_v30 = vld [vmem:[%s5144_s1 + $0x690] sm:$0xff] }
  0xa5   :  { %2576 = vmatpush.bf16.msrb.mxu3 %v4089_v27  ;;  %v4117_v27 = vld [vmem:[%s5144_s1 + $0x6d8] sm:$0xff]  ;;  %v4116_v31 = vld [vmem:[%s5144_s1 + $0x6d0] sm:$0xff] }
  0xa6   :  { %2535 = vmatpush.bf16.msrb.mxu0 %v4064_v32  ;;  %v4091_v32 = vld [vmem:[%s5144_s1 + $0x608] sm:$0xff] }
  0xa7   :  { %2549 = vmatpush.bf16.msrb.mxu1 %v4072_v33  ;;  %v4099_v33 = vld [vmem:[%s5144_s1 + $0x648] sm:$0xff] }
  0xa8   :  { %2563 = vmatpush.bf16.msrb.mxu2 %v4080_v34  ;;  %v4107_v34 = vld [vmem:[%s5144_s1 + $0x688] sm:$0xff] }
  0xa9   :  { %2577 = vmatpush.bf16.msrb.mxu3 %v4088_v35  ;;  %v4115_v35 = vld [vmem:[%s5144_s1 + $0x6c8] sm:$0xff] }
  0xaa   :  { %2536 = vmatpush.bf16.msrb.mxu0 %v4063_v36  ;;  %v4090_v36 = vld [vmem:[%s5144_s1 + $0x600] sm:$0xff] }
  0xab   :  { %2550 = vmatpush.bf16.msrb.mxu1 %v4071_v37  ;;  %v4098_v37 = vld [vmem:[%s5144_s1 + $0x640] sm:$0xff] }
  0xac   :  { %2564 = vmatpush.bf16.msrb.mxu2 %v4079_v38  ;;  %v4106_v38 = vld [vmem:[%s5144_s1 + $0x680] sm:$0xff] }
  0xad   :  { %2578 = vmatpush.bf16.msrb.mxu3 %v4087_v39  ;;  %v4114_v39 = vld [vmem:[%s5144_s1 + $0x6c0] sm:$0xff] }
  0xae   :  { %2537 = vmatpush.bf16.msrb.mxu0 %v4062_v40  ;;  %v4129_v40 = vld [vmem:[%s5144_s1 + $0x738] sm:$0xff] }
  0xaf   :  { %2551 = vmatpush.bf16.msrb.mxu1 %v4070_v41  ;;  %v4137_v41 = vld [vmem:[%s5144_s1 + $0x778] sm:$0xff] }
  0xb0   :  { %2565 = vmatpush.bf16.msrb.mxu2 %v4078_v42  ;;  %v2812_v42 = vld [vmem:[%s5145_s0 + $0x60] sm:$0xf] }
  0xb1   :  { %2579 = vmatpush.bf16.msrb.mxu3 %v4086_v43  ;;  %v3894_v43 = vld [vmem:[%s5145_s0 + $0xdc] sm:$0xf0] }
  0xb2   :  { %2538 = vmatpush.bf16.msrb.mxu0 %v4061_v44  ;;  %v2820_v44 = vld [vmem:[%s5145_s0 + $0x68] sm:$0xf] }
  0xb3   :  { %2552 = vmatpush.bf16.msrb.mxu1 %v4069_v45  ;;  %v3895_v45 = vld [vmem:[%s5145_s0 + $0xe4] sm:$0xf0] }
  0xb4   :  { %2566 = vmatpush.bf16.msrb.mxu2 %v4077_v46  ;;  %v3878_v46 = vld [vmem:[%s5145_s0 + $0x64] sm:$0xf] }
  0xb5   :  { %2580 = vmatpush.bf16.msrb.mxu3 %v4085_v47  ;;  %v2814_v47 = vld [vmem:[%s5145_s0 + $0xe0] sm:$0xf0] }
  0xb6   :  { %2539 = vmatpush.bf16.msrb.mxu0 %v4060_v48  ;;  %v3879_v48 = vld [vmem:[%s5145_s0 + $0x6c] sm:$0xf] }
  0xb7   :  { %2553 = vmatpush.bf16.msrb.mxu1 %v4068_v49  ;;  %v2822_v49 = vld [vmem:[%s5145_s0 + $0xe8] sm:$0xf0] }
  0xb8   :  { %2567 = vmatpush.bf16.msrb.mxu2 %v4076_v50  ;;  %v4145_v50 = vld [vmem:[%s5144_s1 + $0x7b8] sm:$0xff] }
  0xb9   :  { %2581 = vmatpush.bf16.msrb.mxu3 %v4084_v51  ;;  %v4153_v51 = vld [vmem:[%s5144_s1 + $0x7f8] sm:$0xff] }
  0xba   :  { %2540 = vmatpush.bf16.msrb.mxu0 %v4059_v52  ;;  %v2813_v52 = vor.u32 %v3894_v43, %v2812_v42 }
  0xbb   :  { %2554 = vmatpush.bf16.msrb.mxu1 %v4067_v53  ;;  %v2821_v53 = vor.u32 %v3895_v45, %v2820_v44 }
  0xbc   :  { %2568 = vmatpush.bf16.msrb.mxu2 %v4075_v54  ;;  %v2817_v54 = vor.u32 %v3878_v46, %v2814_v47 }
  0xbd   :  { %2582 = vmatpush.bf16.msrb.mxu3 %v4083_v55  ;;  %v2825_v55 = vor.u32 %v3879_v48, %v2822_v49 }
  0xbe   :  { %2541 = vmatpush.bf16.msrb.mxu0 %v4058_v56  ;;  %v4128_v56 = vld [vmem:[%s5144_s1 + $0x730] sm:$0xff] }
  0xbf   :  { %2555 = vmatpush.bf16.msrb.mxu1 %v4066_v57  ;;  %v4136_v57 = vld [vmem:[%s5144_s1 + $0x770] sm:$0xff] }
  0xc0   :  { %2569 = vmatpush.bf16.msrb.mxu2 %v4074_v58  ;;  %v4144_v58 = vld [vmem:[%s5144_s1 + $0x7b0] sm:$0xff] }
  0xc1   :  { %2583 = vmatpush.bf16.msrb.mxu3 %v4082_v59  ;;  %2542 = vmatmul.bf16.vlgmr.msrb.gmra.mxu0 %v2797_v8  ;;  %v4152_v59 = vld [vmem:[%s5144_s1 + $0x7f0] sm:$0xff] }
  0xc2   :  { %2590 = vmatpush.bf16.msra.mxu0 %v4097_v60  ;;  %2556 = vmatmul.bf16.vlgmr.msrb.gmra.mxu1 %v2801_v10  ;;  %v4127_v60 = vld [vmem:[%s5144_s1 + $0x728] sm:$0xff]  ;;  %v4124_v8 = vld [vmem:[%s5144_s1 + $0x710] sm:$0xff] }
  0xc3   :  { %2604 = vmatpush.bf16.msra.mxu1 %v4105_v61  ;;  %2570 = vmatmul.bf16.vlgmr.msrb.gmra.mxu2 %v2805_v9  ;;  %v4135_v61 = vld [vmem:[%s5144_s1 + $0x768] sm:$0xff]  ;;  %v4132_v9 = vld [vmem:[%s5144_s1 + $0x750] sm:$0xff] }
  0xc4   :  { %2618 = vmatpush.bf16.msra.mxu2 %v4113_v6  ;;  %2584 = vmatmul.bf16.vlgmr.msrb.gmra.mxu3 %v2809_v11  ;;  %v4141_v6 = vld [vmem:[%s5144_s1 + $0x798] sm:$0xff]  ;;  %v4140_v10 = vld [vmem:[%s5144_s1 + $0x790] sm:$0xff] }
  0xc5   :  { %2632 = vmatpush.bf16.msra.mxu3 %v4121_v7  ;;  %v4149_v7 = vld [vmem:[%s5144_s1 + $0x7d8] sm:$0xff]  ;;  %v4148_v11 = vld [vmem:[%s5144_s1 + $0x7d0] sm:$0xff] }
  0xc6   :  { %2591 = vmatpush.bf16.msra.mxu0 %v4096_v12  ;;  %v4123_v12 = vld [vmem:[%s5144_s1 + $0x708] sm:$0xff] }
  0xc7   :  { %2605 = vmatpush.bf16.msra.mxu1 %v4104_v13  ;;  %v4131_v13 = vld [vmem:[%s5144_s1 + $0x748] sm:$0xff] }
  0xc8   :  { %2619 = vmatpush.bf16.msra.mxu2 %v4112_v14  ;;  %v4139_v14 = vld [vmem:[%s5144_s1 + $0x788] sm:$0xff] }
  0xc9   :  { %2633 = vmatpush.bf16.msra.mxu3 %v4120_v15  ;;  %v4147_v15 = vld [vmem:[%s5144_s1 + $0x7c8] sm:$0xff] }
  0xca   :  { %2592 = vmatpush.bf16.msra.mxu0 %v4095_v16  ;;  %v4122_v16 = vld [vmem:[%s5144_s1 + $0x700] sm:$0xff] }
  0xcb   :  { %2606 = vmatpush.bf16.msra.mxu1 %v4103_v17  ;;  %v4130_v17 = vld [vmem:[%s5144_s1 + $0x740] sm:$0xff] }
  0xcc   :  { %2620 = vmatpush.bf16.msra.mxu2 %v4111_v18  ;;  %v4138_v18 = vld [vmem:[%s5144_s1 + $0x780] sm:$0xff] }
  0xcd   :  { %2634 = vmatpush.bf16.msra.mxu3 %v4119_v19  ;;  %v4146_v19 = vld [vmem:[%s5144_s1 + $0x7c0] sm:$0xff] }
  0xce   :  { %2593 = vmatpush.bf16.msra.mxu0 %v4094_v20  ;;  %v2828_v20 = vld [vmem:[%s5145_s0 + $0x70] sm:$0xf] }
  0xcf   :  { %2607 = vmatpush.bf16.msra.mxu1 %v4102_v21  ;;  %v3896_v21 = vld [vmem:[%s5145_s0 + $0xec] sm:$0xf0] }
  0xd0   :  { %2621 = vmatpush.bf16.msra.mxu2 %v4110_v22  ;;  %v3880_v22 = vld [vmem:[%s5145_s0 + $0x74] sm:$0xf] }
  0xd1   :  { %2635 = vmatpush.bf16.msra.mxu3 %v4118_v23  ;;  %v2830_v23 = vld [vmem:[%s5145_s0 + $0xf0] sm:$0xf0] }
  0xd2   :  { %2594 = vmatpush.bf16.msra.mxu0 %v4093_v24  ;;  %v2836_v24 = vld [vmem:[%s5145_s0 + $0x78] sm:$0xf] }
  0xd3   :  { %2608 = vmatpush.bf16.msra.mxu1 %v4101_v25  ;;  %v3897_v25 = vld [vmem:[%s5145_s0 + $0xf4] sm:$0xf0] }
  0xd4   :  { %2622 = vmatpush.bf16.msra.mxu2 %v4109_v26  ;;  %v3881_v26 = vld [vmem:[%s5145_s0 + $0x7c] sm:$0xf] }
  0xd5   :  { %2636 = vmatpush.bf16.msra.mxu3 %v4117_v27  ;;  %v2838_v27 = vld [vmem:[%s5145_s0 + $0xf8] sm:$0xf0] }
  0xd6   :  { %2595 = vmatpush.bf16.msra.mxu0 %v4092_v28  ;;  %v2829_v28 = vor.u32 %v3896_v21, %v2828_v20 }
  0xd7   :  { %2609 = vmatpush.bf16.msra.mxu1 %v4100_v29  ;;  %v2833_v29 = vor.u32 %v3880_v22, %v2830_v23 }
  0xd8   :  { %2623 = vmatpush.bf16.msra.mxu2 %v4108_v30  ;;  %v2263_v30 = vpop.f32.mrf.mxu0 }
  0xd9   :  { %2637 = vmatpush.bf16.msra.mxu3 %v4116_v31  ;;  %v2837_v31 = vor.u32 %v3897_v25, %v2836_v24 }
  0xda   :  { %2596 = vmatpush.bf16.msra.mxu0 %v4091_v32  ;;  %v2841_v32 = vor.u32 %v3881_v26, %v2838_v27 }
  0xdb   :  { %2610 = vmatpush.bf16.msra.mxu1 %v4099_v33  ;;  %v2277_v33 = vpop.f32.mrf.mxu1 }
  0xdc   :  { %2624 = vmatpush.bf16.msra.mxu2 %v4107_v34  ;;  %v2291_v34 = vpop.f32.mrf.mxu2 }
  0xdd   :  { %2638 = vmatpush.bf16.msra.mxu3 %v4115_v35  ;;  %v2305_v35 = vpop.f32.mrf.mxu3 }
  0xde   :  { %2597 = vmatpush.bf16.msra.mxu0 %v4090_v36 }
  0xdf   :  { %2611 = vmatpush.bf16.msra.mxu1 %v4098_v37 }
  0xe0   :  { %2625 = vmatpush.bf16.msra.mxu2 %v4106_v38  ;;  %v2265_v36 = vpop.f32.mrf.mxu0 }
  0xe1   :  { %2639 = vmatpush.bf16.msra.mxu3 %v4114_v39  ;;  %2598 = vmatmul.bf16.vlgmr.msra.gmra.mxu0 %v2813_v52 }
  0xe2   :  { %2646 = vmatpush.bf16.msrb.mxu0 %v4129_v40  ;;  %2612 = vmatmul.bf16.vlgmr.msra.gmra.mxu1 %v2817_v54 }
  0xe3   :  { %2660 = vmatpush.bf16.msrb.mxu1 %v4137_v41  ;;  %2626 = vmatmul.bf16.vlgmr.msra.gmra.mxu2 %v2821_v53  ;;  %v2279_v37 = vpop.f32.mrf.mxu1 }
  0xe4   :  { %2674 = vmatpush.bf16.msrb.mxu2 %v4145_v50  ;;  %2640 = vmatmul.bf16.vlgmr.msra.gmra.mxu3 %v2825_v55  ;;  %v2293_v38 = vpop.f32.mrf.mxu2  ;;  %v2278_v50 = vadd.f32 %v2277_v33, %v2263_v30 }
  0xe5   :  { %2688 = vmatpush.bf16.msrb.mxu3 %v4153_v51  ;;  %v2307_v39 = vpop.f32.mrf.mxu3 }
  0xe6   :  { %2647 = vmatpush.bf16.msrb.mxu0 %v4128_v56  ;;  %v2292_v53 = vadd.f32 %v2291_v34, %v2278_v50 }
  0xe7   :  { %2661 = vmatpush.bf16.msrb.mxu1 %v4136_v57 }
  0xe8   :  { %2675 = vmatpush.bf16.msrb.mxu2 %v4144_v58  ;;  %v2319_v40 = vpop.f32.mrf.mxu0  ;;  %v2306_v56 = vadd.f32 %v2305_v35, %v2292_v53 }
  0xe9   :  { %2689 = vmatpush.bf16.msrb.mxu3 %v4152_v59  ;;  %v2280_v59 = vadd.f32 %v2279_v37, %v2265_v36 }
  0xea   :  { %2648 = vmatpush.bf16.msrb.mxu0 %v4127_v60  ;;  %v2320_v60 = vadd.f32 %v2319_v40, %v2306_v56 }
  0xeb   :  { %2662 = vmatpush.bf16.msrb.mxu1 %v4135_v61  ;;  %v2333_v41 = vpop.f32.mrf.mxu1 }
  0xec   :  { %2676 = vmatpush.bf16.msrb.mxu2 %v4143_v62  ;;  %v2347_v42 = vpop.f32.mrf.mxu2 }
  0xed   :  { %2690 = vmatpush.bf16.msrb.mxu3 %v4151_v63  ;;  %v2361_v43 = vpop.f32.mrf.mxu3  ;;  %v2294_v63 = vadd.f32 %v2293_v38, %v2280_v59 }
  0xee   :  { %2649 = vmatpush.bf16.msrb.mxu0 %v4126_v0  ;;  %v2334_v0 = vadd.f32 %v2333_v41, %v2320_v60 }
  0xef   :  { %2663 = vmatpush.bf16.msrb.mxu1 %v4134_v1 }
  0xf0   :  { %2677 = vmatpush.bf16.msrb.mxu2 %v4142_v2  ;;  %v2321_v44 = vpop.f32.mrf.mxu0 }
  0xf1   :  { %2691 = vmatpush.bf16.msrb.mxu3 %v4150_v3  ;;  %v2308_v3 = vadd.f32 %v2307_v39, %v2294_v63 }
  0xf2   :  { %2650 = vmatpush.bf16.msrb.mxu0 %v4125_v4  ;;  %v2348_v4 = vadd.f32 %v2347_v42, %v2334_v0 }
  0xf3   :  { %2664 = vmatpush.bf16.msrb.mxu1 %v4133_v5  ;;  %v2335_v45 = vpop.f32.mrf.mxu1  ;;  %v2322_v5 = vadd.f32 %v2321_v44, %v2308_v3 }
  0xf4   :  { %2678 = vmatpush.bf16.msrb.mxu2 %v4141_v6  ;;  %v2349_v46 = vpop.f32.mrf.mxu2 }
  0xf5   :  { %2692 = vmatpush.bf16.msrb.mxu3 %v4149_v7  ;;  %v2363_v47 = vpop.f32.mrf.mxu3  ;;  %v2362_v7 = vadd.f32 %v2361_v43, %v2348_v4 }
  0xf6   :  { %2651 = vmatpush.bf16.msrb.mxu0 %v4124_v8 }
  0xf7   :  { %2665 = vmatpush.bf16.msrb.mxu1 %v4132_v9  ;;  %v2336_v9 = vadd.f32 %v2335_v45, %v2322_v5 }
  0xf8   :  { %2679 = vmatpush.bf16.msrb.mxu2 %v4140_v10  ;;  %v2375_v48 = vpop.f32.mrf.mxu0 }
  0xf9   :  { %2693 = vmatpush.bf16.msrb.mxu3 %v4148_v11  ;;  %v2376_v10 = vadd.f32 %v2375_v48, %v2362_v7  ;;  %v2350_v11 = vadd.f32 %v2349_v46, %v2336_v9 }
  0xfa   :  { %2652 = vmatpush.bf16.msrb.mxu0 %v4123_v12 }
  0xfb   :  { %2666 = vmatpush.bf16.msrb.mxu1 %v4131_v13  ;;  %v2389_v49 = vpop.f32.mrf.mxu1 }
  0xfc   :  { %2680 = vmatpush.bf16.msrb.mxu2 %v4139_v14  ;;  %v2403_v51 = vpop.f32.mrf.mxu2  ;;  %v2390_v14 = vadd.f32 %v2389_v49, %v2376_v10 }
  0xfd   :  { %2694 = vmatpush.bf16.msrb.mxu3 %v4147_v15  ;;  %v2417_v52 = vpop.f32.mrf.mxu3 }
  0xfe   :  { %2653 = vmatpush.bf16.msrb.mxu0 %v4122_v16  ;;  %v2364_v16 = vadd.f32 %v2363_v47, %v2350_v11 }
  0xff   :  { %2667 = vmatpush.bf16.msrb.mxu1 %v4130_v17  ;;  %v2404_v17 = vadd.f32 %v2403_v51, %v2390_v14 }
 0x100   :  { %2681 = vmatpush.bf16.msrb.mxu2 %v4138_v18  ;;  %v2377_v54 = vpop.f32.mrf.mxu0 }
 0x101   :  { %2695 = vmatpush.bf16.msrb.mxu3 %v4146_v19  ;;  %2654 = vmatmul.bf16.vlgmr.msrb.gmra.mxu0 %v2829_v28  ;;  %v2378_v19 = vadd.f32 %v2377_v54, %v2364_v16  ;;  %v2418_v20 = vadd.f32 %v2417_v52, %v2404_v17 }
 0x102   :  { %2668 = vmatmul.bf16.vlgmr.msrb.gmra.mxu1 %v2833_v29 }
 0x103   :  { %2682 = vmatmul.bf16.vlgmr.msrb.gmra.mxu2 %v2837_v31  ;;  %v2391_v55 = vpop.f32.mrf.mxu1 }
 0x104   :  { %2696 = vmatmul.bf16.vlgmr.msrb.gmra.mxu3 %v2841_v32  ;;  %v2405_v57 = vpop.f32.mrf.mxu2  ;;  %v2392_v23 = vadd.f32 %v2391_v55, %v2378_v19 }
 0x105   :  { %v2419_v58 = vpop.f32.mrf.mxu3 }
 0x106   :  { %v2406_v25 = vadd.f32 %v2405_v57, %v2392_v23 }
 0x108   :  { %v2431_v61 = vpop.f32.mrf.mxu0  ;;  %v2420_v29 = vadd.f32 %v2419_v58, %v2406_v25 }
 0x109   :  { %v2432_v24 = vadd.f32 %v2431_v61, %v2418_v20 }
 0x10b   :  { %v2445_v62 = vpop.f32.mrf.mxu1 }
 0x10c   :  { %v2459_v1 = vpop.f32.mrf.mxu2  ;;  %v2446_v27 = vadd.f32 %v2445_v62, %v2432_v24 }
 0x10d   :  { %v2473_v2 = vpop.f32.mrf.mxu3 }
 0x10e   :  { %v2460_v30 = vadd.f32 %v2459_v1, %v2446_v27 }
 0x110   :  { %v2433_v6 = vpop.f32.mrf.mxu0  ;;  %v2474_v34 = vadd.f32 %v2473_v2, %v2460_v30 }
 0x111   :  { %v2434_v31 = vadd.f32 %v2433_v6, %v2420_v29 }
 0x113   :  { %v2447_v8 = vpop.f32.mrf.mxu1 }
 0x114   :  { %v2461_v12 = vpop.f32.mrf.mxu2  ;;  %v2448_v36 = vadd.f32 %v2447_v8, %v2434_v31 }
 0x115   :  { %v2475_v13 = vpop.f32.mrf.mxu3 }
 0x116   :  { %v2462_v39 = vadd.f32 %v2461_v12, %v2448_v36 }
 0x118   :  { %v2476_v43 = vadd.f32 %v2475_v13, %v2462_v39 }
 0x11e   :  { %v2487_v15 = vpop.f32.mrf.mxu0 }
 0x11f   :  { %v2501_v18 = vpop.f32.mrf.mxu1  ;;  %v2488_v37 = vadd.f32 %v2487_v15, %v2474_v34 }
 0x121   :  { %v2502_v40 = vadd.f32 %v2501_v18, %v2488_v37 }
 0x126   :  { %v2515_v21 = vpop.f32.mrf.mxu2  ;;  %v2489_v26 = vpop.f32.mrf.mxu0 }
 0x127   :  { %v2529_v22 = vpop.f32.mrf.mxu3  ;;  %v2503_v28 = vpop.f32.mrf.mxu1  ;;  %v2516_v44 = vadd.f32 %v2515_v21, %v2502_v40  ;;  %v2490_v45 = vadd.f32 %v2489_v26, %v2476_v43  ;;  %v4154_v21 = vld [vmem:[%s5146_s2] ss:$0 sm:$0xff] }
 0x129   :  { %v2530_v47 = vadd.f32 %v2529_v22, %v2516_v44  ;;  %v2504_v49 = vadd.f32 %v2503_v28, %v2490_v45 }
 0x12e   :  { %v2517_v32 = vpop.f32.mrf.mxu2 }
 0x12f   :  { %v2531_v33 = vpop.f32.mrf.mxu3  ;;  %v2518_v51 = vadd.f32 %v2517_v32, %v2504_v49 }
 0x131   :  { %v2532_v56 = vadd.f32 %v2531_v33, %v2518_v51 }
 0x13e   :  { %v2543_v35 = vpop.f32.mrf.mxu0 }
 0x13f   :  { %v2557_v38 = vpop.f32.mrf.mxu1  ;;  %v2544_v50 = vadd.f32 %v2543_v35, %v2530_v47 }
 0x141   :  { %v2558_v54 = vadd.f32 %v2557_v38, %v2544_v50 }
 0x146   :  { %v2571_v41 = vpop.f32.mrf.mxu2  ;;  %v2545_v46 = vpop.f32.mrf.mxu0 }
 0x147   :  { %v2585_v42 = vpop.f32.mrf.mxu3  ;;  %v2559_v48 = vpop.f32.mrf.mxu1  ;;  %v2572_v57 = vadd.f32 %v2571_v41, %v2558_v54  ;;  %v2546_v59 = vadd.f32 %v2545_v46, %v2532_v56 }
 0x149   :  { %v2586_v60 = vadd.f32 %v2585_v42, %v2572_v57  ;;  %v2560_v63 = vadd.f32 %v2559_v48, %v2546_v59 }
 0x14e   :  { %v2573_v52 = vpop.f32.mrf.mxu2 }
 0x14f   :  { %v2587_v53 = vpop.f32.mrf.mxu3  ;;  %v2574_v1 = vadd.f32 %v2573_v52, %v2560_v63 }
 0x151   :  { %v2588_v5 = vadd.f32 %v2587_v53, %v2574_v1 }
 0x15e   :  { %v2599_v55 = vpop.f32.mrf.mxu0 }
 0x15f   :  { %v2613_v58 = vpop.f32.mrf.mxu1  ;;  %v2600_v0 = vadd.f32 %v2599_v55, %v2586_v60 }
 0x161   :  { %v2614_v3 = vadd.f32 %v2613_v58, %v2600_v0 }
 0x166   :  { %v2627_v61 = vpop.f32.mrf.mxu2  ;;  %v2601_v2 = vpop.f32.mrf.mxu0 }
 0x167   :  { %v2641_v62 = vpop.f32.mrf.mxu3  ;;  %v2615_v4 = vpop.f32.mrf.mxu1  ;;  %v2628_v6 = vadd.f32 %v2627_v61, %v2614_v3  ;;  %v2602_v7 = vadd.f32 %v2601_v2, %v2588_v5 }
 0x169   :  { %v2642_v10 = vadd.f32 %v2641_v62, %v2628_v6  ;;  %v2616_v12 = vadd.f32 %v2615_v4, %v2602_v7 }
 0x16e   :  { %v2629_v8 = vpop.f32.mrf.mxu2 }
 0x16f   :  { %v2643_v9 = vpop.f32.mrf.mxu3  ;;  %v2630_v15 = vadd.f32 %v2629_v8, %v2616_v12 }
 0x171   :  { %v2644_v19 = vadd.f32 %v2643_v9, %v2630_v15 }
 0x17e   :  { %v2655_v11 = vpop.f32.mrf.mxu0 }
 0x17f   :  { %v2656_v13 = vadd.f32 %v2655_v11, %v2642_v10  ;;  %v2669_v14 = vpop.f32.mrf.mxu1 }
 0x181   :  { %v2670_v16 = vadd.f32 %v2669_v14, %v2656_v13 }
 0x186   :  { %v2683_v17 = vpop.f32.mrf.mxu2  ;;  %v2657_v22 = vpop.f32.mrf.mxu0 }
 0x187   :  { %v2697_v18 = vpop.f32.mrf.mxu3  ;;  %v2684_v20 = vadd.f32 %v2683_v17, %v2670_v16  ;;  %v2658_v24 = vadd.f32 %v2657_v22, %v2644_v19  ;;  %v2671_v26 = vpop.f32.mrf.mxu1 }
 0x189   :  { %v2698_v23 = vadd.f32 %v2697_v18, %v2684_v20  ;;  %v2672_v27 = vadd.f32 %v2671_v26, %v2658_v24 }
 0x18b   :  { %v2706_v25 = vadd.f32 %v4154_v21, %v2698_v23 }
 0x18d   :  { %2708 = vst [vmem:[%s5147_s3] sm:$0xff] %v2706_v25 }
 0x18e   :  { %v2685_v28 = vpop.f32.mrf.mxu2 }
 0x18f   :  { %v2686_v29 = vadd.f32 %v2685_v28, %v2672_v27  ;;  %v2699_v30 = vpop.f32.mrf.mxu3 }
 0x191   :  { %v2700_v31 = vadd.f32 %v2699_v30, %v2686_v29 }
 0x193   :  { %v2707_v32 = vadd.f32 %v4154_v21, %v2700_v31 }
 0x195   :  { %2709 = vst [vmem:[%s5147_s3 + $0x8] sm:$0xff] %v2707_v32 }

// kernel: diffmorpher_forward.12
= control target key start
LH: loop header
LB: loop body
LE: loop exit
PB: predicated region body
PF: predicated region fallthrough
CT: control target
= control target key end

     0   :  { %vm661_vm6 = vcmask 1040384   ;;  %s1700_s1 = inlined_call_operand.vmem [shape: bf16[4,128,256], index: 1, kind: input, shape index: {}]   ;;  %s1701_s0 = inlined_call_operand.vmem [shape: bf16[4,16,128], index: 0, kind: input, shape index: {}]   ;;  %s1702_s2 = inlined_call_operand.vmem [shape: f32[1,1,256], index: 2, kind: input, shape index: {}]   ;;  %s1703_s3 = inlined_call_operand.vmem [shape: f32[1,1,256], index: 3, kind: input, shape index: {}]   ;;  %s1704_s4 = inlined_call_operand.vmem [shape: bf16[4,16,256], index: 4, kind: output, shape index: {}]  }
   0x1   :  { %v813_v0 = vld [vmem:[%s1700_s1 + $0x70] sm:$0xf]  ;;  %v1093_v1 = vld [vmem:[%s1700_s1 + $0x74] sm:$0xf0]  ;;  %v1092_v2 = vld [vmem:[%s1700_s1 + $0x74] sm:$0xf] }
   0x2   :  { %v814_v3 = vor.u32 %v1093_v1, %v813_v0  ;;  %v815_v4 = vld [vmem:[%s1700_s1 + $0x78] sm:$0xf0]  ;;  %v899_v5 = vld [vmem:[%s1700_s1 + $0xf0] sm:$0xf]  ;;  %v1110_v6 = vld [vmem:[%s1700_s1 + $0xf4] sm:$0xf0] }
   0x3   :  { %v818_v7 = vor.u32 %v1092_v2, %v815_v4  ;;  %v900_v8 = vor.u32 %v1110_v6, %v899_v5  ;;  %v1109_v9 = vld [vmem:[%s1700_s1 + $0xf4] sm:$0xf]  ;;  %v901_v10 = vld [vmem:[%s1700_s1 + $0xf8] sm:$0xf0]  ;;  %v805_v11 = vld [vmem:[%s1700_s1 + $0x60] sm:$0xf] }
   0x4   :  { %121 = vmatpush.bf16.msra.mxu0 %v814_v3  ;;  %v904_v12 = vor.u32 %v1109_v9, %v901_v10  ;;  %v1091_v13 = vld [vmem:[%s1700_s1 + $0x64] sm:$0xf0]  ;;  %v1090_v14 = vld [vmem:[%s1700_s1 + $0x64] sm:$0xf]  ;;  %v807_v15 = vld [vmem:[%s1700_s1 + $0x68] sm:$0xf0] }
   0x5   :  { %135 = vmatpush.bf16.msra.mxu1 %v818_v7  ;;  %255 = vmatpush.bf16.msra.mxu2 %v900_v8  ;;  %v806_v16 = vor.u32 %v1091_v13, %v805_v11  ;;  %v810_v17 = vor.u32 %v1090_v14, %v807_v15  ;;  %v891_v18 = vld [vmem:[%s1700_s1 + $0xe0] sm:$0xf]  ;;  %v1108_v19 = vld [vmem:[%s1700_s1 + $0xe4] sm:$0xf0]  ;;  %v1107_v20 = vld [vmem:[%s1700_s1 + $0xe4] sm:$0xf] }
   0x6   :  { %269 = vmatpush.bf16.msra.mxu3 %v904_v12  ;;  %v892_v21 = vor.u32 %v1108_v19, %v891_v18  ;;  %v893_v22 = vld [vmem:[%s1700_s1 + $0xe8] sm:$0xf0]  ;;  %v797_v23 = vld [vmem:[%s1700_s1 + $0x50] sm:$0xf]  ;;  %v1089_v24 = vld [vmem:[%s1700_s1 + $0x54] sm:$0xf0] }
   0x7   :  { %v896_v25 = vor.u32 %v1107_v20, %v893_v22  ;;  %v1088_v26 = vld [vmem:[%s1700_s1 + $0x54] sm:$0xf]  ;;  %v799_v27 = vld [vmem:[%s1700_s1 + $0x58] sm:$0xf0]  ;;  %v883_v28 = vld [vmem:[%s1700_s1 + $0xd0] sm:$0xf]  ;;  %v798_v29 = vor.u32 %v1089_v24, %v797_v23 }
   0x8   :  { %122 = vmatpush.bf16.msra.mxu0 %v806_v16  ;;  %v1106_v30 = vld [vmem:[%s1700_s1 + $0xd4] sm:$0xf0]  ;;  %v1105_v31 = vld [vmem:[%s1700_s1 + $0xd4] sm:$0xf]  ;;  %v885_v32 = vld [vmem:[%s1700_s1 + $0xd8] sm:$0xf0]  ;;  %v802_v33 = vor.u32 %v1088_v26, %v799_v27 }
   0x9   :  { %136 = vmatpush.bf16.msra.mxu1 %v810_v17  ;;  %256 = vmatpush.bf16.msra.mxu2 %v892_v21  ;;  %v884_v34 = vor.u32 %v1106_v30, %v883_v28  ;;  %v789_v35 = vld [vmem:[%s1700_s1 + $0x40] sm:$0xf]  ;;  %v1087_v36 = vld [vmem:[%s1700_s1 + $0x44] sm:$0xf0]  ;;  %v1086_v37 = vld [vmem:[%s1700_s1 + $0x44] sm:$0xf]  ;;  %v888_v38 = vor.u32 %v1105_v31, %v885_v32 }
   0xa   :  { %270 = vmatpush.bf16.msra.mxu3 %v896_v25  ;;  %v791_v39 = vld [vmem:[%s1700_s1 + $0x48] sm:$0xf0]  ;;  %v875_v40 = vld [vmem:[%s1700_s1 + $0xc0] sm:$0xf]  ;;  %v1104_v41 = vld [vmem:[%s1700_s1 + $0xc4] sm:$0xf0]  ;;  %v790_v44 = vor.u32 %v1087_v36, %v789_v35 }
   0xb   :  { %v1103_v42 = vld [vmem:[%s1700_s1 + $0xc4] sm:$0xf]  ;;  %v877_v43 = vld [vmem:[%s1700_s1 + $0xc8] sm:$0xf0]  ;;  %v794_v45 = vor.u32 %v1086_v37, %v791_v39  ;;  %v876_v46 = vor.u32 %v1104_v41, %v875_v40  ;;  %v781_v47 = vld [vmem:[%s1700_s1 + $0x30] sm:$0xf] }
   0xc   :  { %123 = vmatpush.bf16.msra.mxu0 %v798_v29  ;;  %v1085_v48 = vld [vmem:[%s1700_s1 + $0x34] sm:$0xf0]  ;;  %v1084_v49 = vld [vmem:[%s1700_s1 + $0x34] sm:$0xf]  ;;  %v880_v50 = vor.u32 %v1103_v42, %v877_v43  ;;  %v783_v51 = vld [vmem:[%s1700_s1 + $0x38] sm:$0xf0] }
   0xd   :  { %137 = vmatpush.bf16.msra.mxu1 %v802_v33  ;;  %257 = vmatpush.bf16.msra.mxu2 %v884_v34  ;;  %v867_v52 = vld [vmem:[%s1700_s1 + $0xb0] sm:$0xf]  ;;  %v1102_v53 = vld [vmem:[%s1700_s1 + $0xb4] sm:$0xf0]  ;;  %v1101_v54 = vld [vmem:[%s1700_s1 + $0xb4] sm:$0xf]  ;;  %v782_v56 = vor.u32 %v1085_v48, %v781_v47  ;;  %v786_v57 = vor.u32 %v1084_v49, %v783_v51 }
   0xe   :  { %271 = vmatpush.bf16.msra.mxu3 %v888_v38  ;;  %v869_v55 = vld [vmem:[%s1700_s1 + $0xb8] sm:$0xf0]  ;;  %v868_v58 = vor.u32 %v1102_v53, %v867_v52  ;;  %v773_v59 = vld [vmem:[%s1700_s1 + $0x20] sm:$0xf]  ;;  %v1083_v60 = vld [vmem:[%s1700_s1 + $0x24] sm:$0xf0] }
   0xf   :  { %v1082_v61 = vld [vmem:[%s1700_s1 + $0x24] sm:$0xf]  ;;  %v872_v62 = vor.u32 %v1101_v54, %v869_v55  ;;  %v775_v63 = vld [vmem:[%s1700_s1 + $0x28] sm:$0xf0]  ;;  %v859_v0 = vld [vmem:[%s1700_s1 + $0xa0] sm:$0xf]  ;;  %v774_v4 = vor.u32 %v1083_v60, %v773_v59 }
  0x10   :  { %124 = vmatpush.bf16.msra.mxu0 %v790_v44  ;;  %v1100_v1 = vld [vmem:[%s1700_s1 + $0xa4] sm:$0xf0]  ;;  %v1099_v2 = vld [vmem:[%s1700_s1 + $0xa4] sm:$0xf]  ;;  %v861_v3 = vld [vmem:[%s1700_s1 + $0xa8] sm:$0xf0]  ;;  %v778_v5 = vor.u32 %v1082_v61, %v775_v63 }
  0x11   :  { %138 = vmatpush.bf16.msra.mxu1 %v794_v45  ;;  %258 = vmatpush.bf16.msra.mxu2 %v876_v46  ;;  %v860_v6 = vor.u32 %v1100_v1, %v859_v0  ;;  %v765_v7 = vld [vmem:[%s1700_s1 + $0x10] sm:$0xf]  ;;  %v1081_v8 = vld [vmem:[%s1700_s1 + $0x14] sm:$0xf0]  ;;  %v1080_v9 = vld [vmem:[%s1700_s1 + $0x14] sm:$0xf]  ;;  %v864_v10 = vor.u32 %v1099_v2, %v861_v3 }
  0x12   :  { %272 = vmatpush.bf16.msra.mxu3 %v880_v50  ;;  %v767_v11 = vld [vmem:[%s1700_s1 + $0x18] sm:$0xf0]  ;;  %v851_v12 = vld [vmem:[%s1700_s1 + $0x90] sm:$0xf]  ;;  %v1098_v13 = vld [vmem:[%s1700_s1 + $0x94] sm:$0xf0]  ;;  %v766_v16 = vor.u32 %v1081_v8, %v765_v7 }
  0x13   :  { %v1097_v14 = vld [vmem:[%s1700_s1 + $0x94] sm:$0xf]  ;;  %v853_v15 = vld [vmem:[%s1700_s1 + $0x98] sm:$0xf0]  ;;  %v757_v17 = vld [vmem:[%s1700_s1] sm:$0xf]  ;;  %v770_v19 = vor.u32 %v1080_v9, %v767_v11  ;;  %v852_v20 = vor.u32 %v1098_v13, %v851_v12 }
  0x14   :  { %125 = vmatpush.bf16.msra.mxu0 %v782_v56  ;;  %v1079_v18 = vld [vmem:[%s1700_s1 + $0x4] sm:$0xf0]  ;;  %v1078_v21 = vld [vmem:[%s1700_s1 + $0x4] sm:$0xf]  ;;  %v759_v22 = vld [vmem:[%s1700_s1 + $0x8] sm:$0xf0]  ;;  %v856_v24 = vor.u32 %v1097_v14, %v853_v15 }
  0x15   :  { %139 = vmatpush.bf16.msra.mxu1 %v786_v57  ;;  %259 = vmatpush.bf16.msra.mxu2 %v868_v58  ;;  %v843_v23 = vld [vmem:[%s1700_s1 + $0x80] sm:$0xf]  ;;  %v1096_v25 = vld [vmem:[%s1700_s1 + $0x84] sm:$0xf0]  ;;  %v1095_v26 = vld [vmem:[%s1700_s1 + $0x84] sm:$0xf]  ;;  %v758_v31 = vor.u32 %v1079_v18, %v757_v17  ;;  %v762_v35 = vor.u32 %v1078_v21, %v759_v22 }
  0x16   :  { %273 = vmatpush.bf16.msra.mxu3 %v872_v62  ;;  %v845_v27 = vld [vmem:[%s1700_s1 + $0x88] sm:$0xf0]  ;;  %v985_v28 = vld [vmem:[%s1700_s1 + $0x170] sm:$0xf]  ;;  %v1127_v29 = vld [vmem:[%s1700_s1 + $0x174] sm:$0xf0]  ;;  %v844_v36 = vor.u32 %v1096_v25, %v843_v23 }
  0x17   :  { %v1126_v30 = vld [vmem:[%s1700_s1 + $0x174] sm:$0xf]  ;;  %v987_v32 = vld [vmem:[%s1700_s1 + $0x178] sm:$0xf0]  ;;  %v1071_v33 = vld [vmem:[%s1700_s1 + $0x1f0] sm:$0xf]  ;;  %v848_v39 = vor.u32 %v1095_v26, %v845_v27  ;;  %v986_v40 = vor.u32 %v1127_v29, %v985_v28 }
  0x18   :  { %126 = vmatpush.bf16.msra.mxu0 %v774_v4  ;;  %v1144_v34 = vld [vmem:[%s1700_s1 + $0x1f4] sm:$0xf0]  ;;  %v1143_v37 = vld [vmem:[%s1700_s1 + $0x1f4] sm:$0xf]  ;;  %v1073_v38 = vld [vmem:[%s1700_s1 + $0x1f8] sm:$0xf0]  ;;  %v990_v42 = vor.u32 %v1126_v30, %v987_v32 }
  0x19   :  { %140 = vmatpush.bf16.msra.mxu1 %v778_v5  ;;  %260 = vmatpush.bf16.msra.mxu2 %v860_v6  ;;  %v977_v41 = vld [vmem:[%s1700_s1 + $0x160] sm:$0xf]  ;;  %v1072_v43 = vor.u32 %v1144_v34, %v1071_v33  ;;  %v1125_v44 = vld [vmem:[%s1700_s1 + $0x164] sm:$0xf0]  ;;  %v1124_v45 = vld [vmem:[%s1700_s1 + $0x164] sm:$0xf]  ;;  %v1076_v47 = vor.u32 %v1143_v37, %v1073_v38 }
  0x1a   :  { %274 = vmatpush.bf16.msra.mxu3 %v864_v10  ;;  %v979_v46 = vld [vmem:[%s1700_s1 + $0x168] sm:$0xf0]  ;;  %v1063_v48 = vld [vmem:[%s1700_s1 + $0x1e0] sm:$0xf]  ;;  %v1142_v49 = vld [vmem:[%s1700_s1 + $0x1e4] sm:$0xf0]  ;;  %v978_v54 = vor.u32 %v1125_v44, %v977_v41 }
  0x1b   :  { %v1077_v50 = vld [vmem:[%s1701_s0] sm:$0xff]  ;;  %v1065_v52 = vld [vmem:[%s1700_s1 + $0x1e8] sm:$0xf0]  ;;  %v982_v55 = vor.u32 %v1124_v45, %v979_v46  ;;  %v1064_v56 = vor.u32 %v1142_v49, %v1063_v48  ;;  %v969_v57 = vld [vmem:[%s1700_s1 + $0x150] sm:$0xf] }
  0x1c   :  { %127 = vmatpush.bf16.msra.mxu0 %v766_v16  ;;  %v1141_v51 = vld [vmem:[%s1700_s1 + $0x1e4] sm:$0xf]  ;;  %v1094_v53 = vld [vmem:[%s1701_s0 + $0x8] sm:$0xff]  ;;  %v1123_v58 = vld [vmem:[%s1700_s1 + $0x154] sm:$0xf0] }
  0x1d   :  { %141 = vmatpush.bf16.msra.mxu1 %v770_v19  ;;  %261 = vmatpush.bf16.msra.mxu2 %v852_v20  ;;  %v1122_v59 = vld [vmem:[%s1700_s1 + $0x154] sm:$0xf]  ;;  %v1068_v60 = vor.u32 %v1141_v51, %v1065_v52  ;;  %v971_v61 = vld [vmem:[%s1700_s1 + $0x158] sm:$0xf0]  ;;  %v1055_v62 = vld [vmem:[%s1700_s1 + $0x1d0] sm:$0xf]  ;;  %v970_v2 = vor.u32 %v1123_v58, %v969_v57 }
  0x1e   :  { %275 = vmatpush.bf16.msra.mxu3 %v856_v24  ;;  %v1140_v63 = vld [vmem:[%s1700_s1 + $0x1d4] sm:$0xf0]  ;;  %v1139_v0 = vld [vmem:[%s1700_s1 + $0x1d4] sm:$0xf]  ;;  %v1057_v1 = vld [vmem:[%s1700_s1 + $0x1d8] sm:$0xf0]  ;;  %v974_v3 = vor.u32 %v1122_v59, %v971_v61 }
  0x1f   :  { %v1056_v4 = vor.u32 %v1140_v63, %v1055_v62  ;;  %v961_v5 = vld [vmem:[%s1700_s1 + $0x140] sm:$0xf]  ;;  %v1121_v6 = vld [vmem:[%s1700_s1 + $0x144] sm:$0xf0]  ;;  %v1120_v7 = vld [vmem:[%s1700_s1 + $0x144] sm:$0xf]  ;;  %v1060_v8 = vor.u32 %v1139_v0, %v1057_v1 }
  0x20   :  { %128 = vmatpush.bf16.msra.mxu0 %v758_v31  ;;  %v963_v9 = vld [vmem:[%s1700_s1 + $0x148] sm:$0xf0]  ;;  %v1047_v10 = vld [vmem:[%s1700_s1 + $0x1c0] sm:$0xf]  ;;  %v1138_v11 = vld [vmem:[%s1700_s1 + $0x1c4] sm:$0xf0]  ;;  %v962_v14 = vor.u32 %v1121_v6, %v961_v5 }
  0x21   :  { %142 = vmatpush.bf16.msra.mxu1 %v762_v35  ;;  %262 = vmatpush.bf16.msra.mxu2 %v844_v36  ;;  %v1137_v12 = vld [vmem:[%s1700_s1 + $0x1c4] sm:$0xf]  ;;  %v1049_v13 = vld [vmem:[%s1700_s1 + $0x1c8] sm:$0xf0]  ;;  %v966_v15 = vor.u32 %v1120_v7, %v963_v9  ;;  %v1048_v16 = vor.u32 %v1138_v11, %v1047_v10  ;;  %v953_v17 = vld [vmem:[%s1700_s1 + $0x130] sm:$0xf] }
  0x22   :  { %276 = vmatpush.bf16.msra.mxu3 %v848_v39  ;;  %v1119_v18 = vld [vmem:[%s1700_s1 + $0x134] sm:$0xf0]  ;;  %v1118_v19 = vld [vmem:[%s1700_s1 + $0x134] sm:$0xf]  ;;  %v1052_v20 = vor.u32 %v1137_v12, %v1049_v13  ;;  %v955_v21 = vld [vmem:[%s1700_s1 + $0x138] sm:$0xf0] }
  0x23   :  { %129 = vmatmul.bf16.vlgmr.msra.gmra.mxu0 %v1077_v50  ;;  %v1039_v22 = vld [vmem:[%s1700_s1 + $0x1b0] sm:$0xf]  ;;  %v1136_v23 = vld [vmem:[%s1700_s1 + $0x1b4] sm:$0xf0]  ;;  %v1135_v24 = vld [vmem:[%s1700_s1 + $0x1b4] sm:$0xf]  ;;  %v954_v26 = vor.u32 %v1119_v18, %v953_v17  ;;  %v958_v27 = vor.u32 %v1118_v19, %v955_v21 }
  0x24   :  { %389 = vmatpush.bf16.msrb.mxu0 %v986_v40  ;;  %143 = vmatmul.bf16.vlgmr.msra.gmra.mxu1 %v1077_v50  ;;  %v1041_v25 = vld [vmem:[%s1700_s1 + $0x1b8] sm:$0xf0]  ;;  %v1040_v28 = vor.u32 %v1136_v23, %v1039_v22  ;;  %v945_v29 = vld [vmem:[%s1700_s1 + $0x120] sm:$0xf]  ;;  %v1117_v30 = vld [vmem:[%s1700_s1 + $0x124] sm:$0xf0] }
  0x25   :  { %403 = vmatpush.bf16.msrb.mxu1 %v990_v42  ;;  %523 = vmatpush.bf16.msrb.mxu2 %v1072_v43  ;;  %v1116_v31 = vld [vmem:[%s1700_s1 + $0x124] sm:$0xf]  ;;  %v1044_v32 = vor.u32 %v1135_v24, %v1041_v25  ;;  %v947_v33 = vld [vmem:[%s1700_s1 + $0x128] sm:$0xf0]  ;;  %v1031_v34 = vld [vmem:[%s1700_s1 + $0x1a0] sm:$0xf]  ;;  %v946_v38 = vor.u32 %v1117_v30, %v945_v29 }
  0x26   :  { %537 = vmatpush.bf16.msrb.mxu3 %v1076_v47  ;;  %263 = vmatmul.bf16.vlgmr.msra.gmra.mxu2 %v1094_v53  ;;  %v1134_v35 = vld [vmem:[%s1700_s1 + $0x1a4] sm:$0xf0]  ;;  %v1133_v36 = vld [vmem:[%s1700_s1 + $0x1a4] sm:$0xf]  ;;  %v1033_v37 = vld [vmem:[%s1700_s1 + $0x1a8] sm:$0xf0]  ;;  %v950_v39 = vor.u32 %v1116_v31, %v947_v33 }
  0x27   :  { %277 = vmatmul.bf16.vlgmr.msra.gmra.mxu3 %v1094_v53  ;;  %v1032_v40 = vor.u32 %v1134_v35, %v1031_v34  ;;  %v937_v41 = vld [vmem:[%s1700_s1 + $0x110] sm:$0xf]  ;;  %v1115_v42 = vld [vmem:[%s1700_s1 + $0x114] sm:$0xf0]  ;;  %v1114_v43 = vld [vmem:[%s1700_s1 + $0x114] sm:$0xf]  ;;  %v1036_v44 = vor.u32 %v1133_v36, %v1033_v37 }
  0x28   :  { %390 = vmatpush.bf16.msrb.mxu0 %v978_v54  ;;  %v939_v45 = vld [vmem:[%s1700_s1 + $0x118] sm:$0xf0]  ;;  %v1023_v46 = vld [vmem:[%s1700_s1 + $0x190] sm:$0xf]  ;;  %v1132_v47 = vld [vmem:[%s1700_s1 + $0x194] sm:$0xf0]  ;;  %v938_v50 = vor.u32 %v1115_v42, %v937_v41 }
  0x29   :  { %404 = vmatpush.bf16.msrb.mxu1 %v982_v55  ;;  %524 = vmatpush.bf16.msrb.mxu2 %v1064_v56  ;;  %v1131_v48 = vld [vmem:[%s1700_s1 + $0x194] sm:$0xf]  ;;  %v1025_v49 = vld [vmem:[%s1700_s1 + $0x198] sm:$0xf0]  ;;  %v942_v51 = vor.u32 %v1114_v43, %v939_v45  ;;  %v1024_v52 = vor.u32 %v1132_v47, %v1023_v46  ;;  %v929_v53 = vld [vmem:[%s1700_s1 + $0x100] sm:$0xf] }
  0x2a   :  { %538 = vmatpush.bf16.msrb.mxu3 %v1068_v60  ;;  %v1113_v54 = vld [vmem:[%s1700_s1 + $0x104] sm:$0xf0]  ;;  %v1112_v55 = vld [vmem:[%s1700_s1 + $0x104] sm:$0xf]  ;;  %v1028_v56 = vor.u32 %v1131_v48, %v1025_v49  ;;  %v931_v57 = vld [vmem:[%s1700_s1 + $0x108] sm:$0xf0] }
  0x2b   :  { %v1015_v58 = vld [vmem:[%s1700_s1 + $0x180] sm:$0xf]  ;;  %v1130_v59 = vld [vmem:[%s1700_s1 + $0x184] sm:$0xf0]  ;;  %v1129_v60 = vld [vmem:[%s1700_s1 + $0x184] sm:$0xf]  ;;  %v930_v62 = vor.u32 %v1113_v54, %v929_v53  ;;  %v934_v63 = vor.u32 %v1112_v55, %v931_v57 }
  0x2c   :  { %391 = vmatpush.bf16.msrb.mxu0 %v970_v2  ;;  %v1017_v61 = vld [vmem:[%s1700_s1 + $0x188] sm:$0xf0]  ;;  %v1016_v0 = vor.u32 %v1130_v59, %v1015_v58  ;;  %v1111_v2 = vld [vmem:[%s1701_s0 + $0x10] sm:$0xff]  ;;  %v1152_v25 = vmov 8.0  }
  0x2d   :  { %405 = vmatpush.bf16.msrb.mxu1 %v974_v3  ;;  %525 = vmatpush.bf16.msrb.mxu2 %v1056_v4  ;;  %v1020_v1 = vor.u32 %v1129_v60, %v1017_v61  ;;  %v1128_v3 = vld [vmem:[%s1701_s0 + $0x18] sm:$0xff]  ;;  %1146 = vrcp.f32 %v1152_v25 }
  0x2e   :  { %539 = vmatpush.bf16.msrb.mxu3 %v1060_v8 }
  0x30   :  { %392 = vmatpush.bf16.msrb.mxu0 %v962_v14 }
  0x31   :  { %406 = vmatpush.bf16.msrb.mxu1 %v966_v15  ;;  %526 = vmatpush.bf16.msrb.mxu2 %v1048_v16 }
  0x32   :  { %540 = vmatpush.bf16.msrb.mxu3 %v1052_v20 }
  0x33   :  { %v1147_v36 = vpop.eup %1146 }
  0x34   :  { %393 = vmatpush.bf16.msrb.mxu0 %v954_v26  ;;  %vm626_vm0 = vweird.f32 %v1147_v36 }
  0x35   :  { %407 = vmatpush.bf16.msrb.mxu1 %v958_v27  ;;  %527 = vmatpush.bf16.msrb.mxu2 %v1040_v28 }
  0x36   :  { %541 = vmatpush.bf16.msrb.mxu3 %v1044_v32 }
  0x38   :  { %394 = vmatpush.bf16.msrb.mxu0 %v946_v38 }
  0x39   :  { %408 = vmatpush.bf16.msrb.mxu1 %v950_v39  ;;  %528 = vmatpush.bf16.msrb.mxu2 %v1032_v40 }
  0x3a   :  { %542 = vmatpush.bf16.msrb.mxu3 %v1036_v44 }
  0x3c   :  { %395 = vmatpush.bf16.msrb.mxu0 %v938_v50  ;;  %v622_v50 = vmul.f32 8.0, %v1147_v36 }
  0x3d   :  { %409 = vmatpush.bf16.msrb.mxu1 %v942_v51  ;;  %529 = vmatpush.bf16.msrb.mxu2 %v1024_v52 }
  0x3e   :  { %543 = vmatpush.bf16.msrb.mxu3 %v1028_v56  ;;  %v623_v57 = vsub.f32 1.0, %v622_v50 }
  0x40   :  { %396 = vmatpush.bf16.msrb.mxu0 %v930_v62 }
  0x41   :  { %410 = vmatpush.bf16.msrb.mxu1 %v934_v63  ;;  %530 = vmatpush.bf16.msrb.mxu2 %v1016_v0 }
  0x42   :  { %544 = vmatpush.bf16.msrb.mxu3 %v1020_v1 }
  0x43   :  { %397 = vmatmul.bf16.vlgmr.msrb.gmra.mxu0 %v1111_v2 }
  0x44   :  { %411 = vmatmul.bf16.vlgmr.msrb.gmra.mxu1 %v1111_v2  ;;  %531 = vmatmul.bf16.vlgmr.msrb.gmra.mxu2 %v1128_v3 }
  0x45   :  { %545 = vmatmul.bf16.vlgmr.msrb.gmra.mxu3 %v1128_v3 }
  0xa0   :  { %v1574_v4 = vpop.f32.mrf.mxu0 }
  0xa1   :  { %v1576_v5 = vpop.f32.mrf.mxu1  ;;  %v579_v10 = vmul.f32 %v1574_v4, %v1574_v4 }
  0xa2   :  { %v580_v12 = vmul.f32 %v1576_v5, %v1576_v5 }
  0xa8   :  { %v1582_v8 = vpop.f32.mrf.mxu0 }
  0xa9   :  { %v1578_v6 = vpop.f32.mrf.mxu2  ;;  %v1584_v9 = vpop.f32.mrf.mxu1  ;;  %v581_v11 = vmul.f32 %v1582_v8, %v1582_v8  ;;  %v553_v14 = vadd.f32 %v1582_v8, %v1574_v4 }
  0xaa   :  { %v1580_v7 = vpop.f32.mrf.mxu3  ;;  %v582_v13 = vmul.f32 %v1584_v9, %v1584_v9  ;;  %v566_v15 = vadd.f32 %v1584_v9, %v1576_v5  ;;  %v583_v17 = vmul.f32 %v1578_v6, %v1578_v6 }
  0xab   :  { %v595_v18 = vadd.f32 %v581_v11, %v579_v10  ;;  %v584_v21 = vmul.f32 %v1580_v7, %v1580_v7  ;;  %v554_v24 = vadd.f32 %v553_v14, %v1578_v6  ;;  %v624_v10 = vmul.f32 %v1147_v36, %v623_v57 }
  0xac   :  { %v608_v22 = vadd.f32 %v582_v13, %v580_v12  ;;  %v567_v26 = vadd.f32 %v566_v15, %v1580_v7 }
  0xad   :  { %v596_v28 = vadd.f32 %v595_v18, %v583_v17 }
  0xae   :  { %v609_v30 = vadd.f32 %v608_v22, %v584_v21  ;;  %v625_v22 = vadd.f32 %v1147_v36, %v624_v10 }
  0xb1   :  { %v1598_v16 = vpop.f32.mrf.mxu2 }
  0xb2   :  { %v1602_v19 = vpop.f32.mrf.mxu3  ;;  %v585_v27 = vmul.f32 %v1598_v16, %v1598_v16  ;;  %v555_v31 = vadd.f32 %v554_v24, %v1598_v16 }
  0xb3   :  { %v586_v29 = vmul.f32 %v1602_v19, %v1602_v19  ;;  %v568_v33 = vadd.f32 %v567_v26, %v1602_v19 }
  0xb4   :  { %v597_v37 = vadd.f32 %v596_v28, %v585_v27 }
  0xb5   :  { %v610_v41 = vadd.f32 %v609_v30, %v586_v29 }
  0xc0   :  { %v1604_v20 = vpop.f32.mrf.mxu0 }
  0xc1   :  { %v1608_v23 = vpop.f32.mrf.mxu1  ;;  %v587_v32 = vmul.f32 %v1604_v20, %v1604_v20  ;;  %v556_v38 = vadd.f32 %v555_v31, %v1604_v20 }
  0xc2   :  { %v588_v34 = vmul.f32 %v1608_v23, %v1608_v23  ;;  %v569_v42 = vadd.f32 %v568_v33, %v1608_v23 }
  0xc3   :  { %v598_v45 = vadd.f32 %v597_v37, %v587_v32  ;;  %v627_v32 = vsel %vm626_vm0, %v1147_v36, %v625_v22 }
  0xc4   :  { %v611_v48 = vadd.f32 %v610_v41, %v588_v34 }
  0xc7   :  { %v1622_v35 = vpop.f32.mrf.mxu2 }
  0xc8   :  { %v1625_v39 = vpop.f32.mrf.mxu3  ;;  %v1627_v40 = vpop.f32.mrf.mxu0  ;;  %v591_v53 = vmul.f32 %v1622_v35, %v1622_v35 }
  0xc9   :  { %v589_v43 = vmul.f32 %v1627_v40, %v1627_v40  ;;  %v1632_v44 = vpop.f32.mrf.mxu1  ;;  %v557_v46 = vadd.f32 %v556_v38, %v1627_v40  ;;  %v592_v55 = vmul.f32 %v1625_v39, %v1625_v39 }
  0xca   :  { %v590_v47 = vmul.f32 %v1632_v44, %v1632_v44  ;;  %v570_v49 = vadd.f32 %v569_v42, %v1632_v44 }
  0xcb   :  { %v599_v51 = vadd.f32 %v598_v45, %v589_v43  ;;  %v558_v54 = vadd.f32 %v557_v46, %v1622_v35 }
  0xcc   :  { %v612_v52 = vadd.f32 %v611_v48, %v590_v47  ;;  %v571_v58 = vadd.f32 %v570_v49, %v1625_v39 }
  0xcd   :  { %v600_v61 = vadd.f32 %v599_v51, %v591_v53 }
  0xce   :  { %v613_v1 = vadd.f32 %v612_v52, %v592_v55 }
  0xcf   :  { %v1643_v56 = vpop.f32.mrf.mxu2 }
  0xd0   :  { %v559_v59 = vadd.f32 %v558_v54, %v1643_v56  ;;  %v593_v60 = vmul.f32 %v1643_v56, %v1643_v56  ;;  %v1649_v62 = vpop.f32.mrf.mxu3 }
  0xd1   :  { %v572_v63 = vadd.f32 %v571_v58, %v1649_v62  ;;  %v594_v0 = vmul.f32 %v1649_v62, %v1649_v62 }
  0xd2   :  { %v560_v2 = vrot.slane %v559_v59, 4  ;;  %v601_v3 = vadd.f32 %v600_v61, %v593_v60 }
  0xd3   :  { %v573_v11 = vrot.slane %v572_v63, 4  ;;  %v614_v12 = vadd.f32 %v613_v1, %v594_v0 }
  0xd4   :  { %v561_v13 = vadd.f32 %v560_v2, %v559_v59  ;;  %v602_v14 = vrot.slane %v601_v3, 4 }
  0xd5   :  { %v574_v15 = vadd.f32 %v573_v11, %v572_v63  ;;  %v615_v17 = vrot.slane %v614_v12, 4 }
  0xd6   :  { %v562_v18 = vrot.slane %v561_v13, 2  ;;  %v603_v21 = vadd.f32 %v602_v14, %v601_v3 }
  0xd7   :  { %v575_v24 = vrot.slane %v574_v15, 2  ;;  %v616_v25 = vadd.f32 %v615_v17, %v614_v12  ;;  %v551_v12 = vld [vmem:[%s1702_s2] sm:$0x3] }
  0xd8   :  { %v563_v26 = vadd.f32 %v562_v18, %v561_v13  ;;  %v604_v27 = vrot.slane %v603_v21, 2 }
  0xd9   :  { %v576_v28 = vadd.f32 %v575_v24, %v574_v15  ;;  %v617_v29 = vrot.slane %v616_v25, 2  ;;  %v552_v24 = vld [vmem:[%s1703_s3] sm:$0x3] }
  0xda   :  { %v564_v30 = vrot.slane %v563_v26, 1  ;;  %v605_v31 = vadd.f32 %v604_v27, %v603_v21 }
  0xdb   :  { %v577_v33 = vrot.slane %v576_v28, 1  ;;  %v618_v34 = vadd.f32 %v617_v29, %v616_v25 }
  0xdc   :  { %v565_v37 = vadd.f32 %v564_v30, %v563_v26  ;;  %v606_v38 = vrot.slane %v605_v31, 1 }
  0xdd   :  { %v578_v41 = vadd.f32 %v577_v33, %v576_v28  ;;  %v619_v42 = vrot.slane %v618_v34, 1 }
  0xde   :  { %v607_v43 = vadd.f32 %v606_v38, %v605_v31  ;;  %v628_v45 = vmul.f32 %v627_v32, %v565_v37 }
  0xdf   :  { %v620_v46 = vadd.f32 %v619_v42, %v618_v34  ;;  %v629_v47 = vmul.f32 %v627_v32, %v578_v41 }
  0xe0   :  { %v630_v48 = vmul.f32 %v627_v32, %v607_v43  ;;  %v632_v49 = vmul.f32 %v628_v45, %v628_v45 }
  0xe1   :  { %v631_v50 = vmul.f32 %v627_v32, %v620_v46  ;;  %v633_v51 = vmul.f32 %v629_v47, %v629_v47 }
  0xe2   :  { %v634_v52 = vsub.f32 %v630_v48, %v632_v49 }
  0xe3   :  { %v635_v53 = vsub.f32 %v631_v50, %v633_v51 }
  0xe4   :  { %v636_v54 = vadd.f32 1e-05, %v634_v52 }
  0xe5   :  { %v637_v55 = vadd.f32 1e-05, %v635_v53 }
  0xe6   :  { %1148 = vrsqrt.f32 %v636_v54  ;;  %vm644_vm5 = vweird.f32 %v636_v54 }
  0xe7   :  { %1150 = vrsqrt.f32 %v637_v55  ;;  %vm654_vm3 = vweird.f32 %v637_v55 }
  0xec   :  { %v1149_v36 = vpop.eup %1148 }
  0xed   :  { %v1151_v57 = vpop.eup %1150  ;;  %v639_v58 = vmul.f32 %v1149_v36, %v636_v54  ;;  %vm645_vm2 = vweird.f32 %v1149_v36 }
  0xee   :  { %v649_v59 = vmul.f32 %v1151_v57, %v637_v55  ;;  %vm655_vm1 = vweird.f32 %v1151_v57  ;;  %vm646_vm7 = vmor %vm644_vm5, %vm645_vm2 }
  0xef   :  { %v640_v60 = vmul.f32 %v1149_v36, %v639_v58  ;;  %vm656_vm4 = vmor %vm654_vm3, %vm655_vm1 }
  0xf0   :  { %v650_v61 = vmul.f32 %v1151_v57, %v649_v59 }
  0xf1   :  { %v641_v63 = vmul.f32 0.5, %v640_v60 }
  0xf2   :  { %v651_v0 = vmul.f32 0.5, %v650_v61 }
  0xf3   :  { %v642_v1 = vsub.f32 1.5, %v641_v63 }
  0xf4   :  { %v652_v2 = vsub.f32 1.5, %v651_v0 }
  0xf5   :  { %v643_v3 = vmul.f32 %v1149_v36, %v642_v1 }
  0xf6   :  { %v653_v10 = vmul.f32 %v1151_v57, %v652_v2 }
  0xf7   :  { %v647_v14 = vsel %vm646_vm7, %v1149_v36, %v643_v3 }
  0xf8   :  { %v657_v11 = vsel %vm656_vm4, %v1151_v57, %v653_v10 }
  0xf9   :  { %v660_v13 = vrot.slane %v657_v11, 7 }
  0xfb   :  { %v662_v15 = vsel %vm661_vm6, %v647_v14, %v660_v13 }
  0xfc   :  { %v664_v17 = vmul.f32 %v662_v15, %v551_v12 }
  0xfe   :  { %v666_v18 = vperm.slane %v664_v17, 0  ;;  %v667_v21 = vperm.slane %v664_v17, 1 }
 0x100   :  { %v671_v22 = vmul.f32 %v667_v21, %v629_v47  ;;  %v670_v25 = vmul.f32 %v666_v18, %v628_v45  ;;  %v678_v28 = vmul.f32 %v666_v18, %v1574_v4  ;;  %v679_v29 = vmul.f32 %v667_v21, %v1576_v5 }
 0x101   :  { %v680_v30 = vmul.f32 %v666_v18, %v1582_v8  ;;  %v681_v32 = vmul.f32 %v667_v21, %v1584_v9  ;;  %v682_v33 = vmul.f32 %v666_v18, %v1578_v6  ;;  %v683_v34 = vmul.f32 %v667_v21, %v1580_v7 }
 0x102   :  { %v674_v26 = vrot.slane %v671_v22, 7  ;;  %v684_v37 = vmul.f32 %v666_v18, %v1598_v16  ;;  %v685_v38 = vmul.f32 %v667_v21, %v1602_v19  ;;  %v686_v41 = vmul.f32 %v666_v18, %v1604_v20 }
 0x103   :  { %v687_v42 = vmul.f32 %v667_v21, %v1608_v23  ;;  %v688_v4 = vmul.f32 %v666_v18, %v1627_v40  ;;  %v689_v5 = vmul.f32 %v667_v21, %v1632_v44  ;;  %v690_v9 = vmul.f32 %v666_v18, %v1622_v35 }
 0x104   :  { %v675_v27 = vsel %vm661_vm6, %v670_v25, %v674_v26  ;;  %v691_v6 = vmul.f32 %v667_v21, %v1625_v39  ;;  %v692_v7 = vmul.f32 %v666_v18, %v1643_v56  ;;  %v693_v16 = vmul.f32 %v667_v21, %v1649_v62 }
 0x105   :  { %v677_v31 = vsub.f32 %v552_v24, %v675_v27 }
 0x107   :  { %v695_v8 = vperm.slane %v677_v31, 0  ;;  %v696_v43 = vperm.slane %v677_v31, 1 }
 0x109   :  { %v699_v45 = vadd.f32 %v695_v8, %v678_v28  ;;  %v700_v19 = vadd.f32 %v696_v43, %v679_v29  ;;  %v701_v46 = vadd.f32 %v695_v8, %v680_v30  ;;  %v702_v20 = vadd.f32 %v696_v43, %v681_v32 }
 0x10a   :  { %v703_v47 = vadd.f32 %v695_v8, %v682_v33  ;;  %v704_v23 = vadd.f32 %v696_v43, %v683_v34  ;;  %v705_v48 = vadd.f32 %v695_v8, %v684_v37  ;;  %v706_v40 = vadd.f32 %v696_v43, %v685_v38 }
 0x10b   :  { %v707_v49 = vadd.f32 %v695_v8, %v686_v41  ;;  %v708_v44 = vadd.f32 %v696_v43, %v687_v42  ;;  %v709_v50 = vadd.f32 %v695_v8, %v688_v4  ;;  %v710_v51 = vadd.f32 %v696_v43, %v689_v5 }
 0x10c   :  { %v711_v52 = vadd.f32 %v695_v8, %v690_v9  ;;  %v712_v35 = vadd.f32 %v696_v43, %v691_v6  ;;  %v713_v53 = vadd.f32 %v695_v8, %v692_v7  ;;  %v714_v39 = vadd.f32 %v696_v43, %v693_v16 }
 0x10d   :  { %v715_v54 = vmax.f32 %v699_v45, 0.0  ;;  %v716_v56 = vmax.f32 %v700_v19, 0.0  ;;  %v717_v55 = vmax.f32 %v701_v46, 0.0  ;;  %v718_v62 = vmax.f32 %v702_v20, 0.0 }
 0x10e   :  { %v719_v36 = vmax.f32 %v703_v47, 0.0  ;;  %v720_v57 = vmax.f32 %v704_v23, 0.0  ;;  %v721_v58 = vmax.f32 %v705_v48, 0.0  ;;  %v722_v59 = vmax.f32 %v706_v40, 0.0 }
 0x10f   :  { %v723_v60 = vmax.f32 %v707_v49, 0.0  ;;  %v724_v61 = vmax.f32 %v708_v44, 0.0  ;;  %v725_v63 = vmax.f32 %v709_v50, 0.0  ;;  %v726_v0 = vmax.f32 %v710_v51, 0.0 }
 0x110   :  { %v727_v1 = vmax.f32 %v711_v52, 0.0  ;;  %v728_v2 = vmax.f32 %v712_v35, 0.0  ;;  %v729_v3 = vmax.f32 %v713_v53, 0.0  ;;  %v731_v10 = vpack.c.bf16 %v716_v56, %v715_v54 }
 0x111   :  { %v732_v11 = vpack.c.bf16 %v718_v62, %v717_v55  ;;  %v733_v12 = vpack.c.bf16 %v720_v57, %v719_v36  ;;  %v730_v13 = vmax.f32 %v714_v39, 0.0  ;;  %v734_v14 = vpack.c.bf16 %v722_v59, %v721_v58 }
 0x112   :  { %v735_v15 = vpack.c.bf16 %v724_v61, %v723_v60  ;;  %v737_v17 = vpack.c.bf16 %v728_v2, %v727_v1  ;;  %739 = vst [vmem:[%s1704_s4] sm:$0xff] %v731_v10  ;;  %v736_v18 = vpack.c.bf16 %v726_v0, %v725_v63 }
 0x113   :  { %740 = vst [vmem:[%s1704_s4 + $0x8] sm:$0xff] %v732_v11  ;;  %v738_v21 = vpack.c.bf16 %v730_v13, %v729_v3 }
 0x114   :  { %741 = vst [vmem:[%s1704_s4 + $0x10] sm:$0xff] %v733_v12 }
 0x115   :  { %742 = vst [vmem:[%s1704_s4 + $0x18] sm:$0xff] %v734_v14 }
 0x116   :  { %743 = vst [vmem:[%s1704_s4 + $0x20] sm:$0xff] %v735_v15 }
 0x117   :  { %744 = vst [vmem:[%s1704_s4 + $0x28] sm:$0xff] %v736_v18 }
 0x118   :  { %745 = vst [vmem:[%s1704_s4 + $0x30] sm:$0xff] %v737_v17 }
 0x119   :  { %746 = vst [vmem:[%s1704_s4 + $0x38] sm:$0xff] %v738_v21 }

// kernel: diffmorpher_forward.13
= control target key start
LH: loop header
LB: loop body
LE: loop exit
PB: predicated region body
PF: predicated region fallthrough
CT: control target
= control target key end

     0   :  { %s5759_s1 = inlined_call_operand.vmem [shape: bf16[4,1024,128], index: 1, kind: input, shape index: {}]   ;;  %s5760_s0 = inlined_call_operand.vmem [shape: bf16[4,16,1024], index: 0, kind: input, shape index: {}]   ;;  %s5761_s2 = inlined_call_operand.vmem [shape: f32[1,1,128], index: 2, kind: input, shape index: {}]   ;;  %s5762_s3 = inlined_call_operand.vmem [shape: f32[1,1,128], index: 3, kind: input, shape index: {}]   ;;  %s5763_s4 = inlined_call_operand.vmem [shape: bf16[4,16,128], index: 4, kind: output, shape index: {}]  }
   0x1   :  { %v4397_v0 = vld [vmem:[%s5759_s1 + $0x38] sm:$0xff]  ;;  %v4396_v4 = vld [vmem:[%s5759_s1 + $0x30] sm:$0xff]  ;;  %v4395_v8 = vld [vmem:[%s5759_s1 + $0x28] sm:$0xff] }
   0x2   :  { %v4405_v1 = vld [vmem:[%s5759_s1 + $0x78] sm:$0xff]  ;;  %577 = vmatpush.bf16.msra.mxu0 %v4397_v0  ;;  %v4404_v5 = vld [vmem:[%s5759_s1 + $0x70] sm:$0xff]  ;;  %v4403_v9 = vld [vmem:[%s5759_s1 + $0x68] sm:$0xff] }
   0x3   :  { %v4413_v2 = vld [vmem:[%s5759_s1 + $0xb8] sm:$0xff]  ;;  %591 = vmatpush.bf16.msra.mxu1 %v4405_v1  ;;  %v4412_v6 = vld [vmem:[%s5759_s1 + $0xb0] sm:$0xff]  ;;  %v4411_v10 = vld [vmem:[%s5759_s1 + $0xa8] sm:$0xff] }
   0x4   :  { %v4421_v3 = vld [vmem:[%s5759_s1 + $0xf8] sm:$0xff]  ;;  %605 = vmatpush.bf16.msra.mxu2 %v4413_v2  ;;  %v4420_v7 = vld [vmem:[%s5759_s1 + $0xf0] sm:$0xff]  ;;  %v4419_v11 = vld [vmem:[%s5759_s1 + $0xe8] sm:$0xff] }
   0x5   :  { %619 = vmatpush.bf16.msra.mxu3 %v4421_v3  ;;  %v4394_v12 = vld [vmem:[%s5759_s1 + $0x20] sm:$0xff]  ;;  %v4393_v16 = vld [vmem:[%s5759_s1 + $0x18] sm:$0xff]  ;;  %v4392_v20 = vld [vmem:[%s5759_s1 + $0x10] sm:$0xff] }
   0x6   :  { %578 = vmatpush.bf16.msra.mxu0 %v4396_v4  ;;  %v4402_v13 = vld [vmem:[%s5759_s1 + $0x60] sm:$0xff]  ;;  %v4401_v17 = vld [vmem:[%s5759_s1 + $0x58] sm:$0xff]  ;;  %v4400_v21 = vld [vmem:[%s5759_s1 + $0x50] sm:$0xff] }
   0x7   :  { %592 = vmatpush.bf16.msra.mxu1 %v4404_v5  ;;  %v4410_v14 = vld [vmem:[%s5759_s1 + $0xa0] sm:$0xff]  ;;  %v4409_v18 = vld [vmem:[%s5759_s1 + $0x98] sm:$0xff]  ;;  %v4408_v22 = vld [vmem:[%s5759_s1 + $0x90] sm:$0xff] }
   0x8   :  { %606 = vmatpush.bf16.msra.mxu2 %v4412_v6  ;;  %v4418_v15 = vld [vmem:[%s5759_s1 + $0xe0] sm:$0xff]  ;;  %v4417_v19 = vld [vmem:[%s5759_s1 + $0xd8] sm:$0xff]  ;;  %v4416_v23 = vld [vmem:[%s5759_s1 + $0xd0] sm:$0xff] }
   0x9   :  { %620 = vmatpush.bf16.msra.mxu3 %v4420_v7  ;;  %v4391_v24 = vld [vmem:[%s5759_s1 + $0x8] sm:$0xff]  ;;  %v4390_v28 = vld [vmem:[%s5759_s1] sm:$0xff]  ;;  %v4429_v32 = vld [vmem:[%s5759_s1 + $0x138] sm:$0xff] }
   0xa   :  { %579 = vmatpush.bf16.msra.mxu0 %v4395_v8  ;;  %v4399_v25 = vld [vmem:[%s5759_s1 + $0x48] sm:$0xff]  ;;  %v4398_v29 = vld [vmem:[%s5759_s1 + $0x40] sm:$0xff]  ;;  %v4437_v33 = vld [vmem:[%s5759_s1 + $0x178] sm:$0xff] }
   0xb   :  { %593 = vmatpush.bf16.msra.mxu1 %v4403_v9  ;;  %v4407_v26 = vld [vmem:[%s5759_s1 + $0x88] sm:$0xff]  ;;  %v4406_v30 = vld [vmem:[%s5759_s1 + $0x80] sm:$0xff]  ;;  %v4445_v42 = vld [vmem:[%s5759_s1 + $0x1b8] sm:$0xff] }
   0xc   :  { %607 = vmatpush.bf16.msra.mxu2 %v4411_v10  ;;  %v4415_v27 = vld [vmem:[%s5759_s1 + $0xc8] sm:$0xff]  ;;  %v4414_v31 = vld [vmem:[%s5759_s1 + $0xc0] sm:$0xff]  ;;  %v4453_v43 = vld [vmem:[%s5759_s1 + $0x1f8] sm:$0xff] }
   0xd   :  { %621 = vmatpush.bf16.msra.mxu3 %v4419_v11  ;;  %v2824_v34 = vld [vmem:[%s5760_s0] sm:$0xf]  ;;  %v2832_v36 = vld [vmem:[%s5760_s0 + $0x8] sm:$0xf]  ;;  %v4382_v38 = vld [vmem:[%s5760_s0 + $0x4] sm:$0xf] }
   0xe   :  { %580 = vmatpush.bf16.msra.mxu0 %v4394_v12  ;;  %v4386_v35 = vld [vmem:[%s5760_s0 + $0x1c] sm:$0xf0]  ;;  %v4387_v37 = vld [vmem:[%s5760_s0 + $0x24] sm:$0xf0]  ;;  %v2826_v39 = vld [vmem:[%s5760_s0 + $0x20] sm:$0xf0] }
   0xf   :  { %594 = vmatpush.bf16.msra.mxu1 %v4402_v13  ;;  %v4383_v40 = vld [vmem:[%s5760_s0 + $0xc] sm:$0xf]  ;;  %v2825_v44 = vor.u32 %v4386_v35, %v2824_v34  ;;  %v2833_v45 = vor.u32 %v4387_v37, %v2832_v36  ;;  %v2829_v46 = vor.u32 %v4382_v38, %v2826_v39  ;;  %v4428_v48 = vld [vmem:[%s5759_s1 + $0x130] sm:$0xff]  ;;  %v4426_v56 = vld [vmem:[%s5759_s1 + $0x120] sm:$0xff] }
  0x10   :  { %608 = vmatpush.bf16.msra.mxu2 %v4410_v14  ;;  %v2834_v41 = vld [vmem:[%s5760_s0 + $0x28] sm:$0xf0]  ;;  %v4436_v49 = vld [vmem:[%s5759_s1 + $0x170] sm:$0xff]  ;;  %v4434_v57 = vld [vmem:[%s5759_s1 + $0x160] sm:$0xff] }
  0x11   :  { %622 = vmatpush.bf16.msra.mxu3 %v4418_v15  ;;  %v2837_v47 = vor.u32 %v4383_v40, %v2834_v41  ;;  %v4444_v50 = vld [vmem:[%s5759_s1 + $0x1b0] sm:$0xff]  ;;  %v4427_v52 = vld [vmem:[%s5759_s1 + $0x128] sm:$0xff]  ;;  %v4442_v58 = vld [vmem:[%s5759_s1 + $0x1a0] sm:$0xff] }
  0x12   :  { %581 = vmatpush.bf16.msra.mxu0 %v4393_v16  ;;  %v4452_v51 = vld [vmem:[%s5759_s1 + $0x1f0] sm:$0xff]  ;;  %v4435_v53 = vld [vmem:[%s5759_s1 + $0x168] sm:$0xff]  ;;  %v4450_v59 = vld [vmem:[%s5759_s1 + $0x1e0] sm:$0xff] }
  0x13   :  { %595 = vmatpush.bf16.msra.mxu1 %v4401_v17  ;;  %v4443_v54 = vld [vmem:[%s5759_s1 + $0x1a8] sm:$0xff]  ;;  %v4425_v60 = vld [vmem:[%s5759_s1 + $0x118] sm:$0xff]  ;;  %v4424_v0 = vld [vmem:[%s5759_s1 + $0x110] sm:$0xff] }
  0x14   :  { %609 = vmatpush.bf16.msra.mxu2 %v4409_v18  ;;  %v4451_v55 = vld [vmem:[%s5759_s1 + $0x1e8] sm:$0xff]  ;;  %v4433_v61 = vld [vmem:[%s5759_s1 + $0x158] sm:$0xff]  ;;  %v4432_v1 = vld [vmem:[%s5759_s1 + $0x150] sm:$0xff] }
  0x15   :  { %623 = vmatpush.bf16.msra.mxu3 %v4417_v19  ;;  %v4441_v62 = vld [vmem:[%s5759_s1 + $0x198] sm:$0xff]  ;;  %v4440_v2 = vld [vmem:[%s5759_s1 + $0x190] sm:$0xff]  ;;  %v4423_v4 = vld [vmem:[%s5759_s1 + $0x108] sm:$0xff] }
  0x16   :  { %582 = vmatpush.bf16.msra.mxu0 %v4392_v20  ;;  %v4449_v63 = vld [vmem:[%s5759_s1 + $0x1d8] sm:$0xff]  ;;  %v4448_v3 = vld [vmem:[%s5759_s1 + $0x1d0] sm:$0xff]  ;;  %v4431_v5 = vld [vmem:[%s5759_s1 + $0x148] sm:$0xff] }
  0x17   :  { %596 = vmatpush.bf16.msra.mxu1 %v4400_v21  ;;  %v4439_v6 = vld [vmem:[%s5759_s1 + $0x188] sm:$0xff]  ;;  %v4422_v8 = vld [vmem:[%s5759_s1 + $0x100] sm:$0xff]  ;;  %v4469_v12 = vld [vmem:[%s5759_s1 + $0x238] sm:$0xff] }
  0x18   :  { %610 = vmatpush.bf16.msra.mxu2 %v4408_v22  ;;  %v4447_v7 = vld [vmem:[%s5759_s1 + $0x1c8] sm:$0xff]  ;;  %v4430_v9 = vld [vmem:[%s5759_s1 + $0x140] sm:$0xff]  ;;  %v4477_v13 = vld [vmem:[%s5759_s1 + $0x278] sm:$0xff] }
  0x19   :  { %624 = vmatpush.bf16.msra.mxu3 %v4416_v23  ;;  %v4438_v10 = vld [vmem:[%s5759_s1 + $0x180] sm:$0xff]  ;;  %v2840_v14 = vld [vmem:[%s5760_s0 + $0x10] sm:$0xf]  ;;  %v2848_v16 = vld [vmem:[%s5760_s0 + $0x18] sm:$0xf] }
  0x1a   :  { %583 = vmatpush.bf16.msra.mxu0 %v4391_v24  ;;  %v4446_v11 = vld [vmem:[%s5759_s1 + $0x1c0] sm:$0xff]  ;;  %v4388_v15 = vld [vmem:[%s5760_s0 + $0x2c] sm:$0xf0]  ;;  %v4389_v17 = vld [vmem:[%s5760_s0 + $0x34] sm:$0xf0] }
  0x1b   :  { %597 = vmatpush.bf16.msra.mxu1 %v4399_v25  ;;  %v4384_v18 = vld [vmem:[%s5760_s0 + $0x14] sm:$0xf]  ;;  %v4385_v20 = vld [vmem:[%s5760_s0 + $0x1c] sm:$0xf]  ;;  %v2841_v24 = vor.u32 %v4388_v15, %v2840_v14  ;;  %v2849_v25 = vor.u32 %v4389_v17, %v2848_v16  ;;  %v4483_v34 = vld [vmem:[%s5759_s1 + $0x2a8] sm:$0xff] }
  0x1c   :  { %611 = vmatpush.bf16.msra.mxu2 %v4407_v26  ;;  %v2842_v19 = vld [vmem:[%s5760_s0 + $0x30] sm:$0xf0]  ;;  %v2850_v21 = vld [vmem:[%s5760_s0 + $0x38] sm:$0xf0]  ;;  %v4491_v35 = vld [vmem:[%s5759_s1 + $0x2e8] sm:$0xff] }
  0x1d   :  { %625 = vmatpush.bf16.msra.mxu3 %v4415_v27  ;;  %v4485_v22 = vld [vmem:[%s5759_s1 + $0x2b8] sm:$0xff]  ;;  %v2845_v26 = vor.u32 %v4384_v18, %v2842_v19  ;;  %v2853_v27 = vor.u32 %v4385_v20, %v2850_v21  ;;  %v4466_v36 = vld [vmem:[%s5759_s1 + $0x220] sm:$0xff]  ;;  %v4515_v14 = vld [vmem:[%s5759_s1 + $0x3a8] sm:$0xff] }
  0x1e   :  { %584 = vmatpush.bf16.msra.mxu0 %v4390_v28  ;;  %v4493_v23 = vld [vmem:[%s5759_s1 + $0x2f8] sm:$0xff]  ;;  %v4468_v28 = vld [vmem:[%s5759_s1 + $0x230] sm:$0xff]  ;;  %v4474_v37 = vld [vmem:[%s5759_s1 + $0x260] sm:$0xff] }
  0x1f   :  { %598 = vmatpush.bf16.msra.mxu1 %v4398_v29  ;;  %v4476_v29 = vld [vmem:[%s5759_s1 + $0x270] sm:$0xff]  ;;  %v4482_v38 = vld [vmem:[%s5759_s1 + $0x2a0] sm:$0xff]  ;;  %v4465_v40 = vld [vmem:[%s5759_s1 + $0x218] sm:$0xff] }
  0x20   :  { %612 = vmatpush.bf16.msra.mxu2 %v4406_v30  ;;  %v4484_v30 = vld [vmem:[%s5759_s1 + $0x2b0] sm:$0xff]  ;;  %v4490_v39 = vld [vmem:[%s5759_s1 + $0x2e0] sm:$0xff]  ;;  %v4473_v41 = vld [vmem:[%s5759_s1 + $0x258] sm:$0xff] }
  0x21   :  { %626 = vmatpush.bf16.msra.mxu3 %v4414_v31  ;;  %585 = vmatmul.bf16.vlgmr.msra.gmra.mxu0 %v2825_v44  ;;  %v4492_v31 = vld [vmem:[%s5759_s1 + $0x2f0] sm:$0xff]  ;;  %v4523_v15 = vld [vmem:[%s5759_s1 + $0x3e8] sm:$0xff]  ;;  %v4498_v16 = vld [vmem:[%s5759_s1 + $0x320] sm:$0xff] }
  0x22   :  { %633 = vmatpush.bf16.msrb.mxu0 %v4429_v32  ;;  %599 = vmatmul.bf16.vlgmr.msra.gmra.mxu1 %v2829_v46  ;;  %v4467_v32 = vld [vmem:[%s5759_s1 + $0x228] sm:$0xff]  ;;  %v4464_v44 = vld [vmem:[%s5759_s1 + $0x210] sm:$0xff]  ;;  %v4506_v17 = vld [vmem:[%s5759_s1 + $0x360] sm:$0xff] }
  0x23   :  { %647 = vmatpush.bf16.msrb.mxu1 %v4437_v33  ;;  %613 = vmatmul.bf16.vlgmr.msra.gmra.mxu2 %v2833_v45  ;;  %v4475_v33 = vld [vmem:[%s5759_s1 + $0x268] sm:$0xff]  ;;  %v4472_v45 = vld [vmem:[%s5759_s1 + $0x250] sm:$0xff]  ;;  %v4514_v18 = vld [vmem:[%s5759_s1 + $0x3a0] sm:$0xff] }
  0x24   :  { %661 = vmatpush.bf16.msrb.mxu2 %v4445_v42  ;;  %627 = vmatmul.bf16.vlgmr.msra.gmra.mxu3 %v2837_v47  ;;  %v4481_v42 = vld [vmem:[%s5759_s1 + $0x298] sm:$0xff]  ;;  %v4480_v46 = vld [vmem:[%s5759_s1 + $0x290] sm:$0xff]  ;;  %v4522_v19 = vld [vmem:[%s5759_s1 + $0x3e0] sm:$0xff] }
  0x25   :  { %675 = vmatpush.bf16.msrb.mxu3 %v4453_v43  ;;  %v4489_v43 = vld [vmem:[%s5759_s1 + $0x2d8] sm:$0xff]  ;;  %v4488_v47 = vld [vmem:[%s5759_s1 + $0x2d0] sm:$0xff] }
  0x26   :  { %634 = vmatpush.bf16.msrb.mxu0 %v4428_v48  ;;  %v4463_v48 = vld [vmem:[%s5759_s1 + $0x208] sm:$0xff]  ;;  %v4497_v20 = vld [vmem:[%s5759_s1 + $0x318] sm:$0xff] }
  0x27   :  { %648 = vmatpush.bf16.msrb.mxu1 %v4436_v49  ;;  %v4471_v49 = vld [vmem:[%s5759_s1 + $0x248] sm:$0xff]  ;;  %v4505_v21 = vld [vmem:[%s5759_s1 + $0x358] sm:$0xff] }
  0x28   :  { %662 = vmatpush.bf16.msrb.mxu2 %v4444_v50  ;;  %v4479_v50 = vld [vmem:[%s5759_s1 + $0x288] sm:$0xff] }
  0x29   :  { %676 = vmatpush.bf16.msrb.mxu3 %v4452_v51  ;;  %v4487_v51 = vld [vmem:[%s5759_s1 + $0x2c8] sm:$0xff] }
  0x2a   :  { %635 = vmatpush.bf16.msrb.mxu0 %v4427_v52  ;;  %v4462_v52 = vld [vmem:[%s5759_s1 + $0x200] sm:$0xff] }
  0x2b   :  { %649 = vmatpush.bf16.msrb.mxu1 %v4435_v53  ;;  %v4470_v53 = vld [vmem:[%s5759_s1 + $0x240] sm:$0xff] }
  0x2c   :  { %663 = vmatpush.bf16.msrb.mxu2 %v4443_v54  ;;  %v4478_v54 = vld [vmem:[%s5759_s1 + $0x280] sm:$0xff] }
  0x2d   :  { %677 = vmatpush.bf16.msrb.mxu3 %v4451_v55  ;;  %v4486_v55 = vld [vmem:[%s5759_s1 + $0x2c0] sm:$0xff] }
  0x2e   :  { %636 = vmatpush.bf16.msrb.mxu0 %v4426_v56  ;;  %v4501_v56 = vld [vmem:[%s5759_s1 + $0x338] sm:$0xff] }
  0x2f   :  { %650 = vmatpush.bf16.msrb.mxu1 %v4434_v57  ;;  %v4509_v57 = vld [vmem:[%s5759_s1 + $0x378] sm:$0xff] }
  0x30   :  { %664 = vmatpush.bf16.msrb.mxu2 %v4442_v58  ;;  %v3248_v58 = vld [vmem:[%s5760_s0 + $0x40] sm:$0xf] }
  0x31   :  { %678 = vmatpush.bf16.msrb.mxu3 %v4450_v59  ;;  %v4458_v59 = vld [vmem:[%s5760_s0 + $0x5c] sm:$0xf0] }
  0x32   :  { %637 = vmatpush.bf16.msrb.mxu0 %v4425_v60  ;;  %v3256_v60 = vld [vmem:[%s5760_s0 + $0x48] sm:$0xf] }
  0x33   :  { %651 = vmatpush.bf16.msrb.mxu1 %v4433_v61  ;;  %v4459_v61 = vld [vmem:[%s5760_s0 + $0x64] sm:$0xf0] }
  0x34   :  { %665 = vmatpush.bf16.msrb.mxu2 %v4441_v62  ;;  %v4454_v62 = vld [vmem:[%s5760_s0 + $0x44] sm:$0xf] }
  0x35   :  { %679 = vmatpush.bf16.msrb.mxu3 %v4449_v63  ;;  %v3250_v63 = vld [vmem:[%s5760_s0 + $0x60] sm:$0xf0] }
  0x36   :  { %638 = vmatpush.bf16.msrb.mxu0 %v4424_v0  ;;  %v4455_v0 = vld [vmem:[%s5760_s0 + $0x4c] sm:$0xf] }
  0x37   :  { %652 = vmatpush.bf16.msrb.mxu1 %v4432_v1  ;;  %v3258_v1 = vld [vmem:[%s5760_s0 + $0x68] sm:$0xf0] }
  0x38   :  { %666 = vmatpush.bf16.msrb.mxu2 %v4440_v2  ;;  %v4517_v2 = vld [vmem:[%s5759_s1 + $0x3b8] sm:$0xff] }
  0x39   :  { %680 = vmatpush.bf16.msrb.mxu3 %v4448_v3  ;;  %v4525_v3 = vld [vmem:[%s5759_s1 + $0x3f8] sm:$0xff] }
  0x3a   :  { %639 = vmatpush.bf16.msrb.mxu0 %v4423_v4  ;;  %v3249_v4 = vor.u32 %v4458_v59, %v3248_v58  ;;  %v4555_v58 = vld [vmem:[%s5759_s1 + $0x4a8] sm:$0xff] }
  0x3b   :  { %653 = vmatpush.bf16.msrb.mxu1 %v4431_v5  ;;  %v3257_v5 = vor.u32 %v4459_v61, %v3256_v60  ;;  %v4563_v59 = vld [vmem:[%s5759_s1 + $0x4e8] sm:$0xff]  ;;  %v4538_v60 = vld [vmem:[%s5759_s1 + $0x420] sm:$0xff] }
  0x3c   :  { %667 = vmatpush.bf16.msrb.mxu2 %v4439_v6  ;;  %v3253_v6 = vor.u32 %v4454_v62, %v3250_v63  ;;  %v4546_v61 = vld [vmem:[%s5759_s1 + $0x460] sm:$0xff] }
  0x3d   :  { %681 = vmatpush.bf16.msrb.mxu3 %v4447_v7  ;;  %v3261_v7 = vor.u32 %v4455_v0, %v3258_v1  ;;  %v4554_v62 = vld [vmem:[%s5759_s1 + $0x4a0] sm:$0xff]  ;;  %v4537_v0 = vld [vmem:[%s5759_s1 + $0x418] sm:$0xff] }
  0x3e   :  { %640 = vmatpush.bf16.msrb.mxu0 %v4422_v8  ;;  %v4500_v8 = vld [vmem:[%s5759_s1 + $0x330] sm:$0xff]  ;;  %v4562_v63 = vld [vmem:[%s5759_s1 + $0x4e0] sm:$0xff]  ;;  %v4545_v1 = vld [vmem:[%s5759_s1 + $0x458] sm:$0xff] }
  0x3f   :  { %654 = vmatpush.bf16.msrb.mxu1 %v4430_v9  ;;  %v4508_v9 = vld [vmem:[%s5759_s1 + $0x370] sm:$0xff] }
  0x40   :  { %668 = vmatpush.bf16.msrb.mxu2 %v4438_v10  ;;  %v4516_v10 = vld [vmem:[%s5759_s1 + $0x3b0] sm:$0xff] }
  0x41   :  { %682 = vmatpush.bf16.msrb.mxu3 %v4446_v11  ;;  %641 = vmatmul.bf16.vlgmr.msrb.gmra.mxu0 %v2841_v24  ;;  %v4524_v11 = vld [vmem:[%s5759_s1 + $0x3f0] sm:$0xff] }
  0x42   :  { %1251 = vmatpush.bf16.msra.mxu0 %v4469_v12  ;;  %655 = vmatmul.bf16.vlgmr.msrb.gmra.mxu1 %v2845_v26  ;;  %v4499_v12 = vld [vmem:[%s5759_s1 + $0x328] sm:$0xff]  ;;  %v4496_v24 = vld [vmem:[%s5759_s1 + $0x310] sm:$0xff] }
  0x43   :  { %1265 = vmatpush.bf16.msra.mxu1 %v4477_v13  ;;  %669 = vmatmul.bf16.vlgmr.msrb.gmra.mxu2 %v2849_v25  ;;  %v4507_v13 = vld [vmem:[%s5759_s1 + $0x368] sm:$0xff]  ;;  %v4504_v25 = vld [vmem:[%s5759_s1 + $0x350] sm:$0xff] }
  0x44   :  { %1279 = vmatpush.bf16.msra.mxu2 %v4485_v22  ;;  %683 = vmatmul.bf16.vlgmr.msrb.gmra.mxu3 %v2853_v27  ;;  %v4513_v22 = vld [vmem:[%s5759_s1 + $0x398] sm:$0xff]  ;;  %v4512_v26 = vld [vmem:[%s5759_s1 + $0x390] sm:$0xff] }
  0x45   :  { %1293 = vmatpush.bf16.msra.mxu3 %v4493_v23  ;;  %v4521_v23 = vld [vmem:[%s5759_s1 + $0x3d8] sm:$0xff]  ;;  %v4520_v27 = vld [vmem:[%s5759_s1 + $0x3d0] sm:$0xff] }
  0x46   :  { %1252 = vmatpush.bf16.msra.mxu0 %v4468_v28  ;;  %v4495_v28 = vld [vmem:[%s5759_s1 + $0x308] sm:$0xff] }
  0x47   :  { %1266 = vmatpush.bf16.msra.mxu1 %v4476_v29  ;;  %v4503_v29 = vld [vmem:[%s5759_s1 + $0x348] sm:$0xff] }
  0x48   :  { %1280 = vmatpush.bf16.msra.mxu2 %v4484_v30  ;;  %v4511_v30 = vld [vmem:[%s5759_s1 + $0x388] sm:$0xff] }
  0x49   :  { %1294 = vmatpush.bf16.msra.mxu3 %v4492_v31  ;;  %v4519_v31 = vld [vmem:[%s5759_s1 + $0x3c8] sm:$0xff] }
  0x4a   :  { %1253 = vmatpush.bf16.msra.mxu0 %v4467_v32  ;;  %v4494_v32 = vld [vmem:[%s5759_s1 + $0x300] sm:$0xff] }
  0x4b   :  { %1267 = vmatpush.bf16.msra.mxu1 %v4475_v33  ;;  %v4502_v33 = vld [vmem:[%s5759_s1 + $0x340] sm:$0xff] }
  0x4c   :  { %1281 = vmatpush.bf16.msra.mxu2 %v4483_v34  ;;  %v4510_v34 = vld [vmem:[%s5759_s1 + $0x380] sm:$0xff] }
  0x4d   :  { %1295 = vmatpush.bf16.msra.mxu3 %v4491_v35  ;;  %v4518_v35 = vld [vmem:[%s5759_s1 + $0x3c0] sm:$0xff] }
  0x4e   :  { %1254 = vmatpush.bf16.msra.mxu0 %v4466_v36  ;;  %v4541_v36 = vld [vmem:[%s5759_s1 + $0x438] sm:$0xff] }
  0x4f   :  { %1268 = vmatpush.bf16.msra.mxu1 %v4474_v37  ;;  %v4549_v37 = vld [vmem:[%s5759_s1 + $0x478] sm:$0xff] }
  0x50   :  { %1282 = vmatpush.bf16.msra.mxu2 %v4482_v38  ;;  %v3264_v38 = vld [vmem:[%s5760_s0 + $0x50] sm:$0xf] }
  0x51   :  { %1296 = vmatpush.bf16.msra.mxu3 %v4490_v39  ;;  %v4460_v39 = vld [vmem:[%s5760_s0 + $0x6c] sm:$0xf0] }
  0x52   :  { %1255 = vmatpush.bf16.msra.mxu0 %v4465_v40  ;;  %v3272_v40 = vld [vmem:[%s5760_s0 + $0x58] sm:$0xf] }
  0x53   :  { %1269 = vmatpush.bf16.msra.mxu1 %v4473_v41  ;;  %v4461_v41 = vld [vmem:[%s5760_s0 + $0x74] sm:$0xf0] }
  0x54   :  { %1283 = vmatpush.bf16.msra.mxu2 %v4481_v42  ;;  %v4456_v42 = vld [vmem:[%s5760_s0 + $0x54] sm:$0xf] }
  0x55   :  { %1297 = vmatpush.bf16.msra.mxu3 %v4489_v43  ;;  %v3266_v43 = vld [vmem:[%s5760_s0 + $0x70] sm:$0xf0] }
  0x56   :  { %1256 = vmatpush.bf16.msra.mxu0 %v4464_v44  ;;  %v4457_v44 = vld [vmem:[%s5760_s0 + $0x5c] sm:$0xf] }
  0x57   :  { %1270 = vmatpush.bf16.msra.mxu1 %v4472_v45  ;;  %v3274_v45 = vld [vmem:[%s5760_s0 + $0x78] sm:$0xf0] }
  0x58   :  { %1284 = vmatpush.bf16.msra.mxu2 %v4480_v46  ;;  %v4557_v46 = vld [vmem:[%s5759_s1 + $0x4b8] sm:$0xff] }
  0x59   :  { %1298 = vmatpush.bf16.msra.mxu3 %v4488_v47  ;;  %v4565_v47 = vld [vmem:[%s5759_s1 + $0x4f8] sm:$0xff] }
  0x5a   :  { %1257 = vmatpush.bf16.msra.mxu0 %v4463_v48  ;;  %v3265_v48 = vor.u32 %v4460_v39, %v3264_v38  ;;  %v4587_v38 = vld [vmem:[%s5759_s1 + $0x5a8] sm:$0xff] }
  0x5b   :  { %1271 = vmatpush.bf16.msra.mxu1 %v4471_v49  ;;  %v3273_v49 = vor.u32 %v4461_v41, %v3272_v40  ;;  %v4595_v39 = vld [vmem:[%s5759_s1 + $0x5e8] sm:$0xff]  ;;  %v4570_v41 = vld [vmem:[%s5759_s1 + $0x520] sm:$0xff] }
  0x5c   :  { %1285 = vmatpush.bf16.msra.mxu2 %v4479_v50  ;;  %v3269_v50 = vor.u32 %v4456_v42, %v3266_v43  ;;  %v4578_v42 = vld [vmem:[%s5759_s1 + $0x560] sm:$0xff] }
  0x5d   :  { %1299 = vmatpush.bf16.msra.mxu3 %v4487_v51  ;;  %v3277_v51 = vor.u32 %v4457_v44, %v3274_v45  ;;  %v4586_v44 = vld [vmem:[%s5759_s1 + $0x5a0] sm:$0xff] }
  0x5e   :  { %1258 = vmatpush.bf16.msra.mxu0 %v4462_v52  ;;  %v4540_v52 = vld [vmem:[%s5759_s1 + $0x430] sm:$0xff]  ;;  %v4594_v45 = vld [vmem:[%s5759_s1 + $0x5e0] sm:$0xff] }
  0x5f   :  { %1272 = vmatpush.bf16.msra.mxu1 %v4470_v53  ;;  %v4548_v53 = vld [vmem:[%s5759_s1 + $0x470] sm:$0xff] }
  0x60   :  { %1286 = vmatpush.bf16.msra.mxu2 %v4478_v54  ;;  %v4556_v54 = vld [vmem:[%s5759_s1 + $0x4b0] sm:$0xff] }
  0x61   :  { %1300 = vmatpush.bf16.msra.mxu3 %v4486_v55  ;;  %1259 = vmatmul.bf16.vlgmr.msra.gmra.mxu0 %v3249_v4  ;;  %v4564_v55 = vld [vmem:[%s5759_s1 + $0x4f0] sm:$0xff] }
  0x62   :  { %1307 = vmatpush.bf16.msrb.mxu0 %v4501_v56  ;;  %1273 = vmatmul.bf16.vlgmr.msra.gmra.mxu1 %v3253_v6  ;;  %v4539_v56 = vld [vmem:[%s5759_s1 + $0x428] sm:$0xff]  ;;  %v4536_v4 = vld [vmem:[%s5759_s1 + $0x410] sm:$0xff] }
  0x63   :  { %1321 = vmatpush.bf16.msrb.mxu1 %v4509_v57  ;;  %1287 = vmatmul.bf16.vlgmr.msra.gmra.mxu2 %v3257_v5  ;;  %v4547_v57 = vld [vmem:[%s5759_s1 + $0x468] sm:$0xff]  ;;  %v4544_v5 = vld [vmem:[%s5759_s1 + $0x450] sm:$0xff] }
  0x64   :  { %1335 = vmatpush.bf16.msrb.mxu2 %v4517_v2  ;;  %1301 = vmatmul.bf16.vlgmr.msra.gmra.mxu3 %v3261_v7  ;;  %v4553_v2 = vld [vmem:[%s5759_s1 + $0x498] sm:$0xff]  ;;  %v4552_v6 = vld [vmem:[%s5759_s1 + $0x490] sm:$0xff] }
  0x65   :  { %1349 = vmatpush.bf16.msrb.mxu3 %v4525_v3  ;;  %v4561_v3 = vld [vmem:[%s5759_s1 + $0x4d8] sm:$0xff]  ;;  %v4560_v7 = vld [vmem:[%s5759_s1 + $0x4d0] sm:$0xff] }
  0x66   :  { %1308 = vmatpush.bf16.msrb.mxu0 %v4500_v8  ;;  %v4535_v8 = vld [vmem:[%s5759_s1 + $0x408] sm:$0xff] }
  0x67   :  { %1322 = vmatpush.bf16.msrb.mxu1 %v4508_v9  ;;  %v4543_v9 = vld [vmem:[%s5759_s1 + $0x448] sm:$0xff] }
  0x68   :  { %1336 = vmatpush.bf16.msrb.mxu2 %v4516_v10  ;;  %v4551_v10 = vld [vmem:[%s5759_s1 + $0x488] sm:$0xff] }
  0x69   :  { %1350 = vmatpush.bf16.msrb.mxu3 %v4524_v11  ;;  %v4559_v11 = vld [vmem:[%s5759_s1 + $0x4c8] sm:$0xff] }
  0x6a   :  { %1309 = vmatpush.bf16.msrb.mxu0 %v4499_v12  ;;  %v4534_v12 = vld [vmem:[%s5759_s1 + $0x400] sm:$0xff] }
  0x6b   :  { %1323 = vmatpush.bf16.msrb.mxu1 %v4507_v13  ;;  %v4542_v13 = vld [vmem:[%s5759_s1 + $0x440] sm:$0xff] }
  0x6c   :  { %1337 = vmatpush.bf16.msrb.mxu2 %v4515_v14  ;;  %v4550_v14 = vld [vmem:[%s5759_s1 + $0x480] sm:$0xff] }
  0x6d   :  { %1351 = vmatpush.bf16.msrb.mxu3 %v4523_v15  ;;  %v4558_v15 = vld [vmem:[%s5759_s1 + $0x4c0] sm:$0xff] }
  0x6e   :  { %1310 = vmatpush.bf16.msrb.mxu0 %v4498_v16  ;;  %v4573_v16 = vld [vmem:[%s5759_s1 + $0x538] sm:$0xff] }
  0x6f   :  { %1324 = vmatpush.bf16.msrb.mxu1 %v4506_v17  ;;  %v4581_v17 = vld [vmem:[%s5759_s1 + $0x578] sm:$0xff] }
  0x70   :  { %1338 = vmatpush.bf16.msrb.mxu2 %v4514_v18  ;;  %v3672_v18 = vld [vmem:[%s5760_s0 + $0x80] sm:$0xf] }
  0x71   :  { %1352 = vmatpush.bf16.msrb.mxu3 %v4522_v19  ;;  %v4530_v19 = vld [vmem:[%s5760_s0 + $0x9c] sm:$0xf0] }
  0x72   :  { %1311 = vmatpush.bf16.msrb.mxu0 %v4497_v20  ;;  %v3680_v20 = vld [vmem:[%s5760_s0 + $0x88] sm:$0xf] }
  0x73   :  { %1325 = vmatpush.bf16.msrb.mxu1 %v4505_v21  ;;  %v4531_v21 = vld [vmem:[%s5760_s0 + $0xa4] sm:$0xf0] }
  0x74   :  { %1339 = vmatpush.bf16.msrb.mxu2 %v4513_v22  ;;  %v4526_v22 = vld [vmem:[%s5760_s0 + $0x84] sm:$0xf] }
  0x75   :  { %1353 = vmatpush.bf16.msrb.mxu3 %v4521_v23  ;;  %v3674_v23 = vld [vmem:[%s5760_s0 + $0xa0] sm:$0xf0] }
  0x76   :  { %1312 = vmatpush.bf16.msrb.mxu0 %v4496_v24  ;;  %v4527_v24 = vld [vmem:[%s5760_s0 + $0x8c] sm:$0xf] }
  0x77   :  { %1326 = vmatpush.bf16.msrb.mxu1 %v4504_v25  ;;  %v3682_v25 = vld [vmem:[%s5760_s0 + $0xa8] sm:$0xf0] }
  0x78   :  { %1340 = vmatpush.bf16.msrb.mxu2 %v4512_v26  ;;  %v4589_v26 = vld [vmem:[%s5759_s1 + $0x5b8] sm:$0xff] }
  0x79   :  { %1354 = vmatpush.bf16.msrb.mxu3 %v4520_v27  ;;  %v4597_v27 = vld [vmem:[%s5759_s1 + $0x5f8] sm:$0xff] }
  0x7a   :  { %1313 = vmatpush.bf16.msrb.mxu0 %v4495_v28  ;;  %v3673_v28 = vor.u32 %v4530_v19, %v3672_v18  ;;  %v4529_v18 = vld [vmem:[%s5760_s0 + $0x9c] sm:$0xf] }
  0x7b   :  { %1327 = vmatpush.bf16.msrb.mxu1 %v4503_v29  ;;  %v3681_v29 = vor.u32 %v4531_v21, %v3680_v20  ;;  %v3698_v19 = vld [vmem:[%s5760_s0 + $0xb8] sm:$0xf0] }
  0x7c   :  { %1341 = vmatpush.bf16.msrb.mxu2 %v4511_v30  ;;  %v3677_v30 = vor.u32 %v4526_v22, %v3674_v23  ;;  %v4629_v20 = vld [vmem:[%s5759_s1 + $0x6b8] sm:$0xff] }
  0x7d   :  { %1355 = vmatpush.bf16.msrb.mxu3 %v4519_v31  ;;  %v3685_v31 = vor.u32 %v4527_v24, %v3682_v25  ;;  %v4637_v21 = vld [vmem:[%s5759_s1 + $0x6f8] sm:$0xff]  ;;  %v3701_v25 = vor.u32 %v4529_v18, %v3698_v19  ;;  %v4098_v18 = vld [vmem:[%s5760_s0 + $0xe0] sm:$0xf0] }
  0x7e   :  { %1314 = vmatpush.bf16.msrb.mxu0 %v4494_v32  ;;  %v4572_v32 = vld [vmem:[%s5759_s1 + $0x530] sm:$0xff]  ;;  %v4661_v19 = vld [vmem:[%s5759_s1 + $0x7b8] sm:$0xff] }
  0x7f   :  { %1328 = vmatpush.bf16.msrb.mxu1 %v4502_v33  ;;  %v4580_v33 = vld [vmem:[%s5759_s1 + $0x570] sm:$0xff] }
  0x80   :  { %1342 = vmatpush.bf16.msrb.mxu2 %v4510_v34  ;;  %v4588_v34 = vld [vmem:[%s5759_s1 + $0x5b0] sm:$0xff] }
  0x81   :  { %1356 = vmatpush.bf16.msrb.mxu3 %v4518_v35  ;;  %1315 = vmatmul.bf16.vlgmr.msrb.gmra.mxu0 %v3265_v48  ;;  %v4596_v35 = vld [vmem:[%s5759_s1 + $0x5f0] sm:$0xff]  ;;  %v4577_v48 = vld [vmem:[%s5759_s1 + $0x558] sm:$0xff] }
  0x82   :  { %1925 = vmatpush.bf16.msra.mxu0 %v4541_v36  ;;  %1329 = vmatmul.bf16.vlgmr.msrb.gmra.mxu1 %v3269_v50  ;;  %v4571_v36 = vld [vmem:[%s5759_s1 + $0x528] sm:$0xff]  ;;  %v4593_v50 = vld [vmem:[%s5759_s1 + $0x5d8] sm:$0xff] }
  0x83   :  { %1939 = vmatpush.bf16.msra.mxu1 %v4549_v37  ;;  %1343 = vmatmul.bf16.vlgmr.msrb.gmra.mxu2 %v3273_v49  ;;  %v4579_v37 = vld [vmem:[%s5759_s1 + $0x568] sm:$0xff]  ;;  %v4585_v49 = vld [vmem:[%s5759_s1 + $0x598] sm:$0xff] }
  0x84   :  { %1953 = vmatpush.bf16.msra.mxu2 %v4557_v46  ;;  %1357 = vmatmul.bf16.vlgmr.msrb.gmra.mxu3 %v3277_v51 }
  0x85   :  { %1967 = vmatpush.bf16.msra.mxu3 %v4565_v47  ;;  %v4569_v47 = vld [vmem:[%s5759_s1 + $0x518] sm:$0xff] }
  0x86   :  { %1926 = vmatpush.bf16.msra.mxu0 %v4540_v52 }
  0x87   :  { %1940 = vmatpush.bf16.msra.mxu1 %v4548_v53 }
  0x88   :  { %1954 = vmatpush.bf16.msra.mxu2 %v4556_v54  ;;  %v4568_v54 = vld [vmem:[%s5759_s1 + $0x510] sm:$0xff] }
  0x89   :  { %1968 = vmatpush.bf16.msra.mxu3 %v4564_v55  ;;  %v4576_v55 = vld [vmem:[%s5759_s1 + $0x550] sm:$0xff] }
  0x8a   :  { %1927 = vmatpush.bf16.msra.mxu0 %v4539_v56 }
  0x8b   :  { %1941 = vmatpush.bf16.msra.mxu1 %v4547_v57 }
  0x8c   :  { %1955 = vmatpush.bf16.msra.mxu2 %v4555_v58 }
  0x8d   :  { %1969 = vmatpush.bf16.msra.mxu3 %v4563_v59  ;;  %v4584_v59 = vld [vmem:[%s5759_s1 + $0x590] sm:$0xff] }
  0x8e   :  { %1928 = vmatpush.bf16.msra.mxu0 %v4538_v60  ;;  %v4592_v60 = vld [vmem:[%s5759_s1 + $0x5d0] sm:$0xff] }
  0x8f   :  { %1942 = vmatpush.bf16.msra.mxu1 %v4546_v61 }
  0x90   :  { %1956 = vmatpush.bf16.msra.mxu2 %v4554_v62  ;;  %v4567_v62 = vld [vmem:[%s5759_s1 + $0x508] sm:$0xff] }
  0x91   :  { %1970 = vmatpush.bf16.msra.mxu3 %v4562_v63  ;;  %v4575_v63 = vld [vmem:[%s5759_s1 + $0x548] sm:$0xff] }
  0x92   :  { %1929 = vmatpush.bf16.msra.mxu0 %v4537_v0  ;;  %v4583_v0 = vld [vmem:[%s5759_s1 + $0x588] sm:$0xff] }
  0x93   :  { %1943 = vmatpush.bf16.msra.mxu1 %v4545_v1  ;;  %v4591_v1 = vld [vmem:[%s5759_s1 + $0x5c8] sm:$0xff] }
  0x94   :  { %1957 = vmatpush.bf16.msra.mxu2 %v4553_v2 }
  0x95   :  { %1971 = vmatpush.bf16.msra.mxu3 %v4561_v3  ;;  %v4566_v3 = vld [vmem:[%s5759_s1 + $0x500] sm:$0xff] }
  0x96   :  { %1930 = vmatpush.bf16.msra.mxu0 %v4536_v4 }
  0x97   :  { %1944 = vmatpush.bf16.msra.mxu1 %v4544_v5  ;;  %v4574_v5 = vld [vmem:[%s5759_s1 + $0x540] sm:$0xff] }
  0x98   :  { %1958 = vmatpush.bf16.msra.mxu2 %v4552_v6  ;;  %v4582_v6 = vld [vmem:[%s5759_s1 + $0x580] sm:$0xff] }
  0x99   :  { %1972 = vmatpush.bf16.msra.mxu3 %v4560_v7  ;;  %v4590_v7 = vld [vmem:[%s5759_s1 + $0x5c0] sm:$0xff] }
  0x9a   :  { %1931 = vmatpush.bf16.msra.mxu0 %v4535_v8 }
  0x9b   :  { %1945 = vmatpush.bf16.msra.mxu1 %v4543_v9  ;;  %v4613_v9 = vld [vmem:[%s5759_s1 + $0x638] sm:$0xff] }
  0x9c   :  { %1959 = vmatpush.bf16.msra.mxu2 %v4551_v10  ;;  %v4621_v10 = vld [vmem:[%s5759_s1 + $0x678] sm:$0xff] }
  0x9d   :  { %1973 = vmatpush.bf16.msra.mxu3 %v4559_v11  ;;  %v3688_v11 = vld [vmem:[%s5760_s0 + $0x90] sm:$0xf] }
  0x9e   :  { %1932 = vmatpush.bf16.msra.mxu0 %v4534_v12  ;;  %v586_v40 = vpop.f32.mrf.mxu0  ;;  %v4532_v12 = vld [vmem:[%s5760_s0 + $0xac] sm:$0xf0] }
  0x9f   :  { %1946 = vmatpush.bf16.msra.mxu1 %v4542_v13  ;;  %v600_v43 = vpop.f32.mrf.mxu1  ;;  %v3689_v22 = vor.u32 %v4532_v12, %v3688_v11  ;;  %v4106_v11 = vld [vmem:[%s5760_s0 + $0xe8] sm:$0xf0]  ;;  %v4096_v12 = vld [vmem:[%s5760_s0 + $0xc0] sm:$0xf] }
  0xa0   :  { %1960 = vmatpush.bf16.msra.mxu2 %v4550_v14  ;;  %v601_v46 = vadd.f32 %v600_v43, %v586_v40  ;;  %v3696_v14 = vld [vmem:[%s5760_s0 + $0x98] sm:$0xf]  ;;  %v4634_v40 = vld [vmem:[%s5759_s1 + $0x6e0] sm:$0xff] }
  0xa1   :  { %1974 = vmatpush.bf16.msra.mxu3 %v4558_v15  ;;  %1933 = vmatmul.bf16.vlgmr.msra.gmra.mxu0 %v3673_v28  ;;  %v4533_v15 = vld [vmem:[%s5760_s0 + $0xb4] sm:$0xf0]  ;;  %v4628_v28 = vld [vmem:[%s5759_s1 + $0x6b0] sm:$0xff] }
  0xa2   :  { %1981 = vmatpush.bf16.msrb.mxu0 %v4573_v16  ;;  %1947 = vmatmul.bf16.vlgmr.msra.gmra.mxu1 %v3677_v30  ;;  %v4528_v16 = vld [vmem:[%s5760_s0 + $0x94] sm:$0xf]  ;;  %v3697_v23 = vor.u32 %v4533_v15, %v3696_v14  ;;  %v4611_v30 = vld [vmem:[%s5759_s1 + $0x628] sm:$0xff]  ;;  %v4617_v43 = vld [vmem:[%s5759_s1 + $0x658] sm:$0xff] }
  0xa3   :  { %1995 = vmatpush.bf16.msrb.mxu1 %v4581_v17  ;;  %1961 = vmatmul.bf16.vlgmr.msra.gmra.mxu2 %v3681_v29  ;;  %v3690_v17 = vld [vmem:[%s5760_s0 + $0xb0] sm:$0xf0] }
  0xa4   :  { %2009 = vmatpush.bf16.msrb.mxu2 %v4589_v26  ;;  %1975 = vmatmul.bf16.vlgmr.msra.gmra.mxu3 %v3685_v31  ;;  %v3693_v24 = vor.u32 %v4528_v16, %v3690_v17  ;;  %v4612_v26 = vld [vmem:[%s5759_s1 + $0x630] sm:$0xff]  ;;  %v4619_v31 = vld [vmem:[%s5759_s1 + $0x668] sm:$0xff]  ;;  %v4602_v16 = vld [vmem:[%s5760_s0 + $0xdc] sm:$0xf0] }
  0xa5   :  { %2023 = vmatpush.bf16.msrb.mxu3 %v4597_v27  ;;  %v4620_v27 = vld [vmem:[%s5759_s1 + $0x670] sm:$0xff]  ;;  %v4598_v17 = vld [vmem:[%s5760_s0 + $0xc4] sm:$0xf] }
  0xa6   :  { %1982 = vmatpush.bf16.msrb.mxu0 %v4572_v32  ;;  %v614_v51 = vpop.f32.mrf.mxu2  ;;  %v588_v56 = vpop.f32.mrf.mxu0  ;;  %v4636_v29 = vld [vmem:[%s5759_s1 + $0x6f0] sm:$0xff]  ;;  %v4627_v32 = vld [vmem:[%s5759_s1 + $0x6a8] sm:$0xff] }
  0xa7   :  { %1996 = vmatpush.bf16.msrb.mxu1 %v4580_v33  ;;  %v615_v52 = vadd.f32 %v614_v51, %v601_v46  ;;  %v628_v53 = vpop.f32.mrf.mxu3  ;;  %v602_v58 = vpop.f32.mrf.mxu1  ;;  %v4635_v33 = vld [vmem:[%s5759_s1 + $0x6e8] sm:$0xff] }
  0xa8   :  { %2010 = vmatpush.bf16.msrb.mxu2 %v4588_v34  ;;  %v603_v61 = vadd.f32 %v602_v58, %v588_v56  ;;  %v4632_v56 = vld [vmem:[%s5759_s1 + $0x6d0] sm:$0xff]  ;;  %v4607_v58 = vld [vmem:[%s5759_s1 + $0x608] sm:$0xff] }
  0xa9   :  { %2024 = vmatpush.bf16.msrb.mxu3 %v4596_v35  ;;  %v5390_v57 = vadd.f32 %v628_v53, %v615_v52  ;;  %v4608_v52 = vld [vmem:[%s5759_s1 + $0x610] sm:$0xff] }
  0xaa   :  { %1983 = vmatpush.bf16.msrb.mxu0 %v4571_v36  ;;  %v4610_v36 = vld [vmem:[%s5759_s1 + $0x620] sm:$0xff]  ;;  %v4616_v53 = vld [vmem:[%s5759_s1 + $0x650] sm:$0xff] }
  0xab   :  { %1997 = vmatpush.bf16.msrb.mxu1 %v4579_v37  ;;  %v4618_v37 = vld [vmem:[%s5759_s1 + $0x660] sm:$0xff] }
  0xac   :  { %2011 = vmatpush.bf16.msrb.mxu2 %v4587_v38 }
  0xad   :  { %2025 = vmatpush.bf16.msrb.mxu3 %v4595_v39  ;;  %v4626_v39 = vld [vmem:[%s5759_s1 + $0x6a0] sm:$0xff] }
  0xae   :  { %1984 = vmatpush.bf16.msrb.mxu0 %v4570_v41  ;;  %v616_v2 = vpop.f32.mrf.mxu2 }
  0xaf   :  { %1998 = vmatpush.bf16.msrb.mxu1 %v4578_v42  ;;  %v617_v4 = vadd.f32 %v616_v2, %v603_v61  ;;  %v630_v8 = vpop.f32.mrf.mxu3  ;;  %v4609_v42 = vld [vmem:[%s5759_s1 + $0x618] sm:$0xff]  ;;  %v4631_v61 = vld [vmem:[%s5759_s1 + $0x6c8] sm:$0xff]  ;;  %v4614_v2 = vld [vmem:[%s5759_s1 + $0x640] sm:$0xff] }
  0xb0   :  { %2012 = vmatpush.bf16.msrb.mxu2 %v4586_v44  ;;  %v4625_v44 = vld [vmem:[%s5759_s1 + $0x698] sm:$0xff] }
  0xb1   :  { %2026 = vmatpush.bf16.msrb.mxu3 %v4594_v45  ;;  %v5434_v13 = vadd.f32 %v630_v8, %v617_v4  ;;  %v4633_v45 = vld [vmem:[%s5759_s1 + $0x6d8] sm:$0xff]  ;;  %v4630_v4 = vld [vmem:[%s5759_s1 + $0x6c0] sm:$0xff]  ;;  %v4104_v8 = vld [vmem:[%s5760_s0 + $0xc8] sm:$0xf] }
  0xb2   :  { %1985 = vmatpush.bf16.msrb.mxu0 %v4569_v47 }
  0xb3   :  { %1999 = vmatpush.bf16.msrb.mxu1 %v4577_v48 }
  0xb4   :  { %2013 = vmatpush.bf16.msrb.mxu2 %v4585_v49 }
  0xb5   :  { %2027 = vmatpush.bf16.msrb.mxu3 %v4593_v50 }
  0xb6   :  { %1986 = vmatpush.bf16.msrb.mxu0 %v4568_v54 }
  0xb7   :  { %2000 = vmatpush.bf16.msrb.mxu1 %v4576_v55  ;;  %v4624_v55 = vld [vmem:[%s5759_s1 + $0x690] sm:$0xff] }
  0xb8   :  { %2014 = vmatpush.bf16.msrb.mxu2 %v4584_v59  ;;  %v4615_v59 = vld [vmem:[%s5759_s1 + $0x648] sm:$0xff] }
  0xb9   :  { %2028 = vmatpush.bf16.msrb.mxu3 %v4592_v60  ;;  %v4623_v60 = vld [vmem:[%s5759_s1 + $0x688] sm:$0xff] }
  0xba   :  { %1987 = vmatpush.bf16.msrb.mxu0 %v4567_v62 }
  0xbb   :  { %2001 = vmatpush.bf16.msrb.mxu1 %v4575_v63 }
  0xbc   :  { %2015 = vmatpush.bf16.msrb.mxu2 %v4583_v0 }
  0xbd   :  { %2029 = vmatpush.bf16.msrb.mxu3 %v4591_v1  ;;  %v4606_v1 = vld [vmem:[%s5759_s1 + $0x600] sm:$0xff] }
  0xbe   :  { %1988 = vmatpush.bf16.msrb.mxu0 %v4566_v3  ;;  %v642_v34 = vpop.f32.mrf.mxu0  ;;  %v4622_v3 = vld [vmem:[%s5759_s1 + $0x680] sm:$0xff] }
  0xbf   :  { %2002 = vmatpush.bf16.msrb.mxu1 %v4574_v5  ;;  %v643_v35 = vadd.f32 %v642_v34, %v5390_v57  ;;  %v656_v38 = vpop.f32.mrf.mxu1 }
  0xc0   :  { %2016 = vmatpush.bf16.msrb.mxu2 %v4582_v6  ;;  %v4645_v6 = vld [vmem:[%s5759_s1 + $0x738] sm:$0xff] }
  0xc1   :  { %2030 = vmatpush.bf16.msrb.mxu3 %v4590_v7  ;;  %1989 = vmatmul.bf16.vlgmr.msrb.gmra.mxu0 %v3689_v22  ;;  %v657_v41 = vadd.f32 %v656_v38, %v643_v35  ;;  %v4653_v7 = vld [vmem:[%s5759_s1 + $0x778] sm:$0xff]  ;;  %v4642_v35 = vld [vmem:[%s5759_s1 + $0x720] sm:$0xff] }
  0xc2   :  { %2599 = vmatpush.bf16.msra.mxu0 %v4613_v9  ;;  %2003 = vmatmul.bf16.vlgmr.msrb.gmra.mxu1 %v3693_v24  ;;  %v4603_v9 = vld [vmem:[%s5760_s0 + $0xe4] sm:$0xf0]  ;;  %v4097_v24 = vor.u32 %v4602_v16, %v4096_v12  ;;  %v4658_v38 = vld [vmem:[%s5759_s1 + $0x7a0] sm:$0xff]  ;;  %v4601_v12 = vld [vmem:[%s5760_s0 + $0xdc] sm:$0xf] }
  0xc3   :  { %2613 = vmatpush.bf16.msra.mxu1 %v4621_v10  ;;  %2017 = vmatmul.bf16.vlgmr.msrb.gmra.mxu2 %v3697_v23  ;;  %v4599_v10 = vld [vmem:[%s5760_s0 + $0xcc] sm:$0xf]  ;;  %v4105_v22 = vor.u32 %v4603_v9, %v4104_v8  ;;  %v4114_v8 = vld [vmem:[%s5760_s0 + $0xf0] sm:$0xf0]  ;;  %v4120_v9 = vld [vmem:[%s5760_s0 + $0xd8] sm:$0xf] }
  0xc4   :  { %2627 = vmatpush.bf16.msra.mxu2 %v4629_v20  ;;  %2031 = vmatmul.bf16.vlgmr.msrb.gmra.mxu3 %v3701_v25  ;;  %v4669_v20 = vld [vmem:[%s5759_s1 + $0x7f8] sm:$0xff]  ;;  %v4109_v23 = vor.u32 %v4599_v10, %v4106_v11  ;;  %v4101_v25 = vor.u32 %v4598_v17, %v4098_v18 }
  0xc5   :  { %2641 = vmatpush.bf16.msra.mxu3 %v4637_v21  ;;  %v4605_v11 = vld [vmem:[%s5760_s0 + $0xf4] sm:$0xf0] }
  0xc6   :  { %2600 = vmatpush.bf16.msra.mxu0 %v4612_v26  ;;  %v670_v46 = vpop.f32.mrf.mxu2  ;;  %v644_v49 = vpop.f32.mrf.mxu0  ;;  %v4644_v26 = vld [vmem:[%s5759_s1 + $0x730] sm:$0xff]  ;;  %v4121_v17 = vor.u32 %v4605_v11, %v4120_v9 }
  0xc7   :  { %2614 = vmatpush.bf16.msra.mxu1 %v4620_v27  ;;  %v671_v47 = vadd.f32 %v670_v46, %v657_v41  ;;  %v684_v48 = vpop.f32.mrf.mxu3  ;;  %v645_v50 = vadd.f32 %v644_v49, %v5434_v13  ;;  %v658_v54 = vpop.f32.mrf.mxu1  ;;  %v4652_v27 = vld [vmem:[%s5759_s1 + $0x770] sm:$0xff]  ;;  %v4641_v41 = vld [vmem:[%s5759_s1 + $0x718] sm:$0xff] }
  0xc8   :  { %2628 = vmatpush.bf16.msra.mxu2 %v4628_v28  ;;  %v4660_v28 = vld [vmem:[%s5759_s1 + $0x7b0] sm:$0xff] }
  0xc9   :  { %2642 = vmatpush.bf16.msra.mxu3 %v4636_v29  ;;  %v5510_v51 = vadd.f32 %v684_v48, %v671_v47  ;;  %v659_v57 = vadd.f32 %v658_v54, %v645_v50  ;;  %v4668_v29 = vld [vmem:[%s5759_s1 + $0x7f0] sm:$0xff] }
  0xca   :  { %2601 = vmatpush.bf16.msra.mxu0 %v4611_v30  ;;  %v4643_v30 = vld [vmem:[%s5759_s1 + $0x728] sm:$0xff]  ;;  %v4640_v48 = vld [vmem:[%s5759_s1 + $0x710] sm:$0xff] }
  0xcb   :  { %2615 = vmatpush.bf16.msra.mxu1 %v4619_v31  ;;  %v2726_v13 = vmul.f32 %v5510_v51, %v5510_v51  ;;  %v4651_v31 = vld [vmem:[%s5759_s1 + $0x768] sm:$0xff]  ;;  %v4648_v49 = vld [vmem:[%s5759_s1 + $0x750] sm:$0xff] }
  0xcc   :  { %2629 = vmatpush.bf16.msra.mxu2 %v4627_v32  ;;  %v4659_v32 = vld [vmem:[%s5759_s1 + $0x7a8] sm:$0xff]  ;;  %v4656_v54 = vld [vmem:[%s5759_s1 + $0x790] sm:$0xff] }
  0xcd   :  { %2643 = vmatpush.bf16.msra.mxu3 %v4635_v33  ;;  %v4667_v33 = vld [vmem:[%s5759_s1 + $0x7e8] sm:$0xff] }
  0xce   :  { %2602 = vmatpush.bf16.msra.mxu0 %v4610_v36  ;;  %v672_v62 = vpop.f32.mrf.mxu2  ;;  %v4650_v36 = vld [vmem:[%s5759_s1 + $0x760] sm:$0xff] }
  0xcf   :  { %2616 = vmatpush.bf16.msra.mxu1 %v4618_v37  ;;  %v673_v63 = vadd.f32 %v672_v62, %v659_v57  ;;  %v686_v0 = vpop.f32.mrf.mxu3  ;;  %v4639_v57 = vld [vmem:[%s5759_s1 + $0x708] sm:$0xff]  ;;  %v4638_v62 = vld [vmem:[%s5759_s1 + $0x700] sm:$0xff] }
  0xd0   :  { %2630 = vmatpush.bf16.msra.mxu2 %v4626_v39  ;;  %v4666_v39 = vld [vmem:[%s5759_s1 + $0x7e0] sm:$0xff] }
  0xd1   :  { %2644 = vmatpush.bf16.msra.mxu3 %v4634_v40  ;;  %v5548_v5 = vadd.f32 %v686_v0, %v673_v63  ;;  %v4646_v63 = vld [vmem:[%s5759_s1 + $0x740] sm:$0xff] }
  0xd2   :  { %2603 = vmatpush.bf16.msra.mxu0 %v4609_v42  ;;  %v4649_v42 = vld [vmem:[%s5759_s1 + $0x758] sm:$0xff] }
  0xd3   :  { %2617 = vmatpush.bf16.msra.mxu1 %v4617_v43  ;;  %v5575_v14 = vadd.f32 %v5548_v5, %v5510_v51  ;;  %v2727_v15 = vmul.f32 %v5548_v5, %v5548_v5  ;;  %v4657_v43 = vld [vmem:[%s5759_s1 + $0x798] sm:$0xff] }
  0xd4   :  { %2631 = vmatpush.bf16.msra.mxu2 %v4625_v44  ;;  %v4665_v44 = vld [vmem:[%s5759_s1 + $0x7d8] sm:$0xff] }
  0xd5   :  { %2645 = vmatpush.bf16.msra.mxu3 %v4633_v45  ;;  %v5594_v21 = vadd.f32 %v2727_v15, %v2726_v13  ;;  %v4122_v13 = vld [vmem:[%s5760_s0 + $0xf8] sm:$0xf0] }
  0xd6   :  { %2604 = vmatpush.bf16.msra.mxu0 %v4608_v52  ;;  %v4125_v18 = vor.u32 %v4601_v12, %v4122_v13 }
  0xd7   :  { %2618 = vmatpush.bf16.msra.mxu1 %v4616_v53 }
  0xd8   :  { %2632 = vmatpush.bf16.msra.mxu2 %v4624_v55  ;;  %v4664_v55 = vld [vmem:[%s5759_s1 + $0x7d0] sm:$0xff] }
  0xd9   :  { %2646 = vmatpush.bf16.msra.mxu3 %v4632_v56 }
  0xda   :  { %2605 = vmatpush.bf16.msra.mxu0 %v4607_v58  ;;  %v4647_v58 = vld [vmem:[%s5759_s1 + $0x748] sm:$0xff] }
  0xdb   :  { %2619 = vmatpush.bf16.msra.mxu1 %v4615_v59  ;;  %v4655_v59 = vld [vmem:[%s5759_s1 + $0x788] sm:$0xff] }
  0xdc   :  { %2633 = vmatpush.bf16.msra.mxu2 %v4623_v60  ;;  %v4663_v60 = vld [vmem:[%s5759_s1 + $0x7c8] sm:$0xff] }
  0xdd   :  { %2647 = vmatpush.bf16.msra.mxu3 %v4631_v61 }
  0xde   :  { %2606 = vmatpush.bf16.msra.mxu0 %v4606_v1  ;;  %v1260_v34 = vpop.f32.mrf.mxu0  ;;  %v4654_v1 = vld [vmem:[%s5759_s1 + $0x780] sm:$0xff] }
  0xdf   :  { %2620 = vmatpush.bf16.msra.mxu1 %v4614_v2  ;;  %v1274_v37 = vpop.f32.mrf.mxu1  ;;  %v4662_v2 = vld [vmem:[%s5759_s1 + $0x7c0] sm:$0xff] }
  0xe0   :  { %2634 = vmatpush.bf16.msra.mxu2 %v4622_v3  ;;  %v1275_v40 = vadd.f32 %v1274_v37, %v1260_v34  ;;  %v4112_v3 = vld [vmem:[%s5760_s0 + $0xd0] sm:$0xf] }
  0xe1   :  { %2648 = vmatpush.bf16.msra.mxu3 %v4630_v4  ;;  %2607 = vmatmul.bf16.vlgmr.msra.gmra.mxu0 %v4097_v24  ;;  %v4604_v4 = vld [vmem:[%s5760_s0 + $0xec] sm:$0xf0] }
  0xe2   :  { %2655 = vmatpush.bf16.msrb.mxu0 %v4645_v6  ;;  %2621 = vmatmul.bf16.vlgmr.msra.gmra.mxu1 %v4101_v25  ;;  %v4113_v15 = vor.u32 %v4604_v4, %v4112_v3 }
  0xe3   :  { %2669 = vmatpush.bf16.msrb.mxu1 %v4653_v7  ;;  %2635 = vmatmul.bf16.vlgmr.msra.gmra.mxu2 %v4105_v22  ;;  %v4600_v7 = vld [vmem:[%s5760_s0 + $0xd4] sm:$0xf] }
  0xe4   :  { %2683 = vmatpush.bf16.msrb.mxu2 %v4661_v19  ;;  %2649 = vmatmul.bf16.vlgmr.msra.gmra.mxu3 %v4109_v23  ;;  %v4117_v16 = vor.u32 %v4600_v7, %v4114_v8 }
  0xe5   :  { %2697 = vmatpush.bf16.msrb.mxu3 %v4669_v20 }
  0xe6   :  { %2656 = vmatpush.bf16.msrb.mxu0 %v4644_v26  ;;  %v1288_v45 = vpop.f32.mrf.mxu2  ;;  %v1262_v50 = vpop.f32.mrf.mxu0 }
  0xe7   :  { %2670 = vmatpush.bf16.msrb.mxu1 %v4652_v27  ;;  %v1289_v46 = vadd.f32 %v1288_v45, %v1275_v40  ;;  %v1302_v47 = vpop.f32.mrf.mxu3  ;;  %v1276_v53 = vpop.f32.mrf.mxu1 }
  0xe8   :  { %2684 = vmatpush.bf16.msrb.mxu2 %v4660_v28  ;;  %v1277_v56 = vadd.f32 %v1276_v53, %v1262_v50 }
  0xe9   :  { %2698 = vmatpush.bf16.msrb.mxu3 %v4668_v29  ;;  %v1303_v52 = vadd.f32 %v1302_v47, %v1289_v46 }
  0xea   :  { %2657 = vmatpush.bf16.msrb.mxu0 %v4643_v30 }
  0xeb   :  { %2671 = vmatpush.bf16.msrb.mxu1 %v4651_v31 }
  0xec   :  { %2685 = vmatpush.bf16.msrb.mxu2 %v4659_v32 }
  0xed   :  { %2699 = vmatpush.bf16.msrb.mxu3 %v4667_v33 }
  0xee   :  { %2658 = vmatpush.bf16.msrb.mxu0 %v4642_v35  ;;  %v1290_v61 = vpop.f32.mrf.mxu2 }
  0xef   :  { %2672 = vmatpush.bf16.msrb.mxu1 %v4650_v36  ;;  %v1291_v0 = vadd.f32 %v1290_v61, %v1277_v56  ;;  %v1304_v6 = vpop.f32.mrf.mxu3 }
  0xf0   :  { %2686 = vmatpush.bf16.msrb.mxu2 %v4658_v38 }
  0xf1   :  { %2700 = vmatpush.bf16.msrb.mxu3 %v4666_v39  ;;  %v1305_v10 = vadd.f32 %v1304_v6, %v1291_v0 }
  0xf2   :  { %2659 = vmatpush.bf16.msrb.mxu0 %v4641_v41 }
  0xf3   :  { %2673 = vmatpush.bf16.msrb.mxu1 %v4649_v42 }
  0xf4   :  { %2687 = vmatpush.bf16.msrb.mxu2 %v4657_v43 }
  0xf5   :  { %2701 = vmatpush.bf16.msrb.mxu3 %v4665_v44 }
  0xf6   :  { %2660 = vmatpush.bf16.msrb.mxu0 %v4640_v48 }
  0xf7   :  { %2674 = vmatpush.bf16.msrb.mxu1 %v4648_v49 }
  0xf8   :  { %2688 = vmatpush.bf16.msrb.mxu2 %v4656_v54 }
  0xf9   :  { %2702 = vmatpush.bf16.msrb.mxu3 %v4664_v55 }
  0xfa   :  { %2661 = vmatpush.bf16.msrb.mxu0 %v4639_v57 }
  0xfb   :  { %2675 = vmatpush.bf16.msrb.mxu1 %v4647_v58 }
  0xfc   :  { %2689 = vmatpush.bf16.msrb.mxu2 %v4655_v59 }
  0xfd   :  { %2703 = vmatpush.bf16.msrb.mxu3 %v4663_v60 }
  0xfe   :  { %2662 = vmatpush.bf16.msrb.mxu0 %v4638_v62  ;;  %v1316_v19 = vpop.f32.mrf.mxu0 }
  0xff   :  { %2676 = vmatpush.bf16.msrb.mxu1 %v4646_v63  ;;  %v1317_v20 = vadd.f32 %v1316_v19, %v1303_v52  ;;  %v1330_v22 = vpop.f32.mrf.mxu1 }
 0x100   :  { %2690 = vmatpush.bf16.msrb.mxu2 %v4654_v1 }
 0x101   :  { %2704 = vmatpush.bf16.msrb.mxu3 %v4662_v2  ;;  %2663 = vmatmul.bf16.vlgmr.msrb.gmra.mxu0 %v4113_v15  ;;  %v1331_v23 = vadd.f32 %v1330_v22, %v1317_v20 }
 0x102   :  { %2677 = vmatmul.bf16.vlgmr.msrb.gmra.mxu1 %v4117_v16 }
 0x103   :  { %2691 = vmatmul.bf16.vlgmr.msrb.gmra.mxu2 %v4121_v17 }
 0x104   :  { %2705 = vmatmul.bf16.vlgmr.msrb.gmra.mxu3 %v4125_v18 }
 0x106   :  { %v1344_v24 = vpop.f32.mrf.mxu2  ;;  %v1318_v27 = vpop.f32.mrf.mxu0 }
 0x107   :  { %v1345_v25 = vadd.f32 %v1344_v24, %v1331_v23  ;;  %v1358_v26 = vpop.f32.mrf.mxu3  ;;  %v1319_v28 = vadd.f32 %v1318_v27, %v1305_v10  ;;  %v1332_v30 = vpop.f32.mrf.mxu1 }
 0x109   :  { %v5704_v29 = vadd.f32 %v1358_v26, %v1345_v25  ;;  %v1333_v34 = vadd.f32 %v1332_v30, %v1319_v28  ;;  %v4698_v25 = vmov 32.0  }
 0x10a   :  { %4694 = vrcp.f32 %v4698_v25  ;;  %v2712_v25 = vld [vmem:[%s5762_s3] sm:$0x1] }
 0x10b   :  { %v2714_v31 = vadd.f32 %v5575_v14, %v5704_v29  ;;  %v2728_v32 = vmul.f32 %v5704_v29, %v5704_v29 }
 0x10d   :  { %v2735_v33 = vadd.f32 %v5594_v21, %v2728_v32 }
 0x10e   :  { %v1346_v35 = vpop.f32.mrf.mxu2 }
 0x10f   :  { %v1347_v36 = vadd.f32 %v1346_v35, %v1333_v34  ;;  %v1360_v37 = vpop.f32.mrf.mxu3 }
 0x110   :  { %v4695_v35 = vpop.eup %4694 }
 0x111   :  { %v5711_v38 = vadd.f32 %v1360_v37, %v1347_v36  ;;  %vm2752_vm0 = vweird.f32 %v4695_v35 }
 0x113   :  { %v2715_v39 = vadd.f32 %v2714_v31, %v5711_v38  ;;  %v2729_v40 = vmul.f32 %v5711_v38, %v5711_v38 }
 0x115   :  { %v5716_v41 = vadd.f32 %v2735_v33, %v2729_v40 }
 0x11e   :  { %v1934_v42 = vpop.f32.mrf.mxu0 }
 0x11f   :  { %v1948_v14 = vpop.f32.mrf.mxu1 }
 0x120   :  { %v1949_v58 = vadd.f32 %v1948_v14, %v1934_v42 }
 0x126   :  { %v1962_v43 = vpop.f32.mrf.mxu2  ;;  %v1936_v45 = vpop.f32.mrf.mxu0 }
 0x127   :  { %v1976_v44 = vpop.f32.mrf.mxu3  ;;  %v1950_v46 = vpop.f32.mrf.mxu1  ;;  %v1963_v60 = vadd.f32 %v1962_v43, %v1949_v58 }
 0x128   :  { %v1951_v63 = vadd.f32 %v1950_v46, %v1936_v45  ;;  %v2748_v45 = vmul.f32 32.0, %v4695_v35 }
 0x129   :  { %v1977_v0 = vadd.f32 %v1976_v44, %v1963_v60 }
 0x12e   :  { %v1964_v21 = vpop.f32.mrf.mxu2 }
 0x12f   :  { %v1978_v47 = vpop.f32.mrf.mxu3  ;;  %v1965_v3 = vadd.f32 %v1964_v21, %v1951_v63 }
 0x131   :  { %v1979_v8 = vadd.f32 %v1978_v47, %v1965_v3 }
 0x13e   :  { %v1990_v48 = vpop.f32.mrf.mxu0 }
 0x13f   :  { %v2004_v49 = vpop.f32.mrf.mxu1  ;;  %v1991_v6 = vadd.f32 %v1990_v48, %v1977_v0 }
 0x141   :  { %v2005_v11 = vadd.f32 %v2004_v49, %v1991_v6 }
 0x146   :  { %v2018_v50 = vpop.f32.mrf.mxu2  ;;  %v1992_v53 = vpop.f32.mrf.mxu0 }
 0x147   :  { %v2032_v52 = vpop.f32.mrf.mxu3  ;;  %v2006_v54 = vpop.f32.mrf.mxu1  ;;  %v1993_v12 = vadd.f32 %v1992_v53, %v1979_v8  ;;  %v2019_v19 = vadd.f32 %v2018_v50, %v2005_v11 }
 0x149   :  { %v2007_v20 = vadd.f32 %v2006_v54, %v1993_v12  ;;  %v5718_v28 = vadd.f32 %v2032_v52, %v2019_v19 }
 0x14b   :  { %v2730_v36 = vmul.f32 %v5718_v28, %v5718_v28  ;;  %v2716_v42 = vadd.f32 %v2715_v39, %v5718_v28  ;;  %v2749_v39 = vsub.f32 1.0, %v2748_v45 }
 0x14d   :  { %v2737_v46 = vadd.f32 %v5716_v41, %v2730_v36 }
 0x14e   :  { %v2020_v55 = vpop.f32.mrf.mxu2 }
 0x14f   :  { %v2034_v56 = vpop.f32.mrf.mxu3  ;;  %v2021_v23 = vadd.f32 %v2020_v55, %v2007_v20  ;;  %v2711_v20 = vld [vmem:[%s5761_s2] sm:$0x1] }
 0x151   :  { %v5720_v33 = vadd.f32 %v2034_v56, %v2021_v23 }
 0x153   :  { %v2731_v14 = vmul.f32 %v5720_v33, %v5720_v33  ;;  %v2717_v21 = vadd.f32 %v2716_v42, %v5720_v33 }
 0x155   :  { %v2738_v50 = vadd.f32 %v2737_v46, %v2731_v14 }
 0x15e   :  { %v2608_v57 = vpop.f32.mrf.mxu0 }
 0x15f   :  { %v2622_v59 = vpop.f32.mrf.mxu1 }
 0x160   :  { %v2623_v1 = vadd.f32 %v2622_v59, %v2608_v57  ;;  %v2750_v59 = vmul.f32 %v4695_v35, %v2749_v39 }
 0x162   :  { %v2751_v63 = vadd.f32 %v4695_v35, %v2750_v59 }
 0x166   :  { %v2636_v61 = vpop.f32.mrf.mxu2  ;;  %v2610_v2 = vpop.f32.mrf.mxu0 }
 0x167   :  { %v2650_v62 = vpop.f32.mrf.mxu3  ;;  %v2624_v4 = vpop.f32.mrf.mxu1  ;;  %v2637_v7 = vadd.f32 %v2636_v61, %v2623_v1 }
 0x168   :  { %v2625_v15 = vadd.f32 %v2624_v4, %v2610_v2  ;;  %v2753_v4 = vsel %vm2752_vm0, %v4695_v35, %v2751_v63 }
 0x169   :  { %v2651_v13 = vadd.f32 %v2650_v62, %v2637_v7 }
 0x16e   :  { %v2638_v9 = vpop.f32.mrf.mxu2 }
 0x16f   :  { %v2652_v10 = vpop.f32.mrf.mxu3  ;;  %v2639_v22 = vadd.f32 %v2638_v9, %v2625_v15 }
 0x171   :  { %v2653_v30 = vadd.f32 %v2652_v10, %v2639_v22 }
 0x17e   :  { %v2664_v16 = vpop.f32.mrf.mxu0 }
 0x17f   :  { %v2665_v17 = vadd.f32 %v2664_v16, %v2651_v13  ;;  %v2678_v18 = vpop.f32.mrf.mxu1 }
 0x181   :  { %v2679_v24 = vadd.f32 %v2678_v18, %v2665_v17 }
 0x186   :  { %v2692_v26 = vpop.f32.mrf.mxu2  ;;  %v2666_v32 = vpop.f32.mrf.mxu0 }
 0x187   :  { %v2706_v27 = vpop.f32.mrf.mxu3  ;;  %v2693_v31 = vadd.f32 %v2692_v26, %v2679_v24  ;;  %v2667_v34 = vadd.f32 %v2666_v32, %v2653_v30  ;;  %v2680_v40 = vpop.f32.mrf.mxu1 }
 0x189   :  { %v5724_v37 = vadd.f32 %v2706_v27, %v2693_v31  ;;  %v2681_v43 = vadd.f32 %v2680_v40, %v2667_v34 }
 0x18b   :  { %v2732_v47 = vmul.f32 %v5724_v37, %v5724_v37  ;;  %v2718_v52 = vadd.f32 %v2717_v21, %v5724_v37 }
 0x18d   :  { %v2739_v54 = vadd.f32 %v2738_v50, %v2732_v47 }
 0x18e   :  { %v2694_v44 = vpop.f32.mrf.mxu2 }
 0x18f   :  { %v2695_v48 = vadd.f32 %v2694_v44, %v2681_v43  ;;  %v2708_v49 = vpop.f32.mrf.mxu3 }
 0x191   :  { %v2709_v53 = vadd.f32 %v2708_v49, %v2695_v48 }
 0x193   :  { %v2719_v55 = vadd.f32 %v2718_v52, %v2709_v53  ;;  %v2733_v56 = vmul.f32 %v2709_v53, %v2709_v53 }
 0x195   :  { %v2720_v57 = vrot.slane %v2719_v55, 4  ;;  %v2740_v58 = vadd.f32 %v2739_v54, %v2733_v56 }
 0x197   :  { %v2721_v60 = vadd.f32 %v2720_v57, %v2719_v55  ;;  %v2741_v41 = vrot.slane %v2740_v58, 4 }
 0x199   :  { %v2722_v61 = vrot.slane %v2721_v60, 2  ;;  %v2742_v62 = vadd.f32 %v2741_v41, %v2740_v58 }
 0x19b   :  { %v2723_v0 = vadd.f32 %v2722_v61, %v2721_v60  ;;  %v2743_v1 = vrot.slane %v2742_v62, 2 }
 0x19d   :  { %v2724_v2 = vrot.slane %v2723_v0, 1  ;;  %v2744_v3 = vadd.f32 %v2743_v1, %v2742_v62 }
 0x19f   :  { %v2725_v6 = vadd.f32 %v2724_v2, %v2723_v0  ;;  %v2745_v7 = vrot.slane %v2744_v3, 1 }
 0x1a1   :  { %v2746_v8 = vadd.f32 %v2745_v7, %v2744_v3  ;;  %v2754_v9 = vmul.f32 %v2753_v4, %v2725_v6 }
 0x1a3   :  { %v2755_v10 = vmul.f32 %v2753_v4, %v2746_v8  ;;  %v2756_v11 = vmul.f32 %v2754_v9, %v2754_v9 }
 0x1a5   :  { %v2757_v12 = vsub.f32 %v2755_v10, %v2756_v11 }
 0x1a7   :  { %v2758_v13 = vadd.f32 1e-05, %v2757_v12 }
 0x1a9   :  { %4696 = vrsqrt.f32 %v2758_v13  ;;  %vm2765_vm2 = vweird.f32 %v2758_v13 }
 0x1af   :  { %v4697_v15 = vpop.eup %4696 }
 0x1b0   :  { %v2760_v16 = vmul.f32 %v4697_v15, %v2758_v13  ;;  %vm2766_vm1 = vweird.f32 %v4697_v15 }
 0x1b1   :  { %vm2767_vm3 = vmor %vm2765_vm2, %vm2766_vm1 }
 0x1b2   :  { %v2761_v17 = vmul.f32 %v4697_v15, %v2760_v16 }
 0x1b4   :  { %v2762_v18 = vmul.f32 0.5, %v2761_v17 }
 0x1b6   :  { %v2763_v19 = vsub.f32 1.5, %v2762_v18 }
 0x1b8   :  { %v2764_v22 = vmul.f32 %v4697_v15, %v2763_v19 }
 0x1ba   :  { %v2768_v23 = vsel %vm2767_vm3, %v4697_v15, %v2764_v22 }
 0x1bb   :  { %v2769_v24 = vmul.f32 %v2768_v23, %v2711_v20 }
 0x1bd   :  { %v2770_v26 = vmul.f32 %v2769_v24, %v2754_v9  ;;  %v2773_v27 = vperm.slane %v2769_v24, 0 }
 0x1bf   :  { %v2771_v30 = vsub.f32 %v2712_v25, %v2770_v26  ;;  %v2775_v31 = vmul.f32 %v2773_v27, %v5510_v51  ;;  %v2776_v32 = vmul.f32 %v2773_v27, %v5548_v5  ;;  %v2777_v34 = vmul.f32 %v2773_v27, %v5704_v29 }
 0x1c0   :  { %v2778_v35 = vmul.f32 %v2773_v27, %v5711_v38  ;;  %v2779_v40 = vmul.f32 %v2773_v27, %v5718_v28  ;;  %v2780_v42 = vmul.f32 %v2773_v27, %v5720_v33  ;;  %v2781_v14 = vmul.f32 %v2773_v27, %v5724_v37 }
 0x1c1   :  { %v2784_v36 = vperm.slane %v2771_v30, 0  ;;  %v2782_v43 = vmul.f32 %v2773_v27, %v2709_v53 }
 0x1c3   :  { %v2786_v44 = vadd.f32 %v2784_v36, %v2775_v31  ;;  %v2787_v45 = vadd.f32 %v2784_v36, %v2776_v32  ;;  %v2788_v46 = vadd.f32 %v2784_v36, %v2777_v34  ;;  %v2789_v21 = vadd.f32 %v2784_v36, %v2778_v35 }
 0x1c4   :  { %v2790_v47 = vadd.f32 %v2784_v36, %v2779_v40  ;;  %v2791_v51 = vadd.f32 %v2784_v36, %v2780_v42  ;;  %v2792_v48 = vadd.f32 %v2784_v36, %v2781_v14  ;;  %v2793_v5 = vadd.f32 %v2784_v36, %v2782_v43 }
 0x1c5   :  { %v2794_v49 = vmax.f32 %v2786_v44, 0.0  ;;  %v2795_v29 = vmax.f32 %v2787_v45, 0.0  ;;  %v2796_v50 = vmax.f32 %v2788_v46, 0.0  ;;  %v2797_v38 = vmax.f32 %v2789_v21, 0.0 }
 0x1c6   :  { %v2798_v52 = vmax.f32 %v2790_v47, 0.0  ;;  %v2799_v39 = vmax.f32 %v2791_v51, 0.0  ;;  %v2800_v28 = vmax.f32 %v2792_v48, 0.0  ;;  %v2801_v54 = vmax.f32 %v2793_v5, 0.0 }
 0x1c7   :  { %v4673_v33 = vpack.c.bf16 %v2795_v29, %v2794_v49  ;;  %v4678_v55 = vpack.c.bf16 %v2797_v38, %v2796_v50 }
 0x1c8   :  { %v4683_v37 = vpack.c.bf16 %v2799_v39, %v2798_v52  ;;  %v4688_v53 = vpack.c.bf16 %v2801_v54, %v2800_v28 }
 0x1c9   :  { %4674 = vst [vmem:[%s5763_s4] sm:$0xff] %v4673_v33  }
 0x1ca   :  { %4690 = vst [vmem:[%s5763_s4 + $0x8] sm:$0xff] %v4678_v55  }
 0x1cb   :  { %4691 = vst [vmem:[%s5763_s4 + $0x10] sm:$0xff] %v4683_v37  }
 0x1cc   :  { %4692 = vst [vmem:[%s5763_s4 + $0x18] sm:$0xff] %v4688_v53  }

// kernel: diffmorpher_forward.14
= control target key start
LH: loop header
LB: loop body
LE: loop exit
PB: predicated region body
PF: predicated region fallthrough
CT: control target
= control target key end

     0   :  { %s3508_s1 = inlined_call_operand.vmem [shape: bf16[4,512,128], index: 1, kind: input, shape index: {}]   ;;  %s3509_s0 = inlined_call_operand.vmem [shape: bf16[4,32,512], index: 0, kind: input, shape index: {}]   ;;  %s3510_s2 = inlined_call_operand.vmem [shape: f32[1,1,128], index: 2, kind: input, shape index: {}]   ;;  %s3511_s3 = inlined_call_operand.vmem [shape: f32[1,1,128], index: 3, kind: input, shape index: {}]   ;;  %s3512_s4 = inlined_call_operand.vmem [shape: bf16[4,32,128], index: 4, kind: output, shape index: {}]  }
   0x1   :  { %v2589_v0 = vld [vmem:[%s3508_s1 + $0x38] sm:$0xff]  ;;  %v2588_v4 = vld [vmem:[%s3508_s1 + $0x30] sm:$0xff]  ;;  %v2587_v8 = vld [vmem:[%s3508_s1 + $0x28] sm:$0xff] }
   0x2   :  { %v2597_v1 = vld [vmem:[%s3508_s1 + $0x78] sm:$0xff]  ;;  %321 = vmatpush.bf16.msra.mxu0 %v2589_v0  ;;  %v2596_v5 = vld [vmem:[%s3508_s1 + $0x70] sm:$0xff]  ;;  %v2595_v9 = vld [vmem:[%s3508_s1 + $0x68] sm:$0xff] }
   0x3   :  { %v2605_v2 = vld [vmem:[%s3508_s1 + $0xb8] sm:$0xff]  ;;  %340 = vmatpush.bf16.msra.mxu1 %v2597_v1  ;;  %v2604_v6 = vld [vmem:[%s3508_s1 + $0xb0] sm:$0xff]  ;;  %v2603_v10 = vld [vmem:[%s3508_s1 + $0xa8] sm:$0xff] }
   0x4   :  { %v2613_v3 = vld [vmem:[%s3508_s1 + $0xf8] sm:$0xff]  ;;  %359 = vmatpush.bf16.msra.mxu2 %v2605_v2  ;;  %v2612_v7 = vld [vmem:[%s3508_s1 + $0xf0] sm:$0xff]  ;;  %v2611_v11 = vld [vmem:[%s3508_s1 + $0xe8] sm:$0xff] }
   0x5   :  { %378 = vmatpush.bf16.msra.mxu3 %v2613_v3  ;;  %v2586_v12 = vld [vmem:[%s3508_s1 + $0x20] sm:$0xff]  ;;  %v2585_v16 = vld [vmem:[%s3508_s1 + $0x18] sm:$0xff]  ;;  %v2584_v20 = vld [vmem:[%s3508_s1 + $0x10] sm:$0xff] }
   0x6   :  { %322 = vmatpush.bf16.msra.mxu0 %v2588_v4  ;;  %v2594_v13 = vld [vmem:[%s3508_s1 + $0x60] sm:$0xff]  ;;  %v2593_v17 = vld [vmem:[%s3508_s1 + $0x58] sm:$0xff]  ;;  %v2592_v21 = vld [vmem:[%s3508_s1 + $0x50] sm:$0xff] }
   0x7   :  { %341 = vmatpush.bf16.msra.mxu1 %v2596_v5  ;;  %v2602_v14 = vld [vmem:[%s3508_s1 + $0xa0] sm:$0xff]  ;;  %v2601_v18 = vld [vmem:[%s3508_s1 + $0x98] sm:$0xff]  ;;  %v2600_v22 = vld [vmem:[%s3508_s1 + $0x90] sm:$0xff] }
   0x8   :  { %360 = vmatpush.bf16.msra.mxu2 %v2604_v6  ;;  %v2610_v15 = vld [vmem:[%s3508_s1 + $0xe0] sm:$0xff]  ;;  %v2609_v19 = vld [vmem:[%s3508_s1 + $0xd8] sm:$0xff]  ;;  %v2608_v23 = vld [vmem:[%s3508_s1 + $0xd0] sm:$0xff] }
   0x9   :  { %379 = vmatpush.bf16.msra.mxu3 %v2612_v7  ;;  %v2583_v24 = vld [vmem:[%s3508_s1 + $0x8] sm:$0xff]  ;;  %v2582_v28 = vld [vmem:[%s3508_s1] sm:$0xff]  ;;  %v2576_v33 = vld [vmem:[%s3509_s0 + $0xc] sm:$0xf0] }
   0xa   :  { %323 = vmatpush.bf16.msra.mxu0 %v2587_v8  ;;  %v2591_v25 = vld [vmem:[%s3508_s1 + $0x48] sm:$0xff]  ;;  %v2590_v29 = vld [vmem:[%s3508_s1 + $0x40] sm:$0xff]  ;;  %v1722_v35 = vld [vmem:[%s3509_s0 + $0x10] sm:$0xf0] }
   0xb   :  { %342 = vmatpush.bf16.msra.mxu1 %v2595_v9  ;;  %v2599_v26 = vld [vmem:[%s3508_s1 + $0x88] sm:$0xff]  ;;  %v2598_v30 = vld [vmem:[%s3508_s1 + $0x80] sm:$0xff]  ;;  %v2577_v37 = vld [vmem:[%s3509_s0 + $0x14] sm:$0xf0] }
   0xc   :  { %361 = vmatpush.bf16.msra.mxu2 %v2603_v10  ;;  %v2607_v27 = vld [vmem:[%s3508_s1 + $0xc8] sm:$0xff]  ;;  %v2606_v31 = vld [vmem:[%s3508_s1 + $0xc0] sm:$0xff]  ;;  %v1730_v39 = vld [vmem:[%s3509_s0 + $0x18] sm:$0xf0] }
   0xd   :  { %380 = vmatpush.bf16.msra.mxu3 %v2611_v11  ;;  %v1720_v32 = vld [vmem:[%s3509_s0] sm:$0xf]  ;;  %v2574_v34 = vld [vmem:[%s3509_s0 + $0x4] sm:$0xf]  ;;  %v1728_v36 = vld [vmem:[%s3509_s0 + $0x8] sm:$0xf] }
   0xe   :  { %324 = vmatpush.bf16.msra.mxu0 %v2586_v12  ;;  %v2575_v38 = vld [vmem:[%s3509_s0 + $0xc] sm:$0xf]  ;;  %v2645_v40 = vld [vmem:[%s3508_s1 + $0x1b8] sm:$0xff]  ;;  %v1721_v42 = vor.u32 %v2576_v33, %v1720_v32  ;;  %v1725_v43 = vor.u32 %v2574_v34, %v1722_v35  ;;  %v1729_v44 = vor.u32 %v2577_v37, %v1728_v36  ;;  %v2644_v48 = vld [vmem:[%s3508_s1 + $0x1b0] sm:$0xff] }
   0xf   :  { %343 = vmatpush.bf16.msra.mxu1 %v2594_v13  ;;  %v2629_v41 = vld [vmem:[%s3508_s1 + $0x138] sm:$0xff]  ;;  %v1733_v45 = vor.u32 %v2575_v38, %v1730_v39  ;;  %v2628_v49 = vld [vmem:[%s3508_s1 + $0x130] sm:$0xff]  ;;  %v2643_v52 = vld [vmem:[%s3508_s1 + $0x1a8] sm:$0xff] }
  0x10   :  { %362 = vmatpush.bf16.msra.mxu2 %v2602_v14  ;;  %v2637_v46 = vld [vmem:[%s3508_s1 + $0x178] sm:$0xff]  ;;  %v2636_v50 = vld [vmem:[%s3508_s1 + $0x170] sm:$0xff]  ;;  %v2627_v53 = vld [vmem:[%s3508_s1 + $0x128] sm:$0xff] }
  0x11   :  { %381 = vmatpush.bf16.msra.mxu3 %v2610_v15  ;;  %v2653_v47 = vld [vmem:[%s3508_s1 + $0x1f8] sm:$0xff]  ;;  %v2652_v51 = vld [vmem:[%s3508_s1 + $0x1f0] sm:$0xff]  ;;  %v2635_v54 = vld [vmem:[%s3508_s1 + $0x168] sm:$0xff] }
  0x12   :  { %325 = vmatpush.bf16.msra.mxu0 %v2585_v16  ;;  %v2651_v55 = vld [vmem:[%s3508_s1 + $0x1e8] sm:$0xff]  ;;  %v2642_v56 = vld [vmem:[%s3508_s1 + $0x1a0] sm:$0xff]  ;;  %v2580_v61 = vld [vmem:[%s3509_s0 + $0x2c] sm:$0xf0] }
  0x13   :  { %344 = vmatpush.bf16.msra.mxu1 %v2593_v17  ;;  %v2626_v57 = vld [vmem:[%s3508_s1 + $0x120] sm:$0xff]  ;;  %v1738_v63 = vld [vmem:[%s3509_s0 + $0x30] sm:$0xf0]  ;;  %v1744_v0 = vld [vmem:[%s3509_s0 + $0x28] sm:$0xf] }
  0x14   :  { %363 = vmatpush.bf16.msra.mxu2 %v2601_v18  ;;  %v2634_v58 = vld [vmem:[%s3508_s1 + $0x160] sm:$0xff]  ;;  %v2581_v1 = vld [vmem:[%s3509_s0 + $0x34] sm:$0xf0]  ;;  %v2579_v2 = vld [vmem:[%s3509_s0 + $0x2c] sm:$0xf] }
  0x15   :  { %382 = vmatpush.bf16.msra.mxu3 %v2609_v19  ;;  %v2650_v59 = vld [vmem:[%s3508_s1 + $0x1e0] sm:$0xff]  ;;  %v1746_v3 = vld [vmem:[%s3509_s0 + $0x38] sm:$0xf0]  ;;  %v1745_v8 = vor.u32 %v2581_v1, %v1744_v0  ;;  %v2640_v12 = vld [vmem:[%s3508_s1 + $0x190] sm:$0xff] }
  0x16   :  { %326 = vmatpush.bf16.msra.mxu0 %v2584_v20  ;;  %v1736_v60 = vld [vmem:[%s3509_s0 + $0x20] sm:$0xf]  ;;  %v2578_v62 = vld [vmem:[%s3509_s0 + $0x24] sm:$0xf]  ;;  %v2641_v4 = vld [vmem:[%s3508_s1 + $0x198] sm:$0xff]  ;;  %v1749_v9 = vor.u32 %v2579_v2, %v1746_v3 }
  0x17   :  { %345 = vmatpush.bf16.msra.mxu1 %v2592_v21  ;;  %v2625_v5 = vld [vmem:[%s3508_s1 + $0x118] sm:$0xff]  ;;  %v1737_v6 = vor.u32 %v2580_v61, %v1736_v60  ;;  %v1741_v7 = vor.u32 %v2578_v62, %v1738_v63  ;;  %v2624_v13 = vld [vmem:[%s3508_s1 + $0x110] sm:$0xff]  ;;  %v2639_v16 = vld [vmem:[%s3508_s1 + $0x188] sm:$0xff] }
  0x18   :  { %364 = vmatpush.bf16.msra.mxu2 %v2600_v22  ;;  %v2633_v10 = vld [vmem:[%s3508_s1 + $0x158] sm:$0xff]  ;;  %v2632_v14 = vld [vmem:[%s3508_s1 + $0x150] sm:$0xff]  ;;  %v2623_v17 = vld [vmem:[%s3508_s1 + $0x108] sm:$0xff] }
  0x19   :  { %383 = vmatpush.bf16.msra.mxu3 %v2608_v23  ;;  %v2649_v11 = vld [vmem:[%s3508_s1 + $0x1d8] sm:$0xff]  ;;  %v2648_v15 = vld [vmem:[%s3508_s1 + $0x1d0] sm:$0xff]  ;;  %v2631_v18 = vld [vmem:[%s3508_s1 + $0x148] sm:$0xff] }
  0x1a   :  { %327 = vmatpush.bf16.msra.mxu0 %v2583_v24  ;;  %v2647_v19 = vld [vmem:[%s3508_s1 + $0x1c8] sm:$0xff]  ;;  %v2638_v20 = vld [vmem:[%s3508_s1 + $0x180] sm:$0xff]  ;;  %v1962_v33 = vld [vmem:[%s3509_s0 + $0x58] sm:$0xf0] }
  0x1b   :  { %346 = vmatpush.bf16.msra.mxu1 %v2591_v25  ;;  %v2622_v21 = vld [vmem:[%s3508_s1 + $0x100] sm:$0xff]  ;;  %v2685_v25 = vld [vmem:[%s3508_s1 + $0x2b8] sm:$0xff]  ;;  %v2615_v32 = vld [vmem:[%s3509_s0 + $0x4c] sm:$0xf] }
  0x1c   :  { %365 = vmatpush.bf16.msra.mxu2 %v2599_v26  ;;  %v2630_v22 = vld [vmem:[%s3508_s1 + $0x140] sm:$0xff]  ;;  %v2669_v26 = vld [vmem:[%s3508_s1 + $0x238] sm:$0xff]  ;;  %v2684_v37 = vld [vmem:[%s3508_s1 + $0x2b0] sm:$0xff] }
  0x1d   :  { %384 = vmatpush.bf16.msra.mxu3 %v2607_v27  ;;  %v2646_v23 = vld [vmem:[%s3508_s1 + $0x1c0] sm:$0xff]  ;;  %v2616_v27 = vld [vmem:[%s3509_s0 + $0x4c] sm:$0xf0]  ;;  %v2677_v34 = vld [vmem:[%s3508_s1 + $0x278] sm:$0xff] }
  0x1e   :  { %328 = vmatpush.bf16.msra.mxu0 %v2582_v28  ;;  %v1952_v24 = vld [vmem:[%s3509_s0 + $0x40] sm:$0xf]  ;;  %v2614_v28 = vld [vmem:[%s3509_s0 + $0x44] sm:$0xf]  ;;  %v2693_v35 = vld [vmem:[%s3508_s1 + $0x2f8] sm:$0xff] }
  0x1f   :  { %347 = vmatpush.bf16.msra.mxu1 %v2590_v29  ;;  %v1954_v29 = vld [vmem:[%s3509_s0 + $0x50] sm:$0xf0]  ;;  %v1953_v36 = vor.u32 %v2616_v27, %v1952_v24  ;;  %v2665_v60 = vld [vmem:[%s3508_s1 + $0x218] sm:$0xff]  ;;  %v2655_v27 = vld [vmem:[%s3509_s0 + $0x8c] sm:$0xf] }
  0x20   :  { %366 = vmatpush.bf16.msra.mxu2 %v2598_v30  ;;  %v1960_v30 = vld [vmem:[%s3509_s0 + $0x48] sm:$0xf]  ;;  %v1957_v38 = vor.u32 %v2614_v28, %v1954_v29  ;;  %v1978_v61 = vld [vmem:[%s3509_s0 + $0x78] sm:$0xf0]  ;;  %v2680_v1 = vld [vmem:[%s3508_s1 + $0x290] sm:$0xff] }
  0x21   :  { %385 = vmatpush.bf16.msra.mxu3 %v2606_v31  ;;  %329 = vmatmul.bf16.vlgmr.msra.gmra.mxu0 %v1721_v42  ;;  %v2617_v31 = vld [vmem:[%s3509_s0 + $0x54] sm:$0xf0]  ;;  %v2676_v42 = vld [vmem:[%s3508_s1 + $0x270] sm:$0xff]  ;;  %v2194_v28 = vld [vmem:[%s3509_s0 + $0x98] sm:$0xf0] }
  0x22   :  { %703 = vmatpush.bf16.msrb.mxu0 %v2629_v41  ;;  %348 = vmatmul.bf16.vlgmr.msra.gmra.mxu1 %v1725_v43  ;;  %v1961_v39 = vor.u32 %v2617_v31, %v1960_v30  ;;  %v2668_v41 = vld [vmem:[%s3508_s1 + $0x230] sm:$0xff]  ;;  %v2673_v62 = vld [vmem:[%s3508_s1 + $0x258] sm:$0xff] }
  0x23   :  { %367 = vmatmul.bf16.vlgmr.msra.gmra.mxu2 %v1729_v44  ;;  %722 = vmatpush.bf16.msrb.mxu1 %v2637_v46  ;;  %v2692_v43 = vld [vmem:[%s3508_s1 + $0x2f0] sm:$0xff]  ;;  %v2683_v44 = vld [vmem:[%s3508_s1 + $0x2a8] sm:$0xff]  ;;  %v2689_v63 = vld [vmem:[%s3508_s1 + $0x2d8] sm:$0xff] }
  0x24   :  { %741 = vmatpush.bf16.msrb.mxu2 %v2645_v40  ;;  %386 = vmatmul.bf16.vlgmr.msra.gmra.mxu3 %v1733_v45  ;;  %v1965_v40 = vor.u32 %v2615_v32, %v1962_v33  ;;  %v2667_v45 = vld [vmem:[%s3508_s1 + $0x228] sm:$0xff]  ;;  %v2186_v24 = vld [vmem:[%s3509_s0 + $0x90] sm:$0xf0]  ;;  %v2197_v33 = vor.u32 %v2655_v27, %v2194_v28  ;;  %v2442_v27 = vld [vmem:[%s3509_s0 + $0xf8] sm:$0xf0] }
  0x25   :  { %760 = vmatpush.bf16.msrb.mxu3 %v2653_v47  ;;  %v2675_v46 = vld [vmem:[%s3508_s1 + $0x268] sm:$0xff]  ;;  %v2716_v30 = vld [vmem:[%s3508_s1 + $0x370] sm:$0xff] }
  0x26   :  { %704 = vmatpush.bf16.msrb.mxu0 %v2628_v49  ;;  %v2691_v47 = vld [vmem:[%s3508_s1 + $0x2e8] sm:$0xff]  ;;  %v2666_v49 = vld [vmem:[%s3508_s1 + $0x220] sm:$0xff] }
  0x27   :  { %723 = vmatpush.bf16.msrb.mxu1 %v2636_v50  ;;  %v2674_v50 = vld [vmem:[%s3508_s1 + $0x260] sm:$0xff] }
  0x28   :  { %742 = vmatpush.bf16.msrb.mxu2 %v2644_v48  ;;  %v2682_v48 = vld [vmem:[%s3508_s1 + $0x2a0] sm:$0xff] }
  0x29   :  { %761 = vmatpush.bf16.msrb.mxu3 %v2652_v51  ;;  %v2690_v51 = vld [vmem:[%s3508_s1 + $0x2e0] sm:$0xff] }
  0x2a   :  { %705 = vmatpush.bf16.msrb.mxu0 %v2627_v53  ;;  %v2620_v53 = vld [vmem:[%s3509_s0 + $0x6c] sm:$0xf0] }
  0x2b   :  { %724 = vmatpush.bf16.msrb.mxu1 %v2635_v54  ;;  %v2681_v54 = vld [vmem:[%s3508_s1 + $0x298] sm:$0xff] }
  0x2c   :  { %743 = vmatpush.bf16.msrb.mxu2 %v2643_v52  ;;  %v1968_v52 = vld [vmem:[%s3509_s0 + $0x60] sm:$0xf] }
  0x2d   :  { %762 = vmatpush.bf16.msrb.mxu3 %v2651_v55  ;;  %v2618_v55 = vld [vmem:[%s3509_s0 + $0x64] sm:$0xf]  ;;  %v1969_v0 = vor.u32 %v2620_v53, %v1968_v52  ;;  %v2659_v52 = vld [vmem:[%s3509_s0 + $0xac] sm:$0xf]  ;;  %v2705_v53 = vld [vmem:[%s3508_s1 + $0x318] sm:$0xff] }
  0x2e   :  { %706 = vmatpush.bf16.msrb.mxu0 %v2626_v57  ;;  %v1976_v57 = vld [vmem:[%s3509_s0 + $0x68] sm:$0xf] }
  0x2f   :  { %725 = vmatpush.bf16.msrb.mxu1 %v2634_v58  ;;  %v2621_v58 = vld [vmem:[%s3509_s0 + $0x74] sm:$0xf0] }
  0x30   :  { %744 = vmatpush.bf16.msrb.mxu2 %v2642_v56  ;;  %v1970_v56 = vld [vmem:[%s3509_s0 + $0x70] sm:$0xf0]  ;;  %v1977_v3 = vor.u32 %v2621_v58, %v1976_v57 }
  0x31   :  { %763 = vmatpush.bf16.msrb.mxu3 %v2650_v59  ;;  %334 = vmatmul.bf16.gmra.mxu0 %v1737_v6  ;;  %v2619_v59 = vld [vmem:[%s3509_s0 + $0x6c] sm:$0xf]  ;;  %v1973_v2 = vor.u32 %v2618_v55, %v1970_v56  ;;  %v2672_v6 = vld [vmem:[%s3508_s1 + $0x250] sm:$0xff]  ;;  %v2729_v55 = vld [vmem:[%s3508_s1 + $0x3d8] sm:$0xff] }
  0x32   :  { %707 = vmatpush.bf16.msrb.mxu0 %v2625_v5  ;;  %353 = vmatmul.bf16.gmra.mxu1 %v1741_v7  ;;  %v2664_v5 = vld [vmem:[%s3508_s1 + $0x210] sm:$0xff] }
  0x33   :  { %372 = vmatmul.bf16.gmra.mxu2 %v1745_v8  ;;  %726 = vmatpush.bf16.msrb.mxu1 %v2633_v10  ;;  %v2688_v7 = vld [vmem:[%s3508_s1 + $0x2d0] sm:$0xff]  ;;  %v2679_v8 = vld [vmem:[%s3508_s1 + $0x288] sm:$0xff] }
  0x34   :  { %745 = vmatpush.bf16.msrb.mxu2 %v2641_v4  ;;  %391 = vmatmul.bf16.gmra.mxu3 %v1749_v9  ;;  %v1981_v4 = vor.u32 %v2619_v59, %v1978_v61  ;;  %v2663_v9 = vld [vmem:[%s3508_s1 + $0x208] sm:$0xff]  ;;  %v2720_v56 = vld [vmem:[%s3508_s1 + $0x390] sm:$0xff] }
  0x35   :  { %764 = vmatpush.bf16.msrb.mxu3 %v2649_v11  ;;  %v2671_v10 = vld [vmem:[%s3508_s1 + $0x248] sm:$0xff]  ;;  %v2712_v58 = vld [vmem:[%s3508_s1 + $0x350] sm:$0xff] }
  0x36   :  { %708 = vmatpush.bf16.msrb.mxu0 %v2624_v13  ;;  %v2687_v11 = vld [vmem:[%s3508_s1 + $0x2c8] sm:$0xff]  ;;  %v2725_v13 = vld [vmem:[%s3508_s1 + $0x3b8] sm:$0xff] }
  0x37   :  { %727 = vmatpush.bf16.msrb.mxu1 %v2632_v14  ;;  %v2662_v14 = vld [vmem:[%s3508_s1 + $0x200] sm:$0xff] }
  0x38   :  { %746 = vmatpush.bf16.msrb.mxu2 %v2640_v12  ;;  %v2678_v12 = vld [vmem:[%s3508_s1 + $0x280] sm:$0xff] }
  0x39   :  { %765 = vmatpush.bf16.msrb.mxu3 %v2648_v15  ;;  %v2670_v15 = vld [vmem:[%s3508_s1 + $0x240] sm:$0xff] }
  0x3a   :  { %709 = vmatpush.bf16.msrb.mxu0 %v2623_v17  ;;  %v2184_v17 = vld [vmem:[%s3509_s0 + $0x80] sm:$0xf] }
  0x3b   :  { %728 = vmatpush.bf16.msrb.mxu1 %v2631_v18  ;;  %v2656_v18 = vld [vmem:[%s3509_s0 + $0x8c] sm:$0xf0] }
  0x3c   :  { %747 = vmatpush.bf16.msrb.mxu2 %v2639_v16  ;;  %v2686_v16 = vld [vmem:[%s3508_s1 + $0x2c0] sm:$0xff]  ;;  %v2185_v29 = vor.u32 %v2656_v18, %v2184_v17 }
  0x3d   :  { %766 = vmatpush.bf16.msrb.mxu3 %v2647_v19  ;;  %v2709_v19 = vld [vmem:[%s3508_s1 + $0x338] sm:$0xff] }
  0x3e   :  { %710 = vmatpush.bf16.msrb.mxu0 %v2622_v21  ;;  %v2654_v21 = vld [vmem:[%s3509_s0 + $0x84] sm:$0xf] }
  0x3f   :  { %729 = vmatpush.bf16.msrb.mxu1 %v2630_v22  ;;  %v2733_v22 = vld [vmem:[%s3508_s1 + $0x3f8] sm:$0xff]  ;;  %v2189_v31 = vor.u32 %v2654_v21, %v2186_v24  ;;  %v2700_v21 = vld [vmem:[%s3509_s0 + $0xec] sm:$0xf0]  ;;  %v2440_v24 = vld [vmem:[%s3509_s0 + $0xe8] sm:$0xf] }
  0x40   :  { %748 = vmatpush.bf16.msrb.mxu2 %v2638_v20  ;;  %v2717_v20 = vld [vmem:[%s3508_s1 + $0x378] sm:$0xff] }
  0x41   :  { %767 = vmatpush.bf16.msrb.mxu3 %v2646_v23  ;;  %711 = vmatmul.bf16.vlgmr.msrb.gmra.mxu0 %v1953_v36  ;;  %v2724_v23 = vld [vmem:[%s3508_s1 + $0x3b0] sm:$0xff]  ;;  %v2723_v36 = vld [vmem:[%s3508_s1 + $0x3a8] sm:$0xff] }
  0x42   :  { %1085 = vmatpush.bf16.msra.mxu0 %v2669_v26  ;;  %730 = vmatmul.bf16.vlgmr.msrb.gmra.mxu1 %v1957_v38  ;;  %v2657_v26 = vld [vmem:[%s3509_s0 + $0x94] sm:$0xf0]  ;;  %v2707_v38 = vld [vmem:[%s3508_s1 + $0x328] sm:$0xff] }
  0x43   :  { %1104 = vmatpush.bf16.msra.mxu1 %v2677_v34  ;;  %749 = vmatmul.bf16.vlgmr.msrb.gmra.mxu2 %v1961_v39  ;;  %v2708_v34 = vld [vmem:[%s3508_s1 + $0x330] sm:$0xff]  ;;  %v2731_v39 = vld [vmem:[%s3508_s1 + $0x3e8] sm:$0xff] }
  0x44   :  { %1123 = vmatpush.bf16.msra.mxu2 %v2685_v25  ;;  %768 = vmatmul.bf16.vlgmr.msrb.gmra.mxu3 %v1965_v40  ;;  %v2192_v25 = vld [vmem:[%s3509_s0 + $0x88] sm:$0xf]  ;;  %v2722_v40 = vld [vmem:[%s3508_s1 + $0x3a0] sm:$0xff] }
  0x45   :  { %1142 = vmatpush.bf16.msra.mxu3 %v2693_v35  ;;  %v2193_v32 = vor.u32 %v2657_v26, %v2192_v25  ;;  %v2732_v35 = vld [vmem:[%s3508_s1 + $0x3f0] sm:$0xff]  ;;  %v2701_v25 = vld [vmem:[%s3509_s0 + $0xf4] sm:$0xf0]  ;;  %v2699_v26 = vld [vmem:[%s3509_s0 + $0xec] sm:$0xf] }
  0x46   :  { %1086 = vmatpush.bf16.msra.mxu0 %v2668_v41  ;;  %v2714_v41 = vld [vmem:[%s3508_s1 + $0x360] sm:$0xff] }
  0x47   :  { %1105 = vmatpush.bf16.msra.mxu1 %v2676_v42  ;;  %v2706_v42 = vld [vmem:[%s3508_s1 + $0x320] sm:$0xff] }
  0x48   :  { %1124 = vmatpush.bf16.msra.mxu2 %v2684_v37  ;;  %v2715_v37 = vld [vmem:[%s3508_s1 + $0x368] sm:$0xff] }
  0x49   :  { %1143 = vmatpush.bf16.msra.mxu3 %v2692_v43  ;;  %v2730_v43 = vld [vmem:[%s3508_s1 + $0x3e0] sm:$0xff] }
  0x4a   :  { %1087 = vmatpush.bf16.msra.mxu0 %v2667_v45  ;;  %v2200_v45 = vld [vmem:[%s3509_s0 + $0xa0] sm:$0xf] }
  0x4b   :  { %1106 = vmatpush.bf16.msra.mxu1 %v2675_v46  ;;  %v2660_v46 = vld [vmem:[%s3509_s0 + $0xac] sm:$0xf0] }
  0x4c   :  { %1125 = vmatpush.bf16.msra.mxu2 %v2683_v44  ;;  %v2721_v44 = vld [vmem:[%s3508_s1 + $0x398] sm:$0xff]  ;;  %v2201_v57 = vor.u32 %v2660_v46, %v2200_v45 }
  0x4d   :  { %1144 = vmatpush.bf16.msra.mxu3 %v2691_v47  ;;  %v2713_v47 = vld [vmem:[%s3508_s1 + $0x358] sm:$0xff] }
  0x4e   :  { %1088 = vmatpush.bf16.msra.mxu0 %v2666_v49  ;;  %v2202_v49 = vld [vmem:[%s3509_s0 + $0xb0] sm:$0xf0] }
  0x4f   :  { %1107 = vmatpush.bf16.msra.mxu1 %v2674_v50  ;;  %v2208_v50 = vld [vmem:[%s3509_s0 + $0xa8] sm:$0xf] }
  0x50   :  { %1126 = vmatpush.bf16.msra.mxu2 %v2682_v48  ;;  %v2658_v48 = vld [vmem:[%s3509_s0 + $0xa4] sm:$0xf] }
  0x51   :  { %1145 = vmatpush.bf16.msra.mxu3 %v2690_v51  ;;  %716 = vmatmul.bf16.gmra.mxu0 %v1969_v0  ;;  %v2661_v51 = vld [vmem:[%s3509_s0 + $0xb4] sm:$0xf0]  ;;  %v2205_v59 = vor.u32 %v2658_v48, %v2202_v49  ;;  %v2719_v0 = vld [vmem:[%s3508_s1 + $0x388] sm:$0xff] }
  0x52   :  { %1089 = vmatpush.bf16.msra.mxu0 %v2665_v60  ;;  %735 = vmatmul.bf16.gmra.mxu1 %v1973_v2  ;;  %v2209_v60 = vor.u32 %v2661_v51, %v2208_v50  ;;  %v2703_v2 = vld [vmem:[%s3508_s1 + $0x308] sm:$0xff] }
  0x53   :  { %1108 = vmatpush.bf16.msra.mxu1 %v2673_v62  ;;  %754 = vmatmul.bf16.gmra.mxu2 %v1977_v3  ;;  %v2704_v62 = vld [vmem:[%s3508_s1 + $0x310] sm:$0xff]  ;;  %v2727_v3 = vld [vmem:[%s3508_s1 + $0x3c8] sm:$0xff] }
  0x54   :  { %1127 = vmatpush.bf16.msra.mxu2 %v2681_v54  ;;  %773 = vmatmul.bf16.gmra.mxu3 %v1981_v4  ;;  %v2210_v54 = vld [vmem:[%s3509_s0 + $0xb8] sm:$0xf0]  ;;  %v2718_v4 = vld [vmem:[%s3508_s1 + $0x380] sm:$0xff] }
  0x55   :  { %1146 = vmatpush.bf16.msra.mxu3 %v2689_v63  ;;  %v2213_v61 = vor.u32 %v2659_v52, %v2210_v54  ;;  %v2728_v63 = vld [vmem:[%s3508_s1 + $0x3d0] sm:$0xff] }
  0x56   :  { %1090 = vmatpush.bf16.msra.mxu0 %v2664_v5  ;;  %v2710_v5 = vld [vmem:[%s3508_s1 + $0x340] sm:$0xff] }
  0x57   :  { %1109 = vmatpush.bf16.msra.mxu1 %v2672_v6  ;;  %v2702_v6 = vld [vmem:[%s3508_s1 + $0x300] sm:$0xff] }
  0x58   :  { %1128 = vmatpush.bf16.msra.mxu2 %v2680_v1  ;;  %v2711_v1 = vld [vmem:[%s3508_s1 + $0x348] sm:$0xff] }
  0x59   :  { %1147 = vmatpush.bf16.msra.mxu3 %v2688_v7  ;;  %v2726_v7 = vld [vmem:[%s3508_s1 + $0x3c0] sm:$0xff] }
  0x5a   :  { %1091 = vmatpush.bf16.msra.mxu0 %v2663_v9  ;;  %v2696_v9 = vld [vmem:[%s3509_s0 + $0xcc] sm:$0xf0] }
  0x5b   :  { %1110 = vmatpush.bf16.msra.mxu1 %v2671_v10  ;;  %v2694_v10 = vld [vmem:[%s3509_s0 + $0xc4] sm:$0xf] }
  0x5c   :  { %1129 = vmatpush.bf16.msra.mxu2 %v2679_v8  ;;  %v2416_v8 = vld [vmem:[%s3509_s0 + $0xc0] sm:$0xf] }
  0x5d   :  { %1148 = vmatpush.bf16.msra.mxu3 %v2687_v11  ;;  %v2418_v11 = vld [vmem:[%s3509_s0 + $0xd0] sm:$0xf0] }
  0x5e   :  { %1092 = vmatpush.bf16.msra.mxu0 %v2662_v14  ;;  %v2695_v14 = vld [vmem:[%s3509_s0 + $0xcc] sm:$0xf]  ;;  %v2421_v17 = vor.u32 %v2694_v10, %v2418_v11 }
  0x5f   :  { %1111 = vmatpush.bf16.msra.mxu1 %v2670_v15  ;;  %v2426_v15 = vld [vmem:[%s3509_s0 + $0xd8] sm:$0xf0] }
  0x60   :  { %1130 = vmatpush.bf16.msra.mxu2 %v2678_v12  ;;  %v2424_v12 = vld [vmem:[%s3509_s0 + $0xc8] sm:$0xf] }
  0x61   :  { %1149 = vmatpush.bf16.msra.mxu3 %v2686_v16  ;;  %1093 = vmatmul.bf16.vlgmr.msra.gmra.mxu0 %v2185_v29  ;;  %v2417_v16 = vor.u32 %v2696_v9, %v2416_v8 }
  0x62   :  { %1467 = vmatpush.bf16.msrb.mxu0 %v2709_v19  ;;  %1112 = vmatmul.bf16.vlgmr.msra.gmra.mxu1 %v2189_v31  ;;  %v2429_v19 = vor.u32 %v2695_v14, %v2426_v15  ;;  %v2445_v31 = vor.u32 %v2699_v26, %v2442_v27 }
  0x63   :  { %1486 = vmatpush.bf16.msrb.mxu1 %v2717_v20  ;;  %1131 = vmatmul.bf16.vlgmr.msra.gmra.mxu2 %v2193_v32  ;;  %v2432_v20 = vld [vmem:[%s3509_s0 + $0xe0] sm:$0xf] }
  0x64   :  { %1505 = vmatpush.bf16.msrb.mxu2 %v2725_v13  ;;  %1150 = vmatmul.bf16.vlgmr.msra.gmra.mxu3 %v2197_v33  ;;  %v2697_v13 = vld [vmem:[%s3509_s0 + $0xd4] sm:$0xf0]  ;;  %v2433_v28 = vor.u32 %v2700_v21, %v2432_v20 }
  0x65   :  { %1524 = vmatpush.bf16.msrb.mxu3 %v2733_v22  ;;  %v2425_v18 = vor.u32 %v2697_v13, %v2424_v12  ;;  %v2698_v22 = vld [vmem:[%s3509_s0 + $0xe4] sm:$0xf] }
  0x66   :  { %1468 = vmatpush.bf16.msrb.mxu0 %v2708_v34 }
  0x67   :  { %1487 = vmatpush.bf16.msrb.mxu1 %v2716_v30  ;;  %v2441_v30 = vor.u32 %v2701_v25, %v2440_v24 }
  0x68   :  { %1506 = vmatpush.bf16.msrb.mxu2 %v2724_v23  ;;  %v2434_v23 = vld [vmem:[%s3509_s0 + $0xf0] sm:$0xf0] }
  0x69   :  { %1525 = vmatpush.bf16.msrb.mxu3 %v2732_v35  ;;  %v2437_v29 = vor.u32 %v2698_v22, %v2434_v23 }
  0x6a   :  { %1469 = vmatpush.bf16.msrb.mxu0 %v2707_v38 }
  0x6b   :  { %1488 = vmatpush.bf16.msrb.mxu1 %v2715_v37 }
  0x6c   :  { %1507 = vmatpush.bf16.msrb.mxu2 %v2723_v36 }
  0x6d   :  { %1526 = vmatpush.bf16.msrb.mxu3 %v2731_v39 }
  0x6e   :  { %1470 = vmatpush.bf16.msrb.mxu0 %v2706_v42 }
  0x6f   :  { %1489 = vmatpush.bf16.msrb.mxu1 %v2714_v41 }
  0x70   :  { %1508 = vmatpush.bf16.msrb.mxu2 %v2722_v40 }
  0x71   :  { %1527 = vmatpush.bf16.msrb.mxu3 %v2730_v43  ;;  %1098 = vmatmul.bf16.gmra.mxu0 %v2201_v57 }
  0x72   :  { %1471 = vmatpush.bf16.msrb.mxu0 %v2705_v53  ;;  %1117 = vmatmul.bf16.gmra.mxu1 %v2205_v59 }
  0x73   :  { %1490 = vmatpush.bf16.msrb.mxu1 %v2713_v47  ;;  %1136 = vmatmul.bf16.gmra.mxu2 %v2209_v60 }
  0x74   :  { %1509 = vmatpush.bf16.msrb.mxu2 %v2721_v44  ;;  %1155 = vmatmul.bf16.gmra.mxu3 %v2213_v61 }
  0x75   :  { %1528 = vmatpush.bf16.msrb.mxu3 %v2729_v55 }
  0x76   :  { %1472 = vmatpush.bf16.msrb.mxu0 %v2704_v62 }
  0x77   :  { %1491 = vmatpush.bf16.msrb.mxu1 %v2712_v58 }
  0x78   :  { %1510 = vmatpush.bf16.msrb.mxu2 %v2720_v56 }
  0x79   :  { %1529 = vmatpush.bf16.msrb.mxu3 %v2728_v63 }
  0x7a   :  { %1473 = vmatpush.bf16.msrb.mxu0 %v2703_v2 }
  0x7b   :  { %1492 = vmatpush.bf16.msrb.mxu1 %v2711_v1 }
  0x7c   :  { %1511 = vmatpush.bf16.msrb.mxu2 %v2719_v0 }
  0x7d   :  { %1530 = vmatpush.bf16.msrb.mxu3 %v2727_v3 }
  0x7e   :  { %1474 = vmatpush.bf16.msrb.mxu0 %v2702_v6 }
  0x7f   :  { %1493 = vmatpush.bf16.msrb.mxu1 %v2710_v5 }
  0x80   :  { %1512 = vmatpush.bf16.msrb.mxu2 %v2718_v4 }
  0x81   :  { %1531 = vmatpush.bf16.msrb.mxu3 %v2726_v7  ;;  %1475 = vmatmul.bf16.vlgmr.msrb.gmra.mxu0 %v2417_v16 }
  0x82   :  { %1494 = vmatmul.bf16.vlgmr.msrb.gmra.mxu1 %v2421_v17 }
  0x83   :  { %1513 = vmatmul.bf16.vlgmr.msrb.gmra.mxu2 %v2425_v18 }
  0x84   :  { %1532 = vmatmul.bf16.vlgmr.msrb.gmra.mxu3 %v2429_v19 }
  0x91   :  { %1480 = vmatmul.bf16.gmra.mxu0 %v2433_v28 }
  0x92   :  { %1499 = vmatmul.bf16.gmra.mxu1 %v2437_v29 }
  0x93   :  { %1518 = vmatmul.bf16.gmra.mxu2 %v2441_v30 }
  0x94   :  { %1537 = vmatmul.bf16.gmra.mxu3 %v2445_v31 }
  0x9e   :  { %v330_v32 = vpop.f32.mrf.mxu0 }
  0x9f   :  { %v349_v33 = vpop.f32.mrf.mxu1 }
  0xa0   :  { %v350_v34 = vadd.f32 %v349_v33, %v330_v32 }
  0xa6   :  { %v368_v35 = vpop.f32.mrf.mxu2  ;;  %v332_v38 = vpop.f32.mrf.mxu0 }
  0xa7   :  { %v387_v36 = vpop.f32.mrf.mxu3  ;;  %v369_v37 = vadd.f32 %v368_v35, %v350_v34  ;;  %v351_v39 = vpop.f32.mrf.mxu1 }
  0xa8   :  { %v352_v40 = vadd.f32 %v351_v39, %v332_v38 }
  0xa9   :  { %v3388_v41 = vadd.f32 %v387_v36, %v369_v37 }
  0xab   :  { %v1566_v37 = vmul.f32 %v3388_v41, %v3388_v41 }
  0xae   :  { %v370_v42 = vpop.f32.mrf.mxu2  ;;  %v335_v45 = vpop.f32.mrf.mxu0 }
  0xaf   :  { %v389_v43 = vpop.f32.mrf.mxu3  ;;  %v371_v44 = vadd.f32 %v370_v42, %v352_v40  ;;  %v354_v46 = vpop.f32.mrf.mxu1 }
  0xb0   :  { %v355_v47 = vadd.f32 %v354_v46, %v335_v45 }
  0xb1   :  { %v3390_v48 = vadd.f32 %v389_v43, %v371_v44 }
  0xb3   :  { %v1567_v35 = vmul.f32 %v3390_v48, %v3390_v48  ;;  %v1545_v39 = vadd.f32 %v3390_v48, %v3388_v41 }
  0xb5   :  { %v1582_v45 = vadd.f32 %v1567_v35, %v1566_v37  ;;  %v2786_v35 = vmov 128.0  }
  0xb6   :  { %v373_v49 = vpop.f32.mrf.mxu2  ;;  %v337_v52 = vpop.f32.mrf.mxu0  ;;  %2782 = vrcp.f32 %v2786_v35 }
  0xb7   :  { %v392_v50 = vpop.f32.mrf.mxu3  ;;  %v374_v51 = vadd.f32 %v373_v49, %v355_v47  ;;  %v356_v53 = vpop.f32.mrf.mxu1 }
  0xb8   :  { %v357_v54 = vadd.f32 %v356_v53, %v337_v52 }
  0xb9   :  { %v3392_v55 = vadd.f32 %v392_v50, %v374_v51 }
  0xbb   :  { %v1568_v38 = vmul.f32 %v3392_v55, %v3392_v55  ;;  %v1546_v49 = vadd.f32 %v1545_v39, %v3392_v55 }
  0xbe   :  { %v375_v56 = vpop.f32.mrf.mxu2  ;;  %v712_v59 = vpop.f32.mrf.mxu0 }
  0xbf   :  { %v394_v57 = vpop.f32.mrf.mxu3  ;;  %v376_v58 = vadd.f32 %v375_v56, %v357_v54  ;;  %v731_v60 = vpop.f32.mrf.mxu1  ;;  %v1583_v54 = vadd.f32 %v1582_v45, %v1568_v38 }
  0xc0   :  { %v732_v62 = vadd.f32 %v731_v60, %v712_v59 }
  0xc1   :  { %v3394_v61 = vadd.f32 %v394_v57, %v376_v58 }
  0xc3   :  { %v1569_v50 = vmul.f32 %v3394_v61, %v3394_v61  ;;  %v1547_v56 = vadd.f32 %v1546_v49, %v3394_v61 }
  0xc6   :  { %v750_v63 = vpop.f32.mrf.mxu2  ;;  %v714_v2 = vpop.f32.mrf.mxu0 }
  0xc7   :  { %v751_v0 = vadd.f32 %v750_v63, %v732_v62  ;;  %v769_v1 = vpop.f32.mrf.mxu3  ;;  %v733_v3 = vpop.f32.mrf.mxu1  ;;  %v1584_v63 = vadd.f32 %v1583_v54, %v1569_v50 }
  0xc8   :  { %v734_v33 = vadd.f32 %v733_v3, %v714_v2  ;;  %v2783_v50 = vpop.eup %2782 }
  0xc9   :  { %v3396_v4 = vadd.f32 %v769_v1, %v751_v0  ;;  %vm1608_vm0 = vweird.f32 %v2783_v50 }
  0xcb   :  { %v1570_v57 = vmul.f32 %v3396_v4, %v3396_v4  ;;  %v1548_v0 = vadd.f32 %v1547_v56, %v3396_v4 }
  0xce   :  { %v752_v5 = vpop.f32.mrf.mxu2  ;;  %v717_v7 = vpop.f32.mrf.mxu0 }
  0xcf   :  { %v771_v6 = vpop.f32.mrf.mxu3  ;;  %v736_v8 = vpop.f32.mrf.mxu1  ;;  %v753_v36 = vadd.f32 %v752_v5, %v734_v33  ;;  %v1585_v5 = vadd.f32 %v1584_v63, %v1570_v57  ;;  %v1604_v63 = vmul.f32 128.0, %v2783_v50 }
  0xd0   :  { %v737_v34 = vadd.f32 %v736_v8, %v717_v7 }
  0xd1   :  { %v3409_v51 = vadd.f32 %v771_v6, %v753_v36 }
  0xd3   :  { %v1571_v1 = vmul.f32 %v3409_v51, %v3409_v51  ;;  %v1549_v6 = vadd.f32 %v1548_v0, %v3409_v51 }
  0xd6   :  { %v755_v9 = vpop.f32.mrf.mxu2  ;;  %v719_v11 = vpop.f32.mrf.mxu0 }
  0xd7   :  { %v774_v10 = vpop.f32.mrf.mxu3  ;;  %v738_v12 = vpop.f32.mrf.mxu1  ;;  %v756_v40 = vadd.f32 %v755_v9, %v737_v34 }
  0xd8   :  { %v739_v42 = vadd.f32 %v738_v12, %v719_v11 }
  0xd9   :  { %v3414_v58 = vadd.f32 %v774_v10, %v756_v40 }
  0xdb   :  { %v1572_v7 = vmul.f32 %v3414_v58, %v3414_v58 }
  0xde   :  { %v757_v13 = vpop.f32.mrf.mxu2  ;;  %v1094_v15 = vpop.f32.mrf.mxu0 }
  0xdf   :  { %v776_v14 = vpop.f32.mrf.mxu3  ;;  %v1113_v16 = vpop.f32.mrf.mxu1  ;;  %v758_v52 = vadd.f32 %v757_v13, %v739_v42 }
  0xe0   :  { %v1114_v43 = vadd.f32 %v1113_v16, %v1094_v15  ;;  %v1586_v15 = vadd.f32 %v1585_v5, %v1571_v1  ;;  %v1550_v16 = vadd.f32 %v1549_v6, %v3414_v58 }
  0xe1   :  { %v3419_v2 = vadd.f32 %v776_v14, %v758_v52 }
  0xe3   :  { %v1573_v14 = vmul.f32 %v3419_v2, %v3419_v2 }
  0xe6   :  { %v1132_v17 = vpop.f32.mrf.mxu2  ;;  %v1096_v19 = vpop.f32.mrf.mxu0 }
  0xe7   :  { %v1151_v18 = vpop.f32.mrf.mxu3  ;;  %v1115_v20 = vpop.f32.mrf.mxu1  ;;  %v1133_v59 = vadd.f32 %v1132_v17, %v1114_v43 }
  0xe8   :  { %v1116_v60 = vadd.f32 %v1115_v20, %v1096_v19 }
  0xe9   :  { %v3424_v8 = vadd.f32 %v1151_v18, %v1133_v59  ;;  %v1551_v18 = vadd.f32 %v1550_v16, %v3419_v2 }
  0xeb   :  { %v1552_v33 = vadd.f32 %v1551_v18, %v3424_v8 }
  0xee   :  { %v1134_v21 = vpop.f32.mrf.mxu2  ;;  %v1099_v23 = vpop.f32.mrf.mxu0 }
  0xef   :  { %v1153_v22 = vpop.f32.mrf.mxu3  ;;  %v1118_v24 = vpop.f32.mrf.mxu1  ;;  %v1135_v3 = vadd.f32 %v1134_v21, %v1116_v60 }
  0xf0   :  { %v1119_v62 = vadd.f32 %v1118_v24, %v1099_v23  ;;  %v1587_v23 = vadd.f32 %v1586_v15, %v1572_v7  ;;  %v1574_v24 = vmul.f32 %v3424_v8, %v3424_v8 }
  0xf1   :  { %v3429_v20 = vadd.f32 %v1153_v22, %v1135_v3 }
  0xf3   :  { %v1575_v34 = vmul.f32 %v3429_v20, %v3429_v20  ;;  %v1553_v38 = vadd.f32 %v1552_v33, %v3429_v20 }
  0xf6   :  { %v1137_v25 = vpop.f32.mrf.mxu2  ;;  %v1101_v27 = vpop.f32.mrf.mxu0 }
  0xf7   :  { %v1156_v26 = vpop.f32.mrf.mxu3  ;;  %v1120_v28 = vpop.f32.mrf.mxu1  ;;  %v1138_v10 = vadd.f32 %v1137_v25, %v1119_v62 }
  0xf8   :  { %v1121_v11 = vadd.f32 %v1120_v28, %v1101_v27 }
  0xf9   :  { %v3434_v25 = vadd.f32 %v1156_v26, %v1138_v10 }
  0xfb   :  { %v1576_v26 = vmul.f32 %v3434_v25, %v3434_v25 }
  0xfe   :  { %v1139_v29 = vpop.f32.mrf.mxu2  ;;  %v1476_v31 = vpop.f32.mrf.mxu0 }
  0xff   :  { %v1158_v30 = vpop.f32.mrf.mxu3  ;;  %v1495_v32 = vpop.f32.mrf.mxu1  ;;  %v1140_v21 = vadd.f32 %v1139_v29, %v1121_v11  ;;  %v1605_v11 = vsub.f32 1.0, %v1604_v63 }
 0x100   :  { %v1496_v12 = vadd.f32 %v1495_v32, %v1476_v31  ;;  %v1588_v32 = vadd.f32 %v1587_v23, %v1573_v14 }
 0x101   :  { %v3439_v22 = vadd.f32 %v1158_v30, %v1140_v21 }
 0x102   :  { %v1589_v36 = vadd.f32 %v1588_v32, %v1574_v24 }
 0x103   :  { %v1577_v30 = vmul.f32 %v3439_v22, %v3439_v22 }
 0x104   :  { %v1590_v43 = vadd.f32 %v1589_v36, %v1575_v34 }
 0x106   :  { %v1514_v44 = vpop.f32.mrf.mxu2  ;;  %v1478_v47 = vpop.f32.mrf.mxu0  ;;  %v1591_v52 = vadd.f32 %v1590_v43, %v1576_v26 }
 0x107   :  { %v1533_v46 = vpop.f32.mrf.mxu3  ;;  %v1497_v53 = vpop.f32.mrf.mxu1  ;;  %v1515_v27 = vadd.f32 %v1514_v44, %v1496_v12  ;;  %v1554_v44 = vadd.f32 %v1553_v38, %v3434_v25 }
 0x108   :  { %v1498_v28 = vadd.f32 %v1497_v53, %v1478_v47  ;;  %v1592_v56 = vadd.f32 %v1591_v52, %v1577_v30 }
 0x109   :  { %v3444_v39 = vadd.f32 %v1533_v46, %v1515_v27  ;;  %v1555_v53 = vadd.f32 %v1554_v44, %v3439_v22 }
 0x10b   :  { %v1578_v46 = vmul.f32 %v3444_v39, %v3444_v39  ;;  %v1556_v57 = vadd.f32 %v1555_v53, %v3444_v39 }
 0x10d   :  { %v1593_v0 = vadd.f32 %v1592_v56, %v1578_v46  ;;  %v1544_v46 = vld [vmem:[%s3511_s3] sm:$0x1] }
 0x10e   :  { %v1516_v9 = vpop.f32.mrf.mxu2  ;;  %v1481_v17 = vpop.f32.mrf.mxu0 }
 0x10f   :  { %v1535_v13 = vpop.f32.mrf.mxu3  ;;  %v1500_v19 = vpop.f32.mrf.mxu1  ;;  %v1517_v29 = vadd.f32 %v1516_v9, %v1498_v28 }
 0x110   :  { %v1501_v31 = vadd.f32 %v1500_v19, %v1481_v17  ;;  %v1606_v17 = vmul.f32 %v2783_v50, %v1605_v11 }
 0x111   :  { %v3449_v45 = vadd.f32 %v1535_v13, %v1517_v29 }
 0x112   :  { %v1607_v24 = vadd.f32 %v2783_v50, %v1606_v17 }
 0x113   :  { %v1579_v59 = vmul.f32 %v3449_v45, %v3449_v45  ;;  %v1557_v1 = vadd.f32 %v1556_v57, %v3449_v45 }
 0x114   :  { %v1609_v33 = vsel %vm1608_vm0, %v2783_v50, %v1607_v24 }
 0x115   :  { %v1594_v7 = vadd.f32 %v1593_v0, %v1579_v59 }
 0x116   :  { %v1519_v37 = vpop.f32.mrf.mxu2  ;;  %v1483_v47 = vpop.f32.mrf.mxu0 }
 0x117   :  { %v1520_v40 = vadd.f32 %v1519_v37, %v1501_v31  ;;  %v1538_v42 = vpop.f32.mrf.mxu3  ;;  %v1502_v49 = vpop.f32.mrf.mxu1 }
 0x118   :  { %v1503_v60 = vadd.f32 %v1502_v49, %v1483_v47  ;;  %v1543_v49 = vld [vmem:[%s3510_s2] sm:$0x1] }
 0x119   :  { %v3454_v54 = vadd.f32 %v1538_v42, %v1520_v40 }
 0x11b   :  { %v1580_v3 = vmul.f32 %v3454_v54, %v3454_v54  ;;  %v1558_v9 = vadd.f32 %v1557_v1, %v3454_v54 }
 0x11d   :  { %v1595_v12 = vadd.f32 %v1594_v7, %v1580_v3 }
 0x11e   :  { %v1521_v62 = vpop.f32.mrf.mxu2 }
 0x11f   :  { %v1522_v5 = vadd.f32 %v1521_v62, %v1503_v60  ;;  %v1540_v6 = vpop.f32.mrf.mxu3 }
 0x121   :  { %v1541_v10 = vadd.f32 %v1540_v6, %v1522_v5 }
 0x123   :  { %v1559_v13 = vadd.f32 %v1558_v9, %v1541_v10  ;;  %v1581_v15 = vmul.f32 %v1541_v10, %v1541_v10 }
 0x125   :  { %v1560_v16 = vrot.slane %v1559_v13, 4  ;;  %v1596_v14 = vadd.f32 %v1595_v12, %v1581_v15 }
 0x127   :  { %v1561_v19 = vadd.f32 %v1560_v16, %v1559_v13  ;;  %v1597_v21 = vrot.slane %v1596_v14, 4 }
 0x129   :  { %v1562_v23 = vrot.slane %v1561_v19, 2  ;;  %v1598_v18 = vadd.f32 %v1597_v21, %v1596_v14 }
 0x12b   :  { %v1563_v27 = vadd.f32 %v1562_v23, %v1561_v19  ;;  %v1599_v28 = vrot.slane %v1598_v18, 2 }
 0x12d   :  { %v1564_v31 = vrot.slane %v1563_v27, 1  ;;  %v1600_v32 = vadd.f32 %v1599_v28, %v1598_v18 }
 0x12f   :  { %v1565_v34 = vadd.f32 %v1564_v31, %v1563_v27  ;;  %v1601_v29 = vrot.slane %v1600_v32, 1 }
 0x131   :  { %v1602_v35 = vadd.f32 %v1601_v29, %v1600_v32  ;;  %v1610_v36 = vmul.f32 %v1609_v33, %v1565_v34 }
 0x133   :  { %v1611_v37 = vmul.f32 %v1609_v33, %v1602_v35  ;;  %v1612_v38 = vmul.f32 %v1610_v36, %v1610_v36 }
 0x135   :  { %v1613_v26 = vsub.f32 %v1611_v37, %v1612_v38 }
 0x137   :  { %v1614_v40 = vadd.f32 1e-05, %v1613_v26 }
 0x139   :  { %2784 = vrsqrt.f32 %v1614_v40  ;;  %vm1621_vm2 = vweird.f32 %v1614_v40 }
 0x13f   :  { %v2785_v42 = vpop.eup %2784 }
 0x140   :  { %v1616_v43 = vmul.f32 %v2785_v42, %v1614_v40  ;;  %vm1622_vm1 = vweird.f32 %v2785_v42 }
 0x141   :  { %vm1623_vm3 = vmor %vm1621_vm2, %vm1622_vm1 }
 0x142   :  { %v1617_v44 = vmul.f32 %v2785_v42, %v1616_v43 }
 0x144   :  { %v1618_v30 = vmul.f32 0.5, %v1617_v44 }
 0x146   :  { %v1619_v47 = vsub.f32 1.5, %v1618_v30 }
 0x148   :  { %v1620_v50 = vmul.f32 %v2785_v42, %v1619_v47 }
 0x14a   :  { %v1624_v52 = vsel %vm1623_vm3, %v2785_v42, %v1620_v50 }
 0x14b   :  { %v1625_v53 = vmul.f32 %v1624_v52, %v1543_v49 }
 0x14d   :  { %v1626_v56 = vmul.f32 %v1625_v53, %v1610_v36  ;;  %v1629_v57 = vperm.slane %v1625_v53, 0 }
 0x14f   :  { %v1627_v59 = vsub.f32 %v1544_v46, %v1626_v56  ;;  %v1631_v60 = vmul.f32 %v1629_v57, %v3388_v41  ;;  %v1632_v62 = vmul.f32 %v1629_v57, %v3390_v48  ;;  %v1633_v63 = vmul.f32 %v1629_v57, %v3392_v55 }
 0x150   :  { %v1634_v0 = vmul.f32 %v1629_v57, %v3394_v61  ;;  %v1635_v1 = vmul.f32 %v1629_v57, %v3396_v4  ;;  %v1636_v3 = vmul.f32 %v1629_v57, %v3409_v51  ;;  %v1637_v5 = vmul.f32 %v1629_v57, %v3414_v58 }
 0x151   :  { %v1638_v6 = vmul.f32 %v1629_v57, %v3419_v2  ;;  %v1639_v7 = vmul.f32 %v1629_v57, %v3424_v8  ;;  %v1640_v9 = vmul.f32 %v1629_v57, %v3429_v20  ;;  %v1641_v41 = vmul.f32 %v1629_v57, %v3434_v25 }
 0x152   :  { %v1642_v48 = vmul.f32 %v1629_v57, %v3439_v22  ;;  %v1648_v11 = vperm.slane %v1627_v59, 0  ;;  %v1643_v55 = vmul.f32 %v1629_v57, %v3444_v39  ;;  %v1644_v61 = vmul.f32 %v1629_v57, %v3449_v45 }
 0x153   :  { %v1645_v4 = vmul.f32 %v1629_v57, %v3454_v54  ;;  %v1646_v51 = vmul.f32 %v1629_v57, %v1541_v10 }
 0x154   :  { %v1650_v12 = vadd.f32 %v1648_v11, %v1631_v60  ;;  %v1651_v58 = vadd.f32 %v1648_v11, %v1632_v62  ;;  %v1652_v13 = vadd.f32 %v1648_v11, %v1633_v63  ;;  %v1653_v2 = vadd.f32 %v1648_v11, %v1634_v0 }
 0x155   :  { %v1654_v15 = vadd.f32 %v1648_v11, %v1635_v1  ;;  %v1655_v8 = vadd.f32 %v1648_v11, %v1636_v3  ;;  %v1656_v16 = vadd.f32 %v1648_v11, %v1637_v5  ;;  %v1657_v20 = vadd.f32 %v1648_v11, %v1638_v6 }
 0x156   :  { %v1658_v14 = vadd.f32 %v1648_v11, %v1639_v7  ;;  %v1659_v25 = vadd.f32 %v1648_v11, %v1640_v9  ;;  %v1660_v17 = vadd.f32 %v1648_v11, %v1641_v41  ;;  %v1661_v22 = vadd.f32 %v1648_v11, %v1642_v48 }
 0x157   :  { %v1662_v19 = vadd.f32 %v1648_v11, %v1643_v55  ;;  %v1663_v21 = vadd.f32 %v1648_v11, %v1644_v61  ;;  %v1664_v39 = vadd.f32 %v1648_v11, %v1645_v4  ;;  %v1665_v23 = vadd.f32 %v1648_v11, %v1646_v51 }
 0x158   :  { %v1666_v45 = vmax.f32 %v1650_v12, 0.0  ;;  %v1667_v18 = vmax.f32 %v1651_v58, 0.0  ;;  %v1668_v54 = vmax.f32 %v1652_v13, 0.0  ;;  %v1669_v10 = vmax.f32 %v1653_v2, 0.0 }
 0x159   :  { %v1670_v24 = vmax.f32 %v1654_v15, 0.0  ;;  %v1671_v27 = vmax.f32 %v1655_v8, 0.0  ;;  %v1672_v28 = vmax.f32 %v1656_v16, 0.0  ;;  %v1673_v31 = vmax.f32 %v1657_v20, 0.0 }
 0x15a   :  { %v1674_v32 = vmax.f32 %v1658_v14, 0.0  ;;  %v1675_v33 = vmax.f32 %v1659_v25, 0.0  ;;  %v1676_v34 = vmax.f32 %v1660_v17, 0.0  ;;  %v1677_v29 = vmax.f32 %v1661_v22, 0.0 }
 0x15b   :  { %v1678_v35 = vmax.f32 %v1662_v19, 0.0  ;;  %v1679_v36 = vmax.f32 %v1663_v21, 0.0  ;;  %v2737_v37 = vpack.c.bf16 %v1667_v18, %v1666_v45  ;;  %v2742_v38 = vpack.c.bf16 %v1669_v10, %v1668_v54 }
 0x15c   :  { %v2747_v26 = vpack.c.bf16 %v1671_v27, %v1670_v24  ;;  %v1680_v40 = vmax.f32 %v1664_v39, 0.0  ;;  %v1681_v42 = vmax.f32 %v1665_v23, 0.0  ;;  %v2752_v43 = vpack.c.bf16 %v1673_v31, %v1672_v28 }
 0x15d   :  { %2738 = vst [vmem:[%s3512_s4] sm:$0xff] %v2737_v37   ;;  %v2757_v44 = vpack.c.bf16 %v1675_v33, %v1674_v32  ;;  %v2762_v30 = vpack.c.bf16 %v1677_v29, %v1676_v34  ;;  %v2767_v47 = vpack.c.bf16 %v1679_v36, %v1678_v35 }
 0x15e   :  { %2774 = vst [vmem:[%s3512_s4 + $0x8] sm:$0xff] %v2742_v38   ;;  %v2772_v49 = vpack.c.bf16 %v1681_v42, %v1680_v40 }
 0x15f   :  { %2775 = vst [vmem:[%s3512_s4 + $0x10] sm:$0xff] %v2747_v26  }
 0x160   :  { %2776 = vst [vmem:[%s3512_s4 + $0x18] sm:$0xff] %v2752_v43  }
 0x161   :  { %2777 = vst [vmem:[%s3512_s4 + $0x20] sm:$0xff] %v2757_v44  }
 0x162   :  { %2778 = vst [vmem:[%s3512_s4 + $0x28] sm:$0xff] %v2762_v30  }
 0x163   :  { %2779 = vst [vmem:[%s3512_s4 + $0x30] sm:$0xff] %v2767_v47  }
 0x164   :  { %2780 = vst [vmem:[%s3512_s4 + $0x38] sm:$0xff] %v2772_v49  }

// kernel: diffmorpher_forward.15
= control target key start
LH: loop header
LB: loop body
LE: loop exit
PB: predicated region body
PF: predicated region fallthrough
CT: control target
= control target key end

     0   :  { %s5913_s1 = inlined_call_operand.vmem [shape: bf16[4,256,128], index: 1, kind: input, shape index: {}]   ;;  %s5914_s0 = inlined_call_operand.vmem [shape: bf16[4,128,256], index: 0, kind: input, shape index: {}]   ;;  %s5915_s2 = inlined_call_operand.vmem [shape: f32[1,1,128], index: 2, kind: input, shape index: {}]   ;;  %s5916_s3 = inlined_call_operand.vmem [shape: f32[4,128,128], index: 3, kind: output, shape index: {}]  }
   0x1   :  { %v3403_v0 = vld [vmem:[%s5913_s1 + $0x38] sm:$0xff]  ;;  %v3402_v4 = vld [vmem:[%s5913_s1 + $0x30] sm:$0xff]  ;;  %v3401_v8 = vld [vmem:[%s5913_s1 + $0x28] sm:$0xff] }
   0x2   :  { %v3411_v1 = vld [vmem:[%s5913_s1 + $0x78] sm:$0xff]  ;;  %238 = vmatpush.bf16.msra.mxu0 %v3403_v0  ;;  %v3410_v5 = vld [vmem:[%s5913_s1 + $0x70] sm:$0xff]  ;;  %v3409_v9 = vld [vmem:[%s5913_s1 + $0x68] sm:$0xff] }
   0x3   :  { %v3435_v2 = vld [vmem:[%s5913_s1 + $0xb8] sm:$0xff]  ;;  %287 = vmatpush.bf16.msra.mxu1 %v3411_v1  ;;  %v3434_v6 = vld [vmem:[%s5913_s1 + $0xb0] sm:$0xff]  ;;  %v3433_v10 = vld [vmem:[%s5913_s1 + $0xa8] sm:$0xff] }
   0x4   :  { %v3443_v3 = vld [vmem:[%s5913_s1 + $0xf8] sm:$0xff]  ;;  %562 = vmatpush.bf16.msra.mxu2 %v3435_v2  ;;  %v3442_v7 = vld [vmem:[%s5913_s1 + $0xf0] sm:$0xff]  ;;  %v3441_v11 = vld [vmem:[%s5913_s1 + $0xe8] sm:$0xff] }
   0x5   :  { %611 = vmatpush.bf16.msra.mxu3 %v3443_v3  ;;  %v3400_v12 = vld [vmem:[%s5913_s1 + $0x20] sm:$0xff]  ;;  %v3399_v16 = vld [vmem:[%s5913_s1 + $0x18] sm:$0xff]  ;;  %v3398_v20 = vld [vmem:[%s5913_s1 + $0x10] sm:$0xff] }
   0x6   :  { %239 = vmatpush.bf16.msra.mxu0 %v3402_v4  ;;  %v3408_v13 = vld [vmem:[%s5913_s1 + $0x60] sm:$0xff]  ;;  %v3407_v17 = vld [vmem:[%s5913_s1 + $0x58] sm:$0xff]  ;;  %v3406_v21 = vld [vmem:[%s5913_s1 + $0x50] sm:$0xff] }
   0x7   :  { %288 = vmatpush.bf16.msra.mxu1 %v3410_v5  ;;  %v3432_v14 = vld [vmem:[%s5913_s1 + $0xa0] sm:$0xff]  ;;  %v3431_v18 = vld [vmem:[%s5913_s1 + $0x98] sm:$0xff]  ;;  %v3430_v22 = vld [vmem:[%s5913_s1 + $0x90] sm:$0xff] }
   0x8   :  { %563 = vmatpush.bf16.msra.mxu2 %v3434_v6  ;;  %v3440_v15 = vld [vmem:[%s5913_s1 + $0xe0] sm:$0xff]  ;;  %v3439_v19 = vld [vmem:[%s5913_s1 + $0xd8] sm:$0xff]  ;;  %v3438_v23 = vld [vmem:[%s5913_s1 + $0xd0] sm:$0xff] }
   0x9   :  { %612 = vmatpush.bf16.msra.mxu3 %v3442_v7  ;;  %v3397_v24 = vld [vmem:[%s5913_s1 + $0x8] sm:$0xff]  ;;  %v3396_v28 = vld [vmem:[%s5913_s1] sm:$0xff]  ;;  %v3499_v40 = vld [vmem:[%s5913_s1 + $0x1b8] sm:$0xff] }
   0xa   :  { %240 = vmatpush.bf16.msra.mxu0 %v3401_v8  ;;  %v3405_v25 = vld [vmem:[%s5913_s1 + $0x48] sm:$0xff]  ;;  %v3404_v29 = vld [vmem:[%s5913_s1 + $0x40] sm:$0xff]  ;;  %v3507_v41 = vld [vmem:[%s5913_s1 + $0x1f8] sm:$0xff] }
   0xb   :  { %289 = vmatpush.bf16.msra.mxu1 %v3409_v9  ;;  %v3429_v26 = vld [vmem:[%s5913_s1 + $0x88] sm:$0xff]  ;;  %v3428_v30 = vld [vmem:[%s5913_s1 + $0x80] sm:$0xff]  ;;  %v3467_v46 = vld [vmem:[%s5913_s1 + $0x138] sm:$0xff] }
   0xc   :  { %564 = vmatpush.bf16.msra.mxu2 %v3433_v10  ;;  %v3437_v27 = vld [vmem:[%s5913_s1 + $0xc8] sm:$0xff]  ;;  %v3436_v31 = vld [vmem:[%s5913_s1 + $0xc0] sm:$0xff]  ;;  %v3475_v47 = vld [vmem:[%s5913_s1 + $0x178] sm:$0xff] }
   0xd   :  { %613 = vmatpush.bf16.msra.mxu3 %v3441_v11  ;;  %v2662_v32 = vld [vmem:[%s5914_s0] sm:$0xf]  ;;  %v3381_v33 = vld [vmem:[%s5914_s0 + $0x4] sm:$0xf0]  ;;  %v3380_v34 = vld [vmem:[%s5914_s0 + $0x4] sm:$0xf] }
   0xe   :  { %241 = vmatpush.bf16.msra.mxu0 %v3400_v12  ;;  %v2664_v35 = vld [vmem:[%s5914_s0 + $0x8] sm:$0xf0]  ;;  %v2838_v36 = vld [vmem:[%s5914_s0 + $0x80] sm:$0xf]  ;;  %v3413_v37 = vld [vmem:[%s5914_s0 + $0x84] sm:$0xf0]  ;;  %v2663_v42 = vor.u32 %v3381_v33, %v2662_v32 }
   0xf   :  { %290 = vmatpush.bf16.msra.mxu1 %v3408_v13  ;;  %v3412_v38 = vld [vmem:[%s5914_s0 + $0x84] sm:$0xf]  ;;  %v2840_v39 = vld [vmem:[%s5914_s0 + $0x88] sm:$0xf0]  ;;  %v2667_v43 = vor.u32 %v3380_v34, %v2664_v35  ;;  %v2839_v44 = vor.u32 %v3413_v37, %v2838_v36  ;;  %v3498_v48 = vld [vmem:[%s5913_s1 + $0x1b0] sm:$0xff] }
  0x10   :  { %565 = vmatpush.bf16.msra.mxu2 %v3432_v14  ;;  %v2843_v45 = vor.u32 %v3412_v38, %v2840_v39  ;;  %v3506_v49 = vld [vmem:[%s5913_s1 + $0x1f0] sm:$0xff]  ;;  %v3497_v52 = vld [vmem:[%s5913_s1 + $0x1a8] sm:$0xff]  ;;  %v3383_v57 = vld [vmem:[%s5914_s0 + $0x14] sm:$0xf0] }
  0x11   :  { %614 = vmatpush.bf16.msra.mxu3 %v3440_v15  ;;  %v3466_v50 = vld [vmem:[%s5913_s1 + $0x130] sm:$0xff]  ;;  %v3505_v53 = vld [vmem:[%s5913_s1 + $0x1e8] sm:$0xff]  ;;  %v2672_v59 = vld [vmem:[%s5914_s0 + $0x18] sm:$0xf0] }
  0x12   :  { %242 = vmatpush.bf16.msra.mxu0 %v3399_v16  ;;  %v3474_v51 = vld [vmem:[%s5913_s1 + $0x170] sm:$0xff]  ;;  %v3465_v54 = vld [vmem:[%s5913_s1 + $0x128] sm:$0xff]  ;;  %v3415_v61 = vld [vmem:[%s5914_s0 + $0x94] sm:$0xf0] }
  0x13   :  { %291 = vmatpush.bf16.msra.mxu1 %v3407_v17  ;;  %v3473_v55 = vld [vmem:[%s5913_s1 + $0x168] sm:$0xff]  ;;  %v2670_v56 = vld [vmem:[%s5914_s0 + $0x10] sm:$0xf]  ;;  %v3382_v58 = vld [vmem:[%s5914_s0 + $0x14] sm:$0xf] }
  0x14   :  { %566 = vmatpush.bf16.msra.mxu2 %v3431_v18  ;;  %v2846_v60 = vld [vmem:[%s5914_s0 + $0x90] sm:$0xf]  ;;  %v3414_v62 = vld [vmem:[%s5914_s0 + $0x94] sm:$0xf]  ;;  %v2848_v63 = vld [vmem:[%s5914_s0 + $0x98] sm:$0xf0]  ;;  %v2671_v0 = vor.u32 %v3383_v57, %v2670_v56  ;;  %v2675_v1 = vor.u32 %v3382_v58, %v2672_v59 }
  0x15   :  { %615 = vmatpush.bf16.msra.mxu3 %v3439_v19  ;;  %v2847_v2 = vor.u32 %v3415_v61, %v2846_v60  ;;  %v2851_v3 = vor.u32 %v3414_v62, %v2848_v63  ;;  %v3496_v4 = vld [vmem:[%s5913_s1 + $0x1a0] sm:$0xff]  ;;  %v3385_v9 = vld [vmem:[%s5914_s0 + $0x24] sm:$0xf0]  ;;  %v2680_v11 = vld [vmem:[%s5914_s0 + $0x28] sm:$0xf0] }
  0x16   :  { %243 = vmatpush.bf16.msra.mxu0 %v3398_v20  ;;  %v3504_v5 = vld [vmem:[%s5913_s1 + $0x1e0] sm:$0xff]  ;;  %v3417_v13 = vld [vmem:[%s5914_s0 + $0xa4] sm:$0xf0]  ;;  %v2856_v15 = vld [vmem:[%s5914_s0 + $0xa8] sm:$0xf0] }
  0x17   :  { %292 = vmatpush.bf16.msra.mxu1 %v3406_v21  ;;  %v3464_v6 = vld [vmem:[%s5913_s1 + $0x120] sm:$0xff]  ;;  %v3495_v20 = vld [vmem:[%s5913_s1 + $0x198] sm:$0xff]  ;;  %v3494_v36 = vld [vmem:[%s5913_s1 + $0x190] sm:$0xff] }
  0x18   :  { %567 = vmatpush.bf16.msra.mxu2 %v3430_v22  ;;  %v3472_v7 = vld [vmem:[%s5913_s1 + $0x160] sm:$0xff]  ;;  %v3503_v21 = vld [vmem:[%s5913_s1 + $0x1d8] sm:$0xff]  ;;  %v3502_v37 = vld [vmem:[%s5913_s1 + $0x1d0] sm:$0xff] }
  0x19   :  { %616 = vmatpush.bf16.msra.mxu3 %v3438_v23  ;;  %v2678_v8 = vld [vmem:[%s5914_s0 + $0x20] sm:$0xf]  ;;  %v3384_v10 = vld [vmem:[%s5914_s0 + $0x24] sm:$0xf]  ;;  %v3463_v22 = vld [vmem:[%s5913_s1 + $0x118] sm:$0xff] }
  0x1a   :  { %244 = vmatpush.bf16.msra.mxu0 %v3397_v24  ;;  %v2854_v12 = vld [vmem:[%s5914_s0 + $0xa0] sm:$0xf]  ;;  %v3416_v14 = vld [vmem:[%s5914_s0 + $0xa4] sm:$0xf]  ;;  %v2679_v16 = vor.u32 %v3385_v9, %v2678_v8  ;;  %v2683_v17 = vor.u32 %v3384_v10, %v2680_v11  ;;  %v3471_v23 = vld [vmem:[%s5913_s1 + $0x158] sm:$0xff] }
  0x1b   :  { %293 = vmatpush.bf16.msra.mxu1 %v3405_v25  ;;  %v2855_v18 = vor.u32 %v3417_v13, %v2854_v12  ;;  %v2859_v19 = vor.u32 %v3416_v14, %v2856_v15  ;;  %v2686_v24 = vld [vmem:[%s5914_s0 + $0x30] sm:$0xf]  ;;  %v3387_v25 = vld [vmem:[%s5914_s0 + $0x34] sm:$0xf0]  ;;  %v3390_v58 = vld [vmem:[%s5914_s0 + $0x54] sm:$0xf] }
  0x1c   :  { %568 = vmatpush.bf16.msra.mxu2 %v3429_v26  ;;  %v3386_v26 = vld [vmem:[%s5914_s0 + $0x34] sm:$0xf]  ;;  %v2687_v32 = vor.u32 %v3387_v25, %v2686_v24  ;;  %v2702_v56 = vld [vmem:[%s5914_s0 + $0x50] sm:$0xf]  ;;  %v3391_v57 = vld [vmem:[%s5914_s0 + $0x54] sm:$0xf0] }
  0x1d   :  { %617 = vmatpush.bf16.msra.mxu3 %v3437_v27  ;;  %v2688_v27 = vld [vmem:[%s5914_s0 + $0x38] sm:$0xf0]  ;;  %v3462_v38 = vld [vmem:[%s5913_s1 + $0x110] sm:$0xff]  ;;  %v3423_v61 = vld [vmem:[%s5914_s0 + $0xd4] sm:$0xf0] }
  0x1e   :  { %245 = vmatpush.bf16.msra.mxu0 %v3396_v28  ;;  %v2862_v28 = vld [vmem:[%s5914_s0 + $0xb0] sm:$0xf]  ;;  %v2691_v33 = vor.u32 %v3386_v26, %v2688_v27  ;;  %v2704_v59 = vld [vmem:[%s5914_s0 + $0x58] sm:$0xf0]  ;;  %v3422_v62 = vld [vmem:[%s5914_s0 + $0xd4] sm:$0xf] }
  0x1f   :  { %294 = vmatpush.bf16.msra.mxu1 %v3404_v29  ;;  %v3419_v29 = vld [vmem:[%s5914_s0 + $0xb4] sm:$0xf0]  ;;  %v3470_v39 = vld [vmem:[%s5913_s1 + $0x150] sm:$0xff]  ;;  %v2880_v63 = vld [vmem:[%s5914_s0 + $0xd8] sm:$0xf0] }
  0x20   :  { %569 = vmatpush.bf16.msra.mxu2 %v3428_v30  ;;  %v3418_v30 = vld [vmem:[%s5914_s0 + $0xb4] sm:$0xf]  ;;  %v2863_v34 = vor.u32 %v3419_v29, %v2862_v28  ;;  %v2878_v60 = vld [vmem:[%s5914_s0 + $0xd0] sm:$0xf]  ;;  %v2710_v8 = vld [vmem:[%s5914_s0 + $0x60] sm:$0xf] }
  0x21   :  { %618 = vmatpush.bf16.msra.mxu3 %v3436_v31  ;;  %246 = vmatmul.bf16.vlgmr.msra.gmra.mxu0 %v2663_v42  ;;  %v2864_v31 = vld [vmem:[%s5914_s0 + $0xb8] sm:$0xf0]  ;;  %v3388_v42 = vld [vmem:[%s5914_s0 + $0x44] sm:$0xf]  ;;  %v3393_v9 = vld [vmem:[%s5914_s0 + $0x64] sm:$0xf0] }
  0x22   :  { %295 = vmatmul.bf16.vlgmr.msra.gmra.mxu1 %v2667_v43  ;;  %886 = vmatpush.bf16.msrb.mxu0 %v3467_v46  ;;  %v2867_v35 = vor.u32 %v3418_v30, %v2864_v31  ;;  %v2696_v43 = vld [vmem:[%s5914_s0 + $0x48] sm:$0xf0]  ;;  %v3420_v46 = vld [vmem:[%s5914_s0 + $0xc4] sm:$0xf]  ;;  %v2886_v12 = vld [vmem:[%s5914_s0 + $0xe0] sm:$0xf] }
  0x23   :  { %570 = vmatmul.bf16.vlgmr.msra.gmra.mxu2 %v2839_v44  ;;  %935 = vmatpush.bf16.msrb.mxu1 %v3475_v47  ;;  %v2870_v44 = vld [vmem:[%s5914_s0 + $0xc0] sm:$0xf]  ;;  %v2872_v47 = vld [vmem:[%s5914_s0 + $0xc8] sm:$0xf0]  ;;  %v3392_v10 = vld [vmem:[%s5914_s0 + $0x64] sm:$0xf] }
  0x24   :  { %1210 = vmatpush.bf16.msrb.mxu2 %v3499_v40  ;;  %619 = vmatmul.bf16.vlgmr.msra.gmra.mxu3 %v2843_v45  ;;  %v2694_v40 = vld [vmem:[%s5914_s0 + $0x40] sm:$0xf]  ;;  %v3421_v45 = vld [vmem:[%s5914_s0 + $0xc4] sm:$0xf0]  ;;  %v2712_v11 = vld [vmem:[%s5914_s0 + $0x68] sm:$0xf0] }
  0x25   :  { %1259 = vmatpush.bf16.msrb.mxu3 %v3507_v41  ;;  %v3389_v41 = vld [vmem:[%s5914_s0 + $0x44] sm:$0xf0]  ;;  %v3424_v14 = vld [vmem:[%s5914_s0 + $0xe4] sm:$0xf]  ;;  %v2888_v15 = vld [vmem:[%s5914_s0 + $0xe8] sm:$0xf0] }
  0x26   :  { %887 = vmatpush.bf16.msrb.mxu0 %v3466_v50  ;;  %v2871_v50 = vor.u32 %v3421_v45, %v2870_v44  ;;  %v3425_v13 = vld [vmem:[%s5914_s0 + $0xe4] sm:$0xf0]  ;;  %v2894_v24 = vld [vmem:[%s5914_s0 + $0xf0] sm:$0xf]  ;;  %v3427_v25 = vld [vmem:[%s5914_s0 + $0xf4] sm:$0xf0] }
  0x27   :  { %936 = vmatpush.bf16.msrb.mxu1 %v3474_v51  ;;  %v2875_v51 = vor.u32 %v3420_v46, %v2872_v47  ;;  %v3426_v26 = vld [vmem:[%s5914_s0 + $0xf4] sm:$0xf]  ;;  %v2896_v27 = vld [vmem:[%s5914_s0 + $0xf8] sm:$0xf0]  ;;  %v2895_v30 = vor.u32 %v3427_v25, %v2894_v24 }
  0x28   :  { %1211 = vmatpush.bf16.msrb.mxu2 %v3498_v48  ;;  %v2695_v48 = vor.u32 %v3389_v41, %v2694_v40  ;;  %v2899_v31 = vor.u32 %v3426_v26, %v2896_v27  ;;  %v4199_v40 = vld [vmem:[%s5915_s2] ss:$0 sm:$0xff]  ;;  %v4250_v27 = vld [vmem:[%s5914_s0 + $0x124] sm:$0xf] }
  0x29   :  { %1260 = vmatpush.bf16.msrb.mxu3 %v3506_v49  ;;  %v2699_v49 = vor.u32 %v3388_v42, %v2696_v43 }
  0x2a   :  { %888 = vmatpush.bf16.msrb.mxu0 %v3465_v54  ;;  %v3461_v54 = vld [vmem:[%s5913_s1 + $0x108] sm:$0xff] }
  0x2b   :  { %937 = vmatpush.bf16.msrb.mxu1 %v3473_v55  ;;  %v3469_v55 = vld [vmem:[%s5913_s1 + $0x148] sm:$0xff] }
  0x2c   :  { %1212 = vmatpush.bf16.msrb.mxu2 %v3497_v52  ;;  %v3493_v52 = vld [vmem:[%s5913_s1 + $0x188] sm:$0xff] }
  0x2d   :  { %1261 = vmatpush.bf16.msrb.mxu3 %v3505_v53  ;;  %v3501_v53 = vld [vmem:[%s5913_s1 + $0x1c8] sm:$0xff] }
  0x2e   :  { %889 = vmatpush.bf16.msrb.mxu0 %v3464_v6  ;;  %v3460_v6 = vld [vmem:[%s5913_s1 + $0x100] sm:$0xff] }
  0x2f   :  { %938 = vmatpush.bf16.msrb.mxu1 %v3472_v7  ;;  %v3468_v7 = vld [vmem:[%s5913_s1 + $0x140] sm:$0xff] }
  0x30   :  { %1213 = vmatpush.bf16.msrb.mxu2 %v3496_v4  ;;  %v3492_v4 = vld [vmem:[%s5913_s1 + $0x180] sm:$0xff] }
  0x31   :  { %251 = vmatmul.bf16.gmra.mxu0 %v2671_v0  ;;  %1262 = vmatpush.bf16.msrb.mxu3 %v3504_v5  ;;  %v2703_v0 = vor.u32 %v3391_v57, %v2702_v56  ;;  %v3500_v5 = vld [vmem:[%s5913_s1 + $0x1c0] sm:$0xff]  ;;  %v3022_v57 = vld [vmem:[%s5914_s0 + $0x110] sm:$0xf] }
  0x32   :  { %300 = vmatmul.bf16.gmra.mxu1 %v2675_v1  ;;  %890 = vmatpush.bf16.msrb.mxu0 %v3463_v22  ;;  %v2707_v1 = vor.u32 %v3390_v58, %v2704_v59  ;;  %v3394_v22 = vld [vmem:[%s5914_s0 + $0x74] sm:$0xf]  ;;  %v3447_v59 = vld [vmem:[%s5914_s0 + $0x114] sm:$0xf0] }
  0x33   :  { %575 = vmatmul.bf16.gmra.mxu2 %v2847_v2  ;;  %939 = vmatpush.bf16.msrb.mxu1 %v3471_v23  ;;  %v2879_v2 = vor.u32 %v3423_v61, %v2878_v60  ;;  %v2720_v23 = vld [vmem:[%s5914_s0 + $0x78] sm:$0xf0]  ;;  %v3446_v60 = vld [vmem:[%s5914_s0 + $0x114] sm:$0xf] }
  0x34   :  { %624 = vmatmul.bf16.gmra.mxu3 %v2851_v3  ;;  %1214 = vmatpush.bf16.msrb.mxu2 %v3495_v20  ;;  %v2883_v3 = vor.u32 %v3422_v62, %v2880_v63  ;;  %v2718_v20 = vld [vmem:[%s5914_s0 + $0x70] sm:$0xf]  ;;  %v2723_v29 = vor.u32 %v3394_v22, %v2720_v23  ;;  %v3024_v61 = vld [vmem:[%s5914_s0 + $0x118] sm:$0xf0]  ;;  %v4243_v23 = vld [vmem:[%s5914_s0 + $0x124] sm:$0xf0] }
  0x35   :  { %1263 = vmatpush.bf16.msrb.mxu3 %v3503_v21  ;;  %v3395_v21 = vld [vmem:[%s5914_s0 + $0x74] sm:$0xf0]  ;;  %v3198_v63 = vld [vmem:[%s5914_s0 + $0x190] sm:$0xf] }
  0x36   :  { %891 = vmatpush.bf16.msrb.mxu0 %v3462_v38  ;;  %v2719_v28 = vor.u32 %v3395_v21, %v2718_v20  ;;  %v3476_v38 = vld [vmem:[%s5914_s0 + $0x184] sm:$0xf] }
  0x37   :  { %940 = vmatpush.bf16.msrb.mxu1 %v3470_v39  ;;  %v3192_v39 = vld [vmem:[%s5914_s0 + $0x188] sm:$0xf0] }
  0x38   :  { %1215 = vmatpush.bf16.msrb.mxu2 %v3494_v36  ;;  %v3190_v36 = vld [vmem:[%s5914_s0 + $0x180] sm:$0xf]  ;;  %v3195_v46 = vor.u32 %v3476_v38, %v3192_v39 }
  0x39   :  { %1264 = vmatpush.bf16.msrb.mxu3 %v3502_v37  ;;  %v3477_v37 = vld [vmem:[%s5914_s0 + $0x184] sm:$0xf0] }
  0x3a   :  { %892 = vmatpush.bf16.msrb.mxu0 %v3461_v54  ;;  %v3191_v45 = vor.u32 %v3477_v37, %v3190_v36 }
  0x3b   :  { %941 = vmatpush.bf16.msrb.mxu1 %v3469_v55 }
  0x3c   :  { %1216 = vmatpush.bf16.msrb.mxu2 %v3493_v52 }
  0x3d   :  { %1265 = vmatpush.bf16.msrb.mxu3 %v3501_v53 }
  0x3e   :  { %893 = vmatpush.bf16.msrb.mxu0 %v3460_v6 }
  0x3f   :  { %942 = vmatpush.bf16.msrb.mxu1 %v3468_v7 }
  0x40   :  { %1217 = vmatpush.bf16.msrb.mxu2 %v3492_v4  ;;  %v3200_v4 = vld [vmem:[%s5914_s0 + $0x198] sm:$0xf0] }
  0x41   :  { %256 = vmatmul.bf16.gmra.mxu0 %v2679_v16  ;;  %1266 = vmatpush.bf16.msrb.mxu3 %v3500_v5  ;;  %v2711_v16 = vor.u32 %v3393_v9, %v2710_v8  ;;  %v3023_v8 = vor.u32 %v3447_v59, %v3022_v57  ;;  %v3027_v9 = vor.u32 %v3446_v60, %v3024_v61 }
  0x42   :  { %305 = vmatmul.bf16.gmra.mxu1 %v2683_v17  ;;  %v2715_v17 = vor.u32 %v3392_v10, %v2712_v11 }
  0x43   :  { %580 = vmatmul.bf16.gmra.mxu2 %v2855_v18  ;;  %v2887_v18 = vor.u32 %v3425_v13, %v2886_v12 }
  0x44   :  { %629 = vmatmul.bf16.gmra.mxu3 %v2859_v19  ;;  %v2891_v19 = vor.u32 %v3424_v14, %v2888_v15 }
  0x51   :  { %261 = vmatmul.bf16.gmra.mxu0 %v2687_v32  ;;  %v3014_v32 = vld [vmem:[%s5914_s0 + $0x100] sm:$0xf] }
  0x52   :  { %310 = vmatmul.bf16.gmra.mxu1 %v2691_v33  ;;  %v3445_v33 = vld [vmem:[%s5914_s0 + $0x104] sm:$0xf0] }
  0x53   :  { %585 = vmatmul.bf16.gmra.mxu2 %v2863_v34  ;;  %v3444_v34 = vld [vmem:[%s5914_s0 + $0x104] sm:$0xf]  ;;  %v3015_v41 = vor.u32 %v3445_v33, %v3014_v32  ;;  %v4262_v32 = vld [vmem:[%s5914_s0 + $0x1a0] sm:$0xf]  ;;  %v4267_v33 = vld [vmem:[%s5914_s0 + $0x1a4] sm:$0xf0] }
  0x54   :  { %634 = vmatmul.bf16.gmra.mxu3 %v2867_v35  ;;  %v3016_v35 = vld [vmem:[%s5914_s0 + $0x108] sm:$0xf0] }
  0x55   :  { %v3019_v42 = vor.u32 %v3444_v34, %v3016_v35 }
  0x61   :  { %266 = vmatmul.bf16.gmra.mxu0 %v2695_v48 }
  0x62   :  { %315 = vmatmul.bf16.gmra.mxu1 %v2699_v49 }
  0x63   :  { %590 = vmatmul.bf16.gmra.mxu2 %v2871_v50 }
  0x64   :  { %639 = vmatmul.bf16.gmra.mxu3 %v2875_v51 }
  0x71   :  { %271 = vmatmul.bf16.gmra.mxu0 %v2703_v0  ;;  %v3479_v0 = vld [vmem:[%s5914_s0 + $0x194] sm:$0xf0] }
  0x72   :  { %320 = vmatmul.bf16.gmra.mxu1 %v2707_v1  ;;  %v3199_v12 = vor.u32 %v3479_v0, %v3198_v63 }
  0x73   :  { %595 = vmatmul.bf16.gmra.mxu2 %v2879_v2 }
  0x74   :  { %644 = vmatmul.bf16.gmra.mxu3 %v2883_v3  ;;  %v3478_v3 = vld [vmem:[%s5914_s0 + $0x194] sm:$0xf] }
  0x75   :  { %v3203_v13 = vor.u32 %v3478_v3, %v3200_v4 }
  0x81   :  { %276 = vmatmul.bf16.gmra.mxu0 %v2711_v16 }
  0x82   :  { %325 = vmatmul.bf16.gmra.mxu1 %v2715_v17 }
  0x83   :  { %600 = vmatmul.bf16.gmra.mxu2 %v2887_v18 }
  0x84   :  { %649 = vmatmul.bf16.gmra.mxu3 %v2891_v19  ;;  %v4236_v19 = vld [vmem:[%s5914_s0 + $0x120] sm:$0xf] }
  0x85   :  { %v3031_v39 = vor.u32 %v4243_v23, %v4236_v19  ;;  %v4348_v19 = vld [vmem:[%s5914_s0 + $0x138] sm:$0xf0] }
  0x91   :  { %281 = vmatmul.bf16.gmra.mxu0 %v2719_v28 }
  0x92   :  { %330 = vmatmul.bf16.gmra.mxu1 %v2723_v29 }
  0x93   :  { %605 = vmatmul.bf16.gmra.mxu2 %v2895_v30 }
  0x94   :  { %654 = vmatmul.bf16.gmra.mxu3 %v2899_v31  ;;  %v4257_v31 = vld [vmem:[%s5914_s0 + $0x128] sm:$0xf0] }
  0x9e   :  { %v247_v43 = vpop.f32.mrf.mxu0 }
  0x9f   :  { %v296_v44 = vpop.f32.mrf.mxu1 }
  0xa0   :  { %v297_v47 = vadd.f32 %v296_v44, %v247_v43  ;;  %v3035_v44 = vor.u32 %v4250_v27, %v4257_v31 }
  0xa1   :  { %894 = vmatmul.bf16.vlgmr.msrb.gmra.mxu0 %v3015_v41  ;;  %v4277_v41 = vld [vmem:[%s5914_s0 + $0x1a4] sm:$0xf] }
  0xa2   :  { %v1312_v48 = vadd.f32 %v4199_v40, %v297_v47  ;;  %943 = vmatmul.bf16.vlgmr.msrb.gmra.mxu1 %v3019_v42  ;;  %v4282_v42 = vld [vmem:[%s5914_s0 + $0x1a8] sm:$0xf0] }
  0xa3   :  { %1218 = vmatmul.bf16.vlgmr.msrb.gmra.mxu2 %v3191_v45  ;;  %v3207_v45 = vor.u32 %v4267_v33, %v4262_v32 }
  0xa4   :  { %1267 = vmatmul.bf16.vlgmr.msrb.gmra.mxu3 %v3195_v46  ;;  %v3316_v49 = vmul.f32 -1.442695, %v1312_v48 }
  0xa6   :  { %3509 = vpow2.f32 %v3316_v49  ;;  %v571_v50 = vpop.f32.mrf.mxu2  ;;  %v249_v53 = vpop.f32.mrf.mxu0 }
  0xa7   :  { %v620_v51 = vpop.f32.mrf.mxu3  ;;  %v298_v54 = vpop.f32.mrf.mxu1 }
  0xa8   :  { %v621_v52 = vadd.f32 %v620_v51, %v571_v50  ;;  %v299_v55 = vadd.f32 %v298_v54, %v249_v53  ;;  %v3211_v51 = vor.u32 %v4277_v41, %v4282_v42 }
  0xaa   :  { %v1328_v56 = vadd.f32 %v4199_v40, %v621_v52  ;;  %v1313_v58 = vadd.f32 %v4199_v40, %v299_v55 }
  0xac   :  { %v3332_v62 = vmul.f32 -1.442695, %v1328_v56  ;;  %v3510_v1 = vpop.eup %3509  ;;  %v3317_v2 = vmul.f32 -1.442695, %v1313_v58 }
  0xad   :  { %v4228_v5 = vadd.f32 1.0, %v3510_v1 }
  0xae   :  { %3511 = vpow2.f32 %v3332_v62  ;;  %v573_v6 = vpop.f32.mrf.mxu2  ;;  %v252_v10 = vpop.f32.mrf.mxu0 }
  0xaf   :  { %3513 = vpow2.f32 %v3317_v2  ;;  %v622_v7 = vpop.f32.mrf.mxu3  ;;  %v301_v11 = vpop.f32.mrf.mxu1  ;;  %v1641_v34 = vand.u32 2147483647, %v4228_v5  ;;  %v1643_v35 = vand.u32 2147483648, %v4228_v5  ;;  %vm1637_vm0 = vweird.f32 %v4228_v5 }
  0xb0   :  { %3515 = vrcp.f32 %v4228_v5  ;;  %v623_v14 = vadd.f32 %v622_v7, %v573_v6  ;;  %v302_v15 = vadd.f32 %v301_v11, %v252_v10 }
  0xb1   :  { %899 = vmatmul.bf16.gmra.mxu0 %v3023_v8  ;;  %vm4289_vm2 = vcmp.eq.f32.partialorder %v1641_v34, 8.507059e+37  ;;  %v1644_v49 = vor.u32 1.1754944e-38, %v1643_v35 }
  0xb2   :  { %v1329_v16 = vadd.f32 %v4199_v40, %v623_v14  ;;  %v1314_v17 = vadd.f32 %v4199_v40, %v302_v15  ;;  %948 = vmatmul.bf16.gmra.mxu1 %v3027_v9 }
  0xb3   :  { %1223 = vmatmul.bf16.gmra.mxu2 %v3199_v12 }
  0xb4   :  { %v3512_v18 = vpop.eup %3511  ;;  %1272 = vmatmul.bf16.gmra.mxu3 %v3203_v13  ;;  %v3333_v22 = vmul.f32 -1.442695, %v1329_v16  ;;  %v3318_v26 = vmul.f32 -1.442695, %v1314_v17  ;;  %v4322_v13 = vld [vmem:[%s5914_s0 + $0x130] sm:$0xf] }
  0xb5   :  { %v3514_v20 = vpop.eup %3513  ;;  %v4238_v21 = vadd.f32 1.0, %v3512_v18  ;;  %v4334_v16 = vld [vmem:[%s5914_s0 + $0x134] sm:$0xf0]  ;;  %v4339_v17 = vld [vmem:[%s5914_s0 + $0x134] sm:$0xf] }
  0xb6   :  { %v3516_v24 = vpop.eup %3515  ;;  %v4245_v25 = vadd.f32 1.0, %v3514_v20  ;;  %v576_v29 = vpop.f32.mrf.mxu2  ;;  %v4353_v20 = vld [vmem:[%s5914_s0 + $0x1b0] sm:$0xf]  ;;  %v3039_v31 = vor.u32 %v4334_v16, %v4322_v13  ;;  %v3043_v35 = vor.u32 %v4339_v17, %v4348_v19 }
  0xb7   :  { %v1633_v28 = vmul.f32 %v3516_v24, %v4228_v5  ;;  %3517 = vrcp.f32 %v4238_v21  ;;  %v625_v30 = vpop.f32.mrf.mxu3  ;;  %v254_v36 = vpop.f32.mrf.mxu0  ;;  %vm1638_vm1 = vweird.f32 %v3516_v24  ;;  %vm1877_vm3 = vweird.f32 %v4238_v21 }
  0xb8   :  { %3519 = vrcp.f32 %v4245_v25  ;;  %v303_v37 = vpop.f32.mrf.mxu1  ;;  %v626_v43 = vadd.f32 %v625_v30, %v576_v29  ;;  %v1881_v54 = vand.u32 2147483647, %v4238_v21  ;;  %vm1639_vm4 = vmor %vm1637_vm0, %vm1638_vm1  ;;  %v1883_v58 = vand.u32 2147483648, %v4238_v21 }
  0xb9   :  { %v1634_v38 = vsub.f32 1.0, %v1633_v28  ;;  %3521 = vpow2.f32 %v3333_v22  ;;  %v304_v47 = vadd.f32 %v303_v37, %v254_v36  ;;  %v1656_v59 = vand.u32 2147483647, %v4245_v25  ;;  %v4358_v22 = vld [vmem:[%s5914_s0 + $0x1b4] sm:$0xf0] }
  0xba   :  { %3523 = vpow2.f32 %v3318_v26  ;;  %v1330_v50 = vadd.f32 %v4199_v40, %v626_v43  ;;  %v1658_v0 = vand.u32 2147483648, %v4245_v25  ;;  %vm4326_vm6 = vcmp.eq.f32.partialorder %v1881_v54, 8.507059e+37 }
  0xbb   :  { %v1635_v46 = vmul.f32 %v3516_v24, %v1634_v38  ;;  %v1315_v55 = vadd.f32 %v4199_v40, %v304_v47  ;;  %vm1652_vm7 = vweird.f32 %v4245_v25  ;;  %vm4361_vm9 = vcmp.eq.f32.partialorder %v1656_v59, 8.507059e+37 }
  0xbc   :  { %v3334_v60 = vmul.f32 -1.442695, %v1330_v50  ;;  %v1659_v27 = vor.u32 1.1754944e-38, %v1658_v0  ;;  %v3215_v36 = vor.u32 %v4358_v22, %v4353_v20 }
  0xbd   :  { %v4296_v52 = vpop.eup %3517  ;;  %v1636_v53 = vadd.f32 %v3516_v24, %v1635_v46  ;;  %v3319_v1 = vmul.f32 -1.442695, %v1315_v55 }
  0xbe   :  { %v4301_v56 = vpop.eup %3519  ;;  %v1873_v57 = vmul.f32 %v4296_v52, %v4238_v21  ;;  %v578_v2 = vpop.f32.mrf.mxu2  ;;  %3525 = vpow2.f32 %v3334_v60  ;;  %vm1878_vm5 = vweird.f32 %v4296_v52 }
  0xbf   :  { %v3522_v61 = vpop.eup %3521  ;;  %v1640_v62 = vsel %vm1639_vm4, %v3516_v24, %v1636_v53  ;;  %v1648_v63 = vmul.f32 %v4301_v56, %v4245_v25  ;;  %v627_v3 = vpop.f32.mrf.mxu3  ;;  %3527 = vpow2.f32 %v3319_v1  ;;  %vm1653_vm8 = vweird.f32 %v4301_v56  ;;  %vm1879_vm10 = vmor %vm1877_vm3, %vm1878_vm5 }
  0xc0   :  { %v3524_v4 = vpop.eup %3523  ;;  %v1645_v5 = vsel %vm4289_vm2, %v1644_v49, %v1640_v62  ;;  %v1874_v6 = vsub.f32 1.0, %v1873_v57  ;;  %v4312_v7 = vadd.f32 1.0, %v3522_v61  ;;  %v257_v8 = vpop.f32.mrf.mxu0  ;;  %v628_v12 = vadd.f32 %v627_v3, %v578_v2  ;;  %vm4378_vm11 = vmor %vm1652_vm7, %vm1653_vm8 }
  0xc1   :  { %v306_v9 = vpop.f32.mrf.mxu1  ;;  %2592 = vst [vmem:[%s5916_s3] sm:$0xff] %v1645_v5  ;;  %v1649_v10 = vsub.f32 1.0, %v1648_v63  ;;  %v4317_v11 = vadd.f32 1.0, %v3524_v4  ;;  %904 = vmatmul.bf16.gmra.mxu0 %v3031_v39  ;;  %v1884_v24 = vor.u32 1.1754944e-38, %v1883_v58 }
  0xc2   :  { %v1875_v14 = vmul.f32 %v4296_v52, %v1874_v6  ;;  %3529 = vrcp.f32 %v4312_v7  ;;  %953 = vmatmul.bf16.gmra.mxu1 %v3035_v44  ;;  %v1331_v29 = vadd.f32 %v4199_v40, %v628_v12  ;;  %v307_v30 = vadd.f32 %v306_v9, %v257_v8  ;;  %v4398_v44 = vld [vmem:[%s5914_s0 + $0x1b4] sm:$0xf] }
  0xc3   :  { %v1650_v18 = vmul.f32 %v4301_v56, %v1649_v10  ;;  %3531 = vrcp.f32 %v4317_v11  ;;  %1228 = vmatmul.bf16.gmra.mxu2 %v3207_v45  ;;  %v1896_v21 = vand.u32 2147483647, %v4312_v7  ;;  %v1898_v39 = vand.u32 2147483648, %v4312_v7  ;;  %v4403_v45 = vld [vmem:[%s5914_s0 + $0x1b8] sm:$0xf0] }
  0xc4   :  { %v1876_v23 = vadd.f32 %v4296_v52, %v1875_v14  ;;  %1277 = vmatmul.bf16.gmra.mxu3 %v3211_v51  ;;  %v3526_v32 = vpop.eup %3525  ;;  %v1671_v48 = vand.u32 2147483647, %v4317_v11  ;;  %v1673_v49 = vand.u32 2147483648, %v4317_v11  ;;  %v3335_v55 = vmul.f32 -1.442695, %v1331_v29 }
  0xc5   :  { %v1651_v28 = vadd.f32 %v4301_v56, %v1650_v18  ;;  %v3528_v37 = vpop.eup %3527  ;;  %v4393_v41 = vadd.f32 1.0, %v3526_v32  ;;  %vm1892_vm12 = vweird.f32 %v4312_v7  ;;  %v3219_v59 = vor.u32 %v4398_v44, %v4403_v45 }
  0xc6   :  { %v1880_v33 = vsel %vm1879_vm10, %v4296_v52, %v1876_v23  ;;  %v581_v42 = vpop.f32.mrf.mxu2  ;;  %v4412_v50 = vadd.f32 1.0, %v3528_v37  ;;  %vm4424_vm13 = vcmp.eq.f32.partialorder %v1896_v21, 8.507059e+37  ;;  %vm1667_vm14 = vweird.f32 %v4317_v11 }
  0xc7   :  { %v1885_v38 = vsel %vm4326_vm6, %v1884_v24, %v1880_v33  ;;  %v1655_v25 = vsel %vm4378_vm11, %v4301_v56, %v1651_v28  ;;  %v630_v43 = vpop.f32.mrf.mxu3  ;;  %3533 = vrcp.f32 %v4393_v41  ;;  %v1316_v56 = vadd.f32 %v4199_v40, %v307_v30 }
  0xc8   :  { %v3530_v46 = vpop.eup %3529  ;;  %2608 = vst [vmem:[%s5916_s3 + $0x80] sm:$0xff] %v1885_v38  ;;  %v1660_v47 = vsel %vm4361_vm9, %v1659_v27, %v1655_v25  ;;  %v259_v51 = vpop.f32.mrf.mxu0  ;;  %v631_v58 = vadd.f32 %v630_v43, %v581_v42  ;;  %3535 = vrcp.f32 %v4412_v50  ;;  %v1899_v62 = vor.u32 1.1754944e-38, %v1898_v39 }
  0xc9   :  { %v308_v52 = vpop.f32.mrf.mxu1  ;;  %v3532_v53 = vpop.eup %3531  ;;  %2593 = vst [vmem:[%s5916_s3 + $0x8] sm:$0xff] %v1660_v47  ;;  %v1888_v54 = vmul.f32 %v3530_v46, %v4312_v7  ;;  %vm4430_vm15 = vcmp.eq.f32.partialorder %v1671_v48, 8.507059e+37  ;;  %v1674_v1 = vor.u32 1.1754944e-38, %v1673_v49  ;;  %vm1893_vm0 = vweird.f32 %v3530_v46 }
  0xca   :  { %v1663_v57 = vmul.f32 %v3532_v53, %v4317_v11  ;;  %3537 = vpow2.f32 %v3335_v55  ;;  %v3320_v3 = vmul.f32 -1.442695, %v1316_v56  ;;  %vm1668_vm1 = vweird.f32 %v3532_v53  ;;  %vm1894_vm3 = vmor %vm1892_vm12, %vm1893_vm0 }
  0xcb   :  { %v1889_v60 = vsub.f32 1.0, %v1888_v54  ;;  %vm1907_vm2 = vweird.f32 %v4393_v41  ;;  %v1332_v5 = vadd.f32 %v4199_v40, %v631_v58  ;;  %v309_v6 = vadd.f32 %v308_v52, %v259_v51  ;;  %vm1669_vm5 = vmor %vm1667_vm14, %vm1668_vm1  ;;  %v4506_v54 = vld [vmem:[%s5914_s0 + $0x140] sm:$0xf]  ;;  %v3453_v58 = vld [vmem:[%s5914_s0 + $0x144] sm:$0xf0] }
  0xcc   :  { %v1664_v63 = vsub.f32 1.0, %v1663_v57  ;;  %v1911_v10 = vand.u32 2147483647, %v4393_v41  ;;  %v1913_v12 = vand.u32 2147483648, %v4393_v41  ;;  %3539 = vpow2.f32 %v3320_v3 }
  0xcd   :  { %v1890_v2 = vmul.f32 %v3530_v46, %v1889_v60  ;;  %v4436_v8 = vpop.eup %3533  ;;  %vm1682_vm4 = vweird.f32 %v4412_v50  ;;  %v3336_v24 = vmul.f32 -1.442695, %v1332_v5  ;;  %v1317_v30 = vadd.f32 %v4199_v40, %v309_v6 }
  0xce   :  { %v1665_v4 = vmul.f32 %v3532_v53, %v1664_v63  ;;  %v583_v14 = vpop.f32.mrf.mxu2  ;;  %v1903_v23 = vmul.f32 %v4436_v8, %v4393_v41  ;;  %v4446_v28 = vpop.eup %3535  ;;  %vm1908_vm6 = vweird.f32 %v4436_v8  ;;  %v1686_v16 = vand.u32 2147483647, %v4412_v50 }
  0xcf   :  { %v1891_v9 = vadd.f32 %v3530_v46, %v1890_v2  ;;  %v632_v15 = vpop.f32.mrf.mxu3  ;;  %v1678_v37 = vmul.f32 %v4446_v28, %v4412_v50  ;;  %3541 = vpow2.f32 %v3336_v24  ;;  %v3321_v25 = vmul.f32 -1.442695, %v1317_v30  ;;  %vm4489_vm8 = vmor %vm1907_vm2, %vm1908_vm6 }
  0xd0   :  { %v1666_v18 = vadd.f32 %v3532_v53, %v1665_v4  ;;  %v262_v26 = vpop.f32.mrf.mxu0  ;;  %v633_v7 = vadd.f32 %v632_v15, %v583_v14  ;;  %v1904_v21 = vsub.f32 1.0, %v1903_v23  ;;  %v3538_v38 = vpop.eup %3537  ;;  %v1688_v17 = vand.u32 2147483648, %v4412_v50 }
  0xd1   :  { %v311_v27 = vpop.f32.mrf.mxu1  ;;  %v1895_v29 = vsel %vm1894_vm3, %v3530_v46, %v1891_v9  ;;  %909 = vmatmul.bf16.gmra.mxu0 %v3039_v31  ;;  %v1679_v42 = vsub.f32 1.0, %v1678_v37  ;;  %v4472_v43 = vadd.f32 1.0, %v3538_v38  ;;  %3543 = vpow2.f32 %v3321_v25  ;;  %v3485_v37 = vld [vmem:[%s5914_s0 + $0x1c4] sm:$0xf0] }
  0xd2   :  { %v312_v32 = vadd.f32 %v311_v27, %v262_v26  ;;  %v1900_v33 = vsel %vm4424_vm13, %v1899_v62, %v1895_v29  ;;  %v1670_v34 = vsel %vm1669_vm5, %v3532_v53, %v1666_v18  ;;  %958 = vmatmul.bf16.gmra.mxu1 %v3043_v35  ;;  %v1905_v39 = vmul.f32 %v4436_v8, %v1904_v21  ;;  %v3540_v13 = vpop.eup %3539  ;;  %v3048_v62 = vld [vmem:[%s5914_s0 + $0x148] sm:$0xf0] }
  0xd3   :  { %2609 = vst [vmem:[%s5916_s3 + $0x88] sm:$0xff] %v1900_v33  ;;  %v1675_v11 = vsel %vm4430_vm15, %v1674_v1, %v1670_v34  ;;  %v1333_v44 = vadd.f32 %v4199_v40, %v633_v7  ;;  %1233 = vmatmul.bf16.gmra.mxu2 %v3215_v36  ;;  %v1680_v35 = vmul.f32 %v4446_v28, %v1679_v42  ;;  %vm1683_vm7 = vweird.f32 %v4446_v28 }
  0xd4   :  { %2594 = vst [vmem:[%s5916_s3 + $0x10] sm:$0xff] %v1675_v11  ;;  %1282 = vmatmul.bf16.gmra.mxu3 %v3219_v59  ;;  %v1318_v19 = vadd.f32 %v4199_v40, %v312_v32  ;;  %v1906_v31 = vadd.f32 %v4436_v8, %v1905_v39  ;;  %3545 = vrcp.f32 %v4472_v43  ;;  %vm1912_vm9 = vcmp.eq.f32.partialorder %v1911_v10, 8.507059e+37  ;;  %vm1684_vm10 = vmor %vm1682_vm4, %vm1683_vm7  ;;  %v3452_v59 = vld [vmem:[%s5914_s0 + $0x144] sm:$0xf] }
  0xd5   :  { %v1914_v22 = vor.u32 1.1754944e-38, %v1913_v12  ;;  %v4493_v36 = vadd.f32 1.0, %v3540_v13  ;;  %v3337_v45 = vmul.f32 -1.442695, %v1333_v44  ;;  %v1681_v49 = vadd.f32 %v4446_v28, %v1680_v35  ;;  %v3542_v55 = vpop.eup %3541 }
  0xd6   :  { %v586_v46 = vpop.f32.mrf.mxu2  ;;  %v1910_v48 = vsel %vm4489_vm8, %v4436_v8, %v1906_v31  ;;  %v3322_v51 = vmul.f32 -1.442695, %v1318_v19  ;;  %vm1687_vm11 = vcmp.eq.f32.partialorder %v1686_v16, 8.507059e+37  ;;  %v1689_v57 = vor.u32 1.1754944e-38, %v1688_v17 }
  0xd7   :  { %v635_v47 = vpop.f32.mrf.mxu3  ;;  %v1915_v56 = vsel %vm1912_vm9, %v1914_v22, %v1910_v48  ;;  %3547 = vrcp.f32 %v4493_v36  ;;  %v1685_v60 = vsel %vm1684_vm10, %v4446_v28, %v1681_v49  ;;  %v1926_v50 = vand.u32 2147483647, %v4472_v43  ;;  %v3544_v63 = vpop.eup %3543  ;;  %v3222_v28 = vld [vmem:[%s5914_s0 + $0x1c0] sm:$0xf]  ;;  %v3054_v49 = vld [vmem:[%s5914_s0 + $0x150] sm:$0xf] }
  0xd8   :  { %v636_v52 = vadd.f32 %v635_v47, %v586_v46  ;;  %v4499_v41 = vpop.f32.mrf.mxu0  ;;  %2610 = vst [vmem:[%s5916_s3 + $0x90] sm:$0xff] %v1915_v56  ;;  %v1928_v61 = vand.u32 2147483648, %v4472_v43  ;;  %v1690_v0 = vsel %vm1687_vm11, %v1689_v57, %v1685_v60  ;;  %v4528_v1 = vadd.f32 1.0, %v3542_v55 }
  0xd9   :  { %v4501_v53 = vpop.f32.mrf.mxu1  ;;  %3549 = vpow2.f32 %v3337_v45  ;;  %2595 = vst [vmem:[%s5916_s3 + $0x18] sm:$0xff] %v1690_v0  ;;  %v1701_v4 = vand.u32 2147483647, %v4493_v36  ;;  %v1703_v5 = vand.u32 2147483648, %v4493_v36  ;;  %v4538_v6 = vadd.f32 1.0, %v3544_v63 }
  0xda   :  { %v1334_v2 = vadd.f32 %v4199_v40, %v636_v52  ;;  %v4531_v3 = vpop.eup %3545  ;;  %3551 = vpow2.f32 %v3322_v51  ;;  %v3047_v9 = vor.u32 %v3453_v58, %v4506_v54  ;;  %v3051_v10 = vor.u32 %v3452_v59, %v3048_v62 }
  0xdb   :  { %v1918_v8 = vmul.f32 %v4531_v3, %v4472_v43  ;;  %3553 = vrcp.f32 %v4528_v1  ;;  %vm1922_vm12 = vweird.f32 %v4472_v43  ;;  %vm4545_vm13 = vcmp.eq.f32.partialorder %v1926_v50, 8.507059e+37 }
  0xdc   :  { %v1929_v14 = vor.u32 1.1754944e-38, %v1928_v61  ;;  %3555 = vrcp.f32 %v4538_v6  ;;  %vm1697_vm14 = vweird.f32 %v4493_v36  ;;  %v1943_v23 = vand.u32 2147483648, %v4528_v1 }
  0xdd   :  { %v4550_v15 = vpop.eup %3547  ;;  %v1919_v18 = vsub.f32 1.0, %v1918_v8  ;;  %v3338_v24 = vmul.f32 -1.442695, %v1334_v2  ;;  %vm4559_vm15 = vcmp.eq.f32.partialorder %v1701_v4, 8.507059e+37  ;;  %v1704_v7 = vor.u32 1.1754944e-38, %v1703_v5 }
  0xde   :  { %v588_v26 = vpop.f32.mrf.mxu2  ;;  %v1693_v29 = vmul.f32 %v4550_v15, %v4493_v36  ;;  %v1941_v32 = vand.u32 2147483647, %v4528_v1  ;;  %v1718_v33 = vand.u32 2147483648, %v4538_v6  ;;  %vm1923_vm0 = vweird.f32 %v4531_v3 }
  0xdf   :  { %v637_v27 = vpop.f32.mrf.mxu3  ;;  %v3550_v38 = vpop.eup %3549  ;;  %v1920_v11 = vmul.f32 %v4531_v3, %v1919_v18  ;;  %v1716_v25 = vand.u32 2147483647, %v4538_v6  ;;  %3557 = vpow2.f32 %v3338_v24  ;;  %vm1698_vm1 = vweird.f32 %v4550_v15  ;;  %vm1924_vm4 = vmor %vm1922_vm12, %vm1923_vm0 }
  0xe0   :  { %v267_v34 = vpop.f32.mrf.mxu0  ;;  %v3552_v39 = vpop.eup %3551  ;;  %v1694_v42 = vsub.f32 1.0, %v1693_v29  ;;  %vm1937_vm2 = vweird.f32 %v4528_v1  ;;  %v4573_v44 = vadd.f32 1.0, %v3550_v38  ;;  %v1944_v17 = vor.u32 1.1754944e-38, %v1943_v23  ;;  %vm1699_vm7 = vmor %vm1697_vm14, %vm1698_vm1 }
  0xe1   :  { %v316_v21 = vpop.f32.mrf.mxu1  ;;  %v4575_v13 = vpop.eup %3553  ;;  %v1921_v16 = vadd.f32 %v4531_v3, %v1920_v11  ;;  %vm1712_vm3 = vweird.f32 %v4538_v6  ;;  %v4579_v19 = vadd.f32 1.0, %v3552_v39  ;;  %914 = vmatmul.bf16.gmra.mxu0 %v3047_v9  ;;  %v3223_v31 = vor.u32 %v3485_v37, %v3222_v28  ;;  %v3484_v28 = vld [vmem:[%s5914_s0 + $0x1c4] sm:$0xf] }
  0xe2   :  { %963 = vmatmul.bf16.gmra.mxu1 %v3051_v10  ;;  %v3556_v35 = vpop.eup %3555  ;;  %v1695_v20 = vmul.f32 %v4550_v15, %v1694_v42  ;;  %v1933_v22 = vmul.f32 %v4575_v13, %v4528_v1  ;;  %vm4588_vm5 = vcmp.eq.f32.partialorder %v1941_v32, 8.507059e+37  ;;  %v1719_v46 = vor.u32 1.1754944e-38, %v1718_v33 }
  0xe3   :  { %3559 = vrcp.f32 %v4573_v44  ;;  %v1925_v47 = vsel %vm1924_vm4, %v4531_v3, %v1921_v16  ;;  %v1708_v48 = vmul.f32 %v3556_v35, %v4538_v6  ;;  %vm4595_vm6 = vcmp.eq.f32.partialorder %v1716_v25, 8.507059e+37  ;;  %1238 = vmatmul.bf16.gmra.mxu2 %v3223_v31  ;;  %v3224_v6 = vld [vmem:[%s5914_s0 + $0x1c8] sm:$0xf0] }
  0xe4   :  { %v314_v43 = vadd.f32 %v4501_v53, %v4499_v41  ;;  %v638_v51 = vadd.f32 %v637_v27, %v588_v26  ;;  %v1930_v52 = vsel %vm4545_vm13, %v1929_v14, %v1925_v47  ;;  %v1696_v54 = vadd.f32 %v4550_v15, %v1695_v20 }
  0xe5   :  { %v1934_v55 = vsub.f32 1.0, %v1933_v22  ;;  %v317_v56 = vadd.f32 %v316_v21, %v267_v34  ;;  %v3558_v57 = vpop.eup %3557  ;;  %2611 = vst [vmem:[%s5916_s3 + $0x98] sm:$0xff] %v1930_v52  ;;  %vm1938_vm8 = vweird.f32 %v4575_v13  ;;  %v1709_v41 = vsub.f32 1.0, %v1708_v48  ;;  %v3454_v52 = vld [vmem:[%s5914_s0 + $0x154] sm:$0xf] }
  0xe6   :  { %v1956_v53 = vand.u32 2147483647, %v4573_v44  ;;  %3561 = vrcp.f32 %v4579_v19  ;;  %v591_v58 = vpop.f32.mrf.mxu2  ;;  %v1700_v60 = vsel %vm1699_vm7, %v4550_v15, %v1696_v54  ;;  %vm1713_vm9 = vweird.f32 %v3556_v35  ;;  %vm1939_vm12 = vmor %vm1937_vm2, %vm1938_vm8  ;;  %v3056_v54 = vld [vmem:[%s5914_s0 + $0x158] sm:$0xf0] }
  0xe7   :  { %v640_v59 = vpop.f32.mrf.mxu3  ;;  %v1935_v50 = vmul.f32 %v4575_v13, %v1934_v55  ;;  %v1958_v61 = vand.u32 2147483648, %v4573_v44  ;;  %v1705_v36 = vsel %vm4559_vm15, %v1704_v7, %v1700_v60  ;;  %v1710_v0 = vmul.f32 %v3556_v35, %v1709_v41  ;;  %vm1714_vm14 = vmor %vm1712_vm3, %vm1713_vm9  ;;  %v3230_v60 = vld [vmem:[%s5914_s0 + $0x1d0] sm:$0xf] }
  0xe8   :  { %v269_v62 = vpop.f32.mrf.mxu0  ;;  %vm1952_vm10 = vweird.f32 %v4573_v44  ;;  %v1733_v2 = vand.u32 2147483648, %v4579_v19  ;;  %2596 = vst [vmem:[%s5916_s3 + $0x20] sm:$0xff] %v1705_v36  ;;  %vm1727_vm11 = vweird.f32 %v4579_v19  ;;  %v1731_v5 = vand.u32 2147483647, %v4579_v19 }
  0xe9   :  { %v318_v63 = vpop.f32.mrf.mxu1  ;;  %v4621_v3 = vpop.eup %3559  ;;  %v1936_v4 = vadd.f32 %v4575_v13, %v1935_v50  ;;  %v4629_v8 = vadd.f32 1.0, %v3558_v57  ;;  %v1711_v9 = vadd.f32 %v3556_v35, %v1710_v0  ;;  %vm4637_vm13 = vcmp.eq.f32.partialorder %v1956_v53, 8.507059e+37  ;;  %v3487_v50 = vld [vmem:[%s5914_s0 + $0x1d4] sm:$0xf0] }
  0xea   :  { %v1948_v10 = vmul.f32 %v4621_v3, %v4573_v44  ;;  %v1319_v14 = vadd.f32 %v4199_v40, %v314_v43  ;;  %vm1953_vm15 = vweird.f32 %v4621_v3  ;;  %v1959_v1 = vor.u32 1.1754944e-38, %v1958_v61  ;;  %v3455_v44 = vld [vmem:[%s5914_s0 + $0x154] sm:$0xf0] }
  0xeb   :  { %v1940_v15 = vsel %vm1939_vm12, %v4575_v13, %v1936_v4  ;;  %3563 = vrcp.f32 %v4629_v8  ;;  %v1715_v24 = vsel %vm1714_vm14, %v3556_v35, %v1711_v9  ;;  %v1734_v27 = vor.u32 1.1754944e-38, %v1733_v2  ;;  %vm1954_vm2 = vmor %vm1952_vm10, %vm1953_vm15 }
  0xec   :  { %v4648_v18 = vpop.eup %3561  ;;  %v1945_v23 = vsel %vm4588_vm5, %v1944_v17, %v1940_v15  ;;  %v1949_v26 = vsub.f32 1.0, %v1948_v10  ;;  %v1720_v29 = vsel %vm4595_vm6, %v1719_v46, %v1715_v24  ;;  %vm4665_vm0 = vcmp.eq.f32.partialorder %v1731_v5, 8.507059e+37 }
  0xed   :  { %2612 = vst [vmem:[%s5916_s3 + $0xa0] sm:$0xff] %v1945_v23  ;;  %v1723_v30 = vmul.f32 %v4648_v18, %v4579_v19  ;;  %v1971_v32 = vand.u32 2147483647, %v4629_v8  ;;  %v1973_v33 = vand.u32 2147483648, %v4629_v8  ;;  %vm1728_vm1 = vweird.f32 %v4648_v18 }
  0xee   :  { %2597 = vst [vmem:[%s5916_s3 + $0x28] sm:$0xff] %v1720_v29  ;;  %v1950_v34 = vmul.f32 %v4621_v3, %v1949_v26  ;;  %v3323_v21 = vmul.f32 -1.442695, %v1319_v14  ;;  %v1335_v37 = vadd.f32 %v4199_v40, %v638_v51  ;;  %v593_v38 = vpop.f32.mrf.mxu2  ;;  %v1320_v39 = vadd.f32 %v4199_v40, %v317_v56  ;;  %vm1729_vm4 = vmor %vm1727_vm11, %vm1728_vm1 }
  0xef   :  { %v642_v11 = vpop.f32.mrf.mxu3  ;;  %v1724_v25 = vsub.f32 1.0, %v1723_v30  ;;  %v3227_v42 = vor.u32 %v3484_v28, %v3224_v6  ;;  %v641_v13 = vadd.f32 %v640_v59, %v591_v58  ;;  %v319_v20 = vadd.f32 %v318_v63, %v269_v62  ;;  %v3486_v28 = vld [vmem:[%s5914_s0 + $0x1d4] sm:$0xf]  ;;  %v3232_v6 = vld [vmem:[%s5914_s0 + $0x1d8] sm:$0xf0] }
  0xf0   :  { %v272_v16 = vpop.f32.mrf.mxu0  ;;  %v1951_v31 = vadd.f32 %v4621_v3, %v1950_v34  ;;  %3565 = vpow2.f32 %v3323_v21  ;;  %v3339_v35 = vmul.f32 -1.442695, %v1335_v37  ;;  %v3324_v46 = vmul.f32 -1.442695, %v1320_v39 }
  0xf1   :  { %v321_v17 = vpop.f32.mrf.mxu1  ;;  %v4679_v22 = vpop.eup %3563  ;;  %v1725_v45 = vmul.f32 %v4648_v18, %v1724_v25  ;;  %1287 = vmatmul.bf16.gmra.mxu3 %v3227_v42  ;;  %v1336_v47 = vadd.f32 %v4199_v40, %v641_v13  ;;  %v643_v48 = vadd.f32 %v642_v11, %v593_v38  ;;  %v1321_v53 = vadd.f32 %v4199_v40, %v319_v20 }
  0xf2   :  { %v1955_v43 = vsel %vm1954_vm2, %v4621_v3, %v1951_v31  ;;  %v1963_v51 = vmul.f32 %v4679_v22, %v4629_v8  ;;  %vm1968_vm3 = vweird.f32 %v4679_v22  ;;  %3567 = vpow2.f32 %v3339_v35 }
  0xf3   :  { %v1960_v55 = vsel %vm4637_vm13, %v1959_v1, %v1955_v43  ;;  %v1726_v56 = vadd.f32 %v4648_v18, %v1725_v45  ;;  %3569 = vpow2.f32 %v3324_v46  ;;  %v3340_v57 = vmul.f32 -1.442695, %v1336_v47 }
  0xf4   :  { %2613 = vst [vmem:[%s5916_s3 + $0xa8] sm:$0xff] %v1960_v55  ;;  %v1964_v41 = vsub.f32 1.0, %v1963_v51  ;;  %v1337_v58 = vadd.f32 %v4199_v40, %v643_v48  ;;  %v322_v59 = vadd.f32 %v321_v17, %v272_v16  ;;  %v3055_v62 = vor.u32 %v3455_v44, %v3054_v49 }
  0xf5   :  { %v1730_v61 = vsel %vm1729_vm4, %v4648_v18, %v1726_v56  ;;  %3571 = vpow2.f32 %v3340_v57  ;;  %v3059_v19 = vor.u32 %v3454_v52, %v3056_v54  ;;  %v3325_v2 = vmul.f32 -1.442695, %v1321_v53 }
  0xf6   :  { %v3566_v63 = vpop.eup %3565  ;;  %v1735_v36 = vsel %vm4665_vm0, %v1734_v27, %v1730_v61  ;;  %v1965_v0 = vmul.f32 %v4679_v22, %v1964_v41  ;;  %v3341_v3 = vmul.f32 -1.442695, %v1337_v58  ;;  %v596_v4 = vpop.f32.mrf.mxu2  ;;  %v1322_v10 = vadd.f32 %v4199_v40, %v322_v59  ;;  %919 = vmatmul.bf16.gmra.mxu0 %v3055_v62  ;;  %v4810_v41 = vld [vmem:[%s5915_s2] ss:$0 sm:$0xff] }
  0xf7   :  { %v645_v5 = vpop.f32.mrf.mxu3  ;;  %2598 = vst [vmem:[%s5916_s3 + $0x30] sm:$0xff] %v1735_v36  ;;  %v4728_v9 = vadd.f32 1.0, %v3566_v63  ;;  %968 = vmatmul.bf16.gmra.mxu1 %v3059_v19  ;;  %v3231_v12 = vor.u32 %v3487_v50, %v3230_v60  ;;  %vm1967_vm5 = vweird.f32 %v4629_v8  ;;  %3573 = vpow2.f32 %v3325_v2 }
  0xf8   :  { %v4731_v14 = vpop.f32.mrf.mxu0  ;;  %v3568_v1 = vpop.eup %3567  ;;  %v1966_v18 = vadd.f32 %v4679_v22, %v1965_v0  ;;  %vm1969_vm6 = vmor %vm1967_vm5, %vm1968_vm3  ;;  %vm1972_vm7 = vcmp.eq.f32.partialorder %v1971_v32, 8.507059e+37  ;;  %v1974_v40 = vor.u32 1.1754944e-38, %v1973_v33  ;;  %v3326_v30 = vmul.f32 -1.442695, %v1322_v10 }
  0xf9   :  { %v4733_v15 = vpop.f32.mrf.mxu1  ;;  %v3570_v23 = vpop.eup %3569  ;;  %3575 = vrcp.f32 %v4728_v9  ;;  %1243 = vmatmul.bf16.gmra.mxu2 %v3231_v12  ;;  %v4745_v26 = vadd.f32 1.0, %v3568_v1  ;;  %v1746_v7 = vand.u32 2147483647, %v4728_v9  ;;  %v1748_v32 = vand.u32 2147483648, %v4728_v9 }
  0xfa   :  { %v1970_v24 = vsel %vm1969_vm6, %v4679_v22, %v1966_v18  ;;  %v4747_v27 = vadd.f32 1.0, %v3570_v23  ;;  %3577 = vpow2.f32 %v3341_v3  ;;  %v3235_v34 = vor.u32 %v3486_v28, %v3232_v6 }
  0xfb   :  { %v3572_v8 = vpop.eup %3571  ;;  %v1975_v29 = vsel %vm1972_vm7, %v1974_v40, %v1970_v24  ;;  %3579 = vrcp.f32 %v4745_v26  ;;  %v1988_v33 = vand.u32 2147483648, %v4745_v26  ;;  %vm1742_vm8 = vweird.f32 %v4728_v9 }
  0xfc   :  { %2614 = vst [vmem:[%s5916_s3 + $0xb0] sm:$0xff] %v1975_v29  ;;  %3581 = vrcp.f32 %v4747_v27  ;;  %v1763_v37 = vand.u32 2147483648, %v4747_v27  ;;  %v4764_v38 = vadd.f32 1.0, %v3572_v8  ;;  %v1986_v42 = vand.u32 2147483647, %v4745_v26 }
  0xfd   :  { %v3574_v21 = vpop.eup %3573  ;;  %3583 = vpow2.f32 %v3326_v30  ;;  %v646_v16 = vadd.f32 %v645_v5, %v596_v4  ;;  %vm4782_vm9 = vcmp.eq.f32.partialorder %v1746_v7, 8.507059e+37  ;;  %v1749_v45 = vor.u32 1.1754944e-38, %v1748_v32 }
  0xfe   :  { %v4766_v11 = vpop.f32.mrf.mxu2  ;;  %v4774_v13 = vadd.f32 1.0, %v3574_v21  ;;  %v1761_v46 = vand.u32 2147483647, %v4747_v27  ;;  %3585 = vrcp.f32 %v4764_v38  ;;  %vm1982_vm10 = vweird.f32 %v4745_v26 }
  0xff   :  { %v4768_v25 = vpop.f32.mrf.mxu3  ;;  %v4770_v39 = vpop.eup %3575  ;;  %v4789_v47 = vor.u32 1.1754944e-38, %v1988_v33  ;;  %vm1757_vm11 = vweird.f32 %v4747_v27  ;;  %v4793_v43 = vor.u32 1.1754944e-38, %v1763_v37  ;;  %v2003_v51 = vand.u32 2147483648, %v4764_v38 }
 0x100   :  { %v4776_v17 = vpop.f32.mrf.mxu0  ;;  %v3578_v35 = vpop.eup %3577  ;;  %v1738_v20 = vmul.f32 %v4770_v39, %v4728_v9  ;;  %3587 = vrcp.f32 %v4774_v13  ;;  %vm4801_vm12 = vcmp.eq.f32.partialorder %v1986_v42, 8.507059e+37  ;;  %v2001_v56 = vand.u32 2147483647, %v4764_v38 }
 0x101   :  { %v4778_v31 = vpop.f32.mrf.mxu1  ;;  %1292 = vmatmul.bf16.gmra.mxu3 %v3235_v34  ;;  %v3580_v48 = vpop.eup %3579  ;;  %v4796_v44 = vadd.f32 1.0, %v3578_v35  ;;  %v1778_v57 = vand.u32 2147483648, %v4774_v13  ;;  %v4813_v53 = vadd.f32 %v4810_v41, %v646_v16  ;;  %vm1743_vm13 = vweird.f32 %v4770_v39 }
 0x102   :  { %v1739_v49 = vsub.f32 1.0, %v1738_v20  ;;  %v4798_v52 = vpop.eup %3581  ;;  %v1978_v54 = vmul.f32 %v3580_v48, %v4745_v26  ;;  %vm4819_vm14 = vcmp.eq.f32.partialorder %v1761_v46, 8.507059e+37  ;;  %v1776_v61 = vand.u32 2147483647, %v4774_v13  ;;  %vm1744_vm3 = vmor %vm1742_vm8, %vm1743_vm13  ;;  %v3459_v46 = vld [vmem:[%s5914_s0 + $0x174] sm:$0xf0] }
 0x103   :  { %v3584_v58 = vpop.eup %3583  ;;  %v1753_v60 = vmul.f32 %v4798_v52, %v4747_v27  ;;  %vm1983_vm15 = vweird.f32 %v3580_v48  ;;  %vm1997_vm0 = vweird.f32 %v4764_v38  ;;  %3589 = vrcp.f32 %v4796_v44 }
 0x104   :  { %v1740_v59 = vmul.f32 %v4770_v39, %v1739_v49  ;;  %v1979_v62 = vsub.f32 1.0, %v1978_v54  ;;  %v4826_v19 = vpop.eup %3585  ;;  %vm1758_vm1 = vweird.f32 %v4798_v52  ;;  %v4830_v0 = vor.u32 1.1754944e-38, %v2003_v51  ;;  %vm1984_vm6 = vmor %vm1982_vm10, %vm1983_vm15  ;;  %v3062_v51 = vld [vmem:[%s5914_s0 + $0x160] sm:$0xf] }
 0x105   :  { %v1754_v36 = vsub.f32 1.0, %v1753_v60  ;;  %vm1772_vm2 = vweird.f32 %v4774_v13  ;;  %v1993_v10 = vmul.f32 %v4826_v19, %v4764_v38  ;;  %vm4845_vm4 = vcmp.eq.f32.partialorder %v2001_v56, 8.507059e+37  ;;  %vm1759_vm8 = vmor %vm1757_vm11, %vm1758_vm1 }
 0x106   :  { %v1741_v63 = vadd.f32 %v4770_v39, %v1740_v59  ;;  %v4833_v2 = vpop.f32.mrf.mxu2  ;;  %v4837_v4 = vpop.eup %3587  ;;  %v1980_v5 = vmul.f32 %v3580_v48, %v1979_v62  ;;  %v4849_v1 = vor.u32 1.1754944e-38, %v1778_v57  ;;  %v4851_v18 = vadd.f32 1.0, %v3584_v58  ;;  %v3457_v58 = vld [vmem:[%s5914_s0 + $0x164] sm:$0xf0] }
 0x107   :  { %v4835_v3 = vpop.f32.mrf.mxu3  ;;  %v1755_v9 = vmul.f32 %v4798_v52, %v1754_v36  ;;  %v1768_v28 = vmul.f32 %v4837_v4, %v4774_v13  ;;  %vm4861_vm5 = vcmp.eq.f32.partialorder %v1776_v61, 8.507059e+37  ;;  %v2016_v8 = vand.u32 2147483647, %v4796_v44  ;;  %v3456_v13 = vld [vmem:[%s5914_s0 + $0x164] sm:$0xf] }
 0x108   :  { %v4853_v23 = vpop.f32.mrf.mxu0  ;;  %v1745_v24 = vsel %vm1744_vm3, %v4770_v39, %v1741_v63  ;;  %v1981_v30 = vadd.f32 %v3580_v48, %v1980_v5  ;;  %v1994_v7 = vsub.f32 1.0, %v1993_v10  ;;  %v2018_v32 = vand.u32 2147483648, %v4796_v44  ;;  %v3488_v5 = vld [vmem:[%s5914_s0 + $0x1e4] sm:$0xf]  ;;  %v3240_v10 = vld [vmem:[%s5914_s0 + $0x1e8] sm:$0xf0] }
 0x109   :  { %v4855_v40 = vpop.f32.mrf.mxu1  ;;  %v1750_v29 = vsel %vm4782_vm9, %v1749_v45, %v1745_v24  ;;  %v1756_v33 = vadd.f32 %v4798_v52, %v1755_v9  ;;  %v1769_v34 = vsub.f32 1.0, %v1768_v28  ;;  %vm2012_vm7 = vweird.f32 %v4796_v44  ;;  %v4878_v21 = vpop.eup %3589 }
 0x10a   :  { %2599 = vst [vmem:[%s5916_s3 + $0x38] sm:$0xff] %v1750_v29  ;;  %3591 = vrcp.f32 %v4851_v18  ;;  %v1985_v37 = vsel %vm1984_vm6, %v3580_v48, %v1981_v30  ;;  %v1995_v39 = vmul.f32 %v4826_v19, %v1994_v7  ;;  %vm1998_vm9 = vweird.f32 %v4826_v19 }
 0x10b   :  { %vm1773_vm10 = vweird.f32 %v4837_v4  ;;  %v1990_v26 = vsel %vm4801_vm12, %v4789_v47, %v1985_v37  ;;  %v1760_v42 = vsel %vm1759_vm8, %v4798_v52, %v1756_v33  ;;  %v1770_v16 = vmul.f32 %v4837_v4, %v1769_v34  ;;  %vm4911_vm12 = vmor %vm1997_vm0, %vm1998_vm9 }
 0x10c   :  { %v2008_v35 = vmul.f32 %v4878_v21, %v4796_v44  ;;  %vm4894_vm13 = vcmp.eq.f32.partialorder %v2016_v8, 8.507059e+37  ;;  %2615 = vst [vmem:[%s5916_s3 + $0xb8] sm:$0xff] %v1990_v26  ;;  %v1765_v20 = vsel %vm4819_vm14, %v4793_v43, %v1760_v42  ;;  %v1996_v22 = vadd.f32 %v4826_v19, %v1995_v39  ;;  %vm4928_vm14 = vmor %vm1772_vm2, %vm1773_vm10 }
 0x10d   :  { %v2019_v45 = vor.u32 1.1754944e-38, %v2018_v32  ;;  %vm1787_vm11 = vweird.f32 %v4851_v18  ;;  %2600 = vst [vmem:[%s5916_s3 + $0x40] sm:$0xff] %v1765_v20  ;;  %v1771_v47 = vadd.f32 %v4837_v4, %v1770_v16  ;;  %v1791_v49 = vand.u32 2147483647, %v4851_v18 }
 0x10e   :  { %v2009_v48 = vsub.f32 1.0, %v2008_v35  ;;  %v3342_v43 = vmul.f32 -1.442695, %v4813_v53  ;;  %v603_v52 = vpop.f32.mrf.mxu2  ;;  %v2000_v38 = vsel %vm4911_vm12, %v4826_v19, %v1996_v22  ;;  %v324_v56 = vadd.f32 %v4733_v15, %v4731_v14 }
 0x10f   :  { %v652_v54 = vpop.f32.mrf.mxu3  ;;  %v648_v57 = vadd.f32 %v4768_v25, %v4766_v11  ;;  %v327_v53 = vadd.f32 %v4778_v31, %v4776_v17  ;;  %v2005_v14 = vsel %vm4845_vm4, %v4830_v0, %v2000_v38  ;;  %v1775_v15 = vsel %vm4928_vm14, %v4837_v4, %v1771_v47  ;;  %v3064_v25 = vld [vmem:[%s5914_s0 + $0x168] sm:$0xf0]  ;;  %v3238_v17 = vld [vmem:[%s5914_s0 + $0x1e0] sm:$0xf]  ;;  %v3489_v31 = vld [vmem:[%s5914_s0 + $0x1e4] sm:$0xf0] }
 0x110   :  { %v282_v59 = vpop.f32.mrf.mxu0  ;;  %v3592_v50 = vpop.eup %3591  ;;  %v2010_v11 = vmul.f32 %v4878_v21, %v2009_v48  ;;  %vm2013_vm15 = vweird.f32 %v4878_v21  ;;  %2616 = vst [vmem:[%s5916_s3 + $0xc0] sm:$0xff] %v2005_v14  ;;  %v1780_v61 = vsel %vm4861_vm5, %v4849_v1, %v1775_v15  ;;  %v1793_v19 = vand.u32 2147483648, %v4851_v18 }
 0x111   :  { %v331_v60 = vpop.f32.mrf.mxu1  ;;  %v1783_v62 = vmul.f32 %v3592_v50, %v4851_v18  ;;  %3593 = vpow2.f32 %v3342_v43  ;;  %2601 = vst [vmem:[%s5916_s3 + $0x48] sm:$0xff] %v1780_v61  ;;  %v1323_v36 = vadd.f32 %v4810_v41, %v324_v56  ;;  %v1339_v0 = vadd.f32 %v4810_v41, %v648_v57  ;;  %vm2014_vm0 = vmor %vm2012_vm7, %vm2013_vm15  ;;  %v3490_v57 = vld [vmem:[%s5914_s0 + $0x1f4] sm:$0xf] }
 0x112   :  { %v2011_v63 = vadd.f32 %v4878_v21, %v2010_v11  ;;  %v1324_v4 = vadd.f32 %v4810_v41, %v327_v53  ;;  %v3063_v1 = vor.u32 %v3457_v58, %v3062_v51  ;;  %v3067_v24 = vor.u32 %v3456_v13, %v3064_v25  ;;  %v3072_v51 = vld [vmem:[%s5914_s0 + $0x178] sm:$0xf0] }
 0x113   :  { %v1784_v12 = vsub.f32 1.0, %v1783_v62  ;;  %v3239_v9 = vor.u32 %v3489_v31, %v3238_v17  ;;  %vm1788_vm1 = vweird.f32 %v3592_v50  ;;  %v3327_v6 = vmul.f32 -1.442695, %v1323_v36  ;;  %v3248_v13 = vld [vmem:[%s5914_s0 + $0x1f8] sm:$0xf0] }
 0x114   :  { %v2015_v28 = vsel %vm2014_vm0, %v4878_v21, %v2011_v63  ;;  %v3343_v8 = vmul.f32 -1.442695, %v1339_v0  ;;  %v3328_v7 = vmul.f32 -1.442695, %v1324_v4  ;;  %924 = vmatmul.bf16.gmra.mxu0 %v3063_v1  ;;  %973 = vmatmul.bf16.gmra.mxu1 %v3067_v24  ;;  %v3243_v32 = vor.u32 %v3488_v5, %v3240_v10  ;;  %vm1789_vm2 = vmor %vm1787_vm11, %vm1788_vm1 }
 0x115   :  { %v2020_v29 = vsel %vm4894_vm13, %v2019_v45, %v2015_v28  ;;  %v1785_v30 = vmul.f32 %v3592_v50, %v1784_v12  ;;  %3595 = vpow2.f32 %v3327_v6  ;;  %1248 = vmatmul.bf16.gmra.mxu2 %v3239_v9  ;;  %v651_v44 = vadd.f32 %v4835_v3, %v4833_v2  ;;  %v3070_v45 = vld [vmem:[%s5914_s0 + $0x170] sm:$0xf] }
 0x116   :  { %2617 = vst [vmem:[%s5916_s3 + $0xc8] sm:$0xff] %v2020_v29  ;;  %v329_v33 = vadd.f32 %v4855_v40, %v4853_v23  ;;  %v653_v34 = vadd.f32 %v652_v54, %v603_v52  ;;  %v606_v21 = vpop.f32.mrf.mxu2  ;;  %3597 = vpow2.f32 %v3343_v8  ;;  %1297 = vmatmul.bf16.gmra.mxu3 %v3243_v32  ;;  %v332_v42 = vadd.f32 %v331_v60, %v282_v59  ;;  %v3246_v52 = vld [vmem:[%s5914_s0 + $0x1f0] sm:$0xf]  ;;  %v3491_v54 = vld [vmem:[%s5914_s0 + $0x1f4] sm:$0xf0] }
 0x117   :  { %v655_v37 = vpop.f32.mrf.mxu3  ;;  %v3594_v39 = vpop.eup %3593  ;;  %v1786_v26 = vadd.f32 %v3592_v50, %v1785_v30  ;;  %v1794_v27 = vor.u32 1.1754944e-38, %v1793_v19  ;;  %v1340_v2 = vadd.f32 %v4810_v41, %v651_v44  ;;  %vm1792_vm3 = vcmp.eq.f32.partialorder %v1791_v49, 8.507059e+37  ;;  %v3458_v49 = vld [vmem:[%s5914_s0 + $0x174] sm:$0xf] }
 0x118   :  { %v284_v16 = vpop.f32.mrf.mxu0  ;;  %v4999_v20 = vadd.f32 1.0, %v3594_v39  ;;  %v1325_v3 = vadd.f32 %v4810_v41, %v329_v33  ;;  %3599 = vpow2.f32 %v3328_v7  ;;  %v1341_v22 = vadd.f32 %v4810_v41, %v653_v34 }
 0x119   :  { %v333_v35 = vpop.f32.mrf.mxu1  ;;  %v1790_v23 = vsel %vm1789_vm2, %v3592_v50, %v1786_v26  ;;  %v3344_v18 = vmul.f32 -1.442695, %v1340_v2  ;;  %v1326_v48 = vadd.f32 %v4810_v41, %v332_v42  ;;  %v3071_v11 = vor.u32 %v3459_v46, %v3070_v45 }
 0x11a   :  { %v1795_v40 = vsel %vm1792_vm3, %v1794_v27, %v1790_v23  ;;  %3601 = vrcp.f32 %v4999_v20  ;;  %v3329_v47 = vmul.f32 -1.442695, %v1325_v3  ;;  %v2031_v55 = vand.u32 2147483647, %v4999_v20 }
 0x11b   :  { %2602 = vst [vmem:[%s5916_s3 + $0x50] sm:$0xff] %v1795_v40  ;;  %v3596_v43 = vpop.eup %3595  ;;  %3603 = vpow2.f32 %v3344_v18  ;;  %v3345_v58 = vmul.f32 -1.442695, %v1341_v22  ;;  %v2033_v14 = vand.u32 2147483648, %v4999_v20  ;;  %v3330_v15 = vmul.f32 -1.442695, %v1326_v48 }
 0x11c   :  { %v3598_v38 = vpop.eup %3597  ;;  %v5030_v56 = vadd.f32 1.0, %v3596_v43  ;;  %3605 = vpow2.f32 %v3329_v47  ;;  %vm2027_vm4 = vweird.f32 %v4999_v20  ;;  %v3075_v61 = vor.u32 %v3458_v49, %v3072_v51 }
 0x11d   :  { %v5035_v53 = vadd.f32 1.0, %v3598_v38  ;;  %v3247_v62 = vor.u32 %v3491_v54, %v3246_v52  ;;  %vm5053_vm5 = vcmp.eq.f32.partialorder %v2031_v55, 8.507059e+37  ;;  %v3251_v36 = vor.u32 %v3490_v57, %v3248_v13 }
 0x11e   :  { %v5040_v59 = vpop.f32.mrf.mxu2  ;;  %v3600_v50 = vpop.eup %3599  ;;  %3607 = vrcp.f32 %v5030_v56  ;;  %v656_v0 = vadd.f32 %v655_v37, %v606_v21  ;;  %v1806_v4 = vand.u32 2147483647, %v5030_v56  ;;  %v1808_v5 = vand.u32 2147483648, %v5030_v56 }
 0x11f   :  { %v5042_v60 = vpop.f32.mrf.mxu3  ;;  %3609 = vrcp.f32 %v5035_v53  ;;  %v5059_v10 = vadd.f32 1.0, %v3600_v50  ;;  %v2034_v24 = vor.u32 1.1754944e-38, %v2033_v14  ;;  %v334_v9 = vadd.f32 %v333_v35, %v284_v16 }
 0x120   :  { %v5046_v25 = vpop.f32.mrf.mxu0  ;;  %v3602_v31 = vpop.eup %3601  ;;  %3611 = vpow2.f32 %v3345_v58  ;;  %vm1802_vm7 = vweird.f32 %v5030_v56  ;;  %v2046_v6 = vand.u32 2147483647, %v5035_v53  ;;  %v2048_v8 = vand.u32 2147483648, %v5035_v53 }
 0x121   :  { %v5048_v17 = vpop.f32.mrf.mxu1  ;;  %v2023_v19 = vmul.f32 %v3602_v31, %v4999_v20  ;;  %v3604_v12 = vpop.eup %3603  ;;  %3613 = vpow2.f32 %v3330_v15  ;;  %vm2028_vm6 = vweird.f32 %v3602_v31  ;;  %vm2042_vm8 = vweird.f32 %v5035_v53 }
 0x122   :  { %v3606_v28 = vpop.eup %3605  ;;  %3615 = vrcp.f32 %v5059_v10  ;;  %v5068_v7 = vadd.f32 1.0, %v3604_v12  ;;  %v1342_v44 = vadd.f32 %v4810_v41, %v656_v0  ;;  %vm5077_vm9 = vcmp.eq.f32.partialorder %v1806_v4, 8.507059e+37  ;;  %vm2029_vm10 = vmor %vm2027_vm4, %vm2028_vm6 }
 0x123   :  { %v2024_v1 = vsub.f32 1.0, %v2023_v19  ;;  %v5070_v32 = vadd.f32 1.0, %v3606_v28  ;;  %v1809_v37 = vor.u32 1.1754944e-38, %v1808_v5  ;;  %v1821_v39 = vand.u32 2147483647, %v5059_v10 }
 0x124   :  { %v5065_v29 = vpop.eup %3607  ;;  %929 = vmatmul.bf16.gmra.mxu0 %v3071_v11  ;;  %978 = vmatmul.bf16.gmra.mxu1 %v3075_v61  ;;  %v1823_v27 = vand.u32 2147483648, %v5059_v10  ;;  %3617 = vrcp.f32 %v5068_v7  ;;  %vm5097_vm13 = vcmp.eq.f32.partialorder %v2046_v6, 8.507059e+37  ;;  %v2049_v45 = vor.u32 1.1754944e-38, %v2048_v8 }
 0x125   :  { %v2025_v30 = vmul.f32 %v3602_v31, %v2024_v1  ;;  %v5073_v33 = vpop.eup %3609  ;;  %v1798_v34 = vmul.f32 %v5065_v29, %v5030_v56  ;;  %1253 = vmatmul.bf16.gmra.mxu2 %v3247_v62  ;;  %v5102_v46 = vadd.f32 %v4810_v41, %v334_v9  ;;  %3619 = vrcp.f32 %v5070_v32 }
 0x126   :  { %v5082_v26 = vpop.f32.mrf.mxu2  ;;  %v2038_v35 = vmul.f32 %v5073_v33, %v5035_v53  ;;  %1302 = vmatmul.bf16.gmra.mxu3 %v3251_v36  ;;  %v3612_v23 = vpop.eup %3611  ;;  %v3346_v49 = vmul.f32 -1.442695, %v1342_v44  ;;  %vm1803_vm11 = vweird.f32 %v5065_v29  ;;  %vm1817_vm12 = vweird.f32 %v5059_v10 }
 0x127   :  { %v5084_v42 = vpop.f32.mrf.mxu3  ;;  %v2026_v16 = vadd.f32 %v3602_v31, %v2025_v30  ;;  %v1799_v40 = vsub.f32 1.0, %v1798_v34  ;;  %v3614_v18 = vpop.eup %3613  ;;  %vm2043_vm14 = vweird.f32 %v5073_v33  ;;  %vm5116_vm15 = vcmp.eq.f32.partialorder %v1821_v39, 8.507059e+37  ;;  %vm1804_vm1 = vmor %vm1802_vm7, %vm1803_vm11 }
 0x128   :  { %v5090_v2 = vpop.f32.mrf.mxu0  ;;  %v2039_v48 = vsub.f32 1.0, %v2038_v35  ;;  %v3616_v43 = vpop.eup %3615  ;;  %v1824_v55 = vor.u32 1.1754944e-38, %v1823_v27  ;;  %vm2057_vm0 = vweird.f32 %v5068_v7  ;;  %v2061_v58 = vand.u32 2147483647, %v5068_v7  ;;  %vm5135_vm2 = vmor %vm2042_vm8, %vm2043_vm14 }
 0x129   :  { %v5092_v3 = vpop.f32.mrf.mxu1  ;;  %v2030_v47 = vsel %vm2029_vm10, %v3602_v31, %v2026_v16  ;;  %v1800_v51 = vmul.f32 %v5065_v29, %v1799_v40  ;;  %v1813_v54 = vmul.f32 %v3616_v43, %v5059_v10  ;;  %v2063_v13 = vand.u32 2147483648, %v5068_v7 }
 0x12a   :  { %v2035_v20 = vsel %vm5053_vm5, %v2034_v24, %v2030_v47  ;;  %v2040_v52 = vmul.f32 %v5073_v33, %v2039_v48  ;;  %v5124_v50 = vadd.f32 1.0, %v3612_v23  ;;  %v3618_v14 = vpop.eup %3617  ;;  %v1836_v31 = vand.u32 2147483647, %v5070_v32 }
 0x12b   :  { %2618 = vst [vmem:[%s5916_s3 + $0xd0] sm:$0xff] %v2035_v20  ;;  %v1801_v57 = vadd.f32 %v5065_v29, %v1800_v51  ;;  %v1814_v11 = vsub.f32 1.0, %v1813_v54  ;;  %3621 = vpow2.f32 %v3346_v49  ;;  %vm1818_vm3 = vweird.f32 %v3616_v43  ;;  %v3620_v0 = vpop.eup %3619 }
 0x12c   :  { %v2041_v15 = vadd.f32 %v5073_v33, %v2040_v52  ;;  %v2053_v56 = vmul.f32 %v3618_v14, %v5068_v7  ;;  %vm1832_vm4 = vweird.f32 %v5070_v32  ;;  %v5141_v19 = vadd.f32 1.0, %v3614_v18  ;;  %vm1819_vm7 = vmor %vm1817_vm12, %vm1818_vm3 }
 0x12d   :  { %v1805_v61 = vsel %vm1804_vm1, %v5065_v29, %v1801_v57  ;;  %v1815_v5 = vmul.f32 %v3616_v43, %v1814_v11  ;;  %3623 = vrcp.f32 %v5124_v50  ;;  %vm5162_vm5 = vcmp.eq.f32.partialorder %v2061_v58, 8.507059e+37 }
 0x12e   :  { %v5143_v63 = vpop.f32.mrf.mxu2  ;;  %v1810_v4 = vsel %vm5077_vm9, %v1809_v37, %v1805_v61  ;;  %v2045_v53 = vsel %vm5135_vm2, %v5073_v33, %v2041_v15  ;;  %v2054_v9 = vsub.f32 1.0, %v2053_v56  ;;  %v1828_v6 = vmul.f32 %v3620_v0, %v5070_v32 }
 0x12f   :  { %v5145_v36 = vpop.f32.mrf.mxu3  ;;  %2603 = vst [vmem:[%s5916_s3 + $0x58] sm:$0xff] %v1810_v4  ;;  %v2050_v24 = vsel %vm5097_vm13, %v2049_v45, %v2045_v53  ;;  %v1816_v8 = vadd.f32 %v3616_v43, %v1815_v5  ;;  %v2064_v29 = vor.u32 1.1754944e-38, %v2063_v13  ;;  %vm5170_vm6 = vcmp.eq.f32.partialorder %v1836_v31, 8.507059e+37 }
 0x130   :  { %v5153_v12 = vpop.f32.mrf.mxu0  ;;  %2619 = vst [vmem:[%s5916_s3 + $0xd8] sm:$0xff] %v2050_v24  ;;  %v1838_v44 = vand.u32 2147483648, %v5070_v32  ;;  %v2055_v33 = vmul.f32 %v3618_v14, %v2054_v9  ;;  %vm2058_vm8 = vweird.f32 %v3618_v14  ;;  %v1829_v34 = vsub.f32 1.0, %v1828_v6 }
 0x131   :  { %v5155_v1 = vpop.f32.mrf.mxu1  ;;  %3625 = vrcp.f32 %v5141_v19  ;;  %v3622_v21 = vpop.eup %3621  ;;  %v1820_v37 = vsel %vm1819_vm7, %v3616_v43, %v1816_v8  ;;  %vm1833_vm9 = vweird.f32 %v3620_v0  ;;  %v2076_v39 = vand.u32 2147483647, %v5124_v50  ;;  %vm2059_vm10 = vmor %vm2057_vm0, %vm2058_vm8 }
 0x132   :  { %v2078_v16 = vand.u32 2147483648, %v5124_v50  ;;  %v1825_v35 = vsel %vm5116_vm15, %v1824_v55, %v1820_v37  ;;  %v2056_v27 = vadd.f32 %v3618_v14, %v2055_v33  ;;  %v1830_v23 = vmul.f32 %v3620_v0, %v1829_v34  ;;  %vm1834_vm13 = vmor %vm1832_vm4, %vm1833_vm9 }
 0x133   :  { %v1851_v10 = vand.u32 2147483647, %v5141_v19  ;;  %v3624_v40 = vpop.eup %3623  ;;  %2604 = vst [vmem:[%s5916_s3 + $0x60] sm:$0xff] %v1825_v35  ;;  %v1839_v22 = vor.u32 1.1754944e-38, %v1838_v44  ;;  %v1853_v45 = vand.u32 2147483648, %v5141_v19  ;;  %v5190_v18 = vadd.f32 1.0, %v3622_v21 }
 0x134   :  { %v3331_v47 = vmul.f32 -1.442695, %v5102_v46  ;;  %v2060_v48 = vsel %vm2059_vm10, %v3618_v14, %v2056_v27  ;;  %v1831_v49 = vadd.f32 %v3620_v0, %v1830_v23  ;;  %v2068_v43 = vmul.f32 %v3624_v40, %v5124_v50 }
 0x135   :  { %v658_v20 = vadd.f32 %v5042_v60, %v5040_v59  ;;  %v2065_v52 = vsel %vm5162_vm5, %v2064_v29, %v2060_v48  ;;  %vm2072_vm11 = vweird.f32 %v5124_v50  ;;  %vm1847_vm12 = vweird.f32 %v5141_v19 }
 0x136   :  { %v1224_v51 = vpop.f32.mrf.mxu2  ;;  %3627 = vrcp.f32 %v5190_v18  ;;  %2620 = vst [vmem:[%s5916_s3 + $0xe0] sm:$0xff] %v2065_v52  ;;  %v1835_v59 = vsel %vm1834_vm13, %v3620_v0, %v1831_v49  ;;  %v2069_v60 = vsub.f32 1.0, %v2068_v43  ;;  %vm5207_vm14 = vcmp.eq.f32.partialorder %v2076_v39, 8.507059e+37 }
 0x137   :  { %v1273_v7 = vpop.f32.mrf.mxu3  ;;  %v3626_v46 = vpop.eup %3625  ;;  %v2079_v32 = vor.u32 1.1754944e-38, %v2078_v16  ;;  %v1840_v57 = vsel %vm5170_vm6, %v1839_v22, %v1835_v59  ;;  %vm2073_vm15 = vweird.f32 %v3624_v40  ;;  %vm5218_vm0 = vcmp.eq.f32.partialorder %v1851_v10, 8.507059e+37 }
 0x138   :  { %v5211_v38 = vpop.f32.mrf.mxu0  ;;  %v1843_v58 = vmul.f32 %v3626_v46, %v5141_v19  ;;  %3629 = vpow2.f32 %v3331_v47  ;;  %2605 = vst [vmem:[%s5916_s3 + $0x68] sm:$0xff] %v1840_v57  ;;  %v2070_v14 = vmul.f32 %v3624_v40, %v2069_v60  ;;  %v1854_v15 = vor.u32 1.1754944e-38, %v1853_v45  ;;  %vm2074_vm2 = vmor %vm2072_vm11, %vm2073_vm15 }
 0x139   :  { %v5213_v55 = vpop.f32.mrf.mxu1  ;;  %v2091_v11 = vand.u32 2147483647, %v5190_v18  ;;  %v1343_v31 = vadd.f32 %v4810_v41, %v658_v20  ;;  %v945_v62 = vadd.f32 %v5048_v17, %v5046_v25  ;;  %v1269_v56 = vadd.f32 %v5084_v42, %v5082_v26 }
 0x13a   :  { %v1844_v61 = vsub.f32 1.0, %v1843_v58  ;;  %v947_v0 = vadd.f32 %v5092_v3, %v5090_v2  ;;  %v2071_v4 = vadd.f32 %v3624_v40, %v2070_v14  ;;  %vm1848_vm1 = vweird.f32 %v3626_v46 }
 0x13b   :  { %v3347_v53 = vmul.f32 -1.442695, %v1343_v31  ;;  %v1271_v5 = vadd.f32 %v5145_v36, %v5143_v63  ;;  %v1344_v25 = vadd.f32 %v4810_v41, %v945_v62  ;;  %v1360_v17 = vadd.f32 %v4810_v41, %v1269_v56  ;;  %vm1849_vm3 = vmor %vm1847_vm12, %vm1848_vm1 }
 0x13c   :  { %v3628_v24 = vpop.eup %3627  ;;  %v1845_v9 = vmul.f32 %v3626_v46, %v1844_v61  ;;  %v1345_v26 = vadd.f32 %v4810_v41, %v947_v0  ;;  %v2075_v42 = vsel %vm2074_vm2, %v3624_v40, %v2071_v4  ;;  %v950_v3 = vadd.f32 %v5155_v1, %v5153_v12 }
 0x13d   :  { %v2083_v2 = vmul.f32 %v3628_v24, %v5190_v18  ;;  %3631 = vpow2.f32 %v3347_v53  ;;  %v2080_v36 = vsel %vm5207_vm14, %v2079_v32, %v2075_v42  ;;  %v3348_v28 = vmul.f32 -1.442695, %v1344_v25 }
 0x13e   :  { %v3630_v63 = vpop.eup %3629  ;;  %v1846_v50 = vadd.f32 %v3626_v46, %v1845_v9  ;;  %v3364_v6 = vmul.f32 -1.442695, %v1360_v17  ;;  %v5246_v8 = vpop.f32.mrf.mxu2  ;;  %2621 = vst [vmem:[%s5916_s3 + $0xe8] sm:$0xff] %v2080_v36  ;;  %v3349_v12 = vmul.f32 -1.442695, %v1345_v26  ;;  %v1361_v1 = vadd.f32 %v4810_v41, %v1271_v5 }
 0x13f   :  { %v2084_v29 = vsub.f32 1.0, %v2083_v2  ;;  %v5254_v30 = vadd.f32 1.0, %v3630_v63  ;;  %v2093_v33 = vand.u32 2147483648, %v5190_v18  ;;  %3633 = vpow2.f32 %v3348_v28  ;;  %v5258_v21 = vpop.f32.mrf.mxu3 }
 0x140   :  { %v1850_v44 = vsel %vm1849_vm3, %v3626_v46, %v1846_v50  ;;  %v1274_v34 = vadd.f32 %v1273_v7, %v1224_v51  ;;  %vm2088_vm4 = vweird.f32 %v3628_v24  ;;  %v5263_v19 = vpop.f32.mrf.mxu0  ;;  %v3365_v35 = vmul.f32 -1.442695, %v1361_v1 }
 0x141   :  { %v1855_v37 = vsel %vm5218_vm0, %v1854_v15, %v1850_v44  ;;  %v2085_v39 = vmul.f32 %v3628_v24, %v2084_v29  ;;  %3635 = vrcp.f32 %v5254_v30  ;;  %v5265_v16 = vpop.f32.mrf.mxu1  ;;  %v1346_v27 = vadd.f32 %v4810_v41, %v950_v3 }
 0x142   :  { %2606 = vst [vmem:[%s5916_s3 + $0x70] sm:$0xff] %v1855_v37  ;;  %3637 = vpow2.f32 %v3364_v6  ;;  %vm2087_vm5 = vweird.f32 %v5190_v18  ;;  %v1362_v40 = vadd.f32 %v4810_v41, %v1274_v34  ;;  %v2094_v22 = vor.u32 1.1754944e-38, %v2093_v33 }
 0x143   :  { %v3632_v23 = vpop.eup %3631  ;;  %v2086_v10 = vadd.f32 %v3628_v24, %v2085_v39  ;;  %3639 = vpow2.f32 %v3349_v12  ;;  %vm2089_vm6 = vmor %vm2087_vm5, %vm2088_vm4  ;;  %vm2092_vm7 = vcmp.eq.f32.partialorder %v2091_v11, 8.507059e+37  ;;  %v1866_v48 = vand.u32 2147483647, %v5254_v30 }
 0x144   :  { %v5273_v45 = vadd.f32 1.0, %v3632_v23  ;;  %3641 = vpow2.f32 %v3365_v35  ;;  %v3350_v20 = vmul.f32 -1.442695, %v1346_v27  ;;  %v1868_v18 = vand.u32 2147483648, %v5254_v30 }
 0x145   :  { %v2090_v47 = vsel %vm2089_vm6, %v3628_v24, %v2086_v10  ;;  %v3634_v49 = vpop.eup %3633  ;;  %v3366_v7 = vmul.f32 -1.442695, %v1362_v40  ;;  %v952_v46 = vadd.f32 %v5213_v55, %v5211_v38  ;;  %vm1862_vm8 = vweird.f32 %v5254_v30 }
 0x146   :  { %v2095_v43 = vsel %vm2092_vm7, %v2094_v22, %v2090_v47  ;;  %3643 = vrcp.f32 %v5273_v45  ;;  %v5281_v52 = vadd.f32 1.0, %v3634_v49  ;;  %v5287_v54 = vpop.f32.mrf.mxu2  ;;  %vm5289_vm9 = vcmp.eq.f32.partialorder %v1866_v48, 8.507059e+37 }
 0x147   :  { %v3636_v51 = vpop.eup %3635  ;;  %2622 = vst [vmem:[%s5916_s3 + $0xf0] sm:$0xff] %v2095_v43  ;;  %v2106_v58 = vand.u32 2147483647, %v5273_v45  ;;  %v2108_v13 = vand.u32 2147483648, %v5273_v45  ;;  %v5300_v11 = vpop.f32.mrf.mxu3  ;;  %v1869_v31 = vor.u32 1.1754944e-38, %v1868_v18  ;;  %vm2102_vm10 = vweird.f32 %v5273_v45 }
 0x148   :  { %v3638_v59 = vpop.eup %3637  ;;  %v1858_v60 = vmul.f32 %v3636_v51, %v5254_v30  ;;  %3645 = vrcp.f32 %v5281_v52  ;;  %v1347_v61 = vadd.f32 %v4810_v41, %v952_v46  ;;  %v5304_v62 = vpop.f32.mrf.mxu0  ;;  %vm1863_vm13 = vweird.f32 %v3636_v51 }
 0x149   :  { %v3640_v32 = vpop.eup %3639  ;;  %v5296_v55 = vadd.f32 1.0, %v3638_v59  ;;  %3647 = vpow2.f32 %v3350_v20  ;;  %v5306_v56 = vpop.f32.mrf.mxu1  ;;  %v2121_v53 = vand.u32 2147483647, %v5281_v52  ;;  %vm5311_vm11 = vcmp.eq.f32.partialorder %v2106_v58, 8.507059e+37  ;;  %vm1864_vm14 = vmor %vm1862_vm8, %vm1863_vm13 }
 0x14a   :  { %v3642_v14 = vpop.eup %3641  ;;  %v1859_v38 = vsub.f32 1.0, %v1858_v60  ;;  %v5298_v15 = vadd.f32 1.0, %v3640_v32  ;;  %3649 = vpow2.f32 %v3366_v7  ;;  %v2109_v9 = vor.u32 1.1754944e-38, %v2108_v13 }
 0x14b   :  { %3651 = vrcp.f32 %v5296_v55  ;;  %v5315_v25 = vadd.f32 1.0, %v3642_v14  ;;  %v1276_v17 = vadd.f32 %v5258_v21, %v5246_v8  ;;  %vm2117_vm12 = vweird.f32 %v5281_v52 }
 0x14c   :  { %v3644_v0 = vpop.eup %3643  ;;  %v1860_v4 = vmul.f32 %v3636_v51, %v1859_v38  ;;  %v2123_v42 = vand.u32 2147483648, %v5281_v52  ;;  %3653 = vrcp.f32 %v5298_v15  ;;  %v2361_v63 = vand.u32 2147483647, %v5296_v55 }
 0x14d   :  { %v2098_v5 = vmul.f32 %v3644_v0, %v5273_v45  ;;  %v2363_v36 = vand.u32 2147483648, %v5296_v55  ;;  %v5326_v50 = vmul.f32 -1.442695, %v1347_v61  ;;  %vm2103_vm15 = vweird.f32 %v3644_v0 }
 0x14e   :  { %v1861_v26 = vadd.f32 %v3636_v51, %v1860_v4  ;;  %v3646_v2 = vpop.eup %3645  ;;  %vm5329_vm0 = vcmp.eq.f32.partialorder %v2121_v53, 8.507059e+37  ;;  %v2138_v12 = vand.u32 2147483648, %v5298_v15  ;;  %v2136_v33 = vand.u32 2147483647, %v5298_v15  ;;  %v5343_v35 = vpop.f32.mrf.mxu2  ;;  %vm2104_vm4 = vmor %vm2102_vm10, %vm2103_vm15 }
 0x14f   :  { %v2099_v3 = vsub.f32 1.0, %v2098_v5  ;;  %v3648_v28 = vpop.eup %3647  ;;  %v2113_v8 = vmul.f32 %v3646_v2, %v5281_v52  ;;  %3655 = vrcp.f32 %v5315_v25  ;;  %v2124_v37 = vor.u32 1.1754944e-38, %v2123_v42  ;;  %v5358_v43 = vpop.f32.mrf.mxu3 }
 0x150   :  { %v1865_v6 = vsel %vm1864_vm14, %v3636_v51, %v1861_v26  ;;  %v3650_v30 = vpop.eup %3649  ;;  %vm2357_vm1 = vweird.f32 %v5296_v55  ;;  %v1363_v39 = vadd.f32 %v4810_v41, %v1276_v17  ;;  %vm5346_vm2 = vcmp.eq.f32.partialorder %v2361_v63, 8.507059e+37  ;;  %v5366_v59 = vpop.f32.mrf.mxu0 }
 0x151   :  { %v1870_v1 = vsel %vm5289_vm9, %v1869_v31, %v1865_v6  ;;  %v2100_v44 = vmul.f32 %v3644_v0, %v2099_v3  ;;  %v3652_v34 = vpop.eup %3651  ;;  %v2114_v21 = vsub.f32 1.0, %v2113_v8  ;;  %v2364_v40 = vor.u32 1.1754944e-38, %v2363_v36  ;;  %v5368_v45 = vpop.f32.mrf.mxu1 }
 0x152   :  { %2607 = vst [vmem:[%s5916_s3 + $0x78] sm:$0xff] %v1870_v1  ;;  %v2353_v23 = vmul.f32 %v3652_v34, %v5296_v55  ;;  %vm2132_vm3 = vweird.f32 %v5298_v15  ;;  %v5351_v22 = vadd.f32 1.0, %v3648_v28  ;;  %v3654_v47 = vpop.eup %3653  ;;  %vm2118_vm5 = vweird.f32 %v3646_v2 }
 0x153   :  { %v2101_v27 = vadd.f32 %v3644_v0, %v2100_v44  ;;  %v2115_v41 = vmul.f32 %v3646_v2, %v2114_v21  ;;  %v2139_v48 = vor.u32 1.1754944e-38, %v2138_v12  ;;  %v5356_v49 = vadd.f32 1.0, %v3650_v30  ;;  %vm2119_vm7 = vmor %vm2117_vm12, %vm2118_vm5 }
 0x154   :  { %v2354_v51 = vsub.f32 1.0, %v2353_v23  ;;  %v2128_v18 = vmul.f32 %v3654_v47, %v5298_v15  ;;  %vm5361_vm6 = vcmp.eq.f32.partialorder %v2136_v33, 8.507059e+37  ;;  %v2376_v46 = vand.u32 2147483647, %v5315_v25 }
 0x155   :  { %v2105_v20 = vsel %vm2104_vm4, %v3644_v0, %v2101_v27  ;;  %v2116_v32 = vadd.f32 %v3646_v2, %v2115_v41  ;;  %v2378_v57 = vand.u32 2147483648, %v5315_v25  ;;  %3657 = vrcp.f32 %v5351_v22  ;;  %v3656_v58 = vpop.eup %3655 }
 0x156   :  { %v2110_v60 = vsel %vm5311_vm11, %v2109_v9, %v2105_v20  ;;  %v2355_v13 = vmul.f32 %v3652_v34, %v2354_v51  ;;  %vm2358_vm8 = vweird.f32 %v3652_v34  ;;  %v2129_v14 = vsub.f32 1.0, %v2128_v18  ;;  %v5403_v63 = vpop.f32.mrf.mxu2 }
 0x157   :  { %2623 = vst [vmem:[%s5916_s3 + $0xf8] sm:$0xff] %v2110_v60  ;;  %vm2133_vm9 = vweird.f32 %v3654_v47  ;;  %v2120_v38 = vsel %vm2119_vm7, %v3646_v2, %v2116_v32  ;;  %v2368_v31 = vmul.f32 %v3656_v58, %v5315_v25  ;;  %v2151_v61 = vand.u32 2147483647, %v5351_v22  ;;  %vm2359_vm10 = vmor %vm2357_vm1, %vm2358_vm8  ;;  %v5418_v1 = vpop.f32.mrf.mxu3 }
 0x158   :  { %3659 = vrcp.f32 %v5356_v49  ;;  %v2125_v0 = vsel %vm5329_vm0, %v2124_v37, %v2120_v38  ;;  %v2356_v4 = vadd.f32 %v3652_v34, %v2355_v13  ;;  %v2130_v53 = vmul.f32 %v3654_v47, %v2129_v14  ;;  %vm2134_vm14 = vmor %vm2132_vm3, %vm2133_vm9  ;;  %v5429_v21 = vpop.f32.mrf.mxu0  ;;  %v5436_v37 = vld [vmem:[%s5915_s2] ss:$0 sm:$0xff] }
 0x159   :  { %v2153_v5 = vand.u32 2147483648, %v5351_v22  ;;  %2624 = vst [vmem:[%s5916_s3 + $0x100] sm:$0xff] %v2125_v0  ;;  %v2369_v52 = vsub.f32 1.0, %v2368_v31  ;;  %vm2372_vm13 = vweird.f32 %v5315_v25  ;;  %vm5392_vm11 = vcmp.eq.f32.partialorder %v2376_v46, 8.507059e+37 }
 0x15a   :  { %v2379_v9 = vor.u32 1.1754944e-38, %v2378_v57  ;;  %v2360_v17 = vsel %vm2359_vm10, %v3652_v34, %v2356_v4  ;;  %v2131_v26 = vadd.f32 %v3654_v47, %v2130_v53  ;;  %vm2147_vm12 = vweird.f32 %v5351_v22 }
 0x15b   :  { %3661 = vpow2.f32 %v5326_v50  ;;  %v3658_v42 = vpop.eup %3657  ;;  %v2365_v2 = vsel %vm5346_vm2, %v2364_v40, %v2360_v17  ;;  %v2370_v55 = vmul.f32 %v3656_v58, %v2369_v52  ;;  %vm2373_vm15 = vweird.f32 %v3656_v58 }
 0x15c   :  { %v3367_v3 = vmul.f32 -1.442695, %v1363_v39  ;;  %2640 = vst [vmem:[%s5916_s3 + $0x180] sm:$0xff] %v2365_v2  ;;  %v2135_v36 = vsel %vm2134_vm14, %v3654_v47, %v2131_v26  ;;  %v2143_v50 = vmul.f32 %v3658_v42, %v5351_v22  ;;  %vm5409_vm0 = vcmp.eq.f32.partialorder %v2151_v61, 8.507059e+37  ;;  %vm2374_vm1 = vmor %vm2372_vm13, %vm2373_vm15 }
 0x15d   :  { %v2154_v6 = vor.u32 1.1754944e-38, %v2153_v5  ;;  %v2391_v15 = vand.u32 2147483647, %v5356_v49  ;;  %v2140_v29 = vsel %vm5361_vm6, %v2139_v48, %v2135_v36  ;;  %v2371_v12 = vadd.f32 %v3656_v58, %v2370_v55 }
 0x15e   :  { %v3660_v8 = vpop.eup %3659  ;;  %3663 = vpow2.f32 %v3367_v3  ;;  %v955_v30 = vadd.f32 %v5265_v16, %v5263_v19  ;;  %2625 = vst [vmem:[%s5916_s3 + $0x108] sm:$0xff] %v2140_v29  ;;  %v2144_v44 = vsub.f32 1.0, %v2143_v50  ;;  %vm2148_vm2 = vweird.f32 %v3658_v42  ;;  %v5431_v19 = vpop.f32.mrf.mxu1 }
 0x15f   :  { %v2383_v33 = vmul.f32 %v3660_v8, %v5356_v49  ;;  %v1279_v34 = vadd.f32 %v5300_v11, %v5287_v54  ;;  %v2375_v16 = vsel %vm2374_vm1, %v3656_v58, %v2371_v12  ;;  %v957_v39 = vadd.f32 %v5306_v56, %v5304_v62  ;;  %vm2149_vm5 = vmor %vm2147_vm12, %vm2148_vm2  ;;  %v1236_v58 = vpop.f32.mrf.mxu2 }
 0x160   :  { %v1348_v25 = vadd.f32 %v5436_v37, %v955_v30  ;;  %v1281_v27 = vadd.f32 %v5358_v43, %v5343_v35  ;;  %v2380_v54 = vsel %vm5392_vm11, %v2379_v9, %v2375_v16  ;;  %v2145_v11 = vmul.f32 %v3658_v42, %v2144_v44  ;;  %v915_v61 = vpop.f32.mrf.mxu0 }
 0x161   :  { %v3662_v23 = vpop.eup %3661  ;;  %v2384_v10 = vsub.f32 1.0, %v2383_v33  ;;  %v1364_v40 = vadd.f32 %v5436_v37, %v1279_v34  ;;  %2641 = vst [vmem:[%s5916_s3 + $0x188] sm:$0xff] %v2380_v54  ;;  %vm2387_vm3 = vweird.f32 %v5356_v49  ;;  %v2393_v47 = vand.u32 2147483648, %v5356_v49  ;;  %v1285_v49 = vpop.f32.mrf.mxu3 }
 0x162   :  { %v5451_v62 = vadd.f32 1.0, %v3662_v23  ;;  %v3352_v56 = vmul.f32 -1.442695, %v1348_v25  ;;  %v2146_v35 = vadd.f32 %v3658_v42, %v2145_v11  ;;  %vm2388_vm4 = vweird.f32 %v3660_v8 }
 0x163   :  { %v2385_v41 = vmul.f32 %v3660_v8, %v2384_v10  ;;  %v3368_v48 = vmul.f32 -1.442695, %v1364_v40  ;;  %v1349_v20 = vadd.f32 %v5436_v37, %v957_v39  ;;  %v1365_v51 = vadd.f32 %v5436_v37, %v1281_v27  ;;  %vm2389_vm6 = vmor %vm2387_vm3, %vm2388_vm4 }
 0x164   :  { %v3664_v43 = vpop.eup %3663  ;;  %3665 = vrcp.f32 %v5451_v62  ;;  %v960_v18 = vadd.f32 %v5368_v45, %v5366_v59  ;;  %v2150_v7 = vsel %vm2149_vm5, %v3658_v42, %v2146_v35  ;;  %v2394_v22 = vor.u32 1.1754944e-38, %v2393_v47 }
 0x165   :  { %v2386_v46 = vadd.f32 %v3660_v8, %v2385_v41  ;;  %v5461_v60 = vadd.f32 1.0, %v3664_v43  ;;  %3667 = vpow2.f32 %v3352_v56  ;;  %v2155_v32 = vsel %vm5409_vm0, %v2154_v6, %v2150_v7 }
 0x166   :  { %v2168_v57 = vand.u32 2147483648, %v5451_v62  ;;  %3669 = vpow2.f32 %v3368_v48  ;;  %2626 = vst [vmem:[%s5916_s3 + $0x110] sm:$0xff] %v2155_v32  ;;  %vm2392_vm7 = vcmp.eq.f32.partialorder %v2391_v15, 8.507059e+37  ;;  %v2166_v45 = vand.u32 2147483647, %v5451_v62  ;;  %v964_v0 = vpop.f32.mrf.mxu1 }
 0x167   :  { %v2390_v59 = vsel %vm2389_vm6, %v3660_v8, %v2386_v46  ;;  %3671 = vrcp.f32 %v5461_v60  ;;  %v3353_v14 = vmul.f32 -1.442695, %v1349_v20  ;;  %v3369_v38 = vmul.f32 -1.442695, %v1365_v51 }
 0x168   :  { %v2395_v13 = vsel %vm2392_vm7, %v2394_v22, %v2390_v59  ;;  %vm2162_vm8 = vweird.f32 %v5451_v62  ;;  %v1350_v31 = vadd.f32 %v5436_v37, %v960_v18  ;;  %v2169_v53 = vor.u32 1.1754944e-38, %v2168_v57  ;;  %v5539_v46 = vpop.f32.mrf.mxu0 }
 0x169   :  { %2642 = vst [vmem:[%s5916_s3 + $0x190] sm:$0xff] %v2395_v13  ;;  %v2406_v5 = vand.u32 2147483647, %v5461_v60  ;;  %v2408_v52 = vand.u32 2147483648, %v5461_v60  ;;  %3673 = vpow2.f32 %v3353_v14  ;;  %vm5481_vm9 = vcmp.eq.f32.partialorder %v2166_v45, 8.507059e+37 }
 0x16a   :  { %v3666_v4 = vpop.eup %3665  ;;  %3675 = vpow2.f32 %v3369_v38  ;;  %v3354_v26 = vmul.f32 -1.442695, %v1350_v31  ;;  %v1284_v42 = vadd.f32 %v5418_v1, %v5403_v63  ;;  %v962_v3 = vadd.f32 %v5431_v19, %v5429_v21  ;;  %v1239_v19 = vpop.f32.mrf.mxu2 }
 0x16b   :  { %v3668_v24 = vpop.eup %3667  ;;  %v2158_v9 = vmul.f32 %v3666_v4, %v5451_v62  ;;  %v1286_v36 = vadd.f32 %v1285_v49, %v1236_v58  ;;  %v965_v50 = vadd.f32 %v964_v0, %v915_v61  ;;  %vm2402_vm10 = vweird.f32 %v5461_v60 }
 0x16c   :  { %v3670_v2 = vpop.eup %3669  ;;  %v5487_v55 = vadd.f32 1.0, %v3668_v24  ;;  %3677 = vpow2.f32 %v3354_v26  ;;  %vm5495_vm13 = vcmp.eq.f32.partialorder %v2406_v5, 8.507059e+37  ;;  %v2409_v63 = vor.u32 1.1754944e-38, %v2408_v52 }
 0x16d   :  { %v3672_v28 = vpop.eup %3671  ;;  %v2159_v6 = vsub.f32 1.0, %v2158_v9  ;;  %v5492_v15 = vadd.f32 1.0, %v3670_v2  ;;  %vm2163_vm11 = vweird.f32 %v3666_v4  ;;  %v1366_v30 = vadd.f32 %v5436_v37, %v1284_v42 }
 0x16e   :  { %v2398_v8 = vmul.f32 %v3672_v28, %v5461_v60  ;;  %3679 = vrcp.f32 %v5487_v55  ;;  %v5503_v33 = vadd.f32 %v5436_v37, %v962_v3  ;;  %v5506_v34 = vadd.f32 %v5436_v37, %v1286_v36  ;;  %vm2164_vm12 = vmor %vm2162_vm8, %vm2163_vm11  ;;  %v5541_v32 = vpop.f32.mrf.mxu1 }
 0x16f   :  { %v2160_v12 = vmul.f32 %v3666_v4, %v2159_v6  ;;  %3681 = vrcp.f32 %v5492_v15  ;;  %v3674_v1 = vpop.eup %3673  ;;  %v5509_v21 = vadd.f32 %v5436_v37, %v965_v50  ;;  %v2181_v39 = vand.u32 2147483647, %v5487_v55 }
 0x170   :  { %v2399_v44 = vsub.f32 1.0, %v2398_v8  ;;  %v3676_v16 = vpop.eup %3675  ;;  %v2183_v27 = vand.u32 2147483648, %v5487_v55  ;;  %v5513_v23 = vadd.f32 1.0, %v3674_v1  ;;  %vm2403_vm14 = vweird.f32 %v3672_v28 }
 0x171   :  { %v2161_v25 = vadd.f32 %v3666_v4, %v2160_v12  ;;  %v2421_v11 = vand.u32 2147483647, %v5492_v15  ;;  %v5518_v10 = vadd.f32 1.0, %v3676_v16  ;;  %vm2177_vm15 = vweird.f32 %v5487_v55  ;;  %vm2404_vm1 = vmor %vm2402_vm10, %vm2403_vm14 }
 0x172   :  { %v2400_v54 = vmul.f32 %v3672_v28, %v2399_v44  ;;  %v3678_v40 = vpop.eup %3677  ;;  %v2423_v56 = vand.u32 2147483648, %v5492_v15  ;;  %3683 = vrcp.f32 %v5513_v23  ;;  %vm2417_vm0 = vweird.f32 %v5492_v15  ;;  %v1241_v26 = vpop.f32.mrf.mxu2 }
 0x173   :  { %v2165_v47 = vsel %vm2164_vm12, %v3666_v4, %v2161_v25  ;;  %3685 = vrcp.f32 %v5518_v10  ;;  %vm5534_vm2 = vcmp.eq.f32.partialorder %v2181_v39, 8.507059e+37  ;;  %v2184_v18 = vor.u32 1.1754944e-38, %v2183_v27 }
 0x174   :  { %v1288_v35 = vpop.f32.mrf.mxu3  ;;  %v3680_v41 = vpop.eup %3679  ;;  %v2170_v62 = vsel %vm5481_vm9, %v2169_v53, %v2165_v47  ;;  %v2401_v48 = vadd.f32 %v3672_v28, %v2400_v54  ;;  %v2198_v7 = vand.u32 2147483648, %v5513_v23  ;;  %vm5544_vm3 = vcmp.eq.f32.partialorder %v2421_v11, 8.507059e+37 }
 0x175   :  { %v3682_v43 = vpop.eup %3681  ;;  %2627 = vst [vmem:[%s5916_s3 + $0x118] sm:$0xff] %v2170_v62  ;;  %v2173_v20 = vmul.f32 %v3680_v41, %v5487_v55  ;;  %v2196_v60 = vand.u32 2147483647, %v5513_v23  ;;  %v2424_v13 = vor.u32 1.1754944e-38, %v2423_v56  ;;  %v2436_v14 = vand.u32 2147483647, %v5518_v10 }
 0x176   :  { %v2405_v22 = vsel %vm2404_vm1, %v3672_v28, %v2401_v48  ;;  %v2413_v57 = vmul.f32 %v3682_v43, %v5492_v15  ;;  %vm2178_vm4 = vweird.f32 %v3680_v41  ;;  %vm2192_vm5 = vweird.f32 %v5513_v23  ;;  %v920_v15 = vpop.f32.mrf.mxu0 }
 0x177   :  { %v2410_v59 = vsel %vm5495_vm13, %v2409_v63, %v2405_v22  ;;  %v2174_v45 = vsub.f32 1.0, %v2173_v20  ;;  %v2438_v49 = vand.u32 2147483648, %v5518_v10  ;;  %v5557_v31 = vadd.f32 1.0, %v3678_v40  ;;  %vm2179_vm10 = vmor %vm2177_vm15, %vm2178_vm4 }
 0x178   :  { %2643 = vst [vmem:[%s5916_s3 + $0x198] sm:$0xff] %v2410_v59  ;;  %v2414_v38 = vsub.f32 1.0, %v2413_v57  ;;  %v3684_v61 = vpop.eup %3683  ;;  %vm2418_vm6 = vweird.f32 %v3682_v43  ;;  %v2199_v4 = vor.u32 1.1754944e-38, %v2198_v7  ;;  %vm2432_vm7 = vweird.f32 %v5518_v10 }
 0x179   :  { %v2175_v0 = vmul.f32 %v3680_v41, %v2174_v45  ;;  %v3370_v53 = vmul.f32 -1.442695, %v1366_v30  ;;  %v3686_v5 = vpop.eup %3685  ;;  %v2188_v24 = vmul.f32 %v3684_v61, %v5513_v23  ;;  %vm5561_vm8 = vcmp.eq.f32.partialorder %v2196_v60, 8.507059e+37  ;;  %vm2419_vm11 = vmor %vm2417_vm0, %vm2418_vm6 }
 0x17a   :  { %v2415_v52 = vmul.f32 %v3682_v43, %v2414_v38  ;;  %3687 = vrcp.f32 %v5557_v31  ;;  %v1289_v17 = vadd.f32 %v1288_v35, %v1239_v19  ;;  %v2428_v2 = vmul.f32 %v3686_v5, %v5518_v10  ;;  %v969_v19 = vpop.f32.mrf.mxu1 }
 0x17b   :  { %v2176_v42 = vadd.f32 %v3680_v41, %v2175_v0  ;;  %vm5567_vm9 = vcmp.eq.f32.partialorder %v2436_v14, 8.507059e+37  ;;  %v3355_v36 = vmul.f32 -1.442695, %v5503_v33  ;;  %v2189_v6 = vsub.f32 1.0, %v2188_v24 }
 0x17c   :  { %v1290_v50 = vpop.f32.mrf.mxu3  ;;  %v2416_v28 = vadd.f32 %v3682_v43, %v2415_v52  ;;  %vm2193_vm13 = vweird.f32 %v3684_v61  ;;  %v2439_v8 = vor.u32 1.1754944e-38, %v2438_v49  ;;  %v2429_v63 = vsub.f32 1.0, %v2428_v2  ;;  %v1244_v51 = vpop.f32.mrf.mxu2 }
 0x17d   :  { %v2180_v29 = vsel %vm2179_vm10, %v3680_v41, %v2176_v42  ;;  %3689 = vpow2.f32 %v3370_v53  ;;  %v3371_v12 = vmul.f32 -1.442695, %v5506_v34  ;;  %v2190_v44 = vmul.f32 %v3684_v61, %v2189_v6  ;;  %vm2194_vm15 = vmor %vm2192_vm5, %vm2193_vm13 }
 0x17e   :  { %v2185_v30 = vsel %vm5534_vm2, %v2184_v18, %v2180_v29  ;;  %v2420_v1 = vsel %vm2419_vm11, %v3682_v43, %v2416_v28  ;;  %vm2433_vm12 = vweird.f32 %v3686_v5  ;;  %v2430_v33 = vmul.f32 %v3686_v5, %v2429_v63 }
 0x17f   :  { %2628 = vst [vmem:[%s5916_s3 + $0x120] sm:$0xff] %v2185_v30  ;;  %v2425_v55 = vsel %vm5544_vm3, %v2424_v13, %v2420_v1  ;;  %vm2207_vm14 = vweird.f32 %v5557_v31  ;;  %3691 = vpow2.f32 %v3355_v36  ;;  %v2191_v16 = vadd.f32 %v3684_v61, %v2190_v44  ;;  %vm2434_vm0 = vmor %vm2432_vm7, %vm2433_vm12 }
 0x180   :  { %v3688_v34 = vpop.eup %3687  ;;  %2644 = vst [vmem:[%s5916_s3 + $0x1a0] sm:$0xff] %v2425_v55  ;;  %3693 = vpow2.f32 %v3371_v12  ;;  %v3356_v25 = vmul.f32 -1.442695, %v5509_v21  ;;  %v1368_v39 = vadd.f32 %v5436_v37, %v1289_v17  ;;  %v2431_v27 = vadd.f32 %v3686_v5, %v2430_v33 }
 0x181   :  { %v2203_v54 = vmul.f32 %v3688_v34, %v5557_v31  ;;  %v2213_v11 = vand.u32 2147483648, %v5557_v31  ;;  %v967_v40 = vadd.f32 %v5541_v32, %v5539_v46  ;;  %v2195_v47 = vsel %vm2194_vm15, %v3684_v61, %v2191_v16  ;;  %v5625_v61 = vpop.f32.mrf.mxu0 }
 0x182   :  { %3695 = vpow2.f32 %v3356_v25  ;;  %v3372_v21 = vmul.f32 -1.442695, %v1368_v39  ;;  %v1291_v56 = vadd.f32 %v1290_v50, %v1241_v26  ;;  %v2200_v23 = vsel %vm5561_vm8, %v2199_v4, %v2195_v47  ;;  %v5627_v0 = vpop.f32.mrf.mxu1 }
 0x183   :  { %v3690_v35 = vpop.eup %3689  ;;  %v2435_v41 = vsel %vm2434_vm0, %v3686_v5, %v2431_v27  ;;  %v2204_v62 = vsub.f32 1.0, %v2203_v54  ;;  %v1353_v48 = vadd.f32 %v5436_v37, %v967_v40  ;;  %2629 = vst [vmem:[%s5916_s3 + $0x128] sm:$0xff] %v2200_v23  ;;  %vm2208_vm1 = vweird.f32 %v3688_v34 }
 0x184   :  { %v2440_v43 = vsel %vm5567_vm9, %v2439_v8, %v2435_v41  ;;  %v5610_v10 = vadd.f32 1.0, %v3690_v35  ;;  %3697 = vpow2.f32 %v3372_v21  ;;  %v1369_v20 = vadd.f32 %v5436_v37, %v1291_v56  ;;  %v1293_v22 = vpop.f32.mrf.mxu3  ;;  %vm2209_vm2 = vmor %vm2207_vm14, %vm2208_vm1  ;;  %v5652_v29 = vpop.f32.mrf.mxu2 }
 0x185   :  { %v3692_v18 = vpop.eup %3691  ;;  %2645 = vst [vmem:[%s5916_s3 + $0x1a8] sm:$0xff] %v2440_v43  ;;  %v2205_v7 = vmul.f32 %v3688_v34, %v2204_v62  ;;  %v2211_v46 = vand.u32 2147483647, %v5557_v31  ;;  %v3357_v32 = vmul.f32 -1.442695, %v1353_v48  ;;  %v970_v45 = vadd.f32 %v969_v19, %v920_v15 }
 0x186   :  { %v3694_v57 = vpop.eup %3693  ;;  %3699 = vrcp.f32 %v5610_v10  ;;  %v5618_v60 = vadd.f32 1.0, %v3692_v18  ;;  %v2214_v14 = vor.u32 1.1754944e-38, %v2213_v11  ;;  %v3373_v38 = vmul.f32 -1.442695, %v1369_v20 }
 0x187   :  { %v2206_v58 = vadd.f32 %v3688_v34, %v2205_v7  ;;  %v5620_v59 = vadd.f32 1.0, %v3694_v57  ;;  %3701 = vpow2.f32 %v3357_v32  ;;  %vm2212_vm3 = vcmp.eq.f32.partialorder %v2211_v46, 8.507059e+37 }
 0x188   :  { %v3696_v13 = vpop.eup %3695  ;;  %3703 = vrcp.f32 %v5618_v60  ;;  %v2451_v5 = vand.u32 2147483647, %v5610_v10  ;;  %v2453_v52 = vand.u32 2147483648, %v5610_v10  ;;  %v2228_v31 = vand.u32 2147483648, %v5618_v60 }
 0x189   :  { %v2210_v49 = vsel %vm2209_vm2, %v3688_v34, %v2206_v58  ;;  %3705 = vrcp.f32 %v5620_v59  ;;  %v5636_v24 = vadd.f32 1.0, %v3696_v13  ;;  %v1354_v9 = vadd.f32 %v5436_v37, %v970_v45 }
 0x18a   :  { %v3698_v4 = vpop.eup %3697  ;;  %v2215_v53 = vsel %vm2212_vm3, %v2214_v14, %v2210_v49  ;;  %v2226_v26 = vand.u32 2147483647, %v5618_v60  ;;  %v2468_v42 = vand.u32 2147483648, %v5620_v59  ;;  %3707 = vpow2.f32 %v3373_v38 }
 0x18b   :  { %2630 = vst [vmem:[%s5916_s3 + $0x130] sm:$0xff] %v2215_v53  ;;  %v5641_v2 = vadd.f32 1.0, %v3698_v4  ;;  %vm2447_vm4 = vweird.f32 %v5610_v10  ;;  %v2466_v36 = vand.u32 2147483647, %v5620_v59  ;;  %v1294_v50 = vadd.f32 %v1293_v22, %v1244_v51 }
 0x18c   :  { %v3700_v17 = vpop.eup %3699  ;;  %vm5646_vm5 = vcmp.eq.f32.partialorder %v2451_v5, 8.507059e+37  ;;  %v2454_v8 = vor.u32 1.1754944e-38, %v2453_v52  ;;  %vm2222_vm6 = vweird.f32 %v5618_v60  ;;  %3709 = vrcp.f32 %v5636_v24  ;;  %v5656_v44 = vpop.f32.mrf.mxu3 }
 0x18d   :  { %v2443_v3 = vmul.f32 %v3700_v17, %v5610_v10  ;;  %v3702_v28 = vpop.eup %3701  ;;  %v2229_v30 = vor.u32 1.1754944e-38, %v2228_v31  ;;  %vm2462_vm7 = vweird.f32 %v5620_v59  ;;  %3711 = vrcp.f32 %v5641_v2 }
 0x18e   :  { %v3704_v63 = vpop.eup %3703  ;;  %v3358_v1 = vmul.f32 -1.442695, %v1354_v9  ;;  %vm2448_vm8 = vweird.f32 %v3700_v17  ;;  %vm5659_vm9 = vcmp.eq.f32.partialorder %v2226_v26, 8.507059e+37  ;;  %v2469_v19 = vor.u32 1.1754944e-38, %v2468_v42 }
 0x18f   :  { %v2444_v12 = vsub.f32 1.0, %v2443_v3  ;;  %v3706_v55 = vpop.eup %3705  ;;  %v2218_v33 = vmul.f32 %v3704_v63, %v5618_v60  ;;  %v2243_v34 = vand.u32 2147483648, %v5636_v24  ;;  %vm5665_vm10 = vcmp.eq.f32.partialorder %v2466_v36, 8.507059e+37  ;;  %vm2449_vm12 = vmor %vm2447_vm4, %vm2448_vm8 }
 0x190   :  { %v2458_v25 = vmul.f32 %v3706_v55, %v5620_v59  ;;  %vm2237_vm13 = vweird.f32 %v5636_v24  ;;  %v2241_v27 = vand.u32 2147483647, %v5636_v24  ;;  %v3708_v54 = vpop.eup %3707  ;;  %vm2223_vm11 = vweird.f32 %v3704_v63 }
 0x191   :  { %v2445_v16 = vmul.f32 %v3700_v17, %v2444_v12  ;;  %v2219_v11 = vsub.f32 1.0, %v2218_v33  ;;  %v2481_v40 = vand.u32 2147483647, %v5641_v2  ;;  %v5672_v47 = vadd.f32 1.0, %v3702_v28  ;;  %v5675_v23 = vpop.f32.mrf.mxu0  ;;  %v5677_v41 = vpop.f32.mrf.mxu1  ;;  %vm2224_vm2 = vmor %vm2222_vm6, %vm2223_vm11 }
 0x192   :  { %v2459_v56 = vsub.f32 1.0, %v2458_v25  ;;  %v2483_v35 = vand.u32 2147483648, %v5641_v2  ;;  %3713 = vpow2.f32 %v3358_v1  ;;  %v3710_v62 = vpop.eup %3709  ;;  %v2244_v43 = vor.u32 1.1754944e-38, %v2243_v34 }
 0x193   :  { %v2446_v21 = vadd.f32 %v3700_v17, %v2445_v16  ;;  %v2220_v48 = vmul.f32 %v3704_v63, %v2219_v11  ;;  %vm2477_vm14 = vweird.f32 %v5641_v2  ;;  %3715 = vrcp.f32 %v5672_v47  ;;  %v3712_v51 = vpop.eup %3711 }
 0x194   :  { %v5684_v20 = vadd.f32 1.0, %v3708_v54  ;;  %v2460_v7 = vmul.f32 %v3706_v55, %v2459_v56  ;;  %vm2463_vm15 = vweird.f32 %v3706_v55  ;;  %v2233_v46 = vmul.f32 %v3710_v62, %v5636_v24 }
 0x195   :  { %v2450_v18 = vsel %vm2449_vm12, %v3700_v17, %v2446_v21  ;;  %vm5687_vm0 = vcmp.eq.f32.partialorder %v2241_v27, 8.507059e+37  ;;  %v2221_v22 = vadd.f32 %v3704_v63, %v2220_v48  ;;  %v2473_v57 = vmul.f32 %v3712_v51, %v5641_v2  ;;  %vm2464_vm3 = vmor %vm2462_vm7, %vm2463_vm15 }
 0x196   :  { %v2455_v10 = vsel %vm5646_vm5, %v2454_v8, %v2450_v18  ;;  %vm5694_vm1 = vcmp.eq.f32.partialorder %v2481_v40, 8.507059e+37  ;;  %v2461_v45 = vadd.f32 %v3706_v55, %v2460_v7  ;;  %v2234_v13 = vsub.f32 1.0, %v2233_v46 }
 0x197   :  { %2646 = vst [vmem:[%s5916_s3 + $0x1b0] sm:$0xff] %v2455_v10  ;;  %v2484_v14 = vor.u32 1.1754944e-38, %v2483_v35  ;;  %v1370_v38 = vadd.f32 %v5436_v37, %v1294_v50  ;;  %v2225_v49 = vsel %vm2224_vm2, %v3704_v63, %v2221_v22  ;;  %vm2238_vm4 = vweird.f32 %v3710_v62 }
 0x198   :  { %v2474_v4 = vsub.f32 1.0, %v2473_v57  ;;  %3717 = vrcp.f32 %v5684_v20  ;;  %v1249_v53 = vpop.f32.mrf.mxu2  ;;  %v3714_v5 = vpop.eup %3713  ;;  %v2230_v52 = vsel %vm5659_vm9, %v2229_v30, %v2225_v49  ;;  %v2465_v60 = vsel %vm2464_vm3, %v3706_v55, %v2461_v45  ;;  %vm2239_vm7 = vmor %vm2237_vm13, %vm2238_vm4 }
 0x199   :  { %v2235_v31 = vmul.f32 %v3710_v62, %v2234_v13  ;;  %v2256_v9 = vand.u32 2147483647, %v5672_v47  ;;  %v1298_v17 = vpop.f32.mrf.mxu3  ;;  %v3716_v26 = vpop.eup %3715  ;;  %2631 = vst [vmem:[%s5916_s3 + $0x138] sm:$0xff] %v2230_v52  ;;  %v2470_v59 = vsel %vm5665_vm10, %v2469_v19, %v2465_v60  ;;  %vm2478_vm5 = vweird.f32 %v3712_v51 }
 0x19a   :  { %v2475_v42 = vmul.f32 %v3712_v51, %v2474_v4  ;;  %v2258_v3 = vand.u32 2147483648, %v5672_v47  ;;  %2647 = vst [vmem:[%s5916_s3 + $0x1b8] sm:$0xff] %v2470_v59  ;;  %v2248_v50 = vmul.f32 %v3716_v26, %v5672_v47  ;;  %vm2252_vm6 = vweird.f32 %v5672_v47  ;;  %vm2479_vm8 = vmor %vm2477_vm14, %vm2478_vm5  ;;  %v927_v33 = vpop.f32.mrf.mxu0  ;;  %v976_v15 = vpop.f32.mrf.mxu1 }
 0x19b   :  { %v2236_v36 = vadd.f32 %v3710_v62, %v2235_v31  ;;  %v2496_v28 = vand.u32 2147483647, %v5684_v20  ;;  %v2498_v8 = vand.u32 2147483648, %v5684_v20  ;;  %v5727_v63 = vadd.f32 1.0, %v3714_v5 }
 0x19c   :  { %v2476_v6 = vadd.f32 %v3712_v51, %v2475_v42  ;;  %v3374_v12 = vmul.f32 -1.442695, %v1370_v38  ;;  %v2249_v1 = vsub.f32 1.0, %v2248_v50  ;;  %vm5731_vm9 = vcmp.eq.f32.partialorder %v2256_v9, 8.507059e+37 }
 0x19d   :  { %v2240_v30 = vsel %vm2239_vm7, %v3710_v62, %v2236_v36  ;;  %vm2492_vm10 = vweird.f32 %v5684_v20  ;;  %v972_v24 = vadd.f32 %v5627_v0, %v5625_v61  ;;  %v2259_v25 = vor.u32 1.1754944e-38, %v2258_v3 }
 0x19e   :  { %v3718_v19 = vpop.eup %3717  ;;  %v2245_v34 = vsel %vm5687_vm0, %v2244_v43, %v2240_v30  ;;  %v2480_v16 = vsel %vm2479_vm8, %v3712_v51, %v2476_v6  ;;  %3719 = vrcp.f32 %v5727_v63  ;;  %v2250_v39 = vmul.f32 %v3716_v26, %v2249_v1 }
 0x19f   :  { %2632 = vst [vmem:[%s5916_s3 + $0x140] sm:$0xff] %v2245_v34  ;;  %v2485_v2 = vsel %vm5694_vm1, %v2484_v14, %v2480_v16  ;;  %vm2253_vm13 = vweird.f32 %v3716_v26  ;;  %v2488_v61 = vmul.f32 %v3718_v19, %v5684_v20  ;;  %vm5750_vm11 = vcmp.eq.f32.partialorder %v2496_v28, 8.507059e+37 }
 0x1a0   :  { %2648 = vst [vmem:[%s5916_s3 + $0x1c0] sm:$0xff] %v2485_v2  ;;  %v2499_v27 = vor.u32 1.1754944e-38, %v2498_v8  ;;  %3721 = vpow2.f32 %v3374_v12  ;;  %v1355_v54 = vadd.f32 %v5436_v37, %v972_v24  ;;  %v2251_v11 = vadd.f32 %v3716_v26, %v2250_v39  ;;  %vm2254_vm12 = vmor %vm2252_vm6, %vm2253_vm13  ;;  %v1251_v48 = vpop.f32.mrf.mxu2 }
 0x1a1   :  { %v2489_v40 = vsub.f32 1.0, %v2488_v61  ;;  %v1296_v21 = vadd.f32 %v5656_v44, %v5652_v29  ;;  %v975_v56 = vadd.f32 %v5677_v41, %v5675_v23  ;;  %vm2493_vm14 = vweird.f32 %v3718_v19  ;;  %v1300_v43 = vpop.f32.mrf.mxu3 }
 0x1a2   :  { %vm2267_vm15 = vweird.f32 %v5727_v63  ;;  %v3359_v35 = vmul.f32 -1.442695, %v1355_v54  ;;  %v1299_v62 = vadd.f32 %v1298_v17, %v1249_v53  ;;  %v2255_v51 = vsel %vm2254_vm12, %v3716_v26, %v2251_v11  ;;  %vm2494_vm0 = vmor %vm2492_vm10, %vm2493_vm14  ;;  %v930_v53 = vpop.f32.mrf.mxu0  ;;  %v979_v5 = vpop.f32.mrf.mxu1 }
 0x1a3   :  { %v2490_v18 = vmul.f32 %v3718_v19, %v2489_v40  ;;  %v1371_v7 = vadd.f32 %v5436_v37, %v1296_v21  ;;  %v1356_v46 = vadd.f32 %v5436_v37, %v975_v56  ;;  %v2260_v44 = vsel %vm5731_vm9, %v2259_v25, %v2255_v51 }
 0x1a4   :  { %v3720_v29 = vpop.eup %3719  ;;  %3723 = vpow2.f32 %v3359_v35  ;;  %v1372_v47 = vadd.f32 %v5436_v37, %v1299_v62  ;;  %v977_v23 = vadd.f32 %v976_v15, %v927_v33  ;;  %2633 = vst [vmem:[%s5916_s3 + $0x148] sm:$0xff] %v2260_v44  ;;  %v2273_v10 = vand.u32 2147483648, %v5727_v63 }
 0x1a5   :  { %v2491_v41 = vadd.f32 %v3718_v19, %v2490_v18  ;;  %v2263_v32 = vmul.f32 %v3720_v29, %v5727_v63  ;;  %v3375_v22 = vmul.f32 -1.442695, %v1371_v7  ;;  %v3360_v58 = vmul.f32 -1.442695, %v1356_v46 }
 0x1a6   :  { %v3722_v57 = vpop.eup %3721  ;;  %v3376_v45 = vmul.f32 -1.442695, %v1372_v47  ;;  %v1357_v13 = vadd.f32 %v5436_v37, %v977_v23  ;;  %v1301_v14 = vadd.f32 %v1300_v43, %v1251_v48  ;;  %vm2268_vm1 = vweird.f32 %v3720_v29 }
 0x1a7   :  { %v2495_v38 = vsel %vm2494_vm0, %v3718_v19, %v2491_v41  ;;  %v2264_v49 = vsub.f32 1.0, %v2263_v32  ;;  %v5776_v4 = vadd.f32 1.0, %v3722_v57  ;;  %3725 = vpow2.f32 %v3375_v22  ;;  %vm2269_vm2 = vmor %vm2267_vm15, %vm2268_vm1 }
 0x1a8   :  { %v2500_v52 = vsel %vm5750_vm11, %v2499_v27, %v2495_v38  ;;  %3727 = vpow2.f32 %v3360_v58  ;;  %v3361_v60 = vmul.f32 -1.442695, %v1357_v13  ;;  %v1373_v20 = vadd.f32 %v5436_v37, %v1301_v14  ;;  %v1254_v50 = vpop.f32.mrf.mxu2 }
 0x1a9   :  { %2649 = vst [vmem:[%s5916_s3 + $0x1c8] sm:$0xff] %v2500_v52  ;;  %v2265_v31 = vmul.f32 %v3720_v29, %v2264_v49  ;;  %v2271_v9 = vand.u32 2147483647, %v5727_v63  ;;  %3729 = vrcp.f32 %v5776_v4  ;;  %v980_v26 = vadd.f32 %v979_v5, %v930_v53  ;;  %v1303_v28 = vpop.f32.mrf.mxu3 }
 0x1aa   :  { %v3724_v17 = vpop.eup %3723  ;;  %3731 = vpow2.f32 %v3376_v45  ;;  %v3377_v3 = vmul.f32 -1.442695, %v1373_v20  ;;  %v2274_v36 = vor.u32 1.1754944e-38, %v2273_v10  ;;  %v2511_v12 = vand.u32 2147483647, %v5776_v4  ;;  %v932_v0 = vpop.f32.mrf.mxu0 }
 0x1ab   :  { %v2266_v59 = vadd.f32 %v3720_v29, %v2265_v31  ;;  %v5786_v42 = vadd.f32 1.0, %v3724_v17  ;;  %3733 = vpow2.f32 %v3361_v60  ;;  %vm2272_vm3 = vcmp.eq.f32.partialorder %v2271_v9, 8.507059e+37  ;;  %v981_v27 = vpop.f32.mrf.mxu1 }
 0x1ac   :  { %v2513_v55 = vand.u32 2147483648, %v5776_v4  ;;  %v1358_v33 = vadd.f32 %v5436_v37, %v980_v26  ;;  %v1304_v19 = vadd.f32 %v1303_v28, %v1254_v50  ;;  %vm2507_vm4 = vweird.f32 %v5776_v4 }
 0x1ad   :  { %v3726_v6 = vpop.eup %3725  ;;  %v2270_v8 = vsel %vm2269_vm2, %v3720_v29, %v2266_v59  ;;  %3735 = vrcp.f32 %v5786_v42  ;;  %v2286_v25 = vand.u32 2147483647, %v5786_v42  ;;  %vm5805_vm5 = vcmp.eq.f32.partialorder %v2511_v12, 8.507059e+37 }
 0x1ae   :  { %v3728_v30 = vpop.eup %3727  ;;  %v2275_v1 = vsel %vm2272_vm3, %v2274_v36, %v2270_v8  ;;  %v5793_v24 = vadd.f32 1.0, %v3726_v6  ;;  %3737 = vpow2.f32 %v3377_v3  ;;  %v2288_v61 = vand.u32 2147483648, %v5786_v42 }
 0x1af   :  { %v3730_v63 = vpop.eup %3729  ;;  %2634 = vst [vmem:[%s5916_s3 + $0x150] sm:$0xff] %v2275_v1  ;;  %v5799_v15 = vadd.f32 1.0, %v3728_v30  ;;  %v2514_v11 = vor.u32 1.1754944e-38, %v2513_v55  ;;  %vm2282_vm6 = vweird.f32 %v5786_v42  ;;  %v3362_v40 = vmul.f32 -1.442695, %v1358_v33 }
 0x1b0   :  { %v3732_v34 = vpop.eup %3731  ;;  %v2503_v16 = vmul.f32 %v3730_v63, %v5776_v4  ;;  %3739 = vrcp.f32 %v5793_v24  ;;  %v2526_v56 = vand.u32 2147483647, %v5793_v24  ;;  %v1374_v48 = vadd.f32 %v5436_v37, %v1304_v19 }
 0x1b1   :  { %v3734_v2 = vpop.eup %3733  ;;  %3741 = vrcp.f32 %v5799_v15  ;;  %v5813_v35 = vadd.f32 1.0, %v3732_v34  ;;  %vm2508_vm7 = vweird.f32 %v3730_v63  ;;  %vm5819_vm8 = vcmp.eq.f32.partialorder %v2286_v25, 8.507059e+37  ;;  %v1305_v25 = vpop.f32.mrf.mxu3 }
 0x1b2   :  { %v2504_v54 = vsub.f32 1.0, %v2503_v16  ;;  %v5815_v62 = vadd.f32 1.0, %v3734_v2  ;;  %v5823_v7 = vadd.f32 %v981_v27, %v932_v0  ;;  %v2289_v29 = vor.u32 1.1754944e-38, %v2288_v61  ;;  %vm2509_vm9 = vmor %vm2507_vm4, %vm2508_vm7  ;;  %v1256_v16 = vpop.f32.mrf.mxu2 }
 0x1b3   :  { %v3736_v21 = vpop.eup %3735  ;;  %v2528_v44 = vand.u32 2147483648, %v5793_v24  ;;  %v2301_v47 = vand.u32 2147483647, %v5799_v15  ;;  %3743 = vrcp.f32 %v5813_v35  ;;  %v2303_v10 = vand.u32 2147483648, %v5799_v15 }
 0x1b4   :  { %v2505_v43 = vmul.f32 %v3730_v63, %v2504_v54  ;;  %v2278_v51 = vmul.f32 %v3736_v21, %v5786_v42  ;;  %v3738_v46 = vpop.eup %3737  ;;  %3745 = vrcp.f32 %v5815_v62  ;;  %vm2522_vm10 = vweird.f32 %v5793_v24 }
 0x1b5   :  { %vm5835_vm13 = vcmp.eq.f32.partialorder %v2526_v56, 8.507059e+37  ;;  %vm2297_vm11 = vweird.f32 %v5799_v15  ;;  %vm2283_vm12 = vweird.f32 %v3736_v21  ;;  %v2529_v4 = vor.u32 1.1754944e-38, %v2528_v44 }
 0x1b6   :  { %v3740_v23 = vpop.eup %3739  ;;  %v2506_v41 = vadd.f32 %v3730_v63, %v2505_v43  ;;  %v2279_v32 = vsub.f32 1.0, %v2278_v51  ;;  %vm5843_vm14 = vcmp.eq.f32.partialorder %v2301_v47, 8.507059e+37  ;;  %v2304_v60 = vor.u32 1.1754944e-38, %v2303_v10  ;;  %vm2284_vm15 = vmor %vm2282_vm6, %vm2283_vm12 }
 0x1b7   :  { %v3742_v22 = vpop.eup %3741  ;;  %v2518_v57 = vmul.f32 %v3740_v23, %v5793_v24  ;;  %v5850_v20 = vadd.f32 1.0, %v3738_v46  ;;  %vm2523_vm0 = vweird.f32 %v3740_v23  ;;  %v2541_v17 = vand.u32 2147483647, %v5813_v35  ;;  %v3767_v46 = vld [vmem:[%s5915_s2] ss:$0 sm:$0xff] }
 0x1b8   :  { %v2510_v45 = vsel %vm2509_vm9, %v3730_v63, %v2506_v41  ;;  %v2280_v13 = vmul.f32 %v3736_v21, %v2279_v32  ;;  %v2293_v14 = vmul.f32 %v3742_v22, %v5799_v15  ;;  %3747 = vpow2.f32 %v3362_v40  ;;  %vm2524_vm2 = vmor %vm2522_vm10, %vm2523_vm0 }
 0x1b9   :  { %v2515_v38 = vsel %vm5805_vm5, %v2514_v11, %v2510_v45  ;;  %v2519_v49 = vsub.f32 1.0, %v2518_v57  ;;  %v3744_v31 = vpop.eup %3743  ;;  %vm2298_vm1 = vweird.f32 %v3742_v22  ;;  %v3378_v8 = vmul.f32 -1.442695, %v1374_v48 }
 0x1ba   :  { %2650 = vst [vmem:[%s5916_s3 + $0x1d0] sm:$0xff] %v2515_v38  ;;  %v2281_v5 = vadd.f32 %v3736_v21, %v2280_v13  ;;  %v2294_v52 = vsub.f32 1.0, %v2293_v14  ;;  %v3746_v26 = vpop.eup %3745  ;;  %v2533_v36 = vmul.f32 %v3744_v31, %v5813_v35  ;;  %v2543_v30 = vand.u32 2147483648, %v5813_v35  ;;  %vm2299_vm3 = vmor %vm2297_vm11, %vm2298_vm1 }
 0x1bb   :  { %v2520_v9 = vmul.f32 %v3740_v23, %v2519_v49  ;;  %v2308_v6 = vmul.f32 %v3746_v26, %v5815_v62  ;;  %3749 = vrcp.f32 %v5850_v20  ;;  %v2316_v33 = vand.u32 2147483647, %v5815_v62 }
 0x1bc   :  { %v2285_v59 = vsel %vm2284_vm15, %v3736_v21, %v2281_v5  ;;  %v2295_v3 = vmul.f32 %v3742_v22, %v2294_v52  ;;  %v2534_v12 = vsub.f32 1.0, %v2533_v36  ;;  %v2318_v63 = vand.u32 2147483648, %v5815_v62 }
 0x1bd   :  { %v2290_v50 = vsel %vm5819_vm8, %v2289_v29, %v2285_v59  ;;  %v2521_v28 = vadd.f32 %v3740_v23, %v2520_v9  ;;  %v2309_v55 = vsub.f32 1.0, %v2308_v6  ;;  %vm2538_vm4 = vweird.f32 %v3744_v31 }
 0x1be   :  { %2635 = vst [vmem:[%s5916_s3 + $0x158] sm:$0xff] %v2290_v50  ;;  %v2296_v42 = vadd.f32 %v3742_v22, %v2295_v3  ;;  %v2535_v34 = vmul.f32 %v3744_v31, %v2534_v12  ;;  %v3748_v2 = vpop.eup %3747  ;;  %vm2313_vm5 = vweird.f32 %v3746_v26  ;;  %3751 = vpow2.f32 %v3378_v8 }
 0x1bf   :  { %v2525_v1 = vsel %vm2524_vm2, %v3740_v23, %v2521_v28  ;;  %v2310_v39 = vmul.f32 %v3746_v26, %v2309_v55  ;;  %vm2537_vm6 = vweird.f32 %v5813_v35  ;;  %v1614_v0 = vadd.f32 1.0, %v3748_v2 }
 0x1c0   :  { %v2530_v19 = vsel %vm5835_vm13, %v2529_v4, %v2525_v1  ;;  %v2300_v24 = vsel %vm2299_vm3, %v3742_v22, %v2296_v42  ;;  %v2536_v61 = vadd.f32 %v3744_v31, %v2535_v34  ;;  %v1359_v27 = vadd.f32 %v5436_v37, %v5823_v7  ;;  %vm2539_vm7 = vmor %vm2537_vm6, %vm2538_vm4 }
 0x1c1   :  { %2651 = vst [vmem:[%s5916_s3 + $0x1d8] sm:$0xff] %v2530_v19  ;;  %v2305_v15 = vsel %vm5843_vm14, %v2304_v60, %v2300_v24  ;;  %v2544_v54 = vor.u32 1.1754944e-38, %v2543_v30  ;;  %v2311_v11 = vadd.f32 %v3746_v26, %v2310_v39  ;;  %vm2312_vm8 = vweird.f32 %v5815_v62  ;;  %v3750_v21 = vpop.eup %3749 }
 0x1c2   :  { %2636 = vst [vmem:[%s5916_s3 + $0x160] sm:$0xff] %v2305_v15  ;;  %v1306_v40 = vadd.f32 %v1305_v25, %v1256_v16  ;;  %v2540_v56 = vsel %vm2539_vm7, %v3744_v31, %v2536_v61  ;;  %vm2542_vm9 = vcmp.eq.f32.partialorder %v2541_v17, 8.507059e+37  ;;  %vm2314_vm10 = vmor %vm2312_vm8, %vm2313_vm5  ;;  %v2319_v48 = vor.u32 1.1754944e-38, %v2318_v63 }
 0x1c3   :  { %3753 = vrcp.f32 %v1614_v0  ;;  %v2545_v43 = vsel %vm2542_vm9, %v2544_v54, %v2540_v56  ;;  %v2315_v51 = vsel %vm2314_vm10, %v3746_v26, %v2311_v11  ;;  %vm2317_vm13 = vcmp.eq.f32.partialorder %v2316_v33, 8.507059e+37 }
 0x1c4   :  { %v2548_v35 = vmul.f32 %v3750_v21, %v5850_v20  ;;  %2652 = vst [vmem:[%s5916_s3 + $0x1e0] sm:$0xff] %v2545_v43  ;;  %v2320_v37 = vsel %vm2317_vm13, %v2319_v48, %v2315_v51  ;;  %v3363_v18 = vmul.f32 -1.442695, %v1359_v27  ;;  %v3752_v62 = vpop.eup %3751  ;;  %v1375_v29 = vadd.f32 %v3767_v46, %v1306_v40 }
 0x1c5   :  { %2637 = vst [vmem:[%s5916_s3 + $0x168] sm:$0xff] %v2320_v37  ;;  %v2558_v44 = vand.u32 2147483648, %v5850_v20  ;;  %v1630_v47 = vadd.f32 1.0, %v3752_v62  ;;  %vm2553_vm11 = vweird.f32 %v3750_v21  ;;  %v2556_v41 = vand.u32 2147483647, %v5850_v20 }
 0x1c6   :  { %v2549_v7 = vsub.f32 1.0, %v2548_v35  ;;  %3755 = vpow2.f32 %v3363_v18  ;;  %v3379_v32 = vmul.f32 -1.442695, %v1375_v29  ;;  %vm2552_vm12 = vweird.f32 %v5850_v20 }
 0x1c7   :  { %3757 = vrcp.f32 %v1630_v47  ;;  %vm2554_vm14 = vmor %vm2552_vm12, %vm2553_vm11  ;;  %v2559_v58 = vor.u32 1.1754944e-38, %v2558_v44  ;;  %vm2557_vm15 = vcmp.eq.f32.partialorder %v2556_v41, 8.507059e+37  ;;  %vm2327_vm0 = vweird.f32 %v1614_v0 }
 0x1c8   :  { %v2550_v23 = vmul.f32 %v3750_v21, %v2549_v7  ;;  %3759 = vpow2.f32 %v3379_v32  ;;  %v2333_v49 = vand.u32 2147483648, %v1614_v0  ;;  %v2331_v53 = vand.u32 2147483647, %v1614_v0 }
 0x1c9   :  { %v3754_v10 = vpop.eup %3753  ;;  %v2573_v36 = vand.u32 2147483648, %v1630_v47  ;;  %v2571_v28 = vand.u32 2147483647, %v1630_v47  ;;  %vm2567_vm5 = vweird.f32 %v1630_v47 }
 0x1ca   :  { %v2551_v22 = vadd.f32 %v3750_v21, %v2550_v23  ;;  %v2323_v57 = vmul.f32 %v3754_v10, %v1614_v0  ;;  %vm2328_vm1 = vweird.f32 %v3754_v10  ;;  %v2334_v9 = vor.u32 1.1754944e-38, %v2333_v49 }
 0x1cb   :  { %vm2329_vm2 = vmor %vm2327_vm0, %vm2328_vm1  ;;  %vm2332_vm3 = vcmp.eq.f32.partialorder %v2331_v53, 8.507059e+37  ;;  %v2574_v42 = vor.u32 1.1754944e-38, %v2573_v36  ;;  %vm2572_vm7 = vcmp.eq.f32.partialorder %v2571_v28, 8.507059e+37 }
 0x1cc   :  { %v2555_v45 = vsel %vm2554_vm14, %v3750_v21, %v2551_v22  ;;  %v2324_v13 = vsub.f32 1.0, %v2323_v57  ;;  %v3756_v14 = vpop.eup %3755 }
 0x1cd   :  { %v2560_v38 = vsel %vm2557_vm15, %v2559_v58, %v2555_v45  ;;  %v1615_v5 = vadd.f32 1.0, %v3756_v14  ;;  %v3758_v52 = vpop.eup %3757 }
 0x1ce   :  { %2653 = vst [vmem:[%s5916_s3 + $0x1e8] sm:$0xff] %v2560_v38  ;;  %v2325_v4 = vmul.f32 %v3754_v10, %v2324_v13  ;;  %v3760_v60 = vpop.eup %3759  ;;  %v2563_v31 = vmul.f32 %v3758_v52, %v1630_v47  ;;  %vm2568_vm4 = vweird.f32 %v3758_v52 }
 0x1cf   :  { %3761 = vrcp.f32 %v1615_v5  ;;  %v1631_v17 = vadd.f32 1.0, %v3760_v60  ;;  %vm2569_vm6 = vmor %vm2567_vm5, %vm2568_vm4  ;;  %v2348_v63 = vand.u32 2147483648, %v1615_v5  ;;  %v2346_v34 = vand.u32 2147483647, %v1615_v5 }
 0x1d0   :  { %v2326_v20 = vadd.f32 %v3754_v10, %v2325_v4  ;;  %v2564_v59 = vsub.f32 1.0, %v2563_v31  ;;  %vm2342_vm9 = vweird.f32 %v1615_v5 }
 0x1d1   :  { %3763 = vrcp.f32 %v1631_v17  ;;  %v2588_v2 = vand.u32 2147483648, %v1631_v17  ;;  %v2349_v15 = vor.u32 1.1754944e-38, %v2348_v63  ;;  %v2586_v61 = vand.u32 2147483647, %v1631_v17 }
 0x1d2   :  { %v2330_v26 = vsel %vm2329_vm2, %v3754_v10, %v2326_v20  ;;  %v2565_v50 = vmul.f32 %v3758_v52, %v2564_v59  ;;  %vm2347_vm11 = vcmp.eq.f32.partialorder %v2346_v34, 8.507059e+37  ;;  %vm2582_vm12 = vweird.f32 %v1631_v17 }
 0x1d3   :  { %v2335_v3 = vsel %vm2332_vm3, %v2334_v9, %v2330_v26  ;;  %v2589_v11 = vor.u32 1.1754944e-38, %v2588_v2  ;;  %vm2587_vm15 = vcmp.eq.f32.partialorder %v2586_v61, 8.507059e+37 }
 0x1d4   :  { %2638 = vst [vmem:[%s5916_s3 + $0x170] sm:$0xff] %v2335_v3  ;;  %v2566_v8 = vadd.f32 %v3758_v52, %v2565_v50 }
 0x1d5   :  { %v3762_v6 = vpop.eup %3761 }
 0x1d6   :  { %v2338_v12 = vmul.f32 %v3762_v6, %v1615_v5  ;;  %v2570_v30 = vsel %vm2569_vm6, %v3758_v52, %v2566_v8  ;;  %vm2343_vm8 = vweird.f32 %v3762_v6 }
 0x1d7   :  { %v3764_v1 = vpop.eup %3763  ;;  %v2575_v55 = vsel %vm2572_vm7, %v2574_v42, %v2570_v30  ;;  %vm2344_vm10 = vmor %vm2342_vm9, %vm2343_vm8 }
 0x1d8   :  { %v2339_v33 = vsub.f32 1.0, %v2338_v12  ;;  %2654 = vst [vmem:[%s5916_s3 + $0x1f0] sm:$0xff] %v2575_v55  ;;  %v2578_v19 = vmul.f32 %v3764_v1, %v1631_v17  ;;  %vm2583_vm13 = vweird.f32 %v3764_v1 }
 0x1d9   :  { %vm2584_vm14 = vmor %vm2582_vm12, %vm2583_vm13 }
 0x1da   :  { %v2340_v24 = vmul.f32 %v3762_v6, %v2339_v33  ;;  %v2579_v16 = vsub.f32 1.0, %v2578_v19 }
 0x1dc   :  { %v2341_v25 = vadd.f32 %v3762_v6, %v2340_v24  ;;  %v2580_v39 = vmul.f32 %v3764_v1, %v2579_v16 }
 0x1de   :  { %v2345_v0 = vsel %vm2344_vm10, %v3762_v6, %v2341_v25  ;;  %v2581_v54 = vadd.f32 %v3764_v1, %v2580_v39 }
 0x1df   :  { %v2350_v27 = vsel %vm2347_vm11, %v2349_v15, %v2345_v0 }
 0x1e0   :  { %2639 = vst [vmem:[%s5916_s3 + $0x178] sm:$0xff] %v2350_v27  ;;  %v2585_v40 = vsel %vm2584_vm14, %v3764_v1, %v2581_v54 }
 0x1e1   :  { %v2590_v21 = vsel %vm2587_vm15, %v2589_v11, %v2585_v40 }
 0x1e2   :  { %2655 = vst [vmem:[%s5916_s3 + $0x1f8] sm:$0xff] %v2590_v21 }

</bundles_post_ra>
